<compile_context>
chip_gen: v7x
topology: tpu7x:2x2x1
jax: 0.10.0
libtpu: 0.0.40
codegen_flags: <defaults>
</compile_context>

<pallas_src>
import functools

import jax
import jax.numpy as jnp
from jax import lax
from jax.experimental import pallas as pl
from jax.experimental.pallas import tpu as pltpu

LANE = 128


def _is_pow2(v):
    return v > 0 and (v & (v - 1)) == 0


# ------------------------------- kernel ------------------------------------ #

def _bottleneck_kernel(x_ref, w1_ref, w2_ref, w3_ref, b1_ref, b2_ref, b3_ref,
                       o_ref, *, nb, H, W):
    """`nb` whole images (flattened to rows) per grid step; all resident in VMEM."""
    M = nb * H * W
    Cp = w1_ref.shape[1]          # lane-padded intermediate channels
    cd = w1_ref.dtype             # MXU operand dtype (float32 or bfloat16)

    x = x_ref[...]                                        # [M, Cin] (unpadded C)
    xf = x.astype(jnp.float32)                            # residual kept in f32

    # ---- conv1 (1x1, BN1 scale folded into w1) + bias + relu ---------------
    # K = Cin stays unpadded; Mosaic masks the non-aligned contraction tile.
    h1 = jnp.dot(x.astype(cd), w1_ref[...], preferred_element_type=jnp.float32)
    h1 = jnp.maximum(h1 + b1_ref[...], 0.0)               # [M, Cp] f32

    # ---- in-kernel border coordinates (replaces the DMA'd mask array) ------
    if _is_pow2(H) and _is_pow2(W):
        r = lax.broadcasted_iota(jnp.int32, (M, Cp), 0)   # flat row index
        xc = r & (W - 1)                                  # x within image
        yc = (r >> (W.bit_length() - 1)) & (H - 1)        # y within image
    else:
        # Generic fallback: per-axis iota then leading-dim collapse.
        yc = lax.broadcasted_iota(jnp.int32, (nb, H, W, Cp), 1).reshape(M, Cp)
        xc = lax.broadcasted_iota(jnp.int32, (nb, H, W, Cp), 2).reshape(M, Cp)

    # ---- conv2 (3x3, stride 1, pad 1) as ONE im2col matmul -----------------
    # Nine shifted taps from XLU rolls of the flat activation; rows whose tap
    # falls outside its image (including cross-image wrap rows from the batch
    # folding) are zeroed by the iota-derived masks, so the math matches a
    # per-image zero-padded 3x3 conv.
    taps = []
    for oy in (-1, 0, 1):
        for ox in (-1, 0, 1):
            d = oy * W + ox
            if d == 0:
                taps.append(h1.astype(cd))
                continue
            t = pltpu.roll(h1, shift=(-d) % M, axis=0)
            conds = []
            if oy < 0:
                conds.append(yc >= -oy)
            elif oy > 0:
                conds.append(yc < H - oy)
            if ox < 0:
                conds.append(xc >= -ox)
            elif ox > 0:
                conds.append(xc < W - ox)
            ok = conds[0]
            for c in conds[1:]:
                ok = ok & c
            taps.append(jnp.where(ok, t, 0.0).astype(cd))
    slab = jnp.concatenate(taps, axis=-1)                 # [M, 9*Cp]
    h2 = jnp.dot(slab, w2_ref[...], preferred_element_type=jnp.float32)
    h2 = jnp.maximum(h2 + b2_ref[...], 0.0)               # [M, Cp]

    # ---- conv3 (1x1, BN3 scale folded) + bias + relu -----------------------
    h3 = jnp.dot(h2.astype(cd), w3_ref[...], preferred_element_type=jnp.float32)
    h3 = jnp.maximum(h3 + b3_ref[...], 0.0)               # [M, Ce] (unpadded)

    # ---- residual add (identity shortcut) + final relu ---------------------
    # (the module applies ReLU both after bn3 AND after the add)
    o_ref[...] = jnp.maximum(h3 + xf, 0.0).astype(o_ref.dtype)


# ------------------------------- wrapper ----------------------------------- #

def deconv_bottleneck_pallas(x_nhwc, kp, *, images_per_step=None, out_dtype=None):
    """x_nhwc: [N, H, W, Cin].  kp: dict from to_kernel_params()."""
    N, H, W, Cin = x_nhwc.shape
    Cp = kp["w1"].shape[1]
    Ce = kp["w3"].shape[1]
    assert Cin == kp["cin"] and Cin == Ce, \
        "identity shortcut requires in_channels == out_channels * expansion"

    if images_per_step is None:
        # Keep a 2-way "parallel" grid when possible (feeds both v7x
        # TensorCores); use images_per_step=N on single-TC v5e/v6e for one
        # fat grid step (better per-step overhead amortization).
        images_per_step = N // 2 if (N > 1 and N % 2 == 0) else 1
    nb = images_per_step
    assert N % nb == 0, "images_per_step must divide N"
    M = nb * H * W
    assert M % 8 == 0, "rows per grid step must be a multiple of 8"

    x_flat = x_nhwc.reshape(N * H * W, Cin)   # free reshape; no channel pad
    out_dtype = x_nhwc.dtype if out_dtype is None else out_dtype

    kernel = functools.partial(_bottleneck_kernel, nb=nb, H=H, W=W)
    out_flat = pl.pallas_call(
        kernel,
        out_shape=jax.ShapeDtypeStruct((N * H * W, Ce), out_dtype),
        grid=(N // nb,),
        in_specs=[
            pl.BlockSpec((M, Cin), lambda i: (i, 0)),        # x rows (unpadded C)
            pl.BlockSpec((Cin, Cp), lambda i: (0, 0)),       # w1 (bn1 folded)
            pl.BlockSpec((9 * Cp, Cp), lambda i: (0, 0)),    # w2 im2col (bn2 folded)
            pl.BlockSpec((Cp, Ce), lambda i: (0, 0)),        # w3 (bn3 folded)
            pl.BlockSpec((1, Cp), lambda i: (0, 0)),         # bn1 bias
            pl.BlockSpec((1, Cp), lambda i: (0, 0)),         # bn2 bias
            pl.BlockSpec((1, Ce), lambda i: (0, 0)),         # bn3 bias
        ],
        out_specs=pl.BlockSpec((M, Ce), lambda i: (i, 0)),   # only real channels
        compiler_params=pltpu.CompilerParams(
            dimension_semantics=("parallel",)),
    )(x_flat, kp["w1"], kp["w2"], kp["w3"], kp["b1"], kp["b2"], kp["b3"])

    return out_flat.reshape(N, H, W, Ce)


# --------------- parameter construction (deterministic, in-script) --------- #

def init_params(key, in_channels, out_channels, expansion):
    C, Ce = out_channels, out_channels * expansion
    ks = jax.random.split(key, 6)

    def conv_w(k, o, i, kh, kw):
        return 0.1 * jax.random.normal(k, (o, i, kh, kw), jnp.float32)  # OIHW

    def bn_params(k, c):
        k1, k2, k3, k4 = jax.random.split(k, 4)
        gamma = 1.0 + 0.1 * jax.random.normal(k1, (c,), jnp.float32)
        beta = 0.1 * jax.random.normal(k2, (c,), jnp.float32)
        mean = 0.1 * jax.random.normal(k3, (c,), jnp.float32)
        var = 1.0 + 0.1 * jnp.abs(jax.random.normal(k4, (c,), jnp.float32))
        return gamma, beta, mean, var

    return {
        "conv1": conv_w(ks[0], C, in_channels, 1, 1),
        "bn1": bn_params(ks[1], C),
        "conv2": conv_w(ks[2], C, C, 3, 3),
        "bn2": bn_params(ks[3], C),
        "conv3": conv_w(ks[4], Ce, C, 1, 1),
        "bn3": bn_params(ks[5], Ce),
    }


def _round_up(x, m):
    return (x + m - 1) // m * m


def to_kernel_params(raw, eps=1e-5, compute_dtype=jnp.float32):
    """Fold BN scales into conv weights; lane-pad only the INTERMEDIATE channel
    axis to 128 (HBM-facing Cin/Ce stay unpadded -> no wrapper pad/slice)."""
    def fold(bn):
        g, b, m, v = bn
        s = g / jnp.sqrt(v + eps)
        return s, b - m * s

    s1, b1 = fold(raw["bn1"])
    s2, b2 = fold(raw["bn2"])
    s3, b3 = fold(raw["bn3"])

    w1 = jnp.transpose(raw["conv1"][:, :, 0, 0], (1, 0)) * s1[None, :]        # [Cin, C]
    w2 = jnp.transpose(raw["conv2"], (2, 3, 1, 0)) * s2[None, None, None, :]  # [3,3,C,C] HWIO
    w3 = jnp.transpose(raw["conv3"][:, :, 0, 0], (1, 0)) * s3[None, :]        # [C, Ce]

    Cin, C = w1.shape
    Ce = w3.shape[1]
    # NOTE: at tiny C most padded MXU FLOPs are on zeros; this kernel layout
    # pays off for C >= ~128 (use 256-wide channel tiles on v6e/v7x).
    C_p = _round_up(C, LANE)

    w1p = jnp.pad(w1, ((0, 0), (0, C_p - C))).astype(compute_dtype)            # [Cin, C_p]
    w2p = jnp.pad(w2, ((0, 0), (0, 0), (0, C_p - C), (0, C_p - C)))
    w2p = w2p.reshape(9 * C_p, C_p).astype(compute_dtype)                      # [9*C_p, C_p]
    w3p = jnp.pad(w3, ((0, C_p - C), (0, 0))).astype(compute_dtype)            # [C_p, Ce]

    def pad_bias(b, c):   # padded lanes stay exactly zero (keeps padded h1/h2 = 0)
        return jnp.pad(b, (0, c - b.shape[0])).reshape(1, c).astype(jnp.float32)

    return {"w1": w1p, "w2": w2p, "w3": w3p,
            "b1": pad_bias(b1, C_p), "b2": pad_bias(b2, C_p),
            "b3": b3.reshape(1, Ce).astype(jnp.float32),
            "cin": Cin, "c": C, "ce": Ce}


# ---------------- pure-JAX reference (for correctness check) --------------- #

def ref_forward(x_nhwc, raw, eps=1e-5):
    def conv(x, w_oihw, padding):
        w = jnp.transpose(w_oihw, (2, 3, 1, 0))  # HWIO
        return lax.conv_general_dilated(
            x, w, (1, 1), padding, dimension_numbers=("NHWC", "HWIO", "NHWC"))

    def bn(x, p):
        g, b, m, v = p
        return (x - m) / jnp.sqrt(v + eps) * g + b

    out = jax.nn.relu(bn(conv(x_nhwc, raw["conv1"], "VALID"), raw["bn1"]))
    out = jax.nn.relu(bn(conv(out, raw["conv2"], [(1, 1), (1, 1)]), raw["bn2"]))
    out = jax.nn.relu(bn(conv(out, raw["conv3"], "VALID"), raw["bn3"]))
    return jax.nn.relu(out + x_nhwc)


if __name__ == "__main__":
    # Module config: in_channels = out_channels * expansion so the identity
    # shortcut is shape-compatible (upsample=None, stride=1).
    out_channels, expansion = 8, 2
    in_channels = out_channels * expansion        # 16
    N, H, W = 2, 16, 16

    key = jax.random.PRNGKey(0)
    kx, kparam = jax.random.split(key)
    x_nchw = jax.random.normal(kx, (N, in_channels, H, W), jnp.float32)  # PyTorch layout
    x_nhwc = jnp.transpose(x_nchw, (0, 2, 3, 1))                          # kernel layout

    raw = init_params(kparam, in_channels, out_channels, expansion)
    ref = jax.block_until_ready(ref_forward(x_nhwc, raw))

    # f32 MXU operands, FULL batch folded into one matmul M (grid=1): tight
    # check that the in-kernel masks keep cross-image taps zero.
    kp32 = to_kernel_params(raw, compute_dtype=jnp.float32)
    out32 = jax.block_until_ready(
        deconv_bottleneck_pallas(x_nhwc, kp32, images_per_step=N))
    assert out32.shape == (N, H, W, out_channels * expansion)
    assert jnp.allclose(out32, ref, rtol=1e-4, atol=1e-4), "f32 mismatch vs JAX reference"

    # bf16 MXU operands + bf16 output, default 2-way parallel grid: loose check.
    kp16 = to_kernel_params(raw, compute_dtype=jnp.bfloat16)
    out16 = jax.block_until_ready(
        deconv_bottleneck_pallas(x_nhwc, kp16, out_dtype=jnp.bfloat16))
    assert jnp.allclose(out16.astype(jnp.float32), ref, rtol=5e-2, atol=5e-2), \
        "bf16 mismatch vs JAX reference"

    print("KERNEL_OK")
</pallas_src>

<mosaic_0001>
module attributes {stable_mosaic.version = 11 : i64} {
  func.func @_bottleneck_kernel(%arg0: i32, %arg1: memref<512x16xf32, #tpu.memory_space<vmem>>, %arg2: memref<16x128xf32, #tpu.memory_space<vmem>>, %arg3: memref<1152x128xf32, #tpu.memory_space<vmem>>, %arg4: memref<128x16xf32, #tpu.memory_space<vmem>>, %arg5: memref<1x128xf32, #tpu.memory_space<vmem>>, %arg6: memref<1x128xf32, #tpu.memory_space<vmem>>, %arg7: memref<1x16xf32, #tpu.memory_space<vmem>>, %arg8: memref<512x16xf32, #tpu.memory_space<vmem>>) attributes {dimension_semantics = [#tpu.dimension_semantics<parallel>], iteration_bounds = array<i64: 1>, scalar_prefetch = 0 : i64, scratch_operands = 0 : i64, tpu.core_type = #tpu.core_type<tc>, window_params = [{transform_indices = @transform_0, window_bounds = array<i64: 512, 16>}, {pipeline_mode = #tpu.pipeline_mode<synchronous>, transform_indices = @transform_1, window_bounds = array<i64: 16, 128>}, {pipeline_mode = #tpu.pipeline_mode<synchronous>, transform_indices = @transform_2, window_bounds = array<i64: 1152, 128>}, {pipeline_mode = #tpu.pipeline_mode<synchronous>, transform_indices = @transform_3, window_bounds = array<i64: 128, 16>}, {pipeline_mode = #tpu.pipeline_mode<synchronous>, transform_indices = @transform_4, window_bounds = array<i64: 1, 128>}, {pipeline_mode = #tpu.pipeline_mode<synchronous>, transform_indices = @transform_5, window_bounds = array<i64: 1, 128>}, {pipeline_mode = #tpu.pipeline_mode<synchronous>, transform_indices = @transform_6, window_bounds = array<i64: 1, 16>}, {transform_indices = @transform_7, window_bounds = array<i64: 512, 16>}]} {
    %c0 = arith.constant 0 : index
    %c0_0 = arith.constant 0 : index
    %0 = vector.load %arg1[%c0, %c0_0] : memref<512x16xf32, #tpu.memory_space<vmem>>, vector<512x16xf32>
    %c0_1 = arith.constant 0 : index
    %c0_2 = arith.constant 0 : index
    %1 = vector.load %arg2[%c0_1, %c0_2] : memref<16x128xf32, #tpu.memory_space<vmem>>, vector<16x128xf32>
    %cst = arith.constant dense<0.000000e+00> : vector<512x128xf32>
    %2 = tpu.matmul %0, %1, %cst {dimension_numbers = #tpu.dot_dimension_numbers<[1], [0], [0], [1], [0, 0, 1, 1], [], []>} : vector<512x16xf32>, vector<16x128xf32>, vector<512x128xf32> -> vector<512x128xf32>
    %c0_3 = arith.constant 0 : index
    %c0_4 = arith.constant 0 : index
    %3 = vector.load %arg5[%c0_3, %c0_4] : memref<1x128xf32, #tpu.memory_space<vmem>>, vector<1x128xf32>
    %4 = vector.broadcast %3 : vector<1x128xf32> to vector<512x128xf32>
    %5 = arith.addf %2, %4 : vector<512x128xf32>
    %cst_5 = arith.constant 0.000000e+00 : f32
    %6 = vector.broadcast %cst_5 : f32 to vector<512x128xf32>
    %7 = arith.maximumf %5, %6 : vector<512x128xf32>
    %8 = tpu.iota {dimensions = array<i32: 0>} : vector<512x128xi32>
    %c15_i32 = arith.constant 15 : i32
    %9 = vector.broadcast %c15_i32 : i32 to vector<512x128xi32>
    %10 = arith.andi %8, %9 : vector<512x128xi32>
    %c4_i32 = arith.constant 4 : i32
    %11 = vector.broadcast %c4_i32 : i32 to vector<512x128xi32>
    %12 = arith.shrsi %8, %11 : vector<512x128xi32>
    %c15_i32_6 = arith.constant 15 : i32
    %13 = vector.broadcast %c15_i32_6 : i32 to vector<512x128xi32>
    %14 = arith.andi %12, %13 : vector<512x128xi32>
    %c17_i32 = arith.constant 17 : i32
    %15 = tpu.dynamic_rotate %7 by %c17_i32 dim 0 : vector<512x128xf32>, i32 -> vector<512x128xf32>
    %c1_i32 = arith.constant 1 : i32
    %16 = vector.broadcast %c1_i32 : i32 to vector<512x128xi32>
    %17 = arith.cmpi sge, %14, %16 : vector<512x128xi32>
    %c1_i32_7 = arith.constant 1 : i32
    %18 = vector.broadcast %c1_i32_7 : i32 to vector<512x128xi32>
    %19 = arith.cmpi sge, %10, %18 : vector<512x128xi32>
    %20 = arith.andi %17, %19 : vector<512x128xi1>
    %cst_8 = arith.constant 0.000000e+00 : f32
    %21 = vector.broadcast %cst_8 : f32 to vector<512x128xf32>
    %22 = arith.select %20, %15, %21 : vector<512x128xi1>, vector<512x128xf32>
    %c16_i32 = arith.constant 16 : i32
    %23 = tpu.dynamic_rotate %7 by %c16_i32 dim 0 : vector<512x128xf32>, i32 -> vector<512x128xf32>
    %c1_i32_9 = arith.constant 1 : i32
    %24 = vector.broadcast %c1_i32_9 : i32 to vector<512x128xi32>
    %25 = arith.cmpi sge, %14, %24 : vector<512x128xi32>
    %cst_10 = arith.constant 0.000000e+00 : f32
    %26 = vector.broadcast %cst_10 : f32 to vector<512x128xf32>
    %27 = arith.select %25, %23, %26 : vector<512x128xi1>, vector<512x128xf32>
    %c15_i32_11 = arith.constant 15 : i32
    %28 = tpu.dynamic_rotate %7 by %c15_i32_11 dim 0 : vector<512x128xf32>, i32 -> vector<512x128xf32>
    %c1_i32_12 = arith.constant 1 : i32
    %29 = vector.broadcast %c1_i32_12 : i32 to vector<512x128xi32>
    %30 = arith.cmpi sge, %14, %29 : vector<512x128xi32>
    %c15_i32_13 = arith.constant 15 : i32
    %31 = vector.broadcast %c15_i32_13 : i32 to vector<512x128xi32>
    %32 = arith.cmpi slt, %10, %31 : vector<512x128xi32>
    %33 = arith.andi %30, %32 : vector<512x128xi1>
    %cst_14 = arith.constant 0.000000e+00 : f32
    %34 = vector.broadcast %cst_14 : f32 to vector<512x128xf32>
    %35 = arith.select %33, %28, %34 : vector<512x128xi1>, vector<512x128xf32>
    %c1_i32_15 = arith.constant 1 : i32
    %36 = tpu.dynamic_rotate %7 by %c1_i32_15 dim 0 : vector<512x128xf32>, i32 -> vector<512x128xf32>
    %c1_i32_16 = arith.constant 1 : i32
    %37 = vector.broadcast %c1_i32_16 : i32 to vector<512x128xi32>
    %38 = arith.cmpi sge, %10, %37 : vector<512x128xi32>
    %cst_17 = arith.constant 0.000000e+00 : f32
    %39 = vector.broadcast %cst_17 : f32 to vector<512x128xf32>
    %40 = arith.select %38, %36, %39 : vector<512x128xi1>, vector<512x128xf32>
    %c511_i32 = arith.constant 511 : i32
    %41 = tpu.dynamic_rotate %7 by %c511_i32 dim 0 : vector<512x128xf32>, i32 -> vector<512x128xf32>
    %c15_i32_18 = arith.constant 15 : i32
    %42 = vector.broadcast %c15_i32_18 : i32 to vector<512x128xi32>
    %43 = arith.cmpi slt, %10, %42 : vector<512x128xi32>
    %cst_19 = arith.constant 0.000000e+00 : f32
    %44 = vector.broadcast %cst_19 : f32 to vector<512x128xf32>
    %45 = arith.select %43, %41, %44 : vector<512x128xi1>, vector<512x128xf32>
    %c497_i32 = arith.constant 497 : i32
    %46 = tpu.dynamic_rotate %7 by %c497_i32 dim 0 : vector<512x128xf32>, i32 -> vector<512x128xf32>
    %c15_i32_20 = arith.constant 15 : i32
    %47 = vector.broadcast %c15_i32_20 : i32 to vector<512x128xi32>
    %48 = arith.cmpi slt, %14, %47 : vector<512x128xi32>
    %c1_i32_21 = arith.constant 1 : i32
    %49 = vector.broadcast %c1_i32_21 : i32 to vector<512x128xi32>
    %50 = arith.cmpi sge, %10, %49 : vector<512x128xi32>
    %51 = arith.andi %48, %50 : vector<512x128xi1>
    %cst_22 = arith.constant 0.000000e+00 : f32
    %52 = vector.broadcast %cst_22 : f32 to vector<512x128xf32>
    %53 = arith.select %51, %46, %52 : vector<512x128xi1>, vector<512x128xf32>
    %c496_i32 = arith.constant 496 : i32
    %54 = tpu.dynamic_rotate %7 by %c496_i32 dim 0 : vector<512x128xf32>, i32 -> vector<512x128xf32>
    %c15_i32_23 = arith.constant 15 : i32
    %55 = vector.broadcast %c15_i32_23 : i32 to vector<512x128xi32>
    %56 = arith.cmpi slt, %14, %55 : vector<512x128xi32>
    %cst_24 = arith.constant 0.000000e+00 : f32
    %57 = vector.broadcast %cst_24 : f32 to vector<512x128xf32>
    %58 = arith.select %56, %54, %57 : vector<512x128xi1>, vector<512x128xf32>
    %c495_i32 = arith.constant 495 : i32
    %59 = tpu.dynamic_rotate %7 by %c495_i32 dim 0 : vector<512x128xf32>, i32 -> vector<512x128xf32>
    %c15_i32_25 = arith.constant 15 : i32
    %60 = vector.broadcast %c15_i32_25 : i32 to vector<512x128xi32>
    %61 = arith.cmpi slt, %14, %60 : vector<512x128xi32>
    %c15_i32_26 = arith.constant 15 : i32
    %62 = vector.broadcast %c15_i32_26 : i32 to vector<512x128xi32>
    %63 = arith.cmpi slt, %10, %62 : vector<512x128xi32>
    %64 = arith.andi %61, %63 : vector<512x128xi1>
    %cst_27 = arith.constant 0.000000e+00 : f32
    %65 = vector.broadcast %cst_27 : f32 to vector<512x128xf32>
    %66 = arith.select %64, %59, %65 : vector<512x128xi1>, vector<512x128xf32>
    %67 = tpu.concatenate %22, %27, %35, %40, %7, %45, %53, %58, %66 in 1 : vector<512x128xf32>, vector<512x128xf32>, vector<512x128xf32>, vector<512x128xf32>, vector<512x128xf32>, vector<512x128xf32>, vector<512x128xf32>, vector<512x128xf32>, vector<512x128xf32> -> vector<512x1152xf32>
    %c0_28 = arith.constant 0 : index
    %c0_29 = arith.constant 0 : index
    %68 = vector.load %arg3[%c0_28, %c0_29] : memref<1152x128xf32, #tpu.memory_space<vmem>>, vector<1152x128xf32>
    %cst_30 = arith.constant dense<0.000000e+00> : vector<512x128xf32>
    %69 = tpu.matmul %67, %68, %cst_30 {dimension_numbers = #tpu.dot_dimension_numbers<[1], [0], [0], [1], [0, 0, 1, 1], [], []>} : vector<512x1152xf32>, vector<1152x128xf32>, vector<512x128xf32> -> vector<512x128xf32>
    %c0_31 = arith.constant 0 : index
    %c0_32 = arith.constant 0 : index
    %70 = vector.load %arg6[%c0_31, %c0_32] : memref<1x128xf32, #tpu.memory_space<vmem>>, vector<1x128xf32>
    %71 = vector.broadcast %70 : vector<1x128xf32> to vector<512x128xf32>
    %72 = arith.addf %69, %71 : vector<512x128xf32>
    %cst_33 = arith.constant 0.000000e+00 : f32
    %73 = vector.broadcast %cst_33 : f32 to vector<512x128xf32>
    %74 = arith.maximumf %72, %73 : vector<512x128xf32>
    %c0_34 = arith.constant 0 : index
    %c0_35 = arith.constant 0 : index
    %75 = vector.load %arg4[%c0_34, %c0_35] : memref<128x16xf32, #tpu.memory_space<vmem>>, vector<128x16xf32>
    %cst_36 = arith.constant dense<0.000000e+00> : vector<512x16xf32>
    %76 = tpu.matmul %74, %75, %cst_36 {dimension_numbers = #tpu.dot_dimension_numbers<[1], [0], [0], [1], [0, 0, 1, 1], [], []>} : vector<512x128xf32>, vector<128x16xf32>, vector<512x16xf32> -> vector<512x16xf32>
    %c0_37 = arith.constant 0 : index
    %c0_38 = arith.constant 0 : index
    %77 = vector.load %arg7[%c0_37, %c0_38] : memref<1x16xf32, #tpu.memory_space<vmem>>, vector<1x16xf32>
    %78 = vector.broadcast %77 : vector<1x16xf32> to vector<512x16xf32>
    %79 = arith.addf %76, %78 : vector<512x16xf32>
    %cst_39 = arith.constant 0.000000e+00 : f32
    %80 = vector.broadcast %cst_39 : f32 to vector<512x16xf32>
    %81 = arith.maximumf %79, %80 : vector<512x16xf32>
    %82 = arith.addf %81, %0 : vector<512x16xf32>
    %cst_40 = arith.constant 0.000000e+00 : f32
    %83 = vector.broadcast %cst_40 : f32 to vector<512x16xf32>
    %84 = arith.maximumf %82, %83 : vector<512x16xf32>
    %c0_41 = arith.constant 0 : index
    %c0_42 = arith.constant 0 : index
    %85 = vector.load %arg8[%c0_41, %c0_42] : memref<512x16xf32, #tpu.memory_space<vmem>>, vector<512x16xf32>
    tpu.vector_store %arg8[%c0_41, %c0_42], %84 {strides = array<i32>} : memref<512x16xf32, #tpu.memory_space<vmem>>, vector<512x16xf32>,
    return
  }
  func.func @transform_0(%arg0: i32) -> (i32, i32) {
    %c0_i32 = arith.constant 0 : i32
    %c0_i32_0 = arith.constant 0 : i32
    return %arg0, %c0_i32 : i32, i32
  }
  func.func @transform_1(%arg0: i32) -> (i32, i32) {
    %c0_i32 = arith.constant 0 : i32
    %c0_i32_0 = arith.constant 0 : i32
    %c0_i32_1 = arith.constant 0 : i32
    return %c0_i32, %c0_i32_0 : i32, i32
  }
  func.func @transform_2(%arg0: i32) -> (i32, i32) {
    %c0_i32 = arith.constant 0 : i32
    %c0_i32_0 = arith.constant 0 : i32
    %c0_i32_1 = arith.constant 0 : i32
    return %c0_i32, %c0_i32_0 : i32, i32
  }
  func.func @transform_3(%arg0: i32) -> (i32, i32) {
    %c0_i32 = arith.constant 0 : i32
    %c0_i32_0 = arith.constant 0 : i32
    %c0_i32_1 = arith.constant 0 : i32
    return %c0_i32, %c0_i32_0 : i32, i32
  }
  func.func @transform_4(%arg0: i32) -> (i32, i32) {
    %c0_i32 = arith.constant 0 : i32
    %c0_i32_0 = arith.constant 0 : i32
    %c0_i32_1 = arith.constant 0 : i32
    return %c0_i32, %c0_i32_0 : i32, i32
  }
  func.func @transform_5(%arg0: i32) -> (i32, i32) {
    %c0_i32 = arith.constant 0 : i32
    %c0_i32_0 = arith.constant 0 : i32
    %c0_i32_1 = arith.constant 0 : i32
    return %c0_i32, %c0_i32_0 : i32, i32
  }
  func.func @transform_6(%arg0: i32) -> (i32, i32) {
    %c0_i32 = arith.constant 0 : i32
    %c0_i32_0 = arith.constant 0 : i32
    %c0_i32_1 = arith.constant 0 : i32
    return %c0_i32, %c0_i32_0 : i32, i32
  }
  func.func @transform_7(%arg0: i32) -> (i32, i32) {
    %c0_i32 = arith.constant 0 : i32
    %c0_i32_0 = arith.constant 0 : i32
    return %arg0, %c0_i32 : i32, i32
  }
}

</mosaic_0001>

<bundles_post_ra>
// kernel: tpu_custom_call.1
= control target key start
LH: loop header
LB: loop body
LE: loop exit
PB: predicated region body
PF: predicated region fallthrough
CT: control target
= control target key end

     0   :  { %12 = vsyncpa [#allocation3], 0  ;;  %s6970_s24 = smov [#allocation2]   ;;  %s12037_s0 = inlined_call_operand.vmem [shape: f32[512,16], index: 0, kind: input, shape index: {}]   ;;  %s12038_s1 = inlined_call_operand.vmem [shape: f32[16,128], index: 1, kind: input, shape index: {}]   ;;  %s12039_s2 = inlined_call_operand.hbm [shape: f32[1152,128], index: 2, kind: input, shape index: {}]   ;;  %s12040_s3 = inlined_call_operand.vmem [shape: f32[128,16], index: 3, kind: input, shape index: {}]   ;;  %s12041_s4 = inlined_call_operand.vmem [shape: f32[1,128], index: 4, kind: input, shape index: {}]   ;;  %s12042_s5 = inlined_call_operand.vmem [shape: f32[1,128], index: 5, kind: input, shape index: {}]   ;;  %s12043_s6 = inlined_call_operand.vmem [shape: f32[1,16], index: 6, kind: input, shape index: {}]   ;;  %s12044_s7 = inlined_call_operand.vmem [shape: f32[512,16], index: 7, kind: output, shape index: {}]  }
   0x1   :  { %s22_s25 = sshll.u32 %s6970_s24, 4  ;;  %s6946_s28 = scalar_lea.hbm %s12039_s2, 18432  ;;  %s23_s25 = int_to_ptr.vmem [resolvable:$true] %s22_s25 }
   0x2   :  { %p6947_p0 = scmp.ne.s32.totalorder %s12039_s2, %s6946_s28  ;;  %p6950_p1 = scmp.lt.u32.totalorder %s6946_s28, %s12039_s2 }
   0x4   :  { %p6952_p2 = pnand %p6950_p1, %p6947_p0 }
   0x6   :  { %6955 = shalt.err (!%p6952_p2)
}
   0x7   :  { %s6956_s10 = scalar_lea.vmem %s23_s25, 18432  ;;  %p6961_p4 = scmp.lt.s32.totalorder %s23_s25, %s23_s25 }
   0x8   :  { %p6957_p3 = scmp.ne.s32.totalorder %s23_s25, %s6956_s10  ;;  %p6962_p5 = scmp.lt.s32.totalorder %s6956_s10, %s6956_s10 }
   0xa   :  { %p6963_p6 = por %p6962_p5, %p6961_p4 }
   0xc   :  { %p6964_p7 = pnand %p6963_p6, %p6957_p3 }
   0xe   :  { %6967 = shalt.err (!%p6964_p7)
}
   0xf   :  { %s6971_s11 = smov 128   ;;  %s6972_s12 = smov 8  }
  0x10   :  { %28 = dma.hbm_to_vmem [thread:$0]  %s12039_s2, 18432, %s23_s25, [#allocation3], %s6971_s11, %s6971_s11, %s6972_s12  }
  0x11   :  { %6968 = dma.done.wait [#allocation3], 18432  }
  0x12   :  { %6969 = vsyncadd [#allocation3], 4294948864  ;;  %vm12093_vm0 = vcmask 130048   ;;  %v104_v0 = vld [vmem:[%s12038_s1] sm:$0xff]  ;;  %v105_v1 = vld [vmem:[%s12038_s1 + $0x8] sm:$0xff]  ;;  %v12045_v5 = vmov 0.0|0.0  }
  0x13   :  { %v40_v2 = vld [vmem:[%s12037_s0] sm:$0xff]  ;;  %v6200_v3 = vpack.c.bf16 %v105_v1, %v104_v0  ;;  %v41_v4 = vld [vmem:[%s12037_s0 + $0x8] sm:$0xff]  ;;  %6460 = vmatprep.subr.bf16.mxu1 %v12045_v5  ;;  %v42_v6 = vld [vmem:[%s12037_s0 + $0x10] sm:$0xff] }
  0x14   :  { %5848 = vmatprep.mubr.msk.f32.mxu0 %vm12093_vm0, %v40_v2  ;;  %v43_v7 = vld [vmem:[%s12037_s0 + $0x18] sm:$0xff]  ;;  %v44_v8 = vld [vmem:[%s12037_s0 + $0x20] sm:$0xff]  ;;  %v45_v9 = vld [vmem:[%s12037_s0 + $0x28] sm:$0xff] }
  0x15   :  { %6201 = vmatprep.subr.bf16.mxu0 %v6200_v3  ;;  %v46_v10 = vld [vmem:[%s12037_s0 + $0x30] sm:$0xff]  ;;  %v47_v11 = vld [vmem:[%s12037_s0 + $0x38] sm:$0xff]  ;;  %v48_v12 = vld [vmem:[%s12037_s0 + $0x40] sm:$0xff] }
  0x16   :  { %6203 = vmatpush3.bf16.msra.mxu0 %v6200_v3  ;;  %v49_v13 = vld [vmem:[%s12037_s0 + $0x48] sm:$0xff]  ;;  %v50_v14 = vld [vmem:[%s12037_s0 + $0x50] sm:$0xff]  ;;  %v2326_v15 = vld [vmem:[#allocation2 + $0x100] sm:$0xff] }
  0x17   :  { %6204 = vmatprep.subr.bf16.mxu0 %v12045_v5  ;;  %v2327_v16 = vld [vmem:[#allocation2 + $0x108] sm:$0xff]  ;;  %v2328_v17 = vld [vmem:[#allocation2 + $0x110] sm:$0xff]  ;;  %v2329_v19 = vld [vmem:[#allocation2 + $0x118] sm:$0xff] }
  0x18   :  { %v7077_v18 = vpack.c.bf16 %v2327_v16, %v2326_v15  ;;  %v51_v20 = vld [vmem:[%s12037_s0 + $0x58] sm:$0xff]  ;;  %v52_v21 = vld [vmem:[%s12037_s0 + $0x60] sm:$0xff]  ;;  %v7087_v22 = vpack.c.bf16 %v2329_v19, %v2328_v17  ;;  %v2331_v24 = vld [vmem:[#allocation2 + $0x128] sm:$0xff] }
  0x19   :  { %5849 = vmatmul.mubr.msk.f32.vlgmr.msra.gmra.mrb[0].mxu0 %vm12093_vm0, %v41_v4  ;;  %v2330_v23 = vld [vmem:[#allocation2 + $0x120] sm:$0xff]  ;;  %v53_v25 = vld [vmem:[%s12037_s0 + $0x68] sm:$0xff]  ;;  %v54_v26 = vld [vmem:[%s12037_s0 + $0x70] sm:$0xff] }
  0x1a   :  { %5851 = vmatprep.mubr.msk.f32.mxu0 %vm12093_vm0, %v42_v6  ;;  %12876 = vst [vmem:[#allocation5_spill] sm:$0xff] %v7077_v18  ;;  %6476 = vmatpush1.bf16.msra.mxu1 %v7077_v18  ;;  %12877 = vst [vmem:[#allocation6_spill] sm:$0xff] %v7087_v22  ;;  %v7099_v27 = vpack.c.bf16 %v2331_v24, %v2330_v23  ;;  %v55_v28 = vld [vmem:[%s12037_s0 + $0x78] sm:$0xff]  ;;  %v56_v29 = vld [vmem:[%s12037_s0 + $0x80] sm:$0xff] }
  0x1b   :  { %6461 = vmatprep.subr.bf16.mxu1 %v12045_v5  ;;  %v57_v30 = vld [vmem:[%s12037_s0 + $0x88] sm:$0xff]  ;;  %v58_v31 = vld [vmem:[%s12037_s0 + $0x90] sm:$0xff]  ;;  %v59_v32 = vld [vmem:[%s12037_s0 + $0x98] sm:$0xff] }
  0x1c   :  { %12878 = vst [vmem:[#allocation7_spill] sm:$0xff] %v7099_v27  ;;  %v60_v33 = vld [vmem:[%s12037_s0 + $0xa0] sm:$0xff]  ;;  %v61_v34 = vld [vmem:[%s12037_s0 + $0xa8] sm:$0xff]  ;;  %v62_v35 = vld [vmem:[%s12037_s0 + $0xb0] sm:$0xff] }
  0x1d   :  { %5852 = vmatmul.mubr.msk.f32.gmra.mrb[2].mxu0 %vm12093_vm0, %v43_v7  ;;  %v63_v36 = vld [vmem:[%s12037_s0 + $0xb8] sm:$0xff]  ;;  %v64_v37 = vld [vmem:[%s12037_s0 + $0xc0] sm:$0xff]  ;;  %v65_v38 = vld [vmem:[%s12037_s0 + $0xc8] sm:$0xff] }
  0x1e   :  { %5854 = vmatprep.mubr.msk.f32.mxu0 %vm12093_vm0, %v44_v8  ;;  %6477 = vmatpush1.bf16.msra.mxu1 %v7087_v22  ;;  %v66_v39 = vld [vmem:[%s12037_s0 + $0xd0] sm:$0xff]  ;;  %v67_v40 = vld [vmem:[%s12037_s0 + $0xd8] sm:$0xff]  ;;  %v68_v41 = vld [vmem:[%s12037_s0 + $0xe0] sm:$0xff] }
  0x1f   :  { %6462 = vmatprep.subr.bf16.mxu1 %v12045_v5  ;;  %v69_v42 = vld [vmem:[%s12037_s0 + $0xe8] sm:$0xff]  ;;  %v70_v43 = vld [vmem:[%s12037_s0 + $0xf0] sm:$0xff]  ;;  %v71_v44 = vld [vmem:[%s12037_s0 + $0xf8] sm:$0xff] }
  0x20   :  { %v72_v45 = vld [vmem:[%s12037_s0 + $0x100] sm:$0xff]  ;;  %v73_v46 = vld [vmem:[%s12037_s0 + $0x108] sm:$0xff]  ;;  %v74_v47 = vld [vmem:[%s12037_s0 + $0x110] sm:$0xff] }
  0x21   :  { %5855 = vmatmul.mubr.msk.f32.gmra.mrb[4].mxu0 %vm12093_vm0, %v45_v9  ;;  %v75_v48 = vld [vmem:[%s12037_s0 + $0x118] sm:$0xff]  ;;  %v76_v49 = vld [vmem:[%s12037_s0 + $0x120] sm:$0xff]  ;;  %v77_v50 = vld [vmem:[%s12037_s0 + $0x128] sm:$0xff] }
  0x22   :  { %5857 = vmatprep.mubr.msk.f32.mxu0 %vm12093_vm0, %v46_v10  ;;  %6478 = vmatpush1.bf16.msra.mxu1 %v7099_v27  ;;  %v78_v51 = vld [vmem:[%s12037_s0 + $0x130] sm:$0xff]  ;;  %v79_v52 = vld [vmem:[%s12037_s0 + $0x138] sm:$0xff]  ;;  %v80_v53 = vld [vmem:[%s12037_s0 + $0x140] sm:$0xff] }
  0x23   :  { %6463 = vmatprep.subr.bf16.mxu1 %v12045_v5  ;;  %v81_v54 = vld [vmem:[%s12037_s0 + $0x148] sm:$0xff]  ;;  %v82_v55 = vld [vmem:[%s12037_s0 + $0x150] sm:$0xff]  ;;  %v83_v56 = vld [vmem:[%s12037_s0 + $0x158] sm:$0xff] }
  0x24   :  { %v84_v57 = vld [vmem:[%s12037_s0 + $0x160] sm:$0xff]  ;;  %v2332_v58 = vld [vmem:[#allocation2 + $0x130] sm:$0xff]  ;;  %v2333_v59 = vld [vmem:[#allocation2 + $0x138] sm:$0xff] }
  0x25   :  { %5858 = vmatmul.mubr.msk.f32.gmra.mrb[6].mxu0 %vm12093_vm0, %v47_v11  ;;  %v7225_v60 = vpack.c.bf16 %v2333_v59, %v2332_v58  ;;  %v85_v61 = vld [vmem:[%s12037_s0 + $0x168] sm:$0xff]  ;;  %v86_v62 = vld [vmem:[%s12037_s0 + $0x170] sm:$0xff]  ;;  %v2334_v63 = vld [vmem:[#allocation2 + $0x140] sm:$0xff] }
  0x26   :  { %5860 = vmatprep.mubr.msk.f32.mxu0 %vm12093_vm0, %v48_v12  ;;  %v2335_v0 = vld [vmem:[#allocation2 + $0x148] sm:$0xff]  ;;  %v87_v2 = vld [vmem:[%s12037_s0 + $0x178] sm:$0xff]  ;;  %v88_v3 = vld [vmem:[%s12037_s0 + $0x180] sm:$0xff] }
  0x27   :  { %12879 = vst [vmem:[#allocation8_spill] sm:$0xff] %v7225_v60  ;;  %6479 = vmatpush1.bf16.msra.mxu1 %v7225_v60  ;;  %v7237_v1 = vpack.c.bf16 %v2335_v0, %v2334_v63  ;;  %v2336_v4 = vld [vmem:[#allocation2 + $0x150] sm:$0xff]  ;;  %v2337_v6 = vld [vmem:[#allocation2 + $0x158] sm:$0xff]  ;;  %v89_v8 = vld [vmem:[%s12037_s0 + $0x188] sm:$0xff] }
  0x28   :  { %6464 = vmatprep.subr.bf16.mxu1 %v12045_v5  ;;  %v7249_v7 = vpack.c.bf16 %v2337_v6, %v2336_v4  ;;  %v90_v9 = vld [vmem:[%s12037_s0 + $0x190] sm:$0xff]  ;;  %v2338_v10 = vld [vmem:[#allocation2 + $0x160] sm:$0xff]  ;;  %v2339_v11 = vld [vmem:[#allocation2 + $0x168] sm:$0xff] }
  0x29   :  { %5861 = vmatmul.mubr.msk.f32.gmra.mrb[8].mxu0 %vm12093_vm0, %v49_v13  ;;  %12880 = vst [vmem:[#allocation9_spill] sm:$0xff] %v7237_v1  ;;  %v7261_v12 = vpack.c.bf16 %v2339_v11, %v2338_v10  ;;  %v91_v13 = vld [vmem:[%s12037_s0 + $0x198] sm:$0xff]  ;;  %v2340_v15 = vld [vmem:[#allocation2 + $0x170] sm:$0xff]  ;;  %v93_v19 = vld [vmem:[%s12037_s0 + $0x1a8] sm:$0xff] }
  0x2a   :  { %5863 = vmatprep.mubr.msk.f32.mxu0 %vm12093_vm0, %v50_v14  ;;  %12881 = vst [vmem:[#allocation10_spill] sm:$0xff] %v7249_v7  ;;  %v92_v14 = vld [vmem:[%s12037_s0 + $0x1a0] sm:$0xff]  ;;  %v2341_v16 = vld [vmem:[#allocation2 + $0x178] sm:$0xff]  ;;  %v2343_v23 = vld [vmem:[#allocation2 + $0x188] sm:$0xff] }
  0x2b   :  { %6480 = vmatpush1.bf16.msra.mxu1 %v7237_v1  ;;  %12882 = vst [vmem:[#allocation11_spill] sm:$0xff] %v7261_v12  ;;  %v7273_v17 = vpack.c.bf16 %v2341_v16, %v2340_v15  ;;  %v2296_v59 = vld [vmem:[#allocation2 + $0x10] sm:$0xff]  ;;  %v2298_v63 = vld [vmem:[#allocation2 + $0x20] sm:$0xff]  ;;  %v2299_v0 = vld [vmem:[#allocation2 + $0x28] sm:$0xff] }
  0x2c   :  { %6465 = vmatprep.subr.bf16.mxu1 %v12045_v5  ;;  %v2301_v4 = vld [vmem:[#allocation2 + $0x38] sm:$0xff]  ;;  %v2304_v11 = vld [vmem:[#allocation2 + $0x50] sm:$0xff]  ;;  %v2306_v15 = vld [vmem:[#allocation2 + $0x60] sm:$0xff] }
  0x2d   :  { %5864 = vmatmul.mubr.msk.f32.gmra.mrb[10].mxu0 %vm12093_vm0, %v51_v20  ;;  %12883 = vst [vmem:[#allocation12_spill] sm:$0xff] %v7273_v17  ;;  %v94_v20 = vld [vmem:[%s12037_s0 + $0x1b0] sm:$0xff]  ;;  %v2307_v16 = vld [vmem:[#allocation2 + $0x68] sm:$0xff] }
  0x2e   :  { %5866 = vmatprep.mubr.msk.f32.mxu0 %vm12093_vm0, %v52_v21  ;;  %v2342_v21 = vld [vmem:[#allocation2 + $0x180] sm:$0xff]  ;;  %v2376_v27 = vld [vmem:[#allocation2 + $0x290] sm:$0xff] }
  0x2f   :  { %6481 = vmatpush1.bf16.msra.mxu1 %v7249_v7  ;;  %v7285_v24 = vpack.c.bf16 %v2343_v23, %v2342_v21  ;;  %v2309_v21 = vld [vmem:[#allocation2 + $0x78] sm:$0xff] }
  0x30   :  { %6466 = vmatprep.subr.bf16.mxu1 %v12045_v5 }
  0x31   :  { %5867 = vmatmul.mubr.msk.f32.gmra.mrb[12].mxu0 %vm12093_vm0, %v53_v25  ;;  %12884 = vst [vmem:[#allocation13_spill] sm:$0xff] %v7285_v24  ;;  %v95_v25 = vld [vmem:[%s12037_s0 + $0x1b8] sm:$0xff] }
  0x32   :  { %5869 = vmatprep.mubr.msk.f32.mxu0 %vm12093_vm0, %v54_v26  ;;  %v96_v26 = vld [vmem:[%s12037_s0 + $0x1c0] sm:$0xff] }
  0x33   :  { %6482 = vmatpush1.bf16.msra.mxu1 %v7261_v12 }
  0x34   :  { %6467 = vmatprep.subr.bf16.mxu1 %v12045_v5 }
  0x35   :  { %5870 = vmatmul.mubr.msk.f32.gmra.mrb[14].mxu0 %vm12093_vm0, %v55_v28  ;;  %v2344_v28 = vld [vmem:[#allocation2 + $0x190] sm:$0xff] }
  0x36   :  { %5872 = vmatprep.mubr.msk.f32.mxu0 %vm12093_vm0, %v56_v29  ;;  %v2345_v29 = vld [vmem:[#allocation2 + $0x198] sm:$0xff] }
  0x37   :  { %6483 = vmatpush1.bf16.msra.mxu1 %v7273_v17 }
  0x38   :  { %6468 = vmatprep.subr.bf16.mxu1 %v12045_v5 }
  0x39   :  { %5873 = vmatmul.mubr.msk.f32.gmra.mrb[16].mxu0 %vm12093_vm0, %v57_v30  ;;  %v7297_v30 = vpack.c.bf16 %v2345_v29, %v2344_v28  ;;  %v2312_v29 = vld [vmem:[#allocation2 + $0x90] sm:$0xff] }
  0x3a   :  { %5875 = vmatprep.mubr.msk.f32.mxu0 %vm12093_vm0, %v58_v31  ;;  %v97_v31 = vld [vmem:[%s12037_s0 + $0x1c8] sm:$0xff] }
  0x3b   :  { %6484 = vmatpush1.bf16.msra.mxu1 %v7285_v24  ;;  %12885 = vst [vmem:[#allocation14_spill] sm:$0xff] %v7297_v30 }
  0x3c   :  { %6469 = vmatprep.subr.bf16.mxu1 %v12045_v5 }
  0x3d   :  { %5876 = vmatmul.mubr.msk.f32.gmra.mrb[18].mxu0 %vm12093_vm0, %v59_v32  ;;  %v98_v32 = vld [vmem:[%s12037_s0 + $0x1d0] sm:$0xff] }
  0x3e   :  { %5878 = vmatprep.mubr.msk.f32.mxu0 %vm12093_vm0, %v60_v33  ;;  %v2346_v33 = vld [vmem:[#allocation2 + $0x1a0] sm:$0xff] }
  0x3f   :  { %6485 = vmatpush1.bf16.msra.mxu1 %v7297_v30 }
  0x40   :  { %6470 = vmatprep.subr.bf16.mxu1 %v12045_v5 }
  0x41   :  { %5879 = vmatmul.mubr.msk.f32.gmra.mrb[20].mxu0 %vm12093_vm0, %v61_v34  ;;  %v2347_v34 = vld [vmem:[#allocation2 + $0x1a8] sm:$0xff] }
  0x42   :  { %5881 = vmatprep.mubr.msk.f32.mxu0 %vm12093_vm0, %v62_v35  ;;  %v7309_v35 = vpack.c.bf16 %v2347_v34, %v2346_v33  ;;  %v2314_v33 = vld [vmem:[#allocation2 + $0xa0] sm:$0xff]  ;;  %v2315_v34 = vld [vmem:[#allocation2 + $0xa8] sm:$0xff] }
  0x44   :  { %12886 = vst [vmem:[#allocation15_spill] sm:$0xff] %v7309_v35  ;;  %6486 = vmatpush1.bf16.msra.mxu1 %v7309_v35 }
  0x45   :  { %5882 = vmatmul.mubr.msk.f32.gmra.mrb[22].mxu0 %vm12093_vm0, %v63_v36  ;;  %v99_v36 = vld [vmem:[%s12037_s0 + $0x1d8] sm:$0xff]  ;;  %6471 = vmatprep.subr.bf16.mxu1 %v12045_v5 }
  0x46   :  { %5884 = vmatprep.mubr.msk.f32.mxu0 %vm12093_vm0, %v64_v37  ;;  %v100_v37 = vld [vmem:[%s12037_s0 + $0x1e0] sm:$0xff] }
  0x49   :  { %5885 = vmatmul.mubr.msk.f32.gmra.mrb[24].mxu0 %vm12093_vm0, %v65_v38  ;;  %v2348_v38 = vld [vmem:[#allocation2 + $0x1b0] sm:$0xff] }
  0x4a   :  { %5887 = vmatprep.mubr.msk.f32.mxu0 %vm12093_vm0, %v66_v39  ;;  %v2349_v39 = vld [vmem:[#allocation2 + $0x1b8] sm:$0xff] }
  0x4d   :  { %5888 = vmatmul.mubr.msk.f32.gmra.mrb[26].mxu0 %vm12093_vm0, %v67_v40  ;;  %v7321_v40 = vpack.c.bf16 %v2349_v39, %v2348_v38  ;;  %v2317_v38 = vld [vmem:[#allocation2 + $0xb8] sm:$0xff] }
  0x4e   :  { %5890 = vmatprep.mubr.msk.f32.mxu0 %vm12093_vm0, %v68_v41  ;;  %v101_v41 = vld [vmem:[%s12037_s0 + $0x1e8] sm:$0xff] }
  0x4f   :  { %12887 = vst [vmem:[#allocation16_spill] sm:$0xff] %v7321_v40  ;;  %6487 = vmatpush1.bf16.msra.mxu1 %v7321_v40 }
  0x50   :  { %6472 = vmatprep.subr.bf16.mxu1 %v12045_v5 }
  0x51   :  { %5891 = vmatmul.mubr.msk.f32.gmra.mrb[28].mxu0 %vm12093_vm0, %v69_v42  ;;  %v102_v42 = vld [vmem:[%s12037_s0 + $0x1f0] sm:$0xff] }
  0x52   :  { %5893 = vmatprep.mubr.msk.f32.mxu0 %vm12093_vm0, %v70_v43  ;;  %v2350_v43 = vld [vmem:[#allocation2 + $0x1c0] sm:$0xff] }
  0x55   :  { %5894 = vmatmul.mubr.msk.f32.gmra.mrb[30].mxu0 %vm12093_vm0, %v71_v44  ;;  %v2351_v44 = vld [vmem:[#allocation2 + $0x1c8] sm:$0xff] }
  0x56   :  { %5896 = vmatprep.mubr.msk.f32.mxu0 %vm12093_vm0, %v72_v45  ;;  %v7333_v45 = vpack.c.bf16 %v2351_v44, %v2350_v43  ;;  %v2320_v44 = vld [vmem:[#allocation2 + $0xd0] sm:$0xff] }
  0x58   :  { %12888 = vst [vmem:[#allocation17_spill] sm:$0xff] %v7333_v45  ;;  %6488 = vmatpush1.bf16.msra.mxu1 %v7333_v45 }
  0x59   :  { %5897 = vmatmul.mubr.msk.f32.gmra.mrb[32].mxu0 %vm12093_vm0, %v73_v46  ;;  %v103_v46 = vld [vmem:[%s12037_s0 + $0x1f8] sm:$0xff]  ;;  %6473 = vmatprep.subr.bf16.mxu1 %v12045_v5 }
  0x5a   :  { %5899 = vmatprep.mubr.msk.f32.mxu0 %vm12093_vm0, %v74_v47  ;;  %v2352_v47 = vld [vmem:[#allocation2 + $0x1d0] sm:$0xff] }
  0x5d   :  { %5900 = vmatmul.mubr.msk.f32.gmra.mrb[34].mxu0 %vm12093_vm0, %v75_v48  ;;  %v2353_v48 = vld [vmem:[#allocation2 + $0x1d8] sm:$0xff] }
  0x5e   :  { %5902 = vmatprep.mubr.msk.f32.mxu0 %vm12093_vm0, %v76_v49  ;;  %v7342_v49 = vpack.c.bf16 %v2353_v48, %v2352_v47  ;;  %v2322_v48 = vld [vmem:[#allocation2 + $0xe0] sm:$0xff] }
  0x60   :  { %12889 = vst [vmem:[#allocation18_spill] sm:$0xff] %v7342_v49  ;;  %6489 = vmatpush1.bf16.msra.mxu1 %v7342_v49 }
  0x61   :  { %5903 = vmatmul.mubr.msk.f32.gmra.mrb[36].mxu0 %vm12093_vm0, %v77_v50  ;;  %6474 = vmatprep.subr.bf16.mxu1 %v12045_v5  ;;  %v2354_v50 = vld [vmem:[#allocation2 + $0x1e0] sm:$0xff] }
  0x62   :  { %5905 = vmatprep.mubr.msk.f32.mxu0 %vm12093_vm0, %v78_v51  ;;  %v2355_v51 = vld [vmem:[#allocation2 + $0x1e8] sm:$0xff] }
  0x65   :  { %5906 = vmatmul.mubr.msk.f32.gmra.mrb[38].mxu0 %vm12093_vm0, %v79_v52  ;;  %v7346_v52 = vpack.c.bf16 %v2355_v51, %v2354_v50  ;;  %v2323_v50 = vld [vmem:[#allocation2 + $0xe8] sm:$0xff] }
  0x66   :  { %5908 = vmatprep.mubr.msk.f32.mxu0 %vm12093_vm0, %v80_v53  ;;  %v2356_v53 = vld [vmem:[#allocation2 + $0x1f0] sm:$0xff]  ;;  %v6247_v51 = vpack.c.bf16 %v2323_v50, %v2322_v48 }
  0x67   :  { %12890 = vst [vmem:[#allocation19_spill] sm:$0xff] %v7346_v52  ;;  %6490 = vmatpush1.bf16.msra.mxu1 %v7346_v52  ;;  %v2362_v52 = vld [vmem:[#allocation2 + $0x220] sm:$0xff] }
  0x68   :  { %6475 = vmatprep.subr.bf16.mxu1 %v12045_v5 }
  0x69   :  { %5909 = vmatmul.mubr.msk.f32.gmra.mrb[40].mxu0 %vm12093_vm0, %v81_v54  ;;  %v2357_v54 = vld [vmem:[#allocation2 + $0x1f8] sm:$0xff] }
  0x6a   :  { %5911 = vmatprep.mubr.msk.f32.mxu0 %vm12093_vm0, %v82_v55  ;;  %v7350_v55 = vpack.c.bf16 %v2357_v54, %v2356_v53  ;;  %v2324_v54 = vld [vmem:[#allocation2 + $0xf0] sm:$0xff] }
  0x6c   :  { %12891 = vst [vmem:[#allocation20_spill] sm:$0xff] %v7350_v55  ;;  %6491 = vmatpush1.bf16.msra.mxu1 %v7350_v55 }
  0x6d   :  { %5912 = vmatmul.mubr.msk.f32.gmra.mrb[42].mxu0 %vm12093_vm0, %v83_v56  ;;  %6300 = vmatprep.subr.bf16.mxu1 %v12045_v5  ;;  %v2294_v56 = vld [vmem:[#allocation2] sm:$0xff] }
  0x6e   :  { %5914 = vmatprep.mubr.msk.f32.mxu0 %vm12093_vm0, %v84_v57  ;;  %v2295_v57 = vld [vmem:[#allocation2 + $0x8] sm:$0xff] }
  0x6f   :  { %v6205_v58 = vpack.c.bf16 %v2295_v57, %v2294_v56  ;;  %v2325_v57 = vld [vmem:[#allocation2 + $0xf8] sm:$0xff] }
  0x71   :  { %5915 = vmatmul.mubr.msk.f32.gmra.mrb[44].mxu0 %vm12093_vm0, %v85_v61  ;;  %v2297_v61 = vld [vmem:[#allocation2 + $0x18] sm:$0xff] }
  0x72   :  { %5917 = vmatprep.mubr.msk.f32.mxu0 %vm12093_vm0, %v86_v62  ;;  %6206 = vmatpush1.bf16.msra.mxu0 %v6205_v58  ;;  %v6208_v62 = vpack.c.bf16 %v2297_v61, %v2296_v59  ;;  %v6250_v58 = vpack.c.bf16 %v2325_v57, %v2324_v54 }
  0x73   :  { %6207 = vmatprep.subr.bf16.mxu0 %v12045_v5 }
  0x75   :  { %5918 = vmatmul.mubr.msk.f32.gmra.mrb[46].mxu0 %vm12093_vm0, %v87_v2  ;;  %v6211_v2 = vpack.c.bf16 %v2299_v0, %v2298_v63 }
  0x76   :  { %5920 = vmatprep.mubr.msk.f32.mxu0 %vm12093_vm0, %v88_v3  ;;  %6209 = vmatpush1.bf16.msra.mxu0 %v6208_v62  ;;  %v2300_v3 = vld [vmem:[#allocation2 + $0x30] sm:$0xff] }
  0x77   :  { %6210 = vmatprep.subr.bf16.mxu0 %v12045_v5  ;;  %v6214_v6 = vpack.c.bf16 %v2301_v4, %v2300_v3 }
  0x79   :  { %5921 = vmatmul.mubr.msk.f32.gmra.mrb[48].mxu0 %vm12093_vm0, %v89_v8  ;;  %v2302_v8 = vld [vmem:[#allocation2 + $0x40] sm:$0xff] }
  0x7a   :  { %5923 = vmatprep.mubr.msk.f32.mxu0 %vm12093_vm0, %v90_v9  ;;  %6212 = vmatpush1.bf16.msra.mxu0 %v6211_v2  ;;  %v2303_v9 = vld [vmem:[#allocation2 + $0x48] sm:$0xff] }
  0x7b   :  { %6213 = vmatprep.subr.bf16.mxu0 %v12045_v5  ;;  %v6217_v10 = vpack.c.bf16 %v2303_v9, %v2302_v8 }
  0x7d   :  { %5924 = vmatmul.mubr.msk.f32.gmra.mrb[50].mxu0 %vm12093_vm0, %v91_v13  ;;  %v2305_v13 = vld [vmem:[#allocation2 + $0x58] sm:$0xff] }
  0x7e   :  { %5926 = vmatprep.mubr.msk.f32.mxu0 %vm12093_vm0, %v92_v14  ;;  %6215 = vmatpush1.bf16.msra.mxu0 %v6214_v6  ;;  %v6220_v14 = vpack.c.bf16 %v2305_v13, %v2304_v11 }
  0x7f   :  { %6216 = vmatprep.subr.bf16.mxu0 %v12045_v5 }
  0x81   :  { %5927 = vmatmul.mubr.msk.f32.gmra.mrb[52].mxu0 %vm12093_vm0, %v93_v19  ;;  %v6223_v19 = vpack.c.bf16 %v2307_v16, %v2306_v15 }
  0x82   :  { %5929 = vmatprep.mubr.msk.f32.mxu0 %vm12093_vm0, %v94_v20  ;;  %6218 = vmatpush1.bf16.msra.mxu0 %v6217_v10  ;;  %v2308_v20 = vld [vmem:[#allocation2 + $0x70] sm:$0xff] }
  0x83   :  { %6219 = vmatprep.subr.bf16.mxu0 %v12045_v5  ;;  %v6226_v23 = vpack.c.bf16 %v2309_v21, %v2308_v20 }
  0x85   :  { %5930 = vmatmul.mubr.msk.f32.gmra.mrb[54].mxu0 %vm12093_vm0, %v95_v25  ;;  %v2310_v25 = vld [vmem:[#allocation2 + $0x80] sm:$0xff] }
  0x86   :  { %5932 = vmatprep.mubr.msk.f32.mxu0 %vm12093_vm0, %v96_v26  ;;  %6221 = vmatpush1.bf16.msra.mxu0 %v6220_v14  ;;  %v2311_v26 = vld [vmem:[#allocation2 + $0x88] sm:$0xff]  ;;  %v755_v14 = vlaneseq }
  0x87   :  { %6222 = vmatprep.subr.bf16.mxu0 %v12045_v5  ;;  %v6229_v28 = vpack.c.bf16 %v2311_v26, %v2310_v25 }
  0x89   :  { %5933 = vmatmul.mubr.msk.f32.gmra.mrb[56].mxu0 %vm12093_vm0, %v97_v31  ;;  %v2313_v31 = vld [vmem:[#allocation2 + $0x98] sm:$0xff] }
  0x8a   :  { %5935 = vmatprep.mubr.msk.f32.mxu0 %vm12093_vm0, %v98_v32  ;;  %6224 = vmatpush1.bf16.msra.mxu0 %v6223_v19  ;;  %v6232_v32 = vpack.c.bf16 %v2313_v31, %v2312_v29  ;;  %v7406_v19 = vshrl.u32 %v755_v14, 7  ;;  %v7417_v29 = vld [vmem:[%s12041_s4] ss:$0 sm:$0xff]  ;;  %v12907_v14 = vmov 0 }
  0x8b   :  { %6225 = vmatprep.subr.bf16.mxu0 %v12045_v5 }
  0x8c   :  { %v779_v20 = vadd.s32 184, %v7406_v19  ;;  %vm12166_vm1 = vcmp.lt.s32.totalorder %v7406_v19, 1  ;;  %vm12175_vm2 = vcmp.lt.s32.totalorder %v7406_v19, 7 }
  0x8d   :  { %5936 = vmatmul.mubr.msk.f32.gmra.mrb[58].mxu0 %vm12093_vm0, %v99_v36  ;;  %v6235_v36 = vpack.c.bf16 %v2315_v34, %v2314_v33  ;;  %v781_v34 = vadd.s32 200, %v7406_v19 }
  0x8e   :  { %5938 = vmatprep.mubr.msk.f32.mxu0 %vm12093_vm0, %v100_v37  ;;  %6227 = vmatpush1.bf16.msra.mxu0 %v6226_v23  ;;  %v2316_v37 = vld [vmem:[#allocation2 + $0xb0] sm:$0xff]  ;;  %v907_v25 = vshra.s32 %v779_v20, 4 }
  0x8f   :  { %6228 = vmatprep.subr.bf16.mxu0 %v12045_v5  ;;  %v6238_v39 = vpack.c.bf16 %v2317_v38, %v2316_v37  ;;  %v843_v37 = vand.u32 15, %v779_v20  ;;  %v909_v50 = vshra.s32 %v781_v34, 4 }
  0x90   :  { %v7422_v33 = vand.u32 15, %v907_v25 }
  0x91   :  { %5939 = vmatmul.mubr.msk.f32.gmra.mrb[60].mxu0 %vm12093_vm0, %v101_v41  ;;  %v2318_v41 = vld [vmem:[#allocation2 + $0xc0] sm:$0xff]  ;;  %vm7437_vm4 = vcmp.lt.s32.totalorder %v843_v37, 15 }
  0x92   :  { %5941 = vmatprep.mubr.msk.f32.mxu0 %vm12093_vm0, %v102_v42  ;;  %6230 = vmatpush1.bf16.msra.mxu0 %v6229_v28  ;;  %v2319_v42 = vld [vmem:[#allocation2 + $0xc8] sm:$0xff]  ;;  %v780_v28 = vadd.s32 192, %v7406_v19  ;;  %12900 = vst [vmem:[#allocation29_spill] sm:$0xff] %v7422_v33  ;;  %vm12122_vm3 = vcmp.ge.s32.totalorder %v7422_v33, 1  ;;  %v2360_v33 = vld [vmem:[#allocation2 + $0x210] sm:$0xff] }
  0x93   :  { %6231 = vmatprep.subr.bf16.mxu0 %v12045_v5  ;;  %v6241_v43 = vpack.c.bf16 %v2319_v42, %v2318_v41  ;;  %vm7462_vm6 = vmand %vm12122_vm3, %vm7437_vm4 }
  0x94   :  { %v844_v38 = vand.u32 15, %v780_v28 }
  0x95   :  { %5942 = vmatmul.mubr.msk.f32.gmra.mrb[62].mxu0 %vm12093_vm0, %v103_v46  ;;  %v2321_v46 = vld [vmem:[#allocation2 + $0xd8] sm:$0xff] }
  0x96   :  { %6233 = vmatpush1.bf16.msra.mxu0 %v6232_v32  ;;  %v6244_v47 = vpack.c.bf16 %v2321_v46, %v2320_v44  ;;  %v2358_v46 = vld [vmem:[#allocation2 + $0x200] sm:$0xff]  ;;  %vm7441_vm5 = vcmp.ge.s32.totalorder %v844_v38, 1 }
  0x97   :  { %6234 = vmatprep.subr.bf16.mxu0 %v12045_v5  ;;  %v12908_v14 = vsel %vm7441_vm5, 4294967295, %v12907_v14 }
  0x98   :  { %12909 = vst [vmem:[#allocation34_spill] sm:$0xff] %v12908_v14  ;;  %v7551_v14 = vadd.s32 248, %v7406_v19 }
  0x9a   :  { %6236 = vmatpush1.bf16.msra.mxu0 %v6235_v36 }
  0x9b   :  { %6237 = vmatprep.subr.bf16.mxu0 %v12045_v5 }
  0x9e   :  { %6239 = vmatpush1.bf16.msra.mxu0 %v6238_v39  ;;  %v908_v39 = vshra.s32 %v780_v28, 4 }
  0x9f   :  { %6240 = vmatprep.subr.bf16.mxu0 %v12045_v5 }
  0xa0   :  { %v7445_v20 = vand.u32 15, %v908_v39 }
  0xa2   :  { %6242 = vmatpush1.bf16.msra.mxu0 %v6241_v43  ;;  %12910 = vst [vmem:[#allocation35_spill] sm:$0xff] %v7445_v20  ;;  %vm12118_vm7 = vcmp.ge.s32.totalorder %v7445_v20, 1 }
  0xa3   :  { %6243 = vmatprep.subr.bf16.mxu0 %v12045_v5 }
  0xa6   :  { %6245 = vmatpush1.bf16.msra.mxu0 %v6244_v47  ;;  %v2359_v47 = vld [vmem:[#allocation2 + $0x208] sm:$0xff] }
  0xa7   :  { %6246 = vmatprep.subr.bf16.mxu0 %v12045_v5 }
  0xaa   :  { %6248 = vmatpush1.bf16.msra.mxu0 %v6247_v51  ;;  %v782_v51 = vadd.s32 208, %v7406_v19 }
  0xab   :  { %6249 = vmatprep.subr.bf16.mxu0 %v12045_v5 }
  0xae   :  { %6251 = vmatpush1.bf16.msra.mxu0 %v6250_v58  ;;  %v12904_v58 = vmov 0 }
  0xaf   :  { %6252 = vmatprep.subr.bf16.mxu0 %v12045_v5  ;;  %v12905_v58 = vsel %vm7437_vm4, 4294967295, %v12904_v58 }
  0xb0   :  { %12906 = vst [vmem:[#allocation33_spill] sm:$0xff] %v12905_v58 }
  0xec   :  { %v7368_v53 = vpop.f32.mrb[0].mxu0 }
  0xed   :  { %v7371_v56 = vpop.f32.mrb[1].mxu0 }
  0xf0   :  { %v7373_v59 = vpop.f32.mrb[2].mxu0 }
  0xf1   :  { %v7375_v61 = vpop.f32.mrb[3].mxu0 }
  0xf4   :  { %v7378_v62 = vpop.f32.mrb[4].mxu0 }
  0xf5   :  { %v7380_v63 = vpop.f32.mrb[5].mxu0 }
  0xf8   :  { %v7382_v0 = vpop.f32.mrb[6].mxu0 }
  0xf9   :  { %v7384_v2 = vpop.f32.mrb[7].mxu0 }
  0xfc   :  { %v7386_v3 = vpop.f32.mrb[8].mxu0 }
  0xfd   :  { %v7388_v4 = vpop.f32.mrb[9].mxu0 }
 0x100   :  { %v7390_v6 = vpop.f32.mrb[10].mxu0 }
 0x101   :  { %v7392_v8 = vpop.f32.mrb[11].mxu0 }
 0x104   :  { %v7394_v9 = vpop.f32.mrb[12].mxu0 }
 0x105   :  { %v7396_v10 = vpop.f32.mrb[13].mxu0 }
 0x106   :  { %12892 = vst [vmem:[#allocation21_spill] sm:$0xff] %v7396_v10 }
 0x108   :  { %v7398_v11 = vpop.f32.mrb[14].mxu0 }
 0x109   :  { %12893 = vst [vmem:[#allocation22_spill] sm:$0xff] %v7398_v11  ;;  %v7400_v13 = vpop.f32.mrb[15].mxu0 }
 0x10a   :  { %12894 = vst [vmem:[#allocation23_spill] sm:$0xff] %v7400_v13  ;;  %v2379_v13 = vld [vmem:[#allocation2 + $0x2a8] sm:$0xff] }
 0x10c   :  { %v7402_v15 = vpop.f32.mrb[16].mxu0 }
 0x10d   :  { %12895 = vst [vmem:[#allocation24_spill] sm:$0xff] %v7402_v15  ;;  %v7404_v16 = vpop.f32.mrb[17].mxu0 }
 0x10e   :  { %12896 = vst [vmem:[#allocation25_spill] sm:$0xff] %v7404_v16  ;;  %v2377_v16 = vld [vmem:[#allocation2 + $0x298] sm:$0xff] }
 0x110   :  { %v7409_v21 = vpop.f32.mrb[18].mxu0 }
 0x111   :  { %12897 = vst [vmem:[#allocation26_spill] sm:$0xff] %v7409_v21  ;;  %v7411_v23 = vpop.f32.mrb[19].mxu0 }
 0x112   :  { %12898 = vst [vmem:[#allocation27_spill] sm:$0xff] %v7411_v23 }
 0x114   :  { %v5880_v26 = vpop.f32.mrb[20].mxu0 }
 0x115   :  { %v7419_v31 = vpop.f32.mrb[21].mxu0  ;;  %v478_v32 = vadd.f32 %v5880_v26, %v7417_v29 }
 0x116   :  { %12899 = vst [vmem:[#allocation28_spill] sm:$0xff] %v7419_v31 }
 0x117   :  { %v7426_v43 = vmax.f32 %v478_v32, 0.0  ;;  %v6301_v32 = vpack.c.bf16 %v2359_v47, %v2358_v46  ;;  %v845_v46 = vand.u32 15, %v781_v34  ;;  %v7466_v47 = vand.u32 15, %v909_v50  ;;  %v2361_v34 = vld [vmem:[#allocation2 + $0x218] sm:$0xff] }
 0x118   :  { %v5883_v36 = vpop.f32.mrb[22].mxu0  ;;  %v910_v50 = vshra.s32 %v782_v51, 4 }
 0x119   :  { %v488_v41 = vadd.f32 %v5883_v36, %v7417_v29  ;;  %v482_v42 = vpop.f32.mrb[23].mxu0  ;;  %12901 = vst [vmem:[#allocation30_spill] sm:$0xff] %v7426_v43  ;;  %v7450_v36 = vadd.s32 216, %v7406_v19  ;;  %v12056_v38 = vrot.slane %v7426_v43, 1  ;;  %12914 = vst [vmem:[#allocation37_spill] sm:$0xff] %v7466_v47  ;;  %vm12109_vm8 = vcmp.ge.s32.totalorder %v7466_v47, 1 }
 0x11a   :  { %v483_v44 = vadd.f32 %v7417_v29, %v482_v42  ;;  %vm7495_vm9 = vcmp.lt.s32.totalorder %v845_v46, 15  ;;  %v7513_v46 = vand.u32 15, %v910_v50  ;;  %v2365_v47 = vld [vmem:[#allocation2 + $0x238] sm:$0xff] }
 0x11b   :  { %v7431_v48 = vmax.f32 %v488_v41, 0.0  ;;  %vm7541_vm11 = vmand %vm12109_vm8, %vm7495_vm9 }
 0x11c   :  { %v7435_v54 = vmax.f32 %v483_v44, 0.0  ;;  %v5886_v57 = vpop.f32.mrb[24].mxu0  ;;  %12927 = vst [vmem:[#allocation45_spill] sm:$0xff] %v7513_v46  ;;  %vm12094_vm12 = vcmp.ge.s32.totalorder %v7513_v46, 1 }
 0x11d   :  { %12902 = vst [vmem:[#allocation31_spill] sm:$0xff] %v7431_v48  ;;  %v498_v25 = vadd.f32 %v5886_v57, %v7417_v29  ;;  %v492_v26 = vpop.f32.mrb[25].mxu0  ;;  %v1035_v28 = vrot.slane %v7431_v48, 7  ;;  %v846_v57 = vand.u32 15, %v782_v51 }
 0x11e   :  { %12903 = vst [vmem:[#allocation32_spill] sm:$0xff] %v7435_v54  ;;  %v493_v37 = vadd.f32 %v7417_v29, %v492_v26  ;;  %v12053_v41 = vrot.slane %v7435_v54, 7  ;;  %v1483_v42 = vrot.slane %v7435_v54, 1  ;;  %v911_v54 = vshra.s32 %v7450_v36, 4 }
 0x11f   :  { %v7456_v44 = vmax.f32 %v498_v25, 0.0  ;;  %vm7508_vm10 = vcmp.ge.s32.totalorder %v846_v57, 1 }
 0x120   :  { %v7468_v26 = vmax.f32 %v493_v37, 0.0  ;;  %v5889_v5 = vpop.f32.mrb[26].mxu0  ;;  %v7474_v25 = vsel %vm12166_vm1, %v12053_v41, %v1035_v28  ;;  %v7480_v58 = vsel %vm12175_vm2, %v12056_v38, %v1483_v42  ;;  %v1484_v37 = vrot.slane %v7431_v48, 1 }
 0x121   :  { %12911 = vst [vmem:[#allocation36_spill] sm:$0xff] %v7456_v44  ;;  %12916 = vst [vmem:[#allocation39_spill] sm:$0xff] %v7474_v25  ;;  %v502_v31 = vpop.f32.mrb[27].mxu0  ;;  %3009 = vmatprep.mubr.f32.mxu1 %v7474_v25  ;;  %v784_v41 = vadd.s32 224, %v7406_v19  ;;  %v508_v43 = vadd.f32 %v5889_v5, %v7417_v29  ;;  %v1037_v38 = vrot.slane %v7456_v44, 7  ;;  %v12918_v25 = vmov 0 }
 0x122   :  { %12915 = vst [vmem:[#allocation38_spill] sm:$0xff] %v7468_v26  ;;  %12917 = vst [vmem:[#allocation40_spill] sm:$0xff] %v7480_v58  ;;  %v503_v21 = vadd.f32 %v7417_v29, %v502_v31  ;;  %5332 = vmatmul.mubr.msk.f32.vlgmr.msra.gmra.mrb[0].mxu1 %vm7462_vm6, %v7480_v58  ;;  %v1036_v51 = vrot.slane %v7468_v26, 7  ;;  %v12919_v25 = vsel %vm7495_vm9, 4294967295, %v12918_v25  ;;  %v6304_v48 = vpack.c.bf16 %v2361_v34, %v2360_v33  ;;  %v2363_v33 = vld [vmem:[#allocation2 + $0x228] sm:$0xff] }
 0x123   :  { %6302 = vmatpush1.bf16.msra.mxu1 %v6301_v32  ;;  %12920 = vst [vmem:[#allocation41_spill] sm:$0xff] %v12919_v25  ;;  %v7500_v5 = vadd.s32 232, %v7406_v19  ;;  %v12923_v58 = vmov 0  ;;  %v12926_v32 = vmov 0.0|0.0   ;;  %v7523_v57 = vand.u32 15, %v911_v54  ;;  %v2364_v25 = vld [vmem:[#allocation2 + $0x230] sm:$0xff] }
 0x124   :  { %v7502_v31 = vmax.f32 %v503_v21, 0.0  ;;  %v5892_v55 = vpop.f32.mrb[28].mxu0  ;;  %v7506_v39 = vsel %vm12166_vm1, %v1035_v28, %v1036_v51  ;;  %v12924_v58 = vsel %vm7508_vm10, 4294967295, %v12923_v58  ;;  %6303 = vmatprep.subr.bf16.mxu1 %v12926_v32  ;;  %v7520_v21 = vsel %vm12175_vm2, %v1483_v42, %v1484_v37 }
 0x125   :  { %12922 = vst [vmem:[#allocation43_spill] sm:$0xff] %v7506_v39  ;;  %12925 = vst [vmem:[#allocation44_spill] sm:$0xff] %v12924_v58  ;;  %v512_v34 = vpop.f32.mrb[29].mxu0  ;;  %5333 = vmatprep.mubr.msk.f32.mxu1 %vm7441_vm5, %v7506_v39  ;;  %v1485_v28 = vrot.slane %v7468_v26, 1  ;;  %v912_v49 = vshra.s32 %v784_v41, 4  ;;  %v7525_v45 = vmax.f32 %v508_v43, 0.0  ;;  %v7533_v39 = vsel %vm12166_vm1, %v1036_v51, %v1037_v38 }
 0x126   :  { %12921 = vst [vmem:[#allocation42_spill] sm:$0xff] %v7502_v31  ;;  %12928 = vst [vmem:[#allocation46_spill] sm:$0xff] %v7520_v21  ;;  %v513_v50 = vadd.f32 %v7417_v29, %v512_v34  ;;  %5334 = vmatmul.mubr.msk.f32.gmra.mrb[2].mxu1 %vm12118_vm7, %v7520_v21  ;;  %v1038_v42 = vrot.slane %v7502_v31, 7  ;;  %v847_v54 = vand.u32 15, %v7450_v36  ;;  %v6307_v34 = vpack.c.bf16 %v2363_v33, %v2362_v52  ;;  %v2367_v58 = vld [vmem:[#allocation2 + $0x248] sm:$0xff] }
 0x127   :  { %12929 = vst [vmem:[#allocation47_spill] sm:$0xff] %v7523_v57  ;;  %12930 = vst [vmem:[#allocation48_spill] sm:$0xff] %v7525_v45  ;;  %3019 = vmatprep.mubr.f32.mxu1 %v7533_v39  ;;  %6305 = vmatpush1.bf16.msra.mxu1 %v6304_v48  ;;  %v913_v21 = vshra.s32 %v7500_v5, 4  ;;  %v786_v51 = vadd.s32 240, %v7406_v19  ;;  %v7555_v48 = vsel %vm12175_vm2, %v1484_v37, %v1485_v28  ;;  %v1486_v36 = vrot.slane %v7456_v44, 1 }
 0x128   :  { %12931 = vst [vmem:[#allocation49_spill] sm:$0xff] %v7533_v39  ;;  %v5895_v26 = vpop.f32.mrb[30].mxu0  ;;  %v848_v39 = vand.u32 15, %v784_v41  ;;  %6306 = vmatprep.subr.bf16.mxu1 %v12926_v32  ;;  %12934 = vst [vmem:[#allocation50_spill] sm:$0xff] %v7555_v48  ;;  %vm12105_vm13 = vcmp.ge.s32.totalorder %v7523_v57, 1  ;;  %v7559_v33 = vand.u32 15, %v912_v49  ;;  %v518_v41 = vadd.f32 %v5892_v55, %v7417_v29 }
 0x129   :  { %v522_v52 = vpop.f32.mrb[31].mxu0  ;;  %v7562_v20 = vmax.f32 %v513_v50, 0.0  ;;  %v7569_v40 = vsel %vm12166_vm1, %v1037_v38, %v1038_v42  ;;  %v1039_v37 = vrot.slane %v7525_v45, 7  ;;  %vm7575_vm14 = vcmp.lt.s32.totalorder %v847_v54, 15  ;;  %v2368_v57 = vld [vmem:[#allocation2 + $0x250] sm:$0xff] }
 0x12a   :  { %12935 = vst [vmem:[#allocation51_spill] sm:$0xff] %v7559_v33  ;;  %5335 = vmatmul.mubr.msk.f32.gmra.mrb[4].mxu1 %vm7541_vm11, %v7555_v48  ;;  %12937 = vst [vmem:[#allocation53_spill] sm:$0xff] %v7569_v40  ;;  %v12938_v49 = vmov 0  ;;  %v7579_v55 = vand.u32 15, %v913_v21  ;;  %v914_v50 = vshra.s32 %v786_v51, 4  ;;  %v6310_v43 = vpack.c.bf16 %v2365_v47, %v2364_v25 }
 0x12b   :  { %12936 = vst [vmem:[#allocation52_spill] sm:$0xff] %v7562_v20  ;;  %5336 = vmatprep.mubr.msk.f32.mxu1 %vm7508_vm10, %v7569_v40  ;;  %v12939_v49 = vsel %vm7575_vm14, 4294967295, %v12938_v49  ;;  %6308 = vmatpush1.bf16.msra.mxu1 %v6307_v34  ;;  %vm7583_vm15 = vcmp.ge.s32.totalorder %v848_v39, 1  ;;  %v12942_v38 = vmov 0  ;;  %v849_v44 = vand.u32 15, %v7500_v5  ;;  %v2366_v40 = vld [vmem:[#allocation2 + $0x240] sm:$0xff]  ;;  %vm7612_vm11 = vmand %vm12105_vm13, %vm7575_vm14 }
 0x12c   :  { %12940 = vst [vmem:[#allocation54_spill] sm:$0xff] %v12939_v49  ;;  %12941 = vst [vmem:[#allocation55_spill] sm:$0xff] %v7579_v55  ;;  %v7581_v48 = vpop.f32.mrb[32].mxu0  ;;  %v12943_v38 = vsel %vm7583_vm15, 4294967295, %v12942_v38  ;;  %6309 = vmatprep.subr.bf16.mxu1 %v12926_v32  ;;  %v915_v54 = vshra.s32 %v7551_v14, 4  ;;  %v7592_v21 = vsel %vm12175_vm2, %v1485_v28, %v1486_v36  ;;  %v1487_v47 = vrot.slane %v7502_v31, 1 }
 0x12d   :  { %12944 = vst [vmem:[#allocation56_spill] sm:$0xff] %v12943_v38  ;;  %12945 = vst [vmem:[#allocation57_spill] sm:$0xff] %v7592_v21  ;;  %v532_v25 = vpop.f32.mrb[33].mxu0  ;;  %vm12138_vm6 = vcmp.ge.s32.totalorder %v7559_v33, 1  ;;  %v850_v39 = vand.u32 15, %v786_v51  ;;  %v7596_v34 = vmax.f32 %v518_v41, 0.0  ;;  %v523_v5 = vadd.f32 %v7417_v29, %v522_v52 }
 0x12e   :  { %5337 = vmatmul.mubr.msk.f32.gmra.mrb[6].mxu1 %vm12094_vm12, %v7592_v21  ;;  %v7604_v35 = vsel %vm12166_vm1, %v1038_v42, %v1039_v37  ;;  %v1040_v28 = vrot.slane %v7562_v20, 7  ;;  %vm12137_vm0 = vcmp.ge.s32.totalorder %v7579_v55, 1  ;;  %v7617_v52 = vand.u32 15, %v914_v50  ;;  %v2369_v50 = vld [vmem:[#allocation2 + $0x258] sm:$0xff]  ;;  %v2372_v33 = vld [vmem:[#allocation2 + $0x270] sm:$0xff] }
 0x12f   :  { %12946 = vst [vmem:[#allocation58_spill] sm:$0xff] %v7596_v34  ;;  %12947 = vst [vmem:[#allocation59_spill] sm:$0xff] %v7604_v35  ;;  %3029 = vmatprep.mubr.f32.mxu1 %v7604_v35  ;;  %6311 = vmatpush1.bf16.msra.mxu1 %v6310_v43  ;;  %v788_v42 = vadd.s32 256, %v7406_v19  ;;  %v6313_v41 = vpack.c.bf16 %v2367_v58, %v2366_v40  ;;  %vm7620_vm12 = vcmp.lt.s32.totalorder %v849_v44, 15  ;;  %v12951_v21 = vmov 0 }
 0x130   :  { %12950 = vst [vmem:[#allocation60_spill] sm:$0xff] %v7617_v52  ;;  %v12952_v21 = vsel %vm7620_vm12, 4294967295, %v12951_v21  ;;  %v7624_v35 = vpop.f32.mrb[34].mxu0  ;;  %v7626_v49 = vand.u32 15, %v915_v54  ;;  %v7629_v31 = vadd.s32 264, %v7406_v19  ;;  %6312 = vmatprep.subr.bf16.mxu1 %v12926_v32  ;;  %v7634_v43 = vsel %vm12175_vm2, %v1486_v36, %v1487_v47  ;;  %vm7697_vm3 = vmand %vm12137_vm0, %vm7620_vm12 }
 0x131   :  { %12953 = vst [vmem:[#allocation61_spill] sm:$0xff] %v12952_v21  ;;  %12955 = vst [vmem:[#allocation63_spill] sm:$0xff] %v7634_v43  ;;  %v1488_v40 = vrot.slane %v7525_v45, 1  ;;  %vm7637_vm13 = vcmp.ge.s32.totalorder %v850_v39, 1  ;;  %v12956_v58 = vmov 0  ;;  %v7641_v44 = vpop.f32.mrb[35].mxu0  ;;  %v528_v46 = vadd.f32 %v5895_v26, %v7417_v29 }
 0x132   :  { %12954 = vst [vmem:[#allocation62_spill] sm:$0xff] %v7626_v49  ;;  %v12957_v58 = vsel %vm7637_vm13, 4294967295, %v12956_v58  ;;  %v851_v54 = vand.u32 15, %v7551_v14  ;;  %v7645_v30 = vmax.f32 %v523_v5, 0.0  ;;  %5338 = vmatmul.mubr.msk.f32.gmra.mrb[8].mxu1 %vm7612_vm11, %v7634_v43  ;;  %v7652_v36 = vsel %vm12166_vm1, %v1039_v37, %v1040_v28  ;;  %v2371_v45 = vld [vmem:[#allocation2 + $0x268] sm:$0xff] }
 0x133   :  { %12958 = vst [vmem:[#allocation64_spill] sm:$0xff] %v12957_v58  ;;  %12960 = vst [vmem:[#allocation66_spill] sm:$0xff] %v7652_v36  ;;  %v1041_v39 = vrot.slane %v7596_v34, 7  ;;  %5339 = vmatprep.mubr.msk.f32.mxu1 %vm7583_vm15, %v7652_v36  ;;  %vm12152_vm8 = vcmp.ge.s32.totalorder %v7617_v52, 1  ;;  %v916_v14 = vshra.s32 %v788_v42, 4  ;;  %v7660_v26 = vadd.s32 272, %v7406_v19  ;;  %6314 = vmatpush1.bf16.msra.mxu1 %v6313_v41 }
 0x134   :  { %12959 = vst [vmem:[#allocation65_spill] sm:$0xff] %v7645_v30  ;;  %v6316_v5 = vpack.c.bf16 %v2369_v50, %v2368_v57  ;;  %v7663_v51 = vpop.f32.mrb[36].mxu0  ;;  %v917_v37 = vshra.s32 %v7629_v31, 4  ;;  %v7667_v43 = vadd.s32 280, %v7406_v19  ;;  %6315 = vmatprep.subr.bf16.mxu1 %v12926_v32  ;;  %v2370_v36 = vld [vmem:[#allocation2 + $0x260] sm:$0xff]  ;;  %v7672_v38 = vsel %vm12175_vm2, %v1487_v47, %v1488_v40 }
 0x135   :  { %12961 = vst [vmem:[#allocation67_spill] sm:$0xff] %v7672_v38  ;;  %v1489_v41 = vrot.slane %v7562_v20, 1  ;;  %vm7675_vm7 = vcmp.lt.s32.totalorder %v851_v54, 15  ;;  %v12962_v57 = vmov 0  ;;  %v852_v50 = vand.u32 15, %v788_v42  ;;  %v7679_v24 = vpop.f32.mrb[37].mxu0 }
 0x136   :  { %v12963_v57 = vsel %vm7675_vm7, 4294967295, %v12962_v57  ;;  %v7681_v17 = vmax.f32 %v528_v46, 0.0  ;;  %v533_v12 = vadd.f32 %v7417_v29, %v532_v25  ;;  %5340 = vmatmul.mubr.msk.f32.gmra.mrb[10].mxu1 %vm12138_vm6, %v7672_v38  ;;  %v7689_v47 = vsel %vm12166_vm1, %v1040_v28, %v1041_v39  ;;  %v2374_v58 = vld [vmem:[#allocation2 + $0x280] sm:$0xff] }
 0x137   :  { %12964 = vst [vmem:[#allocation68_spill] sm:$0xff] %v12963_v57  ;;  %12966 = vst [vmem:[#allocation70_spill] sm:$0xff] %v7689_v47  ;;  %v1042_v54 = vrot.slane %v7645_v30, 7  ;;  %3039 = vmatprep.mubr.f32.mxu1 %v7689_v47  ;;  %v7701_v25 = vand.u32 15, %v916_v14  ;;  %v918_v42 = vshra.s32 %v7660_v26, 4  ;;  %v7705_v38 = vadd.s32 288, %v7406_v19  ;;  %6317 = vmatpush1.bf16.msra.mxu1 %v6316_v5 }
 0x138   :  { %12965 = vst [vmem:[#allocation69_spill] sm:$0xff] %v7681_v17  ;;  %v6319_v28 = vpack.c.bf16 %v2371_v45, %v2370_v36  ;;  %v853_v20 = vand.u32 15, %v7629_v31  ;;  %v7708_v47 = vand.u32 15, %v917_v37  ;;  %v7710_v21 = vpop.f32.mrb[38].mxu0  ;;  %v919_v55 = vshra.s32 %v7667_v43, 4  ;;  %6318 = vmatprep.subr.bf16.mxu1 %v12926_v32  ;;  %v2373_v14 = vld [vmem:[#allocation2 + $0x278] sm:$0xff] }
 0x139   :  { %12969 = vst [vmem:[#allocation71_spill] sm:$0xff] %v7701_v25  ;;  %v7716_v7 = vsel %vm12175_vm2, %v1488_v40, %v1489_v41  ;;  %v1490_v1 = vrot.slane %v7596_v34, 1  ;;  %vm7719_vm0 = vcmp.ge.s32.totalorder %v852_v50, 1  ;;  %v12972_v45 = vmov 0  ;;  %v7724_v36 = vpop.f32.mrb[39].mxu0 }
 0x13a   :  { %12970 = vst [vmem:[#allocation72_spill] sm:$0xff] %v7708_v47  ;;  %12971 = vst [vmem:[#allocation73_spill] sm:$0xff] %v7716_v7  ;;  %v12973_v45 = vsel %vm7719_vm0, 4294967295, %v12972_v45  ;;  %v854_v31 = vand.u32 15, %v7660_v26  ;;  %v538_v5 = vadd.f32 %v7581_v48, %v7417_v29  ;;  %v7728_v37 = vmax.f32 %v533_v12, 0.0  ;;  %5341 = vmatmul.mubr.msk.f32.gmra.mrb[12].mxu1 %vm7697_vm3, %v7716_v7 }
 0x13b   :  { %12974 = vst [vmem:[#allocation74_spill] sm:$0xff] %v12973_v45  ;;  %v7735_v40 = vsel %vm12166_vm1, %v1041_v39, %v1042_v54  ;;  %v1043_v50 = vrot.slane %v7681_v17, 7  ;;  %v7742_v26 = vand.u32 15, %v918_v42  ;;  %v920_v12 = vshra.s32 %v7705_v38, 4  ;;  %6320 = vmatpush1.bf16.msra.mxu1 %v6319_v28  ;;  %v2375_v28 = vld [vmem:[#allocation2 + $0x288] sm:$0xff] }
 0x13c   :  { %12975 = vst [vmem:[#allocation75_spill] sm:$0xff] %v7728_v37  ;;  %12976 = vst [vmem:[#allocation76_spill] sm:$0xff] %v7735_v40  ;;  %5342 = vmatprep.mubr.msk.f32.mxu1 %vm7637_vm13, %v7735_v40  ;;  %v7746_v48 = vadd.s32 296, %v7406_v19  ;;  %v6322_v46 = vpack.c.bf16 %v2373_v14, %v2372_v33  ;;  %vm7749_vm11 = vcmp.lt.s32.totalorder %v853_v20, 15  ;;  %v12978_v39 = vmov 0  ;;  %v7753_v7 = vpop.f32.mrb[40].mxu0  ;;  %6321 = vmatprep.subr.bf16.mxu1 %v12926_v32 }
 0x13d   :  { %12977 = vst [vmem:[#allocation77_spill] sm:$0xff] %v7742_v26  ;;  %v12979_v39 = vsel %vm7749_vm11, 4294967295, %v12978_v39  ;;  %v855_v40 = vand.u32 15, %v7667_v43  ;;  %v7756_v34 = vand.u32 15, %v919_v55  ;;  %v7759_v42 = vadd.s32 304, %v7406_v19  ;;  %v7767_v14 = vpop.f32.mrb[41].mxu0 }
 0x13e   :  { %12980 = vst [vmem:[#allocation78_spill] sm:$0xff] %v12979_v39  ;;  %v7764_v33 = vsel %vm12175_vm2, %v1489_v41, %v1490_v1  ;;  %v1491_v20 = vrot.slane %v7645_v30, 1  ;;  %v7771_v55 = vadd.s32 312, %v7406_v19  ;;  %v7773_v43 = vmax.f32 %v538_v5, 0.0 }
 0x13f   :  { %12981 = vst [vmem:[#allocation79_spill] sm:$0xff] %v7756_v34  ;;  %12982 = vst [vmem:[#allocation80_spill] sm:$0xff] %v7764_v33  ;;  %v543_v60 = vadd.f32 %v7417_v29, %v7641_v44  ;;  %5343 = vmatmul.mubr.msk.f32.gmra.mrb[14].mxu1 %vm12152_vm8, %v7764_v33  ;;  %v7782_v41 = vsel %vm12166_vm1, %v1042_v54, %v1043_v50  ;;  %v1044_v30 = vrot.slane %v7728_v37, 7  ;;  %vm12985_vm3 = vcmp.ge.s32.totalorder %v7626_v49, 1 }
 0x140   :  { %12983 = vst [vmem:[#allocation81_spill] sm:$0xff] %v7773_v43  ;;  %12984 = vst [vmem:[#allocation82_spill] sm:$0xff] %v7782_v41  ;;  %3049 = vmatprep.mubr.f32.mxu1 %v7782_v41  ;;  %v7794_v44 = vand.u32 15, %v920_v12  ;;  %v921_v23 = vshra.s32 %v7746_v48, 4  ;;  %v7798_v33 = vadd.s32 320, %v7406_v19  ;;  %6323 = vmatpush1.bf16.msra.mxu1 %v6322_v46  ;;  %v6325_v54 = vpack.c.bf16 %v2375_v28, %v2374_v58  ;;  %v7804_v57 = vpop.f32.mrb[42].mxu0 }
 0x141   :  { %vm7790_vm6 = vmand %vm12985_vm3, %vm7675_vm7  ;;  %vm7800_vm8 = vcmp.ge.s32.totalorder %v854_v31, 1  ;;  %v12989_v52 = vmov 0  ;;  %v922_v49 = vshra.s32 %v7759_v42, 4  ;;  %v7809_v12 = vadd.s32 328, %v7406_v19  ;;  %6324 = vmatprep.subr.bf16.mxu1 %v12926_v32  ;;  %v7817_v46 = vpop.f32.mrb[43].mxu0 }
 0x142   :  { %12988 = vst [vmem:[#allocation83_spill] sm:$0xff] %v7794_v44  ;;  %v12990_v52 = vsel %vm7800_vm8, 4294967295, %v12989_v52  ;;  %v7814_v58 = vsel %vm12175_vm2, %v1490_v1, %v1491_v20  ;;  %v1492_v31 = vrot.slane %v7681_v17, 1  ;;  %v923_v28 = vshra.s32 %v7771_v55, 4 }
 0x143   :  { %12991 = vst [vmem:[#allocation84_spill] sm:$0xff] %v12990_v52  ;;  %12992 = vst [vmem:[#allocation85_spill] sm:$0xff] %v7814_v58  ;;  %v7821_v41 = vadd.s32 336, %v7406_v19  ;;  %v548_v22 = vadd.f32 %v7624_v35, %v7417_v29  ;;  %v7825_v15 = vmax.f32 %v543_v60, 0.0  ;;  %5344 = vmatmul.mubr.msk.f32.gmra.mrb[16].mxu1 %vm7790_vm6, %v7814_v58  ;;  %v7832_v1 = vsel %vm12166_vm1, %v1043_v50, %v1044_v30  ;;  %v2378_v60 = vld [vmem:[#allocation2 + $0x2a0] sm:$0xff] }
 0x144   :  { %12994 = vst [vmem:[#allocation87_spill] sm:$0xff] %v7832_v1  ;;  %v1045_v17 = vrot.slane %v7773_v43, 7  ;;  %5345 = vmatprep.mubr.msk.f32.mxu1 %vm7719_vm0, %v7832_v1  ;;  %v7839_v18 = vand.u32 15, %v921_v23  ;;  %v924_v35 = vshra.s32 %v7798_v33, 4  ;;  %6326 = vmatpush1.bf16.msra.mxu1 %v6325_v54  ;;  %v6328_v5 = vpack.c.bf16 %v2377_v16, %v2376_v27  ;;  %v7848_v58 = vpop.f32.mrb[44].mxu0 }
 0x145   :  { %12993 = vst [vmem:[#allocation86_spill] sm:$0xff] %v7825_v15  ;;  %vm7844_vm1 = vcmp.lt.s32.totalorder %v855_v40, 15  ;;  %v12996_v50 = vmov 0  ;;  %v7850_v45 = vand.u32 15, %v922_v49  ;;  %v925_v23 = vshra.s32 %v7809_v12, 4  ;;  %6327 = vmatprep.subr.bf16.mxu1 %v12926_v32  ;;  %v7860_v40 = vpop.f32.mrb[45].mxu0 }
 0x146   :  { %12995 = vst [vmem:[#allocation88_spill] sm:$0xff] %v7839_v18  ;;  %v12997_v50 = vsel %vm7844_vm1, 4294967295, %v12996_v50  ;;  %v7857_v27 = vsel %vm12175_vm2, %v1491_v20, %v1492_v31  ;;  %v1493_v16 = vrot.slane %v7728_v37, 1  ;;  %v7862_v54 = vand.u32 15, %v923_v28 }
 0x147   :  { %12998 = vst [vmem:[#allocation89_spill] sm:$0xff] %v12997_v50  ;;  %12999 = vst [vmem:[#allocation90_spill] sm:$0xff] %v7850_v45  ;;  %v926_v49 = vshra.s32 %v7821_v41, 4  ;;  %v7865_v11 = vmax.f32 %v548_v22, 0.0  ;;  %v553_v1 = vadd.f32 %v7417_v29, %v7679_v24  ;;  %vm13003_vm6 = vcmp.ge.s32.totalorder %v7701_v25, 1 }
 0x148   :  { %13000 = vst [vmem:[#allocation91_spill] sm:$0xff] %v7857_v27  ;;  %13001 = vst [vmem:[#allocation92_spill] sm:$0xff] %v7862_v54  ;;  %5346 = vmatmul.mubr.msk.f32.gmra.mrb[18].mxu1 %vm13003_vm6, %v7857_v27  ;;  %vm13004_vm3 = vcmp.lt.s32.totalorder %v7406_v19, 1  ;;  %v1046_v37 = vrot.slane %v7825_v15, 7  ;;  %vm13006_vm2 = vcmp.ge.s32.totalorder %v7708_v47, 1  ;;  %v7887_v28 = vand.u32 15, %v924_v35 }
 0x149   :  { %13002 = vst [vmem:[#allocation93_spill] sm:$0xff] %v7865_v11  ;;  %v7874_v20 = vsel %vm13004_vm3, %v1044_v30, %v1045_v17  ;;  %vm7882_vm7 = vmand %vm13006_vm2, %vm7749_vm11  ;;  %v7890_v27 = vadd.s32 344, %v7406_v19  ;;  %6329 = vmatpush1.bf16.msra.mxu1 %v6328_v5  ;;  %v6331_v30 = vpack.c.bf16 %v2379_v13, %v2378_v60  ;;  %v13010_v39 = vand.u32 15, %v7705_v38  ;;  %v7900_v25 = vpop.f32.mrb[46].mxu0  ;;  %v2380_v13 = vld [vmem:[#allocation2 + $0x2b0] sm:$0xff]  ;;  %v2381_v60 = vld [vmem:[#allocation2 + $0x2b8] sm:$0xff] }
 0x14a   :  { %13005 = vst [vmem:[#allocation94_spill] sm:$0xff] %v7874_v20  ;;  %3059 = vmatprep.mubr.f32.mxu1 %v7874_v20  ;;  %13009 = vst [vmem:[#allocation95_spill] sm:$0xff] %v7887_v28  ;;  %v378_v20 = vadd.f32 %v7368_v53, %v7417_v29  ;;  %v13011_v47 = vmov 0  ;;  %v7903_v35 = vand.u32 15, %v925_v23  ;;  %6330 = vmatprep.subr.bf16.mxu1 %v12926_v32  ;;  %vm13016_vm2 = vcmp.lt.s32.totalorder %v7406_v19, 7 }
 0x14b   :  { %vm7896_vm3 = vcmp.ge.s32.totalorder %v13010_v39, 1  ;;  %13014 = vst [vmem:[#allocation97_spill] sm:$0xff] %v7900_v25  ;;  %v7909_v53 = vsel %vm13016_vm2, %v1492_v31, %v1493_v16  ;;  %v1494_v38 = vrot.slane %v7773_v43, 1  ;;  %v7912_v39 = vpop.f32.mrb[47].mxu0  ;;  %v7914_v5 = vand.u32 15, %v926_v49 }
 0x14c   :  { %v13012_v47 = vsel %vm7896_vm3, 4294967295, %v13011_v47  ;;  %13015 = vst [vmem:[#allocation98_spill] sm:$0xff] %v7903_v35  ;;  %13017 = vst [vmem:[#allocation99_spill] sm:$0xff] %v7909_v53  ;;  %v884_v24 = vshra.s32 %v7406_v19, 4  ;;  %v558_v23 = vadd.f32 %v7663_v51, %v7417_v29  ;;  %v7919_v10 = vmax.f32 %v553_v1, 0.0  ;;  %5347 = vmatmul.mubr.msk.f32.gmra.mrb[20].mxu1 %vm7882_vm7, %v7909_v53 }
 0x14d   :  { %13013 = vst [vmem:[#allocation96_spill] sm:$0xff] %v13012_v47  ;;  %13018 = vst [vmem:[#allocation100_spill] sm:$0xff] %v7912_v39  ;;  %vm13021_vm6 = vcmp.lt.s32.totalorder %v7406_v19, 1  ;;  %v1047_v43 = vrot.slane %v7865_v11, 7  ;;  %v373_v49 = vadd.f32 %v7417_v29, %v7371_v56  ;;  %v927_v1 = vshra.s32 %v7890_v27, 4  ;;  %6332 = vmatpush1.bf16.msra.mxu1 %v6331_v30  ;;  %v2383_v30 = vld [vmem:[#allocation2 + $0x2c8] sm:$0xff] }
 0x14e   :  { %13019 = vst [vmem:[#allocation101_spill] sm:$0xff] %v7914_v5  ;;  %13020 = vst [vmem:[#allocation102_spill] sm:$0xff] %v7919_v10  ;;  %v7926_v31 = vsel %vm13021_vm6, %v1045_v17, %v1046_v37  ;;  %v6334_v22 = vpack.c.bf16 %v2381_v60, %v2380_v13  ;;  %v7937_v53 = vmax.f32 %v378_v20, 0.0  ;;  %v7939_v17 = vpop.f32.mrb[48].mxu0  ;;  %v13025_v56 = vand.u32 15, %v7746_v48  ;;  %6333 = vmatprep.subr.bf16.mxu1 %v12926_v32  ;;  %v2382_v20 = vld [vmem:[#allocation2 + $0x2c0] sm:$0xff] }
 0x14f   :  { %13022 = vst [vmem:[#allocation103_spill] sm:$0xff] %v7926_v31  ;;  %5348 = vmatprep.mubr.msk.f32.mxu1 %vm7800_vm8, %v7926_v31  ;;  %13024 = vst [vmem:[#allocation105_spill] sm:$0xff] %v7939_v17  ;;  %v13026_v25 = vmov 0  ;;  %v7949_v31 = vadd.s32 352, %v7406_v19  ;;  %v7952_v51 = vadd.s32 8, %v7406_v19  ;;  %v388_v13 = vadd.f32 %v7373_v59, %v7417_v29 }
 0x150   :  { %13023 = vst [vmem:[#allocation104_spill] sm:$0xff] %v7937_v53  ;;  %vm7944_vm6 = vcmp.lt.s32.totalorder %v13025_v56, 15  ;;  %vm13030_vm7 = vmmov %vm13016_vm2  ;;  %v1495_v60 = vrot.slane %v7825_v15, 1  ;;  %v7962_v56 = vpop.f32.mrb[49].mxu0  ;;  %v7964_v52 = vand.u32 15, %v884_v24  ;;  %v7966_v17 = vmax.f32 %v558_v23, 0.0 }
 0x151   :  { %v13027_v25 = vsel %vm7944_vm6, 4294967295, %v13026_v25  ;;  %13029 = vst [vmem:[#allocation107_spill] sm:$0xff] %v7952_v51  ;;  %v7959_v48 = vsel %vm13030_vm7, %v1493_v16, %v1494_v38  ;;  %v563_v39 = vadd.f32 %v7417_v29, %v7724_v36  ;;  %vm13034_vm2 = vcmp.ge.s32.totalorder %v7742_v26, 1  ;;  %6335 = vmatpush1.bf16.msra.mxu1 %v6334_v22  ;;  %v8000_v50 = vpop.f32.mrb[50].mxu0  ;;  %v2384_v22 = vld [vmem:[#allocation2 + $0x2d0] sm:$0xff] }
 0x152   :  { %13028 = vst [vmem:[#allocation106_spill] sm:$0xff] %v13027_v25  ;;  %13031 = vst [vmem:[#allocation108_spill] sm:$0xff] %v7959_v48  ;;  %5349 = vmatmul.mubr.msk.f32.gmra.mrb[22].mxu1 %vm13034_vm2, %v7959_v48  ;;  %vm13035_vm11 = vcmp.lt.s32.totalorder %v7406_v19, 1  ;;  %v1048_v16 = vrot.slane %v7919_v10, 7  ;;  %v7978_v15 = vmax.f32 %v373_v49, 0.0  ;;  %vm13038_vm7 = vcmp.ge.s32.totalorder %v7756_v34, 1  ;;  %6336 = vmatprep.subr.bf16.mxu1 %v12926_v32 }
 0x153   :  { %13032 = vst [vmem:[#allocation109_spill] sm:$0xff] %v7964_v52  ;;  %13033 = vst [vmem:[#allocation110_spill] sm:$0xff] %v7966_v17  ;;  %v7975_v59 = vsel %vm13035_vm11, %v1046_v37, %v1047_v43  ;;  %v7990_v23 = vand.u32 15, %v927_v1  ;;  %v6337_v37 = vpack.c.bf16 %v2383_v30, %v2382_v20  ;;  %v383_v49 = vadd.f32 %v7417_v29, %v7375_v61  ;;  %v2385_v20 = vld [vmem:[#allocation2 + $0x2d8] sm:$0xff] }
 0x154   :  { %13036 = vst [vmem:[#allocation111_spill] sm:$0xff] %v7975_v59  ;;  %13037 = vst [vmem:[#allocation112_spill] sm:$0xff] %v7978_v15  ;;  %3069 = vmatprep.mubr.f32.mxu1 %v7975_v59  ;;  %v13042_v48 = vand.u32 15, %v7759_v42  ;;  %v13043_v59 = vmov 0  ;;  %v885_v26 = vshra.s32 %v7952_v51, 4  ;;  %v8005_v1 = vadd.s32 16, %v7406_v19 }
 0x155   :  { %vm7985_vm12 = vmand %vm13038_vm7, %vm7844_vm1  ;;  %13041 = vst [vmem:[#allocation113_spill] sm:$0xff] %v7990_v23  ;;  %v8008_v61 = vmax.f32 %v388_v13, 0.0  ;;  %vm13048_vm2 = vcmp.lt.s32.totalorder %v7406_v19, 7  ;;  %v1496_v30 = vrot.slane %v7865_v11, 1  ;;  %v8018_v34 = vadd.s32 360, %v7406_v19  ;;  %6338 = vmatpush1.bf16.msra.mxu1 %v6337_v37 }
 0x156   :  { %vm7996_vm11 = vcmp.ge.s32.totalorder %v13042_v48, 1  ;;  %13046 = vst [vmem:[#allocation115_spill] sm:$0xff] %v8000_v50  ;;  %v8012_v42 = vsel %vm13048_vm2, %v1494_v38, %v1495_v60  ;;  %v8015_v48 = vpop.f32.mrb[51].mxu0  ;;  %v568_v24 = vadd.f32 %v7710_v21, %v7417_v29  ;;  %v8022_v51 = vmax.f32 %v563_v39, 0.0  ;;  %6339 = vmatprep.subr.bf16.mxu1 %v12926_v32 }
 0x157   :  { %v13044_v59 = vsel %vm7996_vm11, 4294967295, %v13043_v59  ;;  %13047 = vst [vmem:[#allocation116_spill] sm:$0xff] %v8008_v61  ;;  %13049 = vst [vmem:[#allocation117_spill] sm:$0xff] %v8012_v42  ;;  %5350 = vmatmul.mubr.msk.f32.gmra.mrb[24].mxu1 %vm7985_vm12, %v8012_v42  ;;  %vm13051_vm7 = vcmp.lt.s32.totalorder %v7406_v19, 1  ;;  %v1049_v13 = vrot.slane %v7966_v17, 7  ;;  %v398_v11 = vadd.f32 %v7378_v62, %v7417_v29  ;;  %v8046_v50 = vpop.f32.mrb[52].mxu0 }
 0x158   :  { %13045 = vst [vmem:[#allocation114_spill] sm:$0xff] %v13044_v59  ;;  %13050 = vst [vmem:[#allocation118_spill] sm:$0xff] %v8022_v51  ;;  %v8029_v38 = vsel %vm13051_vm7, %v1047_v43, %v1048_v16  ;;  %v928_v21 = vshra.s32 %v7949_v31, 4  ;;  %v8040_v39 = vadd.s32 24, %v7406_v19  ;;  %v6340_v36 = vpack.c.bf16 %v2385_v20, %v2384_v22  ;;  %v8063_v22 = vpop.f32.mrb[53].mxu0 }
 0x159   :  { %13052 = vst [vmem:[#allocation119_spill] sm:$0xff] %v8029_v38  ;;  %5351 = vmatprep.mubr.msk.f32.mxu1 %vm7896_vm3, %v8029_v38  ;;  %v8042_v43 = vmax.f32 %v383_v49, 0.0  ;;  %v393_v42 = vadd.f32 %v7417_v29, %v7380_v63  ;;  %13055 = vst [vmem:[#allocation122_spill] sm:$0xff] %v8046_v50  ;;  %v13056_v62 = vand.u32 15, %v7771_v55  ;;  %v13057_v38 = vmov 0 }
 0x15a   :  { %13053 = vst [vmem:[#allocation120_spill] sm:$0xff] %v8040_v39  ;;  %v886_v47 = vshra.s32 %v8005_v1, 4  ;;  %v8060_v49 = vsel %vm13048_vm2, %v1495_v60, %v1496_v30  ;;  %v1497_v63 = vrot.slane %v7919_v10, 1  ;;  %13061 = vst [vmem:[#allocation125_spill] sm:$0xff] %v8063_v22  ;;  %v8065_v20 = vand.u32 15, %v885_v26  ;;  %6341 = vmatpush1.bf16.msra.mxu1 %v6340_v36 }
 0x15b   :  { %13054 = vst [vmem:[#allocation121_spill] sm:$0xff] %v8042_v43  ;;  %vm8051_vm7 = vcmp.lt.s32.totalorder %v13056_v62, 15  ;;  %13060 = vst [vmem:[#allocation124_spill] sm:$0xff] %v8060_v49  ;;  %v929_v55 = vshra.s32 %v8018_v34, 4  ;;  %v8068_v62 = vmax.f32 %v568_v24, 0.0  ;;  %v573_v50 = vadd.f32 %v7417_v29, %v7767_v14  ;;  %6342 = vmatprep.subr.bf16.mxu1 %v12926_v32 }
 0x15c   :  { %v13058_v38 = vsel %vm8051_vm7, 4294967295, %v13057_v38  ;;  %13062 = vst [vmem:[#allocation126_spill] sm:$0xff] %v8065_v20  ;;  %vm13064_vm12 = vcmp.ge.s32.totalorder %v7794_v44, 1  ;;  %vm13065_vm2 = vcmp.lt.s32.totalorder %v7406_v19, 1  ;;  %v1050_v37 = vrot.slane %v8022_v51, 7 }
 0x15d   :  { %13059 = vst [vmem:[#allocation123_spill] sm:$0xff] %v13058_v38  ;;  %13063 = vst [vmem:[#allocation127_spill] sm:$0xff] %v8068_v62  ;;  %5352 = vmatmul.mubr.msk.f32.gmra.mrb[26].mxu1 %vm13064_vm12, %v8060_v49  ;;  %v8077_v60 = vsel %vm13065_vm2, %v1048_v16, %v1049_v13  ;;  %v8080_v10 = vmax.f32 %v398_v11, 0.0  ;;  %vm13068_vm1 = vcmp.ge.s32.totalorder %v7839_v18, 1  ;;  %v8091_v14 = vand.u32 15, %v928_v21 }
 0x15e   :  { %13066 = vst [vmem:[#allocation128_spill] sm:$0xff] %v8077_v60  ;;  %3079 = vmatprep.mubr.f32.mxu1 %v8077_v60  ;;  %vm8087_vm14 = vmand %vm13068_vm1, %vm7944_vm6  ;;  %v887_v16 = vshra.s32 %v8040_v39, 4  ;;  %v8095_v49 = vmax.f32 %v393_v42, 0.0  ;;  %v408_v11 = vadd.f32 %v7382_v0, %v7417_v29  ;;  %v8099_v60 = vpop.f32.mrb[54].mxu0  ;;  %v13074_v25 = vand.u32 15, %v7798_v33 }
 0x15f   :  { %13067 = vst [vmem:[#allocation129_spill] sm:$0xff] %v8080_v10  ;;  %13071 = vst [vmem:[#allocation130_spill] sm:$0xff] %v8091_v14  ;;  %v13075_v18 = vmov 0  ;;  %v8107_v21 = vand.u32 15, %v886_v47  ;;  %vm13079_vm12 = vcmp.lt.s32.totalorder %v7406_v19, 7  ;;  %v1498_v0 = vrot.slane %v7966_v17, 1 }
 0x160   :  { %13072 = vst [vmem:[#allocation131_spill] sm:$0xff] %v8095_v49  ;;  %13073 = vst [vmem:[#allocation132_spill] sm:$0xff] %v8099_v60  ;;  %vm8103_vm1 = vcmp.ge.s32.totalorder %v13074_v25, 1  ;;  %v8113_v42 = vsel %vm13079_vm12, %v1496_v30, %v1497_v63  ;;  %v8116_v36 = vpop.f32.mrb[55].mxu0  ;;  %v8118_v44 = vand.u32 15, %v929_v55  ;;  %v8121_v25 = vadd.s32 368, %v7406_v19 }
 0x161   :  { %v13076_v18 = vsel %vm8103_vm1, 4294967295, %v13075_v18  ;;  %13078 = vst [vmem:[#allocation134_spill] sm:$0xff] %v8107_v21  ;;  %13080 = vst [vmem:[#allocation135_spill] sm:$0xff] %v8113_v42  ;;  %v578_v47 = vadd.f32 %v7753_v7, %v7417_v29  ;;  %v8125_v33 = vmax.f32 %v573_v50, 0.0  ;;  %5353 = vmatmul.mubr.msk.f32.gmra.mrb[28].mxu1 %vm8087_vm14, %v8113_v42  ;;  %v8132_v30 = vsel %vm13065_vm2, %v1049_v13, %v1050_v37  ;;  %v8147_v13 = vpop.f32.mrb[56].mxu0 }
 0x162   :  { %13077 = vst [vmem:[#allocation133_spill] sm:$0xff] %v13076_v18  ;;  %13081 = vst [vmem:[#allocation136_spill] sm:$0xff] %v8116_v36  ;;  %v1051_v24 = vrot.slane %v8068_v62, 7  ;;  %v403_v55 = vadd.f32 %v7417_v29, %v7384_v2  ;;  %5354 = vmatprep.mubr.msk.f32.mxu1 %vm7996_vm11, %v8132_v30  ;;  %v8141_v7 = vand.u32 15, %v887_v16  ;;  %v1013_v50 = vrot.slane %v7937_v53, 7  ;;  %v2386_v18 = vld [vmem:[#allocation2 + $0x2e0] sm:$0xff] }
 0x163   :  { %13082 = vst [vmem:[#allocation137_spill] sm:$0xff] %v8118_v44  ;;  %13083 = vst [vmem:[#allocation138_spill] sm:$0xff] %v8125_v33  ;;  %v1014_v26 = vrot.slane %v8042_v43, 7  ;;  %v8145_v42 = vmax.f32 %v408_v11, 0.0  ;;  %v13088_v2 = vand.u32 15, %v7809_v12  ;;  %v13089_v17 = vmov 0 }
 0x164   :  { %13084 = vst [vmem:[#allocation139_spill] sm:$0xff] %v8132_v30  ;;  %13085 = vst [vmem:[#allocation140_spill] sm:$0xff] %v8141_v7  ;;  %v8157_v30 = vadd.s32 32, %v7406_v19  ;;  %v1015_v16 = vrot.slane %v8008_v61, 7  ;;  %v418_v11 = vadd.f32 %v7386_v3, %v7417_v29  ;;  %v8165_v39 = vsel %vm13079_vm12, %v1497_v63, %v1498_v0 }
 0x165   :  { %13086 = vst [vmem:[#allocation141_spill] sm:$0xff] %v8145_v42  ;;  %13087 = vst [vmem:[#allocation142_spill] sm:$0xff] %v8147_v13  ;;  %vm8152_vm2 = vcmp.lt.s32.totalorder %v13088_v2, 15  ;;  %v1499_v12 = vrot.slane %v8022_v51, 1  ;;  %v8168_v2 = vpop.f32.mrb[57].mxu0  ;;  %v8171_v60 = vmax.f32 %v578_v47, 0.0  ;;  %v583_v36 = vadd.f32 %v7417_v29, %v7817_v46 }
 0x166   :  { %v13090_v17 = vsel %vm8152_vm2, 4294967295, %v13089_v17  ;;  %13092 = vst [vmem:[#allocation144_spill] sm:$0xff] %v8165_v39  ;;  %13093 = vst [vmem:[#allocation145_spill] sm:$0xff] %v8168_v2  ;;  %vm13095_vm14 = vcmp.ge.s32.totalorder %v7850_v45, 1  ;;  %vm13096_vm6 = vcmp.lt.s32.totalorder %v7406_v19, 1  ;;  %v1052_v63 = vrot.slane %v8125_v33, 7 }
 0x167   :  { %13091 = vst [vmem:[#allocation143_spill] sm:$0xff] %v13090_v17  ;;  %13094 = vst [vmem:[#allocation146_spill] sm:$0xff] %v8171_v60  ;;  %5355 = vmatmul.mubr.msk.f32.gmra.mrb[30].mxu1 %vm13095_vm14, %v8165_v39  ;;  %v8180_v3 = vsel %vm13096_vm6, %v1050_v37, %v1051_v24  ;;  %v8183_v59 = vmax.f32 %v403_v55, 0.0  ;;  %v413_v13 = vadd.f32 %v7417_v29, %v7388_v4  ;;  %vm13099_vm12 = vcmp.ge.s32.totalorder %v7862_v54, 1  ;;  %v8206_v4 = vpop.f32.mrb[58].mxu0 }
 0x168   :  { %13097 = vst [vmem:[#allocation147_spill] sm:$0xff] %v8180_v3  ;;  %3089 = vmatprep.mubr.f32.mxu1 %v8180_v3  ;;  %vm8192_vm9 = vmand %vm13099_vm12, %vm8051_vm7  ;;  %v13102_v37 = vrot.slane %v7978_v15, 7  ;;  %v13107_v38 = vand.u32 15, %v7821_v41  ;;  %v13108_v39 = vmov 0  ;;  %v888_v3 = vshra.s32 %v8157_v30, 4 }
 0x169   :  { %13098 = vst [vmem:[#allocation148_spill] sm:$0xff] %v8183_v59  ;;  %vm13104_vm14 = vmmov %vm13096_vm6  ;;  %v930_v51 = vshra.s32 %v8121_v25, 4  ;;  %v13113_v54 = vrot.slane %v8095_v49, 7  ;;  %v8226_v45 = vmax.f32 %v418_v11, 0.0  ;;  %v8238_v22 = vmax.f32 %v583_v36, 0.0 }
 0x16a   :  { %v8200_v47 = vsel %vm13096_vm6, %v13102_v37, %v1013_v50  ;;  %v8204_v55 = vsel %vm13104_vm14, %v1013_v50, %v1014_v26  ;;  %13106 = vst [vmem:[#allocation151_spill] sm:$0xff] %v8206_v4  ;;  %vm8210_vm4 = vcmp.ge.s32.totalorder %v13107_v38, 1  ;;  %vm13111_vm12 = vmmov %vm13096_vm6  ;;  %vm13116_vm14 = vcmp.lt.s32.totalorder %v7406_v19, 7  ;;  %v8232_v38 = vpop.f32.mrb[59].mxu0 }
 0x16b   :  { %13103 = vst [vmem:[#allocation149_spill] sm:$0xff] %v8200_v47  ;;  %13105 = vst [vmem:[#allocation150_spill] sm:$0xff] %v8204_v55  ;;  %v13109_v39 = vsel %vm8210_vm4, 4294967295, %v13108_v39  ;;  %v8218_v37 = vsel %vm13111_vm12, %v1014_v26, %v1015_v16  ;;  %v8224_v50 = vsel %vm13096_vm6, %v1015_v16, %v13113_v54  ;;  %v8230_v41 = vsel %vm13116_vm14, %v1498_v0, %v1499_v12  ;;  %v5940_v46 = vpop.f32.mrb[60].mxu0 }
 0x16c   :  { %13110 = vst [vmem:[#allocation152_spill] sm:$0xff] %v13109_v39  ;;  %13112 = vst [vmem:[#allocation153_spill] sm:$0xff] %v8218_v37  ;;  %v1500_v4 = vrot.slane %v8068_v62, 1  ;;  %v588_v26 = vadd.f32 %v7804_v57, %v7417_v29  ;;  %5356 = vmatmul.mubr.msk.f32.gmra.mrb[32].mxu1 %vm8192_vm9, %v8230_v41  ;;  %v1053_v0 = vrot.slane %v8171_v60, 7  ;;  %v8248_v16 = vmax.f32 %v413_v13, 0.0  ;;  %v2387_v13 = vld [vmem:[#allocation2 + $0x2e8] sm:$0xff] }
 0x16d   :  { %13114 = vst [vmem:[#allocation154_spill] sm:$0xff] %v8224_v50  ;;  %13115 = vst [vmem:[#allocation155_spill] sm:$0xff] %v8226_v45  ;;  %v428_v11 = vadd.f32 %v7390_v6, %v7417_v29  ;;  %v13123_v57 = vand.u32 15, %v7406_v19  ;;  %v8264_v36 = vadd.s32 40, %v7406_v19  ;;  %v423_v6 = vadd.f32 %v7417_v29, %v7392_v8  ;;  %v8286_v45 = vpop.f32.mrb[61].mxu0  ;;  %v2388_v39 = vld [vmem:[#allocation2 + $0x2f0] sm:$0xff] }
 0x16e   :  { %13117 = vst [vmem:[#allocation156_spill] sm:$0xff] %v8230_v41  ;;  %13118 = vst [vmem:[#allocation157_spill] sm:$0xff] %v8232_v38  ;;  %v13128_v2 = vand.u32 15, %v7890_v27  ;;  %v13129_v41 = vmov 0  ;;  %v678_v38 = vadd.f32 %v5940_v46, %v7417_v29  ;;  %v1501_v27 = vrot.slane %v8125_v33, 1 }
 0x16f   :  { %13119 = vst [vmem:[#allocation158_spill] sm:$0xff] %v8238_v22  ;;  %vm13120_vm12 = vmmov %vm13096_vm6  ;;  %vm8259_vm9 = vcmp.ge.s32.totalorder %v13123_v57, 1  ;;  %v8276_v57 = vand.u32 15, %v888_v3  ;;  %vm13134_vm6 = vcmp.lt.s32.totalorder %v7406_v19, 7  ;;  %v8292_v3 = vmax.f32 %v588_v26, 0.0 }
 0x170   :  { %v8245_v54 = vsel %vm13120_vm12, %v1051_v24, %v1052_v63  ;;  %13122 = vst [vmem:[#allocation160_spill] sm:$0xff] %v8248_v16  ;;  %v13124_v24 = vmov 0  ;;  %13127 = vst [vmem:[#allocation162_spill] sm:$0xff] %v8264_v36  ;;  %vm8272_vm14 = vcmp.lt.s32.totalorder %v13128_v2, 15  ;;  %v8284_v8 = vsel %vm13134_vm6, %v1499_v12, %v1500_v4 }
 0x171   :  { %13121 = vst [vmem:[#allocation159_spill] sm:$0xff] %v8245_v54  ;;  %5357 = vmatprep.mubr.msk.f32.mxu1 %vm8103_vm1, %v8245_v54  ;;  %v13125_v24 = vsel %vm8259_vm9, 4294967295, %v13124_v24  ;;  %v13130_v41 = vsel %vm8272_vm14, 4294967295, %v13129_v41  ;;  %13132 = vst [vmem:[#allocation164_spill] sm:$0xff] %v8276_v57  ;;  %v8278_v54 = vand.u32 15, %v930_v51  ;;  %v8290_v2 = vadd.s32 376, %v7406_v19 }
 0x172   :  { %13126 = vst [vmem:[#allocation161_spill] sm:$0xff] %v13125_v24  ;;  %13131 = vst [vmem:[#allocation163_spill] sm:$0xff] %v13130_v41  ;;  %v593_v51 = vadd.f32 %v7417_v29, %v7860_v40  ;;  %vm13138_vm12 = vcmp.ge.s32.totalorder %v7887_v28, 1  ;;  %vm13139_vm7 = vcmp.lt.s32.totalorder %v7406_v19, 1  ;;  %v1054_v46 = vrot.slane %v8238_v22, 7 }
 0x173   :  { %13133 = vst [vmem:[#allocation165_spill] sm:$0xff] %v8278_v54  ;;  %13135 = vst [vmem:[#allocation166_spill] sm:$0xff] %v8284_v8  ;;  %5358 = vmatmul.mubr.msk.f32.gmra.mrb[34].mxu1 %vm13138_vm12, %v8284_v8  ;;  %v8301_v12 = vsel %vm13139_vm7, %v1052_v63, %v1053_v0  ;;  %v8304_v62 = vmax.f32 %v428_v11, 0.0  ;;  %vm13142_vm6 = vcmp.ge.s32.totalorder %v7903_v35, 1  ;;  %v889_v26 = vshra.s32 %v8264_v36, 4 }
 0x174   :  { %13136 = vst [vmem:[#allocation167_spill] sm:$0xff] %v8286_v45  ;;  %13137 = vst [vmem:[#allocation168_spill] sm:$0xff] %v8292_v3  ;;  %3099 = vmatprep.mubr.f32.mxu1 %v8301_v12  ;;  %v8318_v63 = vadd.s32 384, %v7406_v19  ;;  %v6343_v8 = vpack.c.bf16 %v2387_v13, %v2386_v18  ;;  %v8320_v11 = vmax.f32 %v423_v6, 0.0  ;;  %v8322_v33 = vmax.f32 %v678_v38, 0.0 }
 0x175   :  { %13140 = vst [vmem:[#allocation169_spill] sm:$0xff] %v8301_v12  ;;  %13141 = vst [vmem:[#allocation170_spill] sm:$0xff] %v8304_v62  ;;  %v5943_v12 = vpop.f32.mrb[62].mxu0  ;;  %v13147_v17 = vand.u32 15, %v7949_v31  ;;  %v13148_v35 = vmov 0  ;;  %v13151_v45 = vrot.slane %v8080_v10, 7  ;;  %v598_v38 = vadd.f32 %v7848_v58, %v7417_v29 }
 0x176   :  { %vm8311_vm1 = vmand %vm13142_vm6, %vm8152_vm2  ;;  %13145 = vst [vmem:[#allocation171_spill] sm:$0xff] %v8320_v11  ;;  %v13152_v36 = vrot.slane %v8095_v49, 7  ;;  %vm13153_vm6 = vcmp.lt.s32.totalorder %v7406_v19, 1  ;;  %v688_v13 = vadd.f32 %v5943_v12, %v7417_v29  ;;  %v682_v31 = vpop.f32.mrb[63].mxu0  ;;  %vm13155_vm12 = vcmp.lt.s32.totalorder %v7406_v19, 7  ;;  %6344 = vmatpush1.bf16.msra.mxu1 %v6343_v8 }
 0x177   :  { %13146 = vst [vmem:[#allocation172_spill] sm:$0xff] %v8322_v33  ;;  %vm8326_vm7 = vcmp.ge.s32.totalorder %v13147_v17, 1  ;;  %v8344_v17 = vsel %vm13155_vm12, %v1500_v4, %v1501_v27  ;;  %v1502_v6 = vrot.slane %v8171_v60, 1  ;;  %v8347_v28 = vmax.f32 %v593_v51, 0.0  ;;  %6345 = vmatprep.subr.bf16.mxu1 %v12926_v32 }
 0x178   :  { %v13149_v35 = vsel %vm8326_vm7, 4294967295, %v13148_v35  ;;  %v8337_v18 = vsel %vm13153_vm6, %v13152_v36, %v13151_v45  ;;  %13156 = vst [vmem:[#allocation175_spill] sm:$0xff] %v8344_v17  ;;  %v683_v62 = vadd.f32 %v7417_v29, %v682_v31  ;;  %5359 = vmatmul.mubr.msk.f32.gmra.mrb[36].mxu1 %vm8311_vm1, %v8344_v17  ;;  %v8355_v45 = vsel %vm13153_vm6, %v1053_v0, %v1054_v46 }
 0x179   :  { %13150 = vst [vmem:[#allocation173_spill] sm:$0xff] %v13149_v35  ;;  %13154 = vst [vmem:[#allocation174_spill] sm:$0xff] %v8337_v18  ;;  %v1055_v58 = vrot.slane %v8292_v3, 7  ;;  %v438_v4 = vadd.f32 %v7394_v9, %v7417_v29  ;;  %5360 = vmatprep.mubr.msk.f32.mxu1 %vm8210_vm4, %v8355_v45  ;;  %v13159_v36 = vand.u32 15, %v8005_v1  ;;  %v13160_v0 = vmov 0 }
 0x17a   :  { %13157 = vst [vmem:[#allocation176_spill] sm:$0xff] %v8347_v28  ;;  %13158 = vst [vmem:[#allocation177_spill] sm:$0xff] %v8355_v45  ;;  %v931_v8 = vshra.s32 %v8290_v2, 4  ;;  %v8375_v9 = vadd.s32 48, %v7406_v19  ;;  %v8377_v29 = vmax.f32 %v688_v13, 0.0  ;;  %v8379_v12 = vmax.f32 %v683_v62, 0.0 }
 0x17b   :  { %vm8368_vm1 = vcmp.ge.s32.totalorder %v13159_v36, 1  ;;  %v13165_v1 = vand.u32 15, %v8018_v34  ;;  %v13166_v31 = vmov 0  ;;  %v8389_v36 = vand.u32 15, %v889_v26  ;;  %v8409_v26 = vld [vmem:[%s12041_s4] ss:$0 sm:$0xff]  ;;  %vm13177_vm4 = vmmov %vm13153_vm6 }
 0x17c   :  { %v13161_v0 = vsel %vm8368_vm1, 4294967295, %v13160_v0  ;;  %13163 = vst [vmem:[#allocation179_spill] sm:$0xff] %v8377_v29  ;;  %13164 = vst [vmem:[#allocation180_spill] sm:$0xff] %v8379_v12  ;;  %v8391_v51 = vmax.f32 %v598_v38, 0.0  ;;  %v8395_v13 = vsel %vm13155_vm12, %v1501_v27, %v1502_v6  ;;  %v1503_v62 = vrot.slane %v8238_v22, 1  ;;  %v13175_v38 = vld [vmem:[#allocation100_spill] sm:$0xff] }
 0x17d   :  { %13162 = vst [vmem:[#allocation178_spill] sm:$0xff] %v13161_v0  ;;  %vm8385_vm2 = vcmp.lt.s32.totalorder %v13165_v1, 15  ;;  %13169 = vst [vmem:[#allocation182_spill] sm:$0xff] %v8389_v36  ;;  %v13172_v40 = vrot.slane %v8183_v59, 7  ;;  %v13173_v17 = vrot.slane %v8080_v10, 7  ;;  %v603_v1 = vadd.f32 %v8409_v26, %v13175_v38 }
 0x17e   :  { %v13167_v31 = vsel %vm8385_vm2, 4294967295, %v13166_v31  ;;  %13170 = vst [vmem:[#allocation183_spill] sm:$0xff] %v8391_v51  ;;  %13171 = vst [vmem:[#allocation184_spill] sm:$0xff] %v8395_v13  ;;  %vm13176_vm12 = vcmp.ge.s32.totalorder %v7914_v5, 1  ;;  %v8418_v27 = vsel %vm13177_vm4, %v1054_v46, %v1055_v58  ;;  %v1056_v38 = vrot.slane %v8347_v28, 7  ;;  %v13184_v46 = vld [vmem:[#allocation21_spill] sm:$0xff] }
 0x17f   :  { %13168 = vst [vmem:[#allocation181_spill] sm:$0xff] %v13167_v31  ;;  %v8404_v34 = vsel %vm13153_vm6, %v13173_v17, %v13172_v40  ;;  %5361 = vmatmul.mubr.msk.f32.gmra.mrb[38].mxu1 %vm13176_vm12, %v8395_v13  ;;  %13178 = vst [vmem:[#allocation100_spill] sm:$0xff] %v8418_v27  ;;  %vm13179_vm6 = vcmp.ge.s32.totalorder %v7964_v52, 1  ;;  %v1074_v40 = vrot.slane %v8379_v12, 7  ;;  %v8433_v13 = vmax.f32 %v438_v4, 0.0  ;;  %v2389_v5 = vld [vmem:[#allocation2 + $0x2f8] sm:$0xff] }
 0x180   :  { %13174 = vst [vmem:[#allocation185_spill] sm:$0xff] %v8404_v34  ;;  %vm8424_vm11 = vmand %vm13179_vm6, %vm8259_vm9  ;;  %v433_v45 = vadd.f32 %v8409_v26, %v13184_v46  ;;  %3109 = vmatprep.mubr.f32.mxu1 %v8418_v27  ;;  %vm13185_vm4 = vcmp.ge.s32.totalorder %v7990_v23, 1  ;;  %v8447_v52 = vand.u32 15, %v931_v8  ;;  %v890_v4 = vshra.s32 %v8375_v9, 4 }
 0x181   :  { %vm13182_vm3 = vmmov %vm13179_vm6  ;;  %13183 = vst [vmem:[#allocation186_spill] sm:$0xff] %v8433_v13  ;;  %v13189_v22 = vrot.slane %v8322_v33, 7  ;;  %vm13190_vm6 = vcmp.lt.s32.totalorder %v7406_v19, 1  ;;  %v1075_v41 = vrot.slane %v8377_v29, 7  ;;  %v13192_v27 = vand.u32 15, %v8121_v25 }
 0x182   :  { %5169 = vmatprep.mubr.msk.f32.mxu0 %vm13182_vm3, %v8379_v12  ;;  %vm8442_vm12 = vmand %vm13185_vm4, %vm8272_vm14  ;;  %13188 = vst [vmem:[#allocation21_spill] sm:$0xff] %v8447_v52  ;;  %v13193_v23 = vmov 0  ;;  %v932_v60 = vshra.s32 %v8318_v63, 4  ;;  %v8465_v8 = vadd.s32 56, %v7406_v19  ;;  %v13196_v12 = vld [vmem:[#allocation22_spill] sm:$0xff]  ;;  %v8479_v34 = vmax.f32 %v603_v1, 0.0 }
 0x183   :  { %v8454_v46 = vsel %vm13190_vm6, %v13189_v22, %v1074_v40  ;;  %vm8459_vm4 = vcmp.ge.s32.totalorder %v13192_v27, 1  ;;  %v448_v33 = vadd.f32 %v8409_v26, %v13196_v12  ;;  %v13197_v22 = vld [vmem:[#allocation97_spill] sm:$0xff]  ;;  %vm13198_vm6 = vcmp.lt.s32.totalorder %v7406_v19, 7 }
 0x184   :  { %13191 = vst [vmem:[#allocation187_spill] sm:$0xff] %v8454_v46  ;;  %v13194_v23 = vsel %vm8459_vm4, 4294967295, %v13193_v23  ;;  %v608_v13 = vadd.f32 %v8409_v26, %v13197_v22  ;;  %5170 = vmatmul.mubr.msk.f32.vlgmr.msra.gmra.mrb[64].mxu0 %vm8424_vm11, %v8454_v46  ;;  %v8476_v25 = vsel %vm13198_vm6, %v1502_v6, %v1503_v62  ;;  %v1504_v27 = vrot.slane %v8292_v3, 1  ;;  %13200 = vst [vmem:[#allocation97_spill] sm:$0xff] %v8479_v34  ;;  %v13207_v22 = vld [vmem:[#allocation23_spill] sm:$0xff] }
 0x185   :  { %13195 = vst [vmem:[#allocation188_spill] sm:$0xff] %v13194_v23  ;;  %13199 = vst [vmem:[#allocation22_spill] sm:$0xff] %v8476_v25  ;;  %5362 = vmatmul.mubr.msk.f32.gmra.mrb[40].mxu1 %vm8442_vm12, %v8476_v25  ;;  %vm13201_vm3 = vcmp.lt.s32.totalorder %v7406_v19, 1  ;;  %vm13203_vm14 = vcmp.ge.s32.totalorder %v8065_v20, 1  ;;  %v1057_v17 = vrot.slane %v8391_v51, 7  ;;  %v8496_v1 = vmax.f32 %v433_v45, 0.0 }
 0x186   :  { %v8486_v12 = vsel %vm13201_vm3, %v1055_v58, %v1056_v38  ;;  %5171 = vmatprep.mubr.msk.f32.mxu0 %vm13203_vm14, %v8377_v29  ;;  %vm13204_vm11 = vmmov %vm13201_vm3  ;;  %v443_v24 = vadd.f32 %v8409_v26, %v13207_v22  ;;  %v13208_v58 = vand.u32 15, %v8157_v30  ;;  %v805_v45 = vadd.s32 392, %v7406_v19  ;;  %v13212_v25 = vld [vmem:[#allocation5_spill] sm:$0xff] }
 0x187   :  { %13202 = vst [vmem:[#allocation189_spill] sm:$0xff] %v8486_v12  ;;  %v8493_v6 = vsel %vm13204_vm11, %v1074_v40, %v1075_v41  ;;  %13206 = vst [vmem:[#allocation191_spill] sm:$0xff] %v8496_v1  ;;  %5363 = vmatprep.mubr.msk.f32.mxu1 %vm8326_vm7, %v8486_v12  ;;  %v13209_v40 = vmov 0  ;;  %v6346_v29 = vpack.c.bf16 %v2389_v5, %v2388_v39  ;;  %6254 = vmatpush1.bf16.msra.mxu0 %v13212_v25  ;;  %v13213_v22 = vand.u32 15, %v8290_v2 }
 0x188   :  { %13205 = vst [vmem:[#allocation190_spill] sm:$0xff] %v8493_v6  ;;  %vm8507_vm14 = vcmp.ge.s32.totalorder %v13208_v58, 1  ;;  %v13214_v12 = vmov 0  ;;  %v8520_v3 = vand.u32 15, %v890_v4  ;;  %v826_v30 = vand.u32 15, %v8375_v9  ;;  %6255 = vmatprep.subr.bf16.mxu0 %v12926_v32 }
 0x189   :  { %v13210_v40 = vsel %vm8507_vm14, 4294967295, %v13209_v40  ;;  %vm8516_vm11 = vcmp.lt.s32.totalorder %v13213_v22, 15  ;;  %v891_v58 = vshra.s32 %v8465_v8, 4  ;;  %v8526_v5 = vmax.f32 %v448_v33, 0.0  ;;  %6347 = vmatpush1.bf16.msra.mxu1 %v6346_v29 }
 0x18a   :  { %13211 = vst [vmem:[#allocation23_spill] sm:$0xff] %v13210_v40  ;;  %v13215_v12 = vsel %vm8516_vm11, 4294967295, %v13214_v12  ;;  %13217 = vst [vmem:[#allocation192_spill] sm:$0xff] %v8520_v3  ;;  %vm13219_vm6 = vcmp.ge.s32.totalorder %v8065_v20, 1  ;;  %vm13220_vm3 = vcmp.lt.s32.totalorder %v7406_v19, 7  ;;  %v1505_v2 = vrot.slane %v8347_v28, 1  ;;  %6348 = vmatprep.subr.bf16.mxu1 %v12926_v32 }
 0x18b   :  { %13216 = vst [vmem:[#allocation5_spill] sm:$0xff] %v13215_v12  ;;  %13218 = vst [vmem:[#allocation193_spill] sm:$0xff] %v8526_v5  ;;  %5172 = vmatmul.mubr.msk.f32.gmra.mrb[66].mxu0 %vm13219_vm6, %v8493_v6  ;;  %v8533_v39 = vsel %vm13220_vm3, %v1503_v62, %v1504_v27  ;;  %v8536_v4 = vand.u32 15, %v932_v60  ;;  %v8538_v9 = vmax.f32 %v608_v13, 0.0  ;;  %v613_v25 = vadd.f32 %v8409_v26, %v7962_v56  ;;  %v13244_v28 = vld [vmem:[#allocation6_spill] sm:$0xff] }
 0x18c   :  { %13221 = vst [vmem:[#allocation194_spill] sm:$0xff] %v8533_v39  ;;  %vm13224_vm12 = vcmp.ge.s32.totalorder %v8107_v21, 1  ;;  %vm13225_vm6 = vcmp.ge.s32.totalorder %v8091_v14, 1  ;;  %vm13226_vm3 = vcmp.lt.s32.totalorder %v7406_v19, 1  ;;  %v1058_v56 = vrot.slane %v8479_v34, 7  ;;  %6257 = vmatpush1.bf16.msra.mxu0 %v13244_v28 }
 0x18d   :  { %13222 = vst [vmem:[#allocation195_spill] sm:$0xff] %v8536_v4  ;;  %13223 = vst [vmem:[#allocation196_spill] sm:$0xff] %v8538_v9  ;;  %5173 = vmatprep.mubr.msk.f32.mxu0 %vm13224_vm12, %v7978_v15  ;;  %5364 = vmatmul.mubr.msk.f32.gmra.mrb[42].mxu1 %vm13225_vm6, %v8533_v39  ;;  %v8550_v33 = vsel %vm13226_vm3, %v1056_v38, %v1057_v17  ;;  %v8561_v29 = vmax.f32 %v443_v24, 0.0  ;;  %v933_v62 = vshra.s32 %v805_v45, 4  ;;  %v806_v38 = vadd.s32 400, %v7406_v19  ;;  %v13235_v24 = vld [vmem:[#allocation24_spill] sm:$0xff] }
 0x18e   :  { %13227 = vst [vmem:[#allocation197_spill] sm:$0xff] %v8550_v33  ;;  %vm13228_vm9 = vmmov %vm13224_vm12  ;;  %3119 = vmatprep.mubr.f32.mxu1 %v8550_v33  ;;  %vm13232_vm12 = vcmp.ge.s32.totalorder %v8118_v44, 1  ;;  %v8575_v22 = vadd.s32 64, %v7406_v19  ;;  %v458_v35 = vadd.f32 %v8409_v26, %v13235_v24  ;;  %v13236_v21 = vrot.slane %v7978_v15, 7  ;;  %v13245_v44 = vld [vmem:[#allocation25_spill] sm:$0xff]  ;;  %6258 = vmatprep.subr.bf16.mxu0 %v12926_v32 }
 0x18f   :  { %vm8556_vm7 = vmand %vm13228_vm9, %vm8368_vm1  ;;  %13231 = vst [vmem:[#allocation198_spill] sm:$0xff] %v8561_v29  ;;  %v13239_v0 = vand.u32 15, %v8318_v63  ;;  %v13240_v20 = vmov 0  ;;  %v8592_v39 = vand.u32 15, %v891_v58  ;;  %v869_v33 = vand.u32 15, %v805_v45 }
 0x190   :  { %vm8568_vm6 = vmand %vm13232_vm12, %vm8385_vm2  ;;  %v453_v24 = vadd.f32 %v8409_v26, %v13245_v44  ;;  %v13248_v63 = vrot.slane %v8145_v42, 7  ;;  %v13251_v44 = vld [vmem:[#allocation105_spill] sm:$0xff]  ;;  %v8616_v58 = vmax.f32 %v613_v25, 0.0  ;;  %v1059_v60 = vrot.slane %v8538_v9, 7 }
 0x191   :  { %vm13237_vm9 = vmmov %vm13226_vm3  ;;  %vm8588_vm12 = vcmp.ge.s32.totalorder %v13239_v0, 1  ;;  %13243 = vst [vmem:[#allocation200_spill] sm:$0xff] %v8592_v39  ;;  %v13249_v0 = vrot.slane %v8183_v59, 7  ;;  %v618_v45 = vadd.f32 %v8409_v26, %v13251_v44  ;;  %vm8634_vm1 = vcmp.ge.s32.totalorder %v826_v30, 1 }
 0x192   :  { %v8584_v31 = vsel %vm13237_vm9, %v1075_v41, %v13236_v21  ;;  %v13241_v20 = vsel %vm8588_vm12, 4294967295, %v13240_v20  ;;  %vm13246_vm9 = vcmp.lt.s32.totalorder %v7406_v19, 7  ;;  %v1506_v41 = vrot.slane %v8391_v51, 1  ;;  %13252 = vst [vmem:[#allocation105_spill] sm:$0xff] %v8616_v58 }
 0x193   :  { %13238 = vst [vmem:[#allocation24_spill] sm:$0xff] %v8584_v31  ;;  %13242 = vst [vmem:[#allocation199_spill] sm:$0xff] %v13241_v20  ;;  %5174 = vmatmul.mubr.msk.f32.gmra.mrb[68].mxu0 %vm8556_vm7, %v8584_v31  ;;  %v8602_v21 = vsel %vm13246_vm9, %v1504_v27, %v1505_v2  ;;  %v8611_v28 = vsel %vm13226_vm3, %v13249_v0, %v13248_v63  ;;  %vm13253_vm7 = vcmp.ge.s32.totalorder %v8141_v7, 1  ;;  %v13256_v25 = vmov 0 }
 0x194   :  { %13247 = vst [vmem:[#allocation6_spill] sm:$0xff] %v8602_v21  ;;  %13250 = vst [vmem:[#allocation25_spill] sm:$0xff] %v8611_v28  ;;  %5175 = vmatprep.mubr.msk.f32.mxu0 %vm13253_vm7, %v7937_v53  ;;  %5365 = vmatmul.mubr.msk.f32.gmra.mrb[44].mxu1 %vm8568_vm6, %v8602_v21  ;;  %v13257_v25 = vsel %vm8634_vm1, 4294967295, %v13256_v25  ;;  %v8638_v13 = vand.u32 15, %v933_v62  ;;  %v892_v63 = vshra.s32 %v8575_v22, 4  ;;  %v8642_v0 = vadd.s32 72, %v7406_v19 }
 0x195   :  { %vm13254_vm9 = vmmov %vm13226_vm3  ;;  %13258 = vst [vmem:[#allocation202_spill] sm:$0xff] %v13257_v25  ;;  %v8644_v44 = vmax.f32 %v458_v35, 0.0  ;;  %vm8646_vm6 = vcmp.lt.s32.totalorder %v869_v33, 15  ;;  %v13261_v21 = vmov 0  ;;  %v870_v31 = vand.u32 15, %v806_v38 }
 0x196   :  { %v8626_v27 = vsel %vm13254_vm9, %v1057_v17, %v1058_v56  ;;  %13259 = vst [vmem:[#allocation203_spill] sm:$0xff] %v8638_v13  ;;  %v934_v17 = vshra.s32 %v806_v38, 4  ;;  %v13262_v21 = vsel %vm8646_vm6, 4294967295, %v13261_v21  ;;  %v807_v30 = vadd.s32 408, %v7406_v19 }
 0x197   :  { %13255 = vst [vmem:[#allocation201_spill] sm:$0xff] %v8626_v27  ;;  %5366 = vmatprep.mubr.msk.f32.mxu1 %vm8459_vm4, %v8626_v27  ;;  %13260 = vst [vmem:[#allocation204_spill] sm:$0xff] %v8644_v44  ;;  %v13264_v27 = vld [vmem:[#allocation7_spill] sm:$0xff]  ;;  %v8652_v51 = vmax.f32 %v453_v24, 0.0  ;;  %5176 = vmatmul.mubr.msk.f32.gmra.mrb[70].mxu0 %vm13253_vm7, %v8200_v47  ;;  %vm13266_vm9 = vcmp.lt.s32.totalorder %v7406_v19, 7  ;;  %v1507_v35 = vrot.slane %v8479_v34, 1  ;;  %v623_v24 = vadd.f32 %v8409_v26, %v8015_v48 }
 0x198   :  { %13263 = vst [vmem:[#allocation205_spill] sm:$0xff] %v13262_v21  ;;  %6260 = vmatpush1.bf16.msra.mxu0 %v13264_v27  ;;  %v8659_v62 = vsel %vm13266_vm9, %v1505_v2, %v1506_v41  ;;  %v828_v33 = vand.u32 15, %v8575_v22  ;;  %v8664_v38 = vmax.f32 %v618_v45, 0.0  ;;  %vm13269_vm2 = vcmp.ge.s32.totalorder %v8276_v57, 1  ;;  %vm13271_vm9 = vmmov %vm13226_vm3  ;;  %v13286_v34 = vld [vmem:[#allocation115_spill] sm:$0xff] }
 0x199   :  { %13265 = vst [vmem:[#allocation7_spill] sm:$0xff] %v8652_v51  ;;  %13267 = vst [vmem:[#allocation206_spill] sm:$0xff] %v8659_v62  ;;  %6261 = vmatprep.subr.bf16.mxu0 %v12926_v32  ;;  %5177 = vmatprep.mubr.msk.f32.mxu0 %vm13269_vm2, %v8042_v43  ;;  %vm13270_vm7 = vcmp.ge.s32.totalorder %v8278_v54, 1  ;;  %v8676_v2 = vsel %vm13271_vm9, %v1058_v56, %v1059_v60  ;;  %v1060_v22 = vrot.slane %v8616_v58, 7  ;;  %v8693_v56 = vand.u32 15, %v892_v63  ;;  %v13283_v63 = vld [vmem:[#allocation27_spill] sm:$0xff] }
 0x19a   :  { %13268 = vst [vmem:[#allocation207_spill] sm:$0xff] %v8664_v38  ;;  %5367 = vmatmul.mubr.msk.f32.gmra.mrb[46].mxu1 %vm13270_vm7, %v8659_v62  ;;  %13272 = vst [vmem:[#allocation208_spill] sm:$0xff] %v8676_v2  ;;  %v8695_v45 = vand.u32 15, %v934_v17  ;;  %v893_v27 = vshra.s32 %v8642_v0, 4  ;;  %v8699_v57 = vadd.s32 80, %v7406_v19  ;;  %vm8702_vm9 = vcmp.ge.s32.totalorder %v870_v31, 1 }
 0x19b   :  { %vm13273_vm3 = vmmov %vm13269_vm2  ;;  %3129 = vmatprep.mubr.f32.mxu1 %v8676_v2  ;;  %vm13274_vm2 = vcmp.ge.s32.totalorder %v8447_v52, 1  ;;  %13277 = vst [vmem:[#allocation209_spill] sm:$0xff] %v8693_v56  ;;  %v13279_v12 = vmov 0  ;;  %v935_v40 = vshra.s32 %v807_v30, 4  ;;  %v808_v7 = vadd.s32 416, %v7406_v19  ;;  %v13282_v62 = vld [vmem:[#allocation8_spill] sm:$0xff] }
 0x19c   :  { %vm1273_vm4 = vmand %vm13273_vm3, %vm8507_vm14  ;;  %13278 = vst [vmem:[#allocation210_spill] sm:$0xff] %v8695_v45  ;;  %v13280_v12 = vsel %vm8702_vm9, 4294967295, %v13279_v12  ;;  %6263 = vmatpush1.bf16.msra.mxu0 %v13282_v62  ;;  %v8710_v17 = vadd.f32 %v8409_v26, %v13283_v63  ;;  %v1508_v31 = vrot.slane %v8538_v9, 1  ;;  %v871_v2 = vand.u32 15, %v807_v30 }
 0x19d   :  { %vm8688_vm8 = vmand %vm13274_vm2, %vm8516_vm11  ;;  %13281 = vst [vmem:[#allocation211_spill] sm:$0xff] %v13280_v12  ;;  %5178 = vmatmul.mubr.msk.f32.gmra.mrb[72].mxu0 %vm1273_vm4, %v8204_v55  ;;  %vm13284_vm2 = vcmp.lt.s32.totalorder %v7406_v19, 7  ;;  %6264 = vmatprep.subr.bf16.mxu0 %v12926_v32  ;;  %v628_v52 = vadd.f32 %v8409_v26, %v13286_v34  ;;  %v8721_v23 = vmax.f32 %v623_v24, 0.0  ;;  %vm13288_vm7 = vcmp.ge.s32.totalorder %v8389_v36, 1 }
 0x19e   :  { %v8715_v47 = vsel %vm13284_vm2, %v1506_v41, %v1507_v35  ;;  %5179 = vmatprep.mubr.msk.f32.mxu0 %vm13288_vm7, %v8008_v61  ;;  %vm13289_vm4 = vcmp.lt.s32.totalorder %v7406_v19, 1  ;;  %v1061_v30 = vrot.slane %v8664_v38, 7  ;;  %vm8739_vm11 = vcmp.ge.s32.totalorder %v828_v33, 1 }
 0x19f   :  { %13285 = vst [vmem:[#allocation8_spill] sm:$0xff] %v8715_v47  ;;  %13287 = vst [vmem:[#allocation27_spill] sm:$0xff] %v8721_v23  ;;  %5368 = vmatmul.mubr.msk.f32.gmra.mrb[48].mxu1 %vm8688_vm8, %v8715_v47  ;;  %v8731_v41 = vsel %vm13289_vm4, %v1059_v60, %v1060_v22  ;;  %v13291_v34 = vmov 0  ;;  %v8743_v62 = vand.u32 15, %v893_v27  ;;  %v894_v24 = vshra.s32 %v8699_v57, 4 }
 0x1a0   :  { %13290 = vst [vmem:[#allocation115_spill] sm:$0xff] %v8731_v41  ;;  %5369 = vmatprep.mubr.msk.f32.mxu1 %vm8588_vm12, %v8731_v41  ;;  %v13292_v34 = vsel %vm8739_vm11, 4294967295, %v13291_v34  ;;  %v8747_v60 = vadd.s32 88, %v7406_v19  ;;  %v8749_v48 = vand.u32 15, %v935_v40  ;;  %v872_v63 = vand.u32 15, %v808_v7  ;;  %v13296_v41 = vld [vmem:[#allocation9_spill] sm:$0xff]  ;;  %vm13297_vm8 = vmmov %vm13288_vm7 }
 0x1a1   :  { %13293 = vst [vmem:[#allocation212_spill] sm:$0xff] %v13292_v34  ;;  %13294 = vst [vmem:[#allocation213_spill] sm:$0xff] %v8743_v62  ;;  %v936_v47 = vshra.s32 %v808_v7, 4  ;;  %6266 = vmatpush1.bf16.msra.mxu0 %v13296_v41  ;;  %v1509_v27 = vrot.slane %v8616_v58, 1  ;;  %vm8761_vm4 = vcmp.lt.s32.totalorder %v871_v2, 15  ;;  %v13300_v9 = vmov 0 }
 0x1a2   :  { %13295 = vst [vmem:[#allocation214_spill] sm:$0xff] %v8749_v48  ;;  %5180 = vmatmul.mubr.msk.f32.gmra.mrb[74].mxu0 %vm13297_vm8, %v8218_v37  ;;  %vm13298_vm7 = vmmov %vm13284_vm2  ;;  %v13301_v9 = vsel %vm8761_vm4, 4294967295, %v13300_v9  ;;  %v809_v7 = vadd.s32 424, %v7406_v19  ;;  %6267 = vmatprep.subr.bf16.mxu0 %v12926_v32  ;;  %v8767_v40 = vmax.f32 %v628_v52, 0.0  ;;  %v13304_v41 = vld [vmem:[#allocation125_spill] sm:$0xff]  ;;  %vm13305_vm8 = vcmp.ge.s32.totalorder %v8520_v3, 1 }
 0x1a3   :  { %v8758_v33 = vsel %vm13298_vm7, %v1507_v35, %v1508_v31  ;;  %13302 = vst [vmem:[#allocation215_spill] sm:$0xff] %v13301_v9  ;;  %v633_v55 = vadd.f32 %v8409_v26, %v13304_v41  ;;  %5181 = vmatprep.mubr.msk.f32.mxu0 %vm13305_vm8, %v8095_v49  ;;  %vm13306_vm7 = vcmp.ge.s32.totalorder %v8536_v4, 1  ;;  %vm13307_vm3 = vcmp.lt.s32.totalorder %v7406_v19, 1  ;;  %vm13309_vm2 = vmmov %vm13305_vm8  ;;  %v13322_v37 = vld [vmem:[#allocation10_spill] sm:$0xff] }
 0x1a4   :  { %13299 = vst [vmem:[#allocation9_spill] sm:$0xff] %v8758_v33  ;;  %13303 = vst [vmem:[#allocation216_spill] sm:$0xff] %v8767_v40  ;;  %5370 = vmatmul.mubr.msk.f32.gmra.mrb[50].mxu1 %vm13306_vm7, %v8758_v33  ;;  %v8779_v35 = vsel %vm13307_vm3, %v1060_v22, %v1061_v30  ;;  %v1062_v52 = vrot.slane %v8721_v23, 7  ;;  %vm13310_vm8 = vcmp.ge.s32.totalorder %v8638_v13, 1  ;;  %v8796_v22 = vand.u32 15, %v894_v24  ;;  %v13325_v13 = vld [vmem:[#allocation122_spill] sm:$0xff] }
 0x1a5   :  { %13308 = vst [vmem:[#allocation125_spill] sm:$0xff] %v8779_v35  ;;  %vm1275_vm14 = vmand %vm13309_vm2, %vm8634_vm1  ;;  %3139 = vmatprep.mubr.f32.mxu1 %v8779_v35  ;;  %v830_v41 = vand.u32 15, %v8699_v57  ;;  %v895_v3 = vshra.s32 %v8747_v60, 4  ;;  %vm8801_vm7 = vcmp.ge.s32.totalorder %v872_v63, 1  ;;  %v13314_v25 = vmov 0  ;;  %6269 = vmatpush1.bf16.msra.mxu0 %v13322_v37 }
 0x1a6   :  { %vm8791_vm12 = vmand %vm13310_vm8, %vm8646_vm6  ;;  %13313 = vst [vmem:[#allocation217_spill] sm:$0xff] %v8796_v22  ;;  %v13315_v25 = vsel %vm8801_vm7, 4294967295, %v13314_v25  ;;  %v8805_v21 = vand.u32 15, %v936_v47  ;;  %v13318_v36 = vrot.slane %v8248_v16, 7  ;;  %v13319_v33 = vrot.slane %v8145_v42, 7  ;;  %5182 = vmatmul.mubr.msk.f32.gmra.mrb[76].mxu0 %vm1275_vm14, %v8224_v50  ;;  %6270 = vmatprep.subr.bf16.mxu0 %v12926_v32 }
 0x1a7   :  { %13316 = vst [vmem:[#allocation218_spill] sm:$0xff] %v13315_v25  ;;  %vm13320_vm8 = vmmov %vm13307_vm3  ;;  %v810_v57 = vadd.s32 432, %v7406_v19  ;;  %vm13323_vm3 = vcmp.lt.s32.totalorder %v7406_v19, 7  ;;  %v1510_v47 = vrot.slane %v8664_v38, 1  ;;  %v873_v35 = vand.u32 15, %v809_v7 }
 0x1a8   :  { %13317 = vst [vmem:[#allocation219_spill] sm:$0xff] %v8805_v21  ;;  %v8813_v24 = vsel %vm13320_vm8, %v13319_v33, %v13318_v36  ;;  %v8820_v63 = vsel %vm13323_vm3, %v1508_v31, %v1509_v27  ;;  %v937_v58 = vshra.s32 %v809_v7, 4  ;;  %v638_v36 = vadd.f32 %v8409_v26, %v13325_v13 }
 0x1a9   :  { %13321 = vst [vmem:[#allocation220_spill] sm:$0xff] %v8813_v24  ;;  %13324 = vst [vmem:[#allocation10_spill] sm:$0xff] %v8820_v63  ;;  %v8826_v33 = vmax.f32 %v633_v55, 0.0  ;;  %vm13327_vm8 = vcmp.ge.s32.totalorder %v8592_v39, 1  ;;  %5371 = vmatmul.mubr.msk.f32.gmra.mrb[52].mxu1 %vm8791_vm12, %v8820_v63  ;;  %vm13328_vm14 = vcmp.lt.s32.totalorder %v7406_v19, 1  ;;  %v1063_v31 = vrot.slane %v8767_v40, 7 }
 0x1aa   :  { %5183 = vmatprep.mubr.msk.f32.mxu0 %vm13327_vm8, %v8080_v10  ;;  %v8836_v37 = vsel %vm13328_vm14, %v1061_v30, %v1062_v52  ;;  %vm8843_vm2 = vcmp.ge.s32.totalorder %v830_v41, 1  ;;  %v13330_v55 = vmov 0  ;;  %v8847_v13 = vand.u32 15, %v895_v3  ;;  %v13334_v63 = vld [vmem:[#allocation155_spill] sm:$0xff]  ;;  %vm13336_vm14 = vmmov %vm13323_vm3 }
 0x1ab   :  { %13326 = vst [vmem:[#allocation122_spill] sm:$0xff] %v8826_v33  ;;  %13329 = vst [vmem:[#allocation221_spill] sm:$0xff] %v8836_v37  ;;  %5372 = vmatprep.mubr.msk.f32.mxu1 %vm8702_vm9, %v8836_v37  ;;  %v13331_v55 = vsel %vm8843_vm2, 4294967295, %v13330_v55  ;;  %v768_v7 = vadd.s32 96, %v7406_v19  ;;  %v8851_v2 = vadd.s32 104, %v7406_v19  ;;  %v874_v30 = vand.u32 15, %v810_v57  ;;  %5184 = vmatmul.mubr.msk.f32.gmra.mrb[78].mxu0 %vm13327_vm8, %v8337_v18 }
 0x1ac   :  { %13332 = vst [vmem:[#allocation222_spill] sm:$0xff] %v13331_v55  ;;  %13333 = vst [vmem:[#allocation223_spill] sm:$0xff] %v8847_v13  ;;  %v1021_v50 = vrot.slane %v13334_v63, 7  ;;  %v938_v38 = vshra.s32 %v810_v57, 4  ;;  %v13335_v37 = vld [vmem:[#allocation11_spill] sm:$0xff]  ;;  %v8861_v3 = vsel %vm13336_vm14, %v1509_v27, %v1510_v47  ;;  %v1511_v41 = vrot.slane %v8721_v23, 1 }
 0x1ad   :  { %6272 = vmatpush1.bf16.msra.mxu0 %v13335_v37  ;;  %13337 = vst [vmem:[#allocation11_spill] sm:$0xff] %v8861_v3  ;;  %v8864_v12 = vand.u32 15, %v937_v58  ;;  %vm8866_vm3 = vcmp.lt.s32.totalorder %v873_v35, 15  ;;  %v13339_v20 = vmov 0  ;;  %v8871_v57 = vmax.f32 %v638_v36, 0.0  ;;  %v13343_v37 = vld [vmem:[#allocation136_spill] sm:$0xff] }
 0x1ae   :  { %v13340_v20 = vsel %vm8866_vm3, 4294967295, %v13339_v20  ;;  %6273 = vmatprep.subr.bf16.mxu0 %v12926_v32  ;;  %v643_v39 = vadd.f32 %v8409_v26, %v13343_v37  ;;  %vm13344_vm8 = vcmp.ge.s32.totalorder %v8693_v56, 1  ;;  %vm13345_vm14 = vcmp.ge.s32.totalorder %v8695_v45, 1  ;;  %v13359_v36 = vld [vmem:[#allocation12_spill] sm:$0xff] }
 0x1af   :  { %13338 = vst [vmem:[#allocation224_spill] sm:$0xff] %v8864_v12  ;;  %13341 = vst [vmem:[#allocation225_spill] sm:$0xff] %v13340_v20  ;;  %5185 = vmatprep.mubr.msk.f32.mxu0 %vm13344_vm8, %v8183_v59  ;;  %5373 = vmatmul.mubr.msk.f32.gmra.mrb[54].mxu1 %vm13345_vm14, %v8861_v3  ;;  %vm13346_vm12 = vcmp.lt.s32.totalorder %v7406_v19, 1  ;;  %v1064_v27 = vrot.slane %v8826_v33, 7  ;;  %v897_v37 = vshra.s32 %v8851_v2, 4  ;;  %v811_v56 = vadd.s32 440, %v7406_v19 }
 0x1b0   :  { %13342 = vst [vmem:[#allocation226_spill] sm:$0xff] %v8871_v57  ;;  %v8883_v58 = vsel %vm13346_vm12, %v1062_v52, %v1063_v31  ;;  %vm13348_vm6 = vmmov %vm13344_vm8  ;;  %vm13349_vm8 = vcmp.ge.s32.totalorder %v8749_v48, 1  ;;  %v896_v52 = vshra.s32 %v768_v7, 4  ;;  %v13352_v34 = vmov 0  ;;  %v13360_v48 = vld [vmem:[#allocation185_spill] sm:$0xff]  ;;  %v13394_v20 = vld [vmem:[#allocation170_spill] sm:$0xff] }
 0x1b1   :  { %13347 = vst [vmem:[#allocation136_spill] sm:$0xff] %v8883_v58  ;;  %vm1277_vm1 = vmand %vm13348_vm6, %vm8739_vm11  ;;  %3149 = vmatprep.mubr.f32.mxu1 %v8883_v58  ;;  %vm8903_vm6 = vcmp.ge.s32.totalorder %v874_v30, 1  ;;  %v13355_v9 = vrot.slane %v8248_v16, 7  ;;  %v8913_v18 = vand.u32 15, %v938_v38  ;;  %v832_v58 = vand.u32 15, %v768_v7  ;;  %6275 = vmatpush1.bf16.msra.mxu0 %v13359_v36  ;;  %v13363_v38 = vld [vmem:[#allocation132_spill] sm:$0xff] }
 0x1b2   :  { %vm8895_vm9 = vmand %vm13349_vm8, %vm8761_vm4  ;;  %v13353_v34 = vsel %vm8903_vm6, 4294967295, %v13352_v34  ;;  %v812_v23 = vadd.s32 448, %v7406_v19  ;;  %5186 = vmatmul.mubr.msk.f32.gmra.mrb[80].mxu0 %vm1277_vm1, %v13360_v48  ;;  %vm13361_vm8 = vcmp.lt.s32.totalorder %v7406_v19, 7  ;;  %v1512_v45 = vrot.slane %v8767_v40, 1  ;;  %6276 = vmatprep.subr.bf16.mxu0 %v12926_v32 }
 0x1b3   :  { %13354 = vst [vmem:[#allocation227_spill] sm:$0xff] %v13353_v34  ;;  %vm13356_vm14 = vmmov %vm13346_vm12  ;;  %v8920_v30 = vsel %vm13361_vm8, %v1510_v47, %v1511_v41  ;;  %v648_v7 = vadd.f32 %v8409_v26, %v13363_v38  ;;  %v8930_v4 = vmax.f32 %v643_v39, 0.0  ;;  %vm13365_vm1 = vcmp.ge.s32.totalorder %v8743_v62, 1 }
 0x1b4   :  { %v8911_v3 = vsel %vm13356_vm14, %v13355_v9, %v1021_v50  ;;  %13358 = vst [vmem:[#allocation229_spill] sm:$0xff] %v8913_v18  ;;  %13362 = vst [vmem:[#allocation12_spill] sm:$0xff] %v8920_v30  ;;  %v8925_v9 = vadd.s32 112, %v7406_v19  ;;  %5187 = vmatprep.mubr.msk.f32.mxu0 %vm13365_vm1, %v8145_v42  ;;  %5374 = vmatmul.mubr.msk.f32.gmra.mrb[56].mxu1 %vm8895_vm9, %v8920_v30  ;;  %v1065_v36 = vrot.slane %v8871_v57, 7  ;;  %v8946_v39 = vand.u32 15, %v896_v52 }
 0x1b5   :  { %13357 = vst [vmem:[#allocation228_spill] sm:$0xff] %v8911_v3  ;;  %13364 = vst [vmem:[#allocation132_spill] sm:$0xff] %v8930_v4  ;;  %v13369_v38 = vrot.slane %v8320_v11, 7  ;;  %v8954_v35 = vand.u32 15, %v897_v37  ;;  %v939_v30 = vshra.s32 %v811_v56, 4  ;;  %vm8957_vm1 = vcmp.ge.s32.totalorder %v832_v58, 1 }
 0x1b6   :  { %vm13366_vm14 = vmmov %vm13346_vm12  ;;  %13368 = vst [vmem:[#allocation231_spill] sm:$0xff] %v8946_v39  ;;  %v875_v40 = vand.u32 15, %v811_v56  ;;  %v940_v25 = vshra.s32 %v812_v23, 4  ;;  %v1513_v52 = vrot.slane %v8826_v33, 1  ;;  %v876_v37 = vand.u32 15, %v812_v23  ;;  %v13381_v56 = vld [vmem:[#allocation145_spill] sm:$0xff] }
 0x1b7   :  { %v8940_v47 = vsel %vm13366_vm14, %v1063_v31, %v1064_v27  ;;  %vm13370_vm8 = vmmov %vm13346_vm12  ;;  %13372 = vst [vmem:[#allocation233_spill] sm:$0xff] %v8954_v35  ;;  %v13373_v31 = vmov 0  ;;  %vm13377_vm14 = vcmp.ge.s32.totalorder %v8743_v62, 1  ;;  %v898_v58 = vshra.s32 %v8925_v9, 4 }
 0x1b8   :  { %13367 = vst [vmem:[#allocation230_spill] sm:$0xff] %v8940_v47  ;;  %5375 = vmatprep.mubr.msk.f32.mxu1 %vm8801_vm7, %v8940_v47  ;;  %v8952_v48 = vsel %vm13370_vm8, %v1021_v50, %v13369_v38  ;;  %v13374_v31 = vsel %vm8957_vm1, 4294967295, %v13373_v31  ;;  %v13376_v47 = vld [vmem:[#allocation13_spill] sm:$0xff]  ;;  %5188 = vmatmul.mubr.msk.f32.gmra.mrb[82].mxu0 %vm13377_vm14, %v8611_v28  ;;  %vm13378_vm8 = vcmp.lt.s32.totalorder %v7406_v19, 7  ;;  %v8972_v38 = vmax.f32 %v648_v7, 0.0  ;;  %v13396_v28 = vld [vmem:[#allocation14_spill] sm:$0xff] }
 0x1b9   :  { %13371 = vst [vmem:[#allocation232_spill] sm:$0xff] %v8952_v48  ;;  %13375 = vst [vmem:[#allocation234_spill] sm:$0xff] %v13374_v31  ;;  %6278 = vmatpush1.bf16.msra.mxu0 %v13376_v47  ;;  %v8967_v50 = vsel %vm13378_vm8, %v1511_v41, %v1512_v45  ;;  %v653_v47 = vadd.f32 %v8409_v26, %v13381_v56  ;;  %vm13382_vm9 = vcmp.ge.s32.totalorder %v8796_v22, 1  ;;  %vm13383_vm14 = vcmp.ge.s32.totalorder %v8805_v21, 1 }
 0x1ba   :  { %13379 = vst [vmem:[#allocation13_spill] sm:$0xff] %v8967_v50  ;;  %6279 = vmatprep.subr.bf16.mxu0 %v12926_v32  ;;  %13380 = vst [vmem:[#allocation235_spill] sm:$0xff] %v8972_v38  ;;  %5189 = vmatprep.mubr.msk.f32.mxu0 %vm13382_vm9, %v8248_v16  ;;  %v1066_v41 = vrot.slane %v8930_v4, 7  ;;  %v9005_v56 = vadd.s32 120, %v7406_v19  ;;  %v13391_v22 = vmov 0  ;;  %v1023_v55 = vrot.slane %v13394_v20, 7 }
 0x1bb   :  { %5376 = vmatmul.mubr.msk.f32.gmra.mrb[58].mxu1 %vm13383_vm14, %v8967_v50  ;;  %vm13384_vm8 = vmmov %vm13346_vm12  ;;  %v9012_v62 = vand.u32 15, %v940_v25  ;;  %v813_v50 = vadd.s32 456, %v7406_v19  ;;  %v9026_v33 = vand.u32 15, %v898_v58  ;;  %v13403_v25 = vld [vmem:[#allocation142_spill] sm:$0xff]  ;;  %v1024_v58 = vrot.slane %v8496_v1, 7 }
 0x1bc   :  { %v8984_v23 = vsel %vm13384_vm8, %v1064_v27, %v1065_v36  ;;  %vm13386_vm12 = vmmov %vm13382_vm9  ;;  %vm13387_vm9 = vcmp.ge.s32.totalorder %v8864_v12, 1  ;;  %v9002_v27 = vand.u32 15, %v939_v30  ;;  %vm9022_vm8 = vcmp.ge.s32.totalorder %v876_v37, 1 }
 0x1bd   :  { %13385 = vst [vmem:[#allocation145_spill] sm:$0xff] %v8984_v23  ;;  %vm1279_vm4 = vmand %vm13386_vm12, %vm8843_vm2  ;;  %3159 = vmatprep.mubr.f32.mxu1 %v8984_v23  ;;  %vm9007_vm12 = vcmp.lt.s32.totalorder %v875_v40, 15  ;;  %6281 = vmatpush1.bf16.msra.mxu0 %v13396_v28  ;;  %v1514_v23 = vrot.slane %v8871_v57, 1  ;;  %v13399_v40 = vmov 0  ;;  %v658_v12 = vadd.f32 %v8409_v26, %v13403_v25 }
 0x1be   :  { %vm8996_vm11 = vmand %vm13387_vm9, %vm8866_vm3  ;;  %13390 = vst [vmem:[#allocation236_spill] sm:$0xff] %v9002_v27  ;;  %v13392_v22 = vsel %vm9007_vm12, 4294967295, %v13391_v22  ;;  %5190 = vmatmul.mubr.msk.f32.gmra.mrb[84].mxu0 %vm1279_vm4, %v8813_v24  ;;  %vm13397_vm9 = vcmp.lt.s32.totalorder %v7406_v19, 7  ;;  %v13400_v40 = vsel %vm9022_vm8, 4294967295, %v13399_v40  ;;  %6282 = vmatprep.subr.bf16.mxu0 %v12926_v32  ;;  %v9031_v28 = vmax.f32 %v653_v47, 0.0 }
 0x1bf   :  { %13393 = vst [vmem:[#allocation237_spill] sm:$0xff] %v13392_v22  ;;  %13395 = vst [vmem:[#allocation238_spill] sm:$0xff] %v9012_v62  ;;  %v9019_v30 = vsel %vm13397_vm9, %v1512_v45, %v1513_v52  ;;  %vm13405_vm4 = vcmp.ge.s32.totalorder %v8847_v13, 1  ;;  %vm13406_vm9 = vcmp.lt.s32.totalorder %v7406_v19, 1  ;;  %v1067_v37 = vrot.slane %v8972_v38, 7 }
 0x1c0   :  { %13398 = vst [vmem:[#allocation14_spill] sm:$0xff] %v9019_v30  ;;  %13401 = vst [vmem:[#allocation239_spill] sm:$0xff] %v13400_v40  ;;  %5191 = vmatprep.mubr.msk.f32.mxu0 %vm13405_vm4, %v13334_v63  ;;  %5377 = vmatmul.mubr.msk.f32.gmra.mrb[60].mxu1 %vm8996_vm11, %v9019_v30  ;;  %v9041_v45 = vsel %vm13406_vm9, %v1065_v36, %v1066_v41  ;;  %v899_v47 = vshra.s32 %v9005_v56, 4  ;;  %v814_v25 = vadd.s32 464, %v7406_v19  ;;  %v13408_v7 = vrot.slane %v8320_v11, 7 }
 0x1c1   :  { %13402 = vst [vmem:[#allocation240_spill] sm:$0xff] %v9026_v33  ;;  %13404 = vst [vmem:[#allocation142_spill] sm:$0xff] %v9031_v28  ;;  %5378 = vmatprep.mubr.msk.f32.mxu1 %vm8903_vm6, %v9041_v45  ;;  %v834_v30 = vand.u32 15, %v8925_v9  ;;  %v941_v24 = vshra.s32 %v813_v50, 4  ;;  %vm13413_vm14 = vcmp.lt.s32.totalorder %v7406_v19, 7  ;;  %v1515_v34 = vrot.slane %v8930_v4, 1 }
 0x1c2   :  { %13407 = vst [vmem:[#allocation241_spill] sm:$0xff] %v9041_v45  ;;  %vm13409_vm11 = vmmov %vm13406_vm9  ;;  %v13411_v45 = vld [vmem:[#allocation15_spill] sm:$0xff]  ;;  %v9065_v57 = vsel %vm13413_vm14, %v1513_v52, %v1514_v23  ;;  %v9073_v9 = vmax.f32 %v658_v12, 0.0  ;;  %vm13418_vm14 = vcmp.ge.s32.totalorder %v8913_v18, 1  ;;  %v1068_v12 = vrot.slane %v9031_v28, 7 }
 0x1c3   :  { %v9055_v36 = vsel %vm13409_vm11, %v13408_v7, %v1023_v55  ;;  %6284 = vmatpush1.bf16.msra.mxu0 %v13411_v45  ;;  %vm13412_vm9 = vmmov %vm13405_vm4  ;;  %13414 = vst [vmem:[#allocation15_spill] sm:$0xff] %v9065_v57  ;;  %v9070_v7 = vadd.s32 128, %v7406_v19  ;;  %v13416_v45 = vld [vmem:[#allocation157_spill] sm:$0xff]  ;;  %v9105_v31 = vand.u32 15, %v899_v47  ;;  %v878_v13 = vand.u32 15, %v814_v25 }
 0x1c4   :  { %13410 = vst [vmem:[#allocation242_spill] sm:$0xff] %v9055_v36  ;;  %5192 = vmatmul.mubr.msk.f32.gmra.mrb[86].mxu0 %vm13412_vm9, %v8911_v3  ;;  %6285 = vmatprep.subr.bf16.mxu0 %v12926_v32  ;;  %13415 = vst [vmem:[#allocation243_spill] sm:$0xff] %v9073_v9  ;;  %v663_v21 = vadd.f32 %v8409_v26, %v13416_v45  ;;  %vm13417_vm9 = vcmp.ge.s32.totalorder %v8946_v39, 1  ;;  %v877_v39 = vand.u32 15, %v813_v50  ;;  %v13428_v3 = vld [vmem:[#allocation186_spill] sm:$0xff]  ;;  %v942_v4 = vshra.s32 %v814_v25, 4 }
 0x1c5   :  { %5193 = vmatprep.mubr.msk.f32.mxu0 %vm13417_vm9, %v8320_v11  ;;  %5379 = vmatmul.mubr.msk.f32.gmra.mrb[62].mxu1 %vm13418_vm14, %v9065_v57  ;;  %vm13419_vm4 = vmmov %vm13409_vm11  ;;  %13426 = vst [vmem:[#allocation245_spill] sm:$0xff] %v9105_v31  ;;  %v9107_v57 = vand.u32 15, %v941_v24  ;;  %v9111_v22 = vadd.s32 472, %v7406_v19  ;;  %v1516_v47 = vrot.slane %v8972_v38, 1  ;;  %vm9120_vm14 = vcmp.ge.s32.totalorder %v834_v30, 1  ;;  %v13435_v25 = vld [vmem:[#allocation151_spill] sm:$0xff] }
 0x1c6   :  { %v9085_v52 = vsel %vm13419_vm4, %v1066_v41, %v1067_v37  ;;  %vm13421_vm11 = vmmov %vm13417_vm9  ;;  %vm13422_vm9 = vcmp.ge.s32.totalorder %v9002_v27, 1  ;;  %v9103_v41 = vsel %vm13419_vm4, %v1023_v55, %v1024_v58  ;;  %v13429_v27 = vld [vmem:[#allocation16_spill] sm:$0xff]  ;;  %v13432_v50 = vmov 0 }
 0x1c7   :  { %13420 = vst [vmem:[#allocation157_spill] sm:$0xff] %v9085_v52  ;;  %vm1281_vm3 = vmand %vm13421_vm11, %vm8957_vm1  ;;  %3169 = vmatprep.mubr.f32.mxu1 %v9085_v52  ;;  %v1025_v52 = vrot.slane %v13428_v3, 7  ;;  %6287 = vmatpush1.bf16.msra.mxu0 %v13429_v27  ;;  %vm13430_vm11 = vcmp.lt.s32.totalorder %v7406_v19, 7  ;;  %v13433_v50 = vsel %vm9120_vm14, 4294967295, %v13432_v50  ;;  %v900_v24 = vshra.s32 %v9070_v7, 4 }
 0x1c8   :  { %vm9097_vm2 = vmand %vm13422_vm9, %vm9007_vm12  ;;  %13425 = vst [vmem:[#allocation244_spill] sm:$0xff] %v9103_v41  ;;  %5194 = vmatmul.mubr.msk.f32.gmra.mrb[88].mxu0 %vm1281_vm3, %v8952_v48  ;;  %v9117_v55 = vsel %vm13430_vm11, %v1514_v23, %v1515_v34  ;;  %6288 = vmatprep.subr.bf16.mxu0 %v12926_v32  ;;  %v668_v18 = vadd.f32 %v8409_v26, %v13435_v25  ;;  %v9128_v27 = vmax.f32 %v663_v21, 0.0  ;;  %vm13437_vm3 = vcmp.ge.s32.totalorder %v8954_v35, 1  ;;  %v13449_v48 = vld [vmem:[#allocation17_spill] sm:$0xff] }
 0x1c9   :  { %13427 = vst [vmem:[#allocation246_spill] sm:$0xff] %v9107_v57  ;;  %13431 = vst [vmem:[#allocation16_spill] sm:$0xff] %v9117_v55  ;;  %5195 = vmatprep.mubr.msk.f32.mxu0 %vm13437_vm3, %v13394_v20  ;;  %5380 = vmatmul.mubr.msk.f32.gmra.mrb[64].mxu1 %vm9097_vm2, %v9117_v55  ;;  %v1069_v30 = vrot.slane %v9073_v9, 7  ;;  %vm9145_vm11 = vcmp.lt.s32.totalorder %v877_v39, 15  ;;  %v13440_v21 = vmov 0  ;;  %vm9149_vm3 = vcmp.ge.s32.totalorder %v878_v13, 1 }
 0x1ca   :  { %13434 = vst [vmem:[#allocation247_spill] sm:$0xff] %v13433_v50  ;;  %13436 = vst [vmem:[#allocation151_spill] sm:$0xff] %v9128_v27  ;;  %v13441_v21 = vsel %vm9145_vm11, 4294967295, %v13440_v21  ;;  %v13443_v25 = vmov 0  ;;  %v9154_v45 = vadd.s32 136, %v7406_v19  ;;  %v9161_v55 = vand.u32 15, %v942_v4 }
 0x1cb   :  { %vm13438_vm9 = vmmov %vm13419_vm4  ;;  %13442 = vst [vmem:[#allocation249_spill] sm:$0xff] %v13441_v21  ;;  %v13444_v25 = vsel %vm9149_vm3, 4294967295, %v13443_v25  ;;  %v943_v39 = vshra.s32 %v9111_v22, 4  ;;  %6290 = vmatpush1.bf16.msra.mxu0 %v13449_v48  ;;  %vm13452_vm12 = vcmp.lt.s32.totalorder %v7406_v19, 7  ;;  %v9175_v40 = vand.u32 15, %v900_v24 }
 0x1cc   :  { %v9138_v23 = vsel %vm13438_vm9, %v1067_v37, %v1068_v12  ;;  %13445 = vst [vmem:[#allocation250_spill] sm:$0xff] %v13444_v25  ;;  %vm13446_vm9 = vmmov %vm13419_vm4  ;;  %vm13451_vm4 = vcmp.ge.s32.totalorder %v8954_v35, 1  ;;  %v9172_v38 = vsel %vm13452_vm12, %v1515_v34, %v1516_v47  ;;  %6291 = vmatprep.subr.bf16.mxu0 %v12926_v32  ;;  %v9178_v4 = vmax.f32 %v668_v18, 0.0 }
 0x1cd   :  { %13439 = vst [vmem:[#allocation248_spill] sm:$0xff] %v9138_v23  ;;  %5381 = vmatprep.mubr.msk.f32.mxu1 %vm9022_vm8, %v9138_v23  ;;  %v9159_v37 = vsel %vm13446_vm9, %v1024_v58, %v1025_v52  ;;  %13448 = vst [vmem:[#allocation252_spill] sm:$0xff] %v9161_v55  ;;  %v13450_v23 = vld [vmem:[#allocation167_spill] sm:$0xff]  ;;  %5196 = vmatmul.mubr.msk.f32.gmra.mrb[90].mxu0 %vm13451_vm4, %v9055_v36  ;;  %v1517_v58 = vrot.slane %v9031_v28, 1  ;;  %vm13456_vm9 = vcmp.ge.s32.totalorder %v9026_v33, 1  ;;  %vm13457_vm2 = vcmp.ge.s32.totalorder %v9012_v62, 1 }
 0x1ce   :  { %13447 = vst [vmem:[#allocation251_spill] sm:$0xff] %v9159_v37  ;;  %v673_v13 = vadd.f32 %v8409_v26, %v13450_v23  ;;  %13453 = vst [vmem:[#allocation17_spill] sm:$0xff] %v9172_v38  ;;  %5197 = vmatprep.mubr.msk.f32.mxu0 %vm13456_vm9, %v8496_v1  ;;  %5382 = vmatmul.mubr.msk.f32.gmra.mrb[66].mxu1 %vm13457_vm2, %v9172_v38  ;;  %vm13458_vm4 = vcmp.lt.s32.totalorder %v7406_v19, 1  ;;  %v1070_v18 = vrot.slane %v9128_v27, 7  ;;  %v1026_v48 = vrot.slane %v8561_v29, 7  ;;  %v13465_v36 = vld [vmem:[#allocation18_spill] sm:$0xff] }
 0x1cf   :  { %13454 = vst [vmem:[#allocation167_spill] sm:$0xff] %v9175_v40  ;;  %13455 = vst [vmem:[#allocation253_spill] sm:$0xff] %v9178_v4  ;;  %v9188_v34 = vsel %vm13458_vm4, %v1068_v12, %v1069_v30  ;;  %v836_v12 = vand.u32 15, %v9070_v7  ;;  %v901_v23 = vshra.s32 %v9154_v45, 4  ;;  %v816_v33 = vadd.s32 480, %v7406_v19  ;;  %6293 = vmatpush1.bf16.msra.mxu0 %v13465_v36 }
 0x1d0   :  { %13459 = vst [vmem:[#allocation254_spill] sm:$0xff] %v9188_v34  ;;  %vm13460_vm12 = vmmov %vm13456_vm9  ;;  %3179 = vmatprep.mubr.f32.mxu1 %v9188_v34  ;;  %vm13461_vm9 = vcmp.ge.s32.totalorder %v9107_v57, 1  ;;  %v774_v50 = vadd.s32 144, %v7406_v19  ;;  %v879_v35 = vand.u32 15, %v9111_v22  ;;  %v9211_v38 = vand.u32 15, %v943_v39  ;;  %6294 = vmatprep.subr.bf16.mxu0 %v12926_v32  ;;  %v13481_v57 = vld [vmem:[#allocation19_spill] sm:$0xff] }
 0x1d1   :  { %vm1283_vm1 = vmand %vm13460_vm12, %vm9120_vm14  ;;  %v9214_v21 = vadd.s32 488, %v7406_v19  ;;  %v9217_v34 = vmax.f32 %v673_v13, 0.0  ;;  %vm13467_vm12 = vcmp.lt.s32.totalorder %v7406_v19, 7  ;;  %v1518_v28 = vrot.slane %v9073_v9, 1 }
 0x1d2   :  { %vm9201_vm2 = vmand %vm13461_vm9, %vm9145_vm11  ;;  %13464 = vst [vmem:[#allocation255_spill] sm:$0xff] %v9211_v38  ;;  %5198 = vmatmul.mubr.msk.f32.gmra.mrb[92].mxu0 %vm1283_vm1, %v9103_v41  ;;  %v9222_v7 = vsel %vm13467_vm12, %v1516_v47, %v1517_v58  ;;  %vm13469_vm4 = vcmp.ge.s32.totalorder %v9105_v31, 1  ;;  %vm13470_vm1 = vcmp.lt.s32.totalorder %v7406_v19, 1  ;;  %v1071_v36 = vrot.slane %v9178_v4, 7 }
 0x1d3   :  { %13466 = vst [vmem:[#allocation18_spill] sm:$0xff] %v9217_v34  ;;  %13468 = vst [vmem:[#allocation256_spill] sm:$0xff] %v9222_v7  ;;  %5199 = vmatprep.mubr.msk.f32.mxu0 %vm13469_vm4, %v13428_v3  ;;  %5383 = vmatmul.mubr.msk.f32.gmra.mrb[68].mxu1 %vm9201_vm2, %v9222_v7  ;;  %v9235_v22 = vsel %vm13470_vm1, %v1069_v30, %v1070_v18  ;;  %v9243_v39 = vadd.s32 152, %v7406_v19  ;;  %vm9248_vm4 = vcmp.ge.s32.totalorder %v836_v12, 1  ;;  %v13474_v13 = vmov 0 }
 0x1d4   :  { %13471 = vst [vmem:[#allocation257_spill] sm:$0xff] %v9235_v22  ;;  %vm13472_vm12 = vmmov %vm13470_vm1  ;;  %5384 = vmatprep.mubr.msk.f32.mxu1 %vm9149_vm3, %v9235_v22  ;;  %v13475_v13 = vsel %vm9248_vm4, 4294967295, %v13474_v13  ;;  %v9252_v24 = vand.u32 15, %v901_v23  ;;  %v902_v30 = vshra.s32 %v774_v50, 4  ;;  %v944_v7 = vshra.s32 %v816_v33, 4  ;;  %6296 = vmatpush1.bf16.msra.mxu0 %v13481_v57 }
 0x1d5   :  { %v9240_v47 = vsel %vm13472_vm12, %v1025_v52, %v1026_v48  ;;  %13476 = vst [vmem:[#allocation259_spill] sm:$0xff] %v13475_v13  ;;  %vm9255_vm1 = vcmp.lt.s32.totalorder %v879_v35, 15  ;;  %v13478_v52 = vmov 0  ;;  %v880_v41 = vand.u32 15, %v816_v33  ;;  %6297 = vmatprep.subr.bf16.mxu0 %v12926_v32 }
 0x1d6   :  { %13473 = vst [vmem:[#allocation258_spill] sm:$0xff] %v9240_v47  ;;  %13477 = vst [vmem:[#allocation260_spill] sm:$0xff] %v9252_v24  ;;  %v13479_v52 = vsel %vm9255_vm1, 4294967295, %v13478_v52  ;;  %v945_v9 = vshra.s32 %v9214_v21, 4  ;;  %vm13482_vm12 = vcmp.ge.s32.totalorder %v9105_v31, 1  ;;  %vm13483_vm9 = vcmp.lt.s32.totalorder %v7406_v19, 7 }
 0x1d7   :  { %13480 = vst [vmem:[#allocation261_spill] sm:$0xff] %v13479_v52  ;;  %5200 = vmatmul.mubr.msk.f32.gmra.mrb[94].mxu0 %vm13482_vm12, %v9159_v37  ;;  %v9266_v12 = vsel %vm13483_vm9, %v1517_v58, %v1518_v28  ;;  %v1519_v23 = vrot.slane %v9128_v27, 1  ;;  %v1072_v35 = vrot.slane %v9217_v34, 7  ;;  %v1027_v22 = vrot.slane %v8526_v5, 7  ;;  %v13497_v52 = vld [vmem:[#allocation20_spill] sm:$0xff] }
 0x1d8   :  { %13484 = vst [vmem:[#allocation19_spill] sm:$0xff] %v9266_v12  ;;  %vm13485_vm2 = vcmp.ge.s32.totalorder %v9175_v40, 1  ;;  %vm13486_vm11 = vcmp.ge.s32.totalorder %v9161_v55, 1  ;;  %vm13487_vm12 = vcmp.lt.s32.totalorder %v7406_v19, 1  ;;  %v838_v57 = vand.u32 15, %v774_v50  ;;  %6299 = vmatpush1.bf16.msra.mxu0 %v13497_v52 }
 0x1d9   :  { %5201 = vmatprep.mubr.msk.f32.mxu0 %vm13485_vm2, %v8561_v29  ;;  %5385 = vmatmul.mubr.msk.f32.gmra.mrb[70].mxu1 %vm13486_vm11, %v9266_v12  ;;  %v9280_v33 = vsel %vm13487_vm12, %v1070_v18, %v1071_v36  ;;  %vm13489_vm9 = vmmov %vm13485_vm2  ;;  %v903_v58 = vshra.s32 %v9243_v39, 4  ;;  %v818_v31 = vadd.s32 496, %v7406_v19  ;;  %vm13490_vm11 = vcmp.ge.s32.totalorder %v9211_v38, 1 }
 0x1da   :  { %13488 = vst [vmem:[#allocation262_spill] sm:$0xff] %v9280_v33  ;;  %vm1285_vm14 = vmand %vm13489_vm9, %vm9248_vm4  ;;  %3189 = vmatprep.mubr.f32.mxu1 %v9280_v33  ;;  %v9294_v18 = vand.u32 15, %v902_v30  ;;  %v9296_v13 = vand.u32 15, %v944_v7  ;;  %v776_v40 = vadd.s32 160, %v7406_v19  ;;  %vm9299_vm9 = vcmp.ge.s32.totalorder %v880_v41, 1 }
 0x1db   :  { %vm1713_vm12 = vmand %vm13490_vm11, %vm9255_vm1  ;;  %v13493_v50 = vmov 0  ;;  %v881_v12 = vand.u32 15, %v9214_v21  ;;  %v9304_v37 = vand.u32 15, %v945_v9  ;;  %v819_v33 = vadd.s32 504, %v7406_v19  ;;  %5202 = vmatmul.mubr.msk.f32.gmra.mrb[96].mxu0 %vm1285_vm14, %v9240_v47 }
 0x1dc   :  { %13491 = vst [vmem:[#allocation263_spill] sm:$0xff] %v9294_v18  ;;  %13492 = vst [vmem:[#allocation264_spill] sm:$0xff] %v9296_v13  ;;  %v13494_v50 = vsel %vm9299_vm9, 4294967295, %v13493_v50  ;;  %vm13498_vm11 = vcmp.lt.s32.totalorder %v7406_v19, 7  ;;  %vm13500_vm2 = vcmp.lt.s32.totalorder %v7406_v19, 1  ;;  %v1520_v9 = vrot.slane %v9178_v4, 1 }
 0x1dd   :  { %13495 = vst [vmem:[#allocation265_spill] sm:$0xff] %v13494_v50  ;;  %13496 = vst [vmem:[#allocation266_spill] sm:$0xff] %v9304_v37  ;;  %v9311_v7 = vsel %vm13498_vm11, %v1518_v28, %v1519_v23  ;;  %v9315_v41 = vsel %vm13500_vm2, %v1071_v36, %v1072_v35  ;;  %vm13504_vm4 = vcmp.ge.s32.totalorder %v9252_v24, 1  ;;  %v1028_v21 = vrot.slane %v8652_v51, 7  ;;  %v13512_v4 = vld [vmem:[#allocation26_spill] sm:$0xff] }
 0x1de   :  { %13499 = vst [vmem:[#allocation20_spill] sm:$0xff] %v9311_v7  ;;  %13501 = vst [vmem:[#allocation267_spill] sm:$0xff] %v9315_v41  ;;  %5203 = vmatprep.mubr.msk.f32.mxu0 %vm13504_vm4, %v8526_v5  ;;  %5386 = vmatmul.mubr.msk.f32.gmra.mrb[72].mxu1 %vm1713_vm12, %v9311_v7  ;;  %vm9327_vm14 = vcmp.ge.s32.totalorder %v838_v57, 1  ;;  %v13505_v28 = vmov 0  ;;  %v9331_v36 = vand.u32 15, %v903_v58  ;;  %v946_v52 = vshra.s32 %v818_v31, 4 }
 0x1df   :  { %vm13502_vm1 = vmmov %vm13500_vm2  ;;  %v13506_v28 = vsel %vm9327_vm14, 4294967295, %v13505_v28  ;;  %5387 = vmatprep.mubr.msk.f32.mxu1 %vm9299_vm9, %v9315_v41  ;;  %v9339_v7 = vadd.s32 168, %v7406_v19  ;;  %vm9342_vm12 = vcmp.lt.s32.totalorder %v881_v12, 15  ;;  %v13509_v57 = vmov 0 }
 0x1e0   :  { %v9319_v30 = vsel %vm13502_vm1, %v1026_v48, %v1027_v22  ;;  %13507 = vst [vmem:[#allocation269_spill] sm:$0xff] %v13506_v28  ;;  %13508 = vst [vmem:[#allocation270_spill] sm:$0xff] %v9331_v36  ;;  %vm12627_vm1 = vcmp.ge.s32.totalorder %v9294_v18, 1  ;;  %v904_v48 = vshra.s32 %v776_v40, 4  ;;  %v13510_v57 = vsel %vm9342_vm12, 4294967295, %v13509_v57 }
 0x1e1   :  { %13503 = vst [vmem:[#allocation268_spill] sm:$0xff] %v9319_v30  ;;  %13511 = vst [vmem:[#allocation271_spill] sm:$0xff] %v13510_v57  ;;  %v882_v58 = vand.u32 15, %v818_v31  ;;  %v947_v47 = vshra.s32 %v819_v33, 4  ;;  %v468_v50 = vadd.f32 %v8409_v26, %v13512_v4  ;;  %v9349_v41 = vmax.f32 %v8710_v17, 0.0  ;;  %v13518_v17 = vld [vmem:[#allocation172_spill] sm:$0xff] }
 0x1e2   :  { %vm13514_vm11 = vmmov %vm13504_vm4  ;;  %vm13515_vm2 = vcmp.lt.s32.totalorder %v7406_v19, 7  ;;  %v1521_v12 = vrot.slane %v9217_v34, 1  ;;  %vm13517_vm4 = vcmp.ge.s32.totalorder %v9296_v13, 1  ;;  %v13519_v31 = vrot.slane %v13518_v17, 7 }
 0x1e3   :  { %13513 = vst [vmem:[#allocation26_spill] sm:$0xff] %v9349_v41  ;;  %5204 = vmatmul.mubr.msk.f32.gmra.mrb[98].mxu0 %vm13514_vm11, %v9319_v30  ;;  %v9356_v27 = vsel %vm13515_vm2, %v1519_v23, %v1520_v9  ;;  %vm13520_vm9 = vcmp.lt.s32.totalorder %v7406_v19, 1  ;;  %vm1287_vm2 = vmand %vm12627_vm1, %vm9327_vm14  ;;  %vm12635_vm3 = vcmp.ge.s32.totalorder %v9331_v36, 1  ;;  %v9380_v24 = vand.u32 15, %v946_v52  ;;  %v2390_v36 = vld [vmem:[#allocation2 + $0x300] sm:$0xff] }
 0x1e4   :  { %13516 = vst [vmem:[#allocation272_spill] sm:$0xff] %v9356_v27  ;;  %5205 = vmatprep.mubr.msk.f32.mxu0 %vm12627_vm1, %v8652_v51  ;;  %5388 = vmatmul.mubr.msk.f32.gmra.mrb[74].mxu1 %vm13517_vm4, %v9356_v27  ;;  %v9369_v4 = vsel %vm13520_vm9, %v1072_v35, %v13519_v31  ;;  %vm13522_vm11 = vmmov %vm13520_vm9  ;;  %vm13525_vm9 = vcmp.ge.s32.totalorder %v9304_v37, 1  ;;  %v9387_v35 = vand.u32 15, %v904_v48  ;;  %v905_v31 = vshra.s32 %v9339_v7, 4 }
 0x1e5   :  { %13521 = vst [vmem:[#allocation273_spill] sm:$0xff] %v9369_v4  ;;  %v9373_v23 = vsel %vm13522_vm11, %v1027_v22, %v1028_v21  ;;  %13524 = vst [vmem:[#allocation275_spill] sm:$0xff] %v9380_v24  ;;  %3199 = vmatprep.mubr.f32.mxu1 %v9369_v4  ;;  %v840_v22 = vand.u32 15, %v776_v40  ;;  %v778_v28 = vadd.s32 176, %v7406_v19  ;;  %vm9391_vm11 = vcmp.ge.s32.totalorder %v882_v58, 1  ;;  %v13534_v4 = vld [vmem:[#allocation28_spill] sm:$0xff] }
 0x1e6   :  { %13523 = vst [vmem:[#allocation274_spill] sm:$0xff] %v9373_v23  ;;  %vm1715_vm4 = vmand %vm13525_vm9, %vm9342_vm12  ;;  %v13527_v18 = vmov 0  ;;  %v1029_v52 = vrot.slane %v8644_v44, 7  ;;  %v883_v27 = vand.u32 15, %v819_v33  ;;  %v9396_v30 = vand.u32 15, %v947_v47 }
 0x1e7   :  { %13526 = vst [vmem:[#allocation276_spill] sm:$0xff] %v9387_v35  ;;  %v13528_v18 = vsel %vm9391_vm11, 4294967295, %v13527_v18  ;;  %5206 = vmatmul.mubr.msk.f32.gmra.mrb[100].mxu0 %vm1287_vm2, %v9373_v23  ;;  %vm13531_vm9 = vcmp.lt.s32.totalorder %v7406_v19, 7  ;;  %v1522_v40 = vrot.slane %v13518_v17, 1  ;;  %v9404_v57 = vmax.f32 %v468_v50, 0.0  ;;  %v2397_v23 = vld [vmem:[#allocation2 + $0x338] sm:$0xff] }
 0x1e8   :  { %13529 = vst [vmem:[#allocation277_spill] sm:$0xff] %v13528_v18  ;;  %13530 = vst [vmem:[#allocation278_spill] sm:$0xff] %v9396_v30  ;;  %v9401_v48 = vsel %vm13531_vm9, %v1520_v9, %v1521_v12  ;;  %v473_v58 = vadd.f32 %v8409_v26, %v13534_v4  ;;  %5207 = vmatprep.mubr.msk.f32.mxu0 %vm12635_vm3, %v8644_v44  ;;  %vm9417_vm9 = vcmp.ge.s32.totalorder %v840_v22, 1  ;;  %v13535_v47 = vmov 0 }
 0x1e9   :  { %13532 = vst [vmem:[#allocation279_spill] sm:$0xff] %v9401_v48  ;;  %13533 = vst [vmem:[#allocation280_spill] sm:$0xff] %v9404_v57  ;;  %5389 = vmatmul.mubr.msk.f32.gmra.mrb[76].mxu1 %vm1715_vm4, %v9401_v48  ;;  %v13536_v47 = vsel %vm9417_vm9, 4294967295, %v13535_v47  ;;  %v9421_v33 = vand.u32 15, %v905_v31  ;;  %v906_v26 = vshra.s32 %v778_v28, 4  ;;  %vm13539_vm12 = vcmp.lt.s32.totalorder %v7406_v19, 1 }
 0x1ea   :  { %5390 = vmatprep.mubr.msk.f32.mxu1 %vm9391_vm11, %v8454_v46  ;;  %13537 = vst [vmem:[#allocation28_spill] sm:$0xff] %v13536_v47  ;;  %v9425_v50 = vsel %vm13539_vm12, %v1028_v21, %v1029_v52  ;;  %v1030_v9 = vrot.slane %v9349_v41, 7  ;;  %vm9429_vm1 = vcmp.lt.s32.totalorder %v883_v27, 15  ;;  %v13541_v4 = vmov 0  ;;  %v13546_v31 = vld [vmem:[#allocation180_spill] sm:$0xff] }
 0x1eb   :  { %13538 = vst [vmem:[#allocation281_spill] sm:$0xff] %v9421_v33  ;;  %13540 = vst [vmem:[#allocation282_spill] sm:$0xff] %v9425_v50  ;;  %v13542_v4 = vsel %vm9429_vm1, 4294967295, %v13541_v4  ;;  %5208 = vmatmul.mubr.msk.f32.gmra.mrb[102].mxu0 %vm12635_vm3, %v9425_v50  ;;  %vm13544_vm2 = vcmp.lt.s32.totalorder %v7406_v19, 7  ;;  %vm13547_vm12 = vcmp.ge.s32.totalorder %v9387_v35, 1  ;;  %vm13548_vm4 = vcmp.ge.s32.totalorder %v9380_v24, 1 }
 0x1ec   :  { %13543 = vst [vmem:[#allocation283_spill] sm:$0xff] %v13542_v4  ;;  %v9438_v22 = vsel %vm13544_vm2, %v1521_v12, %v1522_v40  ;;  %5209 = vmatprep.mubr.msk.f32.mxu0 %vm13547_vm12, %v9349_v41  ;;  %vm13549_vm14 = vmmov %vm13547_vm12  ;;  %v1462_v21 = vrot.slane %v7937_v53, 1  ;;  %vm12655_vm2 = vcmp.ge.s32.totalorder %v9421_v33, 1  ;;  %vm13550_vm12 = vcmp.ge.s32.totalorder %v9396_v30, 1  ;;  %v2393_v48 = vld [vmem:[#allocation2 + $0x318] sm:$0xff] }
 0x1ed   :  { %13545 = vst [vmem:[#allocation284_spill] sm:$0xff] %v9438_v22  ;;  %5391 = vmatmul.mubr.msk.f32.gmra.mrb[78].mxu1 %vm13548_vm4, %v9438_v22  ;;  %vm1289_vm11 = vmand %vm13549_vm14, %vm9417_vm9  ;;  %v9459_v12 = vand.u32 15, %v906_v26  ;;  %v842_v46 = vand.u32 15, %v778_v28  ;;  %v9461_v47 = vmax.f32 %v473_v58, 0.0  ;;  %vm13553_vm14 = vcmp.lt.s32.totalorder %v7406_v19, 1  ;;  %v13555_v22 = vld [vmem:[#allocation107_spill] sm:$0xff] }
 0x1ee   :  { %3209 = vmatprep.mubr.f32.mxu1 %v8493_v6  ;;  %vm1717_vm3 = vmand %vm13550_vm12, %vm9429_vm1  ;;  %v9465_v35 = vsel %vm13553_vm14, %v1029_v52, %v1030_v9  ;;  %v1031_v27 = vrot.slane %v9404_v57, 7  ;;  %v2391_v6 = vld [vmem:[#allocation2 + $0x308] sm:$0xff]  ;;  %v821_v50 = vand.u32 15, %v13555_v22  ;;  %v13556_v4 = vrot.slane %v13546_v31, 1  ;;  %v13573_v33 = vld [vmem:[#allocation120_spill] sm:$0xff] }
 0x1ef   :  { %13551 = vst [vmem:[#allocation285_spill] sm:$0xff] %v9459_v12  ;;  %13552 = vst [vmem:[#allocation286_spill] sm:$0xff] %v9461_v47  ;;  %5210 = vmatmul.mubr.msk.f32.gmra.mrb[104].mxu0 %vm1289_vm11, %v9465_v35  ;;  %vm13557_vm4 = vcmp.lt.s32.totalorder %v7406_v19, 7  ;;  %v13559_v28 = vrot.slane %v7978_v15, 1  ;;  %v1463_v58 = vrot.slane %v8042_v43, 1  ;;  %vm12664_vm11 = vcmp.ge.s32.totalorder %v9459_v12, 1 }
 0x1f0   :  { %13554 = vst [vmem:[#allocation287_spill] sm:$0xff] %v9465_v35  ;;  %v9474_v26 = vsel %vm13557_vm4, %v1522_v40, %v13556_v4  ;;  %5211 = vmatprep.mubr.msk.f32.mxu0 %vm12655_vm2, %v9404_v57  ;;  %vm13560_vm12 = vmmov %vm13557_vm4  ;;  %v6349_v40 = vpack.c.bf16 %v2391_v6, %v2390_v36  ;;  %vm9489_vm14 = vcmp.ge.s32.totalorder %v842_v46, 1  ;;  %v13562_v4 = vmov 0  ;;  %v2392_v35 = vld [vmem:[#allocation2 + $0x310] sm:$0xff]  ;;  %v2394_v12 = vld [vmem:[#allocation2 + $0x320] sm:$0xff] }
 0x1f1   :  { %13558 = vst [vmem:[#allocation107_spill] sm:$0xff] %v9474_v26  ;;  %5392 = vmatmul.mubr.msk.f32.gmra.mrb[80].mxu1 %vm1717_vm3, %v9474_v26  ;;  %v9484_v52 = vsel %vm13560_vm12, %v13559_v28, %v1462_v21  ;;  %v13563_v4 = vsel %vm9489_vm14, 4294967295, %v13562_v4  ;;  %vm13565_vm4 = vcmp.lt.s32.totalorder %v7406_v19, 1  ;;  %vm9497_vm3 = vcmp.lt.s32.totalorder %v821_v50, 15  ;;  %v14072_v26 = vld [vmem:[#allocation129_spill] sm:$0xff] }
 0x1f2   :  { %13561 = vst [vmem:[#allocation288_spill] sm:$0xff] %v9484_v52  ;;  %3279 = vmatprep.mubr.f32.mxu1 %v9484_v52  ;;  %13564 = vst [vmem:[#allocation289_spill] sm:$0xff] %v13563_v4  ;;  %v9495_v22 = vsel %vm13565_vm4, %v1030_v9, %v1031_v27  ;;  %v1032_v28 = vrot.slane %v9461_v47, 7  ;;  %v9511_v46 = vsel %vm13560_vm12, %v1462_v21, %v1463_v58  ;;  %v1464_v6 = vrot.slane %v8008_v61, 1  ;;  %v13572_v9 = vld [vmem:[#allocation30_spill] sm:$0xff] }
 0x1f3   :  { %13566 = vst [vmem:[#allocation290_spill] sm:$0xff] %v9495_v22  ;;  %5212 = vmatmul.mubr.msk.f32.gmra.mrb[106].mxu0 %vm12655_vm2, %v9495_v22  ;;  %13569 = vst [vmem:[#allocation291_spill] sm:$0xff] %v9511_v46  ;;  %v6352_v36 = vpack.c.bf16 %v2393_v48, %v2392_v35  ;;  %vm13570_vm2 = vcmp.lt.s32.totalorder %v7406_v19, 1  ;;  %v1033_v21 = vrot.slane %v13572_v9, 7  ;;  %v823_v22 = vand.u32 15, %v13573_v33  ;;  %v2395_v4 = vld [vmem:[#allocation2 + $0x328] sm:$0xff] }
 0x1f4   :  { %5213 = vmatprep.mubr.msk.f32.mxu0 %vm12664_vm11, %v9461_v47  ;;  %vm1291_vm4 = vmand %vm12664_vm11, %vm9489_vm14  ;;  %v9523_v50 = vsel %vm13570_vm2, %v1031_v27, %v1032_v28  ;;  %vm13576_vm11 = vcmp.lt.s32.totalorder %v7406_v19, 7  ;;  %v1465_v48 = vrot.slane %v8095_v49, 1  ;;  %v6355_v33 = vpack.c.bf16 %v2395_v4, %v2394_v12  ;;  %v2398_v4 = vld [vmem:[#allocation2 + $0x340] sm:$0xff] }
 0x1f5   :  { %3280 = vmatmul.mubr.f32.vlgmr.msra.gmra.mrb[82].mxu1 %v7978_v15  ;;  %13571 = vst [vmem:[#allocation292_spill] sm:$0xff] %v9523_v50  ;;  %v9535_v35 = vsel %vm13576_vm11, %v1463_v58, %v1464_v6  ;;  %v9541_v27 = vsel %vm13570_vm2, %v1032_v28, %v1033_v21  ;;  %v13582_v58 = vld [vmem:[#allocation32_spill] sm:$0xff]  ;;  %vm13585_vm2 = vcmp.lt.s32.totalorder %v7406_v19, 7 }
 0x1f6   :  { %6350 = vmatpush1.bf16.msra.mxu1 %v6349_v40  ;;  %5393 = vmatprep.mubr.msk.f32.mxu1 %vm9497_vm3, %v9511_v46  ;;  %v13574_v40 = vld [vmem:[#allocation29_spill] sm:$0xff]  ;;  %13577 = vst [vmem:[#allocation120_spill] sm:$0xff] %v9535_v35  ;;  %13578 = vst [vmem:[#allocation293_spill] sm:$0xff] %v9541_v27  ;;  %v9557_v12 = vsel %vm13585_vm2, %v1464_v6, %v1465_v48  ;;  %v13591_v6 = vld [vmem:[#allocation162_spill] sm:$0xff] }
 0x1f7   :  { %6351 = vmatprep.subr.bf16.mxu1 %v12926_v32  ;;  %5214 = vmatmul.mubr.msk.f32.gmra.mrb[108].mxu0 %vm1291_vm4, %v9523_v50  ;;  %vm13575_vm12 = vcmp.ge.s32.totalorder %v13574_v40, 1  ;;  %vm9543_vm4 = vcmp.lt.s32.totalorder %v823_v22, 15  ;;  %v1466_v22 = vrot.slane %v8080_v10, 1  ;;  %v13593_v46 = vld [vmem:[#allocation37_spill] sm:$0xff]  ;;  %v14073_v50 = vld [vmem:[#allocation148_spill] sm:$0xff] }
 0x1f8   :  { %5215 = vmatprep.mubr.msk.f32.mxu0 %vm13575_vm12, %v13572_v9  ;;  %vm13581_vm11 = vmmov %vm13575_vm12 }
 0x1f9   :  { %3285 = vmatmul.mubr.f32.gmra.mrb[84].mxu1 %v7937_v53  ;;  %v2396_v53 = vld [vmem:[#allocation2 + $0x330] sm:$0xff] }
 0x1fa   :  { %3289 = vmatprep.mubr.f32.mxu1 %v9535_v35  ;;  %6353 = vmatpush1.bf16.msra.mxu1 %v6352_v36  ;;  %v13583_v35 = vld [vmem:[#allocation35_spill] sm:$0xff]  ;;  %v6358_v28 = vpack.c.bf16 %v2397_v23, %v2396_v53  ;;  %v13588_v36 = vrot.slane %v13582_v58, 7  ;;  %v1467_v23 = vrot.slane %v8183_v59, 1 }
 0x1fb   :  { %6354 = vmatprep.subr.bf16.mxu1 %v12926_v32  ;;  %5216 = vmatmul.mubr.msk.f32.gmra.mrb[110].mxu0 %vm13581_vm11, %v9541_v27  ;;  %vm13584_vm12 = vcmp.ge.s32.totalorder %v13583_v35, 1  ;;  %vm13589_vm11 = vcmp.lt.s32.totalorder %v7406_v19, 1  ;;  %v2399_v35 = vld [vmem:[#allocation2 + $0x348] sm:$0xff]  ;;  %v13592_v27 = vld [vmem:[#allocation31_spill] sm:$0xff] }
 0x1fc   :  { %5217 = vmatprep.mubr.msk.f32.mxu0 %vm13584_vm12, %v13582_v58  ;;  %vm13587_vm14 = vmmov %vm13584_vm12  ;;  %v9571_v40 = vsel %vm13589_vm11, %v1033_v21, %v13588_v36  ;;  %v6361_v21 = vpack.c.bf16 %v2399_v35, %v2398_v4  ;;  %v2400_v36 = vld [vmem:[#allocation2 + $0x350] sm:$0xff]  ;;  %v1468_v4 = vrot.slane %v8145_v42, 1  ;;  %v13609_v35 = vld [vmem:[#allocation36_spill] sm:$0xff] }
 0x1fd   :  { %3290 = vmatmul.mubr.f32.gmra.mrb[86].mxu1 %v8042_v43  ;;  %vm1293_vm1 = vmand %vm13587_vm14, %vm7441_vm5  ;;  %13590 = vst [vmem:[#allocation294_spill] sm:$0xff] %v9571_v40  ;;  %v825_v43 = vand.u32 15, %v13591_v6  ;;  %vm13594_vm14 = vcmp.ge.s32.totalorder %v13593_v46, 1  ;;  %v2401_v6 = vld [vmem:[#allocation2 + $0x358] sm:$0xff]  ;;  %v2402_v46 = vld [vmem:[#allocation2 + $0x360] sm:$0xff] }
 0x1fe   :  { %5394 = vmatprep.mubr.msk.f32.mxu1 %vm9543_vm4, %v9557_v12  ;;  %6356 = vmatpush1.bf16.msra.mxu1 %v6355_v33  ;;  %vm13595_vm12 = vmmov %vm13585_vm2  ;;  %v14074_v33 = vld [vmem:[#allocation141_spill] sm:$0xff] }
 0x1ff   :  { %6357 = vmatprep.subr.bf16.mxu1 %v12926_v32  ;;  %5218 = vmatmul.mubr.msk.f32.gmra.mrb[112].mxu0 %vm1293_vm1, %v9571_v40  ;;  %v9582_v53 = vsel %vm13595_vm12, %v1465_v48, %v1466_v22  ;;  %vm9586_vm2 = vcmp.lt.s32.totalorder %v825_v43, 15  ;;  %v13599_v40 = vld [vmem:[#allocation39_spill] sm:$0xff]  ;;  %vm13600_vm1 = vmmov %vm13594_vm14  ;;  %v13601_v48 = vld [vmem:[#allocation38_spill] sm:$0xff] }
 0x200   :  { %5219 = vmatprep.mubr.msk.f32.mxu0 %vm13594_vm14, %v13592_v27  ;;  %13596 = vst [vmem:[#allocation162_spill] sm:$0xff] %v9582_v53  ;;  %vm13604_vm14 = vmmov %vm13595_vm12 }
 0x201   :  { %3295 = vmatmul.mubr.f32.gmra.mrb[88].mxu1 %v8008_v61  ;;  %v13602_v61 = vld [vmem:[#allocation45_spill] sm:$0xff]  ;;  %v9600_v43 = vsel %vm13604_vm14, %v1466_v22, %v1467_v23  ;;  %v2403_v22 = vld [vmem:[#allocation2 + $0x368] sm:$0xff] }
 0x202   :  { %3299 = vmatprep.mubr.f32.mxu1 %v9582_v53  ;;  %6359 = vmatpush1.bf16.msra.mxu1 %v6358_v28  ;;  %vm13603_vm11 = vcmp.ge.s32.totalorder %v13602_v61, 1  ;;  %13605 = vst [vmem:[#allocation295_spill] sm:$0xff] %v9600_v43  ;;  %v6364_v28 = vpack.c.bf16 %v2401_v6, %v2400_v36  ;;  %v13610_v53 = vld [vmem:[#allocation47_spill] sm:$0xff]  ;;  %v14075_v36 = vld [vmem:[#allocation160_spill] sm:$0xff] }
 0x203   :  { %6360 = vmatprep.subr.bf16.mxu1 %v12926_v32  ;;  %5220 = vmatmul.mubr.msk.f32.gmra.mrb[114].mxu0 %vm13600_vm1, %v13599_v40  ;;  %vm13607_vm12 = vmmov %vm13603_vm11  ;;  %v827_v40 = vand.u32 15, %v8465_v8  ;;  %vm13611_vm1 = vcmp.ge.s32.totalorder %v13610_v53, 1  ;;  %v6367_v8 = vpack.c.bf16 %v2403_v22, %v2402_v46  ;;  %v2404_v6 = vld [vmem:[#allocation2 + $0x370] sm:$0xff]  ;;  %v2406_v53 = vld [vmem:[#allocation2 + $0x380] sm:$0xff] }
 0x204   :  { %5221 = vmatprep.mubr.msk.f32.mxu0 %vm13603_vm11, %v13601_v48  ;;  %vm1295_vm5 = vmand %vm13607_vm12, %vm7508_vm10 }
 0x205   :  { %3300 = vmatmul.mubr.f32.gmra.mrb[90].mxu1 %v8095_v49  ;;  %v13608_v49 = vld [vmem:[#allocation43_spill] sm:$0xff]  ;;  %vm13612_vm11 = vmmov %vm13604_vm14  ;;  %vm9623_vm14 = vcmp.lt.s32.totalorder %v827_v40, 15  ;;  %v13626_v40 = vld [vmem:[#allocation48_spill] sm:$0xff] }
 0x206   :  { %5395 = vmatprep.mubr.msk.f32.mxu1 %vm9586_vm2, %v9600_v43  ;;  %6362 = vmatpush1.bf16.msra.mxu1 %v6361_v21  ;;  %v9619_v61 = vsel %vm13612_vm11, %v1467_v23, %v1468_v4  ;;  %v1469_v21 = vrot.slane %v8248_v16, 1  ;;  %v13616_v43 = vld [vmem:[#allocation49_spill] sm:$0xff]  ;;  %v13618_v23 = vld [vmem:[#allocation42_spill] sm:$0xff] }
 0x207   :  { %6363 = vmatprep.subr.bf16.mxu1 %v12926_v32  ;;  %5222 = vmatmul.mubr.msk.f32.gmra.mrb[116].mxu0 %vm1295_vm5, %v13608_v49  ;;  %13613 = vst [vmem:[#allocation296_spill] sm:$0xff] %v9619_v61  ;;  %v2405_v49 = vld [vmem:[#allocation2 + $0x378] sm:$0xff]  ;;  %vm13617_vm5 = vmmov %vm13611_vm1 }
 0x208   :  { %5223 = vmatprep.mubr.msk.f32.mxu0 %vm13611_vm1, %v13609_v35  ;;  %vm13621_vm1 = vmmov %vm13612_vm11  ;;  %v6370_v22 = vpack.c.bf16 %v2405_v49, %v2404_v6  ;;  %v1471_v49 = vrot.slane %v8320_v11, 1  ;;  %v2408_v6 = vld [vmem:[#allocation2 + $0x390] sm:$0xff] }
 0x209   :  { %3305 = vmatmul.mubr.f32.gmra.mrb[92].mxu1 %v8080_v10  ;;  %v13619_v10 = vld [vmem:[#allocation51_spill] sm:$0xff]  ;;  %v9637_v46 = vsel %vm13621_vm1, %v1468_v4, %v1469_v21  ;;  %v2407_v4 = vld [vmem:[#allocation2 + $0x388] sm:$0xff] }
 0x20a   :  { %3309 = vmatprep.mubr.f32.mxu1 %v9619_v61  ;;  %6365 = vmatpush1.bf16.msra.mxu1 %v6364_v28  ;;  %vm13620_vm12 = vcmp.ge.s32.totalorder %v13619_v10, 1  ;;  %13622 = vst [vmem:[#allocation297_spill] sm:$0xff] %v9637_v46  ;;  %v1470_v28 = vrot.slane %v13334_v63, 1  ;;  %v13627_v61 = vld [vmem:[#allocation55_spill] sm:$0xff] }
 0x20b   :  { %6366 = vmatprep.subr.bf16.mxu1 %v12926_v32  ;;  %5224 = vmatmul.mubr.msk.f32.gmra.mrb[118].mxu0 %vm13617_vm5, %v13616_v43  ;;  %vm13624_vm11 = vmmov %vm13620_vm12  ;;  %v829_v43 = vand.u32 15, %v8642_v0  ;;  %vm13628_vm5 = vcmp.ge.s32.totalorder %v13627_v61, 1  ;;  %v6373_v0 = vpack.c.bf16 %v2407_v4, %v2406_v53  ;;  %v2410_v61 = vld [vmem:[#allocation2 + $0x3a0] sm:$0xff] }
 0x20c   :  { %5225 = vmatprep.mubr.msk.f32.mxu0 %vm13620_vm12, %v13618_v23  ;;  %vm1297_vm10 = vmand %vm13624_vm11, %vm7583_vm15 }
 0x20d   :  { %3310 = vmatmul.mubr.f32.gmra.mrb[94].mxu1 %v8183_v59  ;;  %v13625_v59 = vld [vmem:[#allocation53_spill] sm:$0xff]  ;;  %vm13629_vm12 = vmmov %vm13621_vm1  ;;  %vm9660_vm1 = vcmp.lt.s32.totalorder %v829_v43, 15  ;;  %v13642_v43 = vld [vmem:[#allocation58_spill] sm:$0xff] }
 0x20e   :  { %5396 = vmatprep.mubr.msk.f32.mxu1 %vm9623_vm14, %v9637_v46  ;;  %6368 = vmatpush1.bf16.msra.mxu1 %v6367_v8  ;;  %v9656_v10 = vsel %vm13629_vm12, %v1469_v21, %v1470_v28  ;;  %v13633_v46 = vld [vmem:[#allocation59_spill] sm:$0xff]  ;;  %v13635_v21 = vld [vmem:[#allocation52_spill] sm:$0xff] }
 0x20f   :  { %6369 = vmatprep.subr.bf16.mxu1 %v12926_v32  ;;  %5226 = vmatmul.mubr.msk.f32.gmra.mrb[120].mxu0 %vm1297_vm10, %v13625_v59  ;;  %13630 = vst [vmem:[#allocation298_spill] sm:$0xff] %v9656_v10  ;;  %v2409_v59 = vld [vmem:[#allocation2 + $0x398] sm:$0xff]  ;;  %vm13634_vm10 = vmmov %vm13628_vm5 }
 0x210   :  { %5227 = vmatprep.mubr.msk.f32.mxu0 %vm13628_vm5, %v13626_v40  ;;  %vm13638_vm5 = vmmov %vm13629_vm12  ;;  %v6376_v4 = vpack.c.bf16 %v2409_v59, %v2408_v6  ;;  %v1473_v59 = vrot.slane %v8496_v1, 1  ;;  %v13649_v6 = vld [vmem:[#allocation70_spill] sm:$0xff] }
 0x211   :  { %3315 = vmatmul.mubr.f32.gmra.mrb[96].mxu1 %v8145_v42  ;;  %v13636_v42 = vld [vmem:[#allocation60_spill] sm:$0xff]  ;;  %v9674_v53 = vsel %vm13638_vm5, %v1470_v28, %v1471_v49  ;;  %v2411_v28 = vld [vmem:[#allocation2 + $0x3a8] sm:$0xff] }
 0x212   :  { %3319 = vmatprep.mubr.f32.mxu1 %v9656_v10  ;;  %6371 = vmatpush1.bf16.msra.mxu1 %v6370_v22  ;;  %vm13637_vm11 = vcmp.ge.s32.totalorder %v13636_v42, 1  ;;  %v1472_v22 = vrot.slane %v13394_v20, 1  ;;  %v13643_v10 = vld [vmem:[#allocation62_spill] sm:$0xff] }
 0x213   :  { %6372 = vmatprep.subr.bf16.mxu1 %v12926_v32  ;;  %5228 = vmatmul.mubr.msk.f32.gmra.mrb[122].mxu0 %vm13634_vm10, %v13633_v46  ;;  %vm13640_vm12 = vmmov %vm13637_vm11  ;;  %v831_v46 = vand.u32 15, %v8747_v60  ;;  %vm13644_vm10 = vcmp.ge.s32.totalorder %v13643_v10, 1  ;;  %v6379_v60 = vpack.c.bf16 %v2411_v28, %v2410_v61  ;;  %v13658_v28 = vld [vmem:[#allocation76_spill] sm:$0xff]  ;;  %v13670_v10 = vld [vmem:[#allocation77_spill] sm:$0xff] }
 0x214   :  { %5229 = vmatprep.mubr.msk.f32.mxu0 %vm13637_vm11, %v13635_v21  ;;  %vm1299_vm15 = vmand %vm13640_vm12, %vm7637_vm13 }
 0x215   :  { %3320 = vmatmul.mubr.f32.gmra.mrb[98].mxu1 %v8248_v16  ;;  %v13641_v16 = vld [vmem:[#allocation66_spill] sm:$0xff]  ;;  %vm13645_vm11 = vmmov %vm13638_vm5  ;;  %vm9697_vm5 = vcmp.lt.s32.totalorder %v831_v46, 15  ;;  %v1474_v46 = vrot.slane %v13428_v3, 1 }
 0x216   :  { %5397 = vmatprep.mubr.msk.f32.mxu1 %vm9660_vm1, %v9674_v53  ;;  %6374 = vmatpush1.bf16.msra.mxu1 %v6373_v0  ;;  %v9693_v42 = vsel %vm13645_vm11, %v1471_v49, %v1472_v22  ;;  %v13646_v0 = vmov 0 }
 0x217   :  { %6375 = vmatprep.subr.bf16.mxu1 %v12926_v32  ;;  %5230 = vmatmul.mubr.msk.f32.gmra.mrb[124].mxu0 %vm1299_vm15, %v13641_v16  ;;  %v13647_v0 = vsel %vm9697_vm5, 4294967295, %v13646_v0  ;;  %vm13650_vm15 = vmmov %vm13644_vm10  ;;  %v13651_v16 = vld [vmem:[#allocation65_spill] sm:$0xff] }
 0x218   :  { %5231 = vmatprep.mubr.msk.f32.mxu0 %vm13644_vm10, %v13642_v43  ;;  %13648 = vst [vmem:[#allocation299_spill] sm:$0xff] %v13647_v0  ;;  %vm13654_vm10 = vmmov %vm13645_vm11  ;;  %v13992_v0 = vld [vmem:[#allocation231_spill] sm:$0xff] }
 0x219   :  { %3325 = vmatmul.mubr.f32.gmra.mrb[100].mxu1 %v13334_v63  ;;  %v13652_v63 = vld [vmem:[#allocation71_spill] sm:$0xff]  ;;  %v9711_v49 = vsel %vm13654_vm10, %v1472_v22, %v1473_v59  ;;  %v13659_v22 = vld [vmem:[#allocation69_spill] sm:$0xff] }
 0x21a   :  { %3329 = vmatprep.mubr.f32.mxu1 %v9693_v42  ;;  %6377 = vmatpush1.bf16.msra.mxu1 %v6376_v4  ;;  %vm13653_vm12 = vcmp.ge.s32.totalorder %v13652_v63, 1  ;;  %13655 = vst [vmem:[#allocation300_spill] sm:$0xff] %v9711_v49  ;;  %v833_v4 = vand.u32 15, %v8851_v2  ;;  %v1475_v63 = vrot.slane %v8561_v29, 1  ;;  %v13664_v2 = vmov 0 }
 0x21b   :  { %6378 = vmatprep.subr.bf16.mxu1 %v12926_v32  ;;  %5232 = vmatmul.mubr.msk.f32.gmra.mrb[126].mxu0 %vm13650_vm15, %v13649_v6  ;;  %vm13657_vm11 = vmmov %vm13653_vm12  ;;  %v13660_v6 = vld [vmem:[#allocation72_spill] sm:$0xff] }
 0x21c   :  { %5233 = vmatprep.mubr.msk.f32.mxu0 %vm13653_vm12, %v13651_v16  ;;  %vm1301_vm13 = vmand %vm13657_vm11, %vm7719_vm0  ;;  %vm13661_vm15 = vcmp.ge.s32.totalorder %v13660_v6, 1  ;;  %vm13671_vm11 = vcmp.ge.s32.totalorder %v13670_v10, 1  ;;  %v2413_v6 = vld [vmem:[#allocation2 + $0x3b8] sm:$0xff]  ;;  %v1477_v10 = vrot.slane %v8652_v51, 1 }
 0x21d   :  { %3330 = vmatmul.mubr.f32.gmra.mrb[102].mxu1 %v8320_v11  ;;  %vm13662_vm12 = vmmov %vm13654_vm10  ;;  %vm9734_vm10 = vcmp.lt.s32.totalorder %v833_v4, 15  ;;  %v1476_v4 = vrot.slane %v8526_v5, 1  ;;  %v2412_v11 = vld [vmem:[#allocation2 + $0x3b0] sm:$0xff] }
 0x21e   :  { %5398 = vmatprep.mubr.msk.f32.mxu1 %vm9697_vm5, %v9711_v49  ;;  %6380 = vmatpush1.bf16.msra.mxu1 %v6379_v60  ;;  %v9730_v61 = vsel %vm13662_vm12, %v1473_v59, %v1474_v46  ;;  %v13665_v2 = vsel %vm9734_vm10, 4294967295, %v13664_v2  ;;  %v13667_v60 = vld [vmem:[#allocation82_spill] sm:$0xff]  ;;  %vm13676_vm0 = vmmov %vm13671_vm11  ;;  %v13679_v49 = vld [vmem:[#allocation79_spill] sm:$0xff] }
 0x21f   :  { %6381 = vmatprep.subr.bf16.mxu1 %v12926_v32  ;;  %5234 = vmatmul.mubr.msk.f32.gmra.mrb[128].mxu0 %vm1301_vm13, %v13658_v28  ;;  %13663 = vst [vmem:[#allocation301_spill] sm:$0xff] %v9730_v61  ;;  %13666 = vst [vmem:[#allocation302_spill] sm:$0xff] %v13665_v2  ;;  %v13669_v28 = vld [vmem:[#allocation75_spill] sm:$0xff] }
 0x220   :  { %5235 = vmatprep.mubr.msk.f32.mxu0 %vm13661_vm15, %v13659_v22  ;;  %vm13668_vm13 = vmmov %vm13661_vm15  ;;  %v14076_v8 = vld [vmem:[#allocation299_spill] sm:$0xff] }
 0x221   :  { %3335 = vmatmul.mubr.f32.gmra.mrb[104].mxu1 %v13394_v20  ;;  %vm13672_vm15 = vmmov %vm13662_vm12  ;;  %v13674_v20 = vld [vmem:[#allocation84_spill] sm:$0xff] }
 0x222   :  { %3339 = vmatprep.mubr.f32.mxu1 %v9730_v61  ;;  %v9747_v59 = vsel %vm13672_vm15, %v1474_v46, %v1475_v63  ;;  %vm13675_vm12 = vnez %v13674_v20  ;;  %v13677_v61 = vld [vmem:[#allocation87_spill] sm:$0xff]  ;;  %v13678_v46 = vld [vmem:[#allocation81_spill] sm:$0xff] }
 0x223   :  { %5236 = vmatmul.mubr.msk.f32.gmra.mrb[130].mxu0 %vm13668_vm13, %v13667_v60  ;;  %13673 = vst [vmem:[#allocation303_spill] sm:$0xff] %v9747_v59  ;;  %vm1303_vm9 = vmand %vm13676_vm0, %vm13675_vm12  ;;  %v6382_v60 = vpack.c.bf16 %v2413_v6, %v2412_v11  ;;  %vm13680_vm13 = vcmp.ge.s32.totalorder %v13679_v49, 1  ;;  %v13683_v11 = vmov 0  ;;  %v13688_v6 = vld [vmem:[#allocation86_spill] sm:$0xff]  ;;  %v13696_v49 = vld [vmem:[#allocation103_spill] sm:$0xff] }
 0x224   :  { %5237 = vmatprep.mubr.msk.f32.mxu0 %vm13671_vm11, %v13669_v28  ;;  %vm13681_vm0 = vmmov %vm13672_vm15 }
 0x225   :  { %3340 = vmatmul.mubr.f32.gmra.mrb[106].mxu1 %v8496_v1  ;;  %v835_v1 = vand.u32 15, %v9005_v56  ;;  %v9765_v20 = vsel %vm13681_vm0, %v1475_v63, %v1476_v4  ;;  %v13686_v56 = vld [vmem:[#allocation94_spill] sm:$0xff] }
 0x226   :  { %5399 = vmatprep.mubr.msk.f32.mxu1 %vm9734_vm10, %v9747_v59  ;;  %6383 = vmatpush1.bf16.msra.mxu1 %v6382_v60  ;;  %13682 = vst [vmem:[#allocation304_spill] sm:$0xff] %v9765_v20  ;;  %v13689_v60 = vld [vmem:[#allocation83_spill] sm:$0xff]  ;;  %v13716_v59 = vld [vmem:[#allocation92_spill] sm:$0xff] }
 0x227   :  { %5238 = vmatmul.mubr.msk.f32.gmra.mrb[132].mxu0 %vm1303_vm9, %v13677_v61  ;;  %6384 = vmatprep.subr.bf16.mxu1 %v12926_v32  ;;  %vm9770_vm11 = vcmp.lt.s32.totalorder %v835_v1, 15  ;;  %vm13687_vm9 = vmmov %vm13680_vm13  ;;  %vm13690_vm15 = vcmp.ge.s32.totalorder %v13689_v60, 1  ;;  %v13693_v61 = vld [vmem:[#allocation96_spill] sm:$0xff]  ;;  %v1478_v1 = vrot.slane %v8644_v44, 1  ;;  %v13702_v60 = vmov 0 }
 0x228   :  { %5239 = vmatprep.mubr.msk.f32.mxu0 %vm13680_vm13, %v13678_v46  ;;  %v13684_v11 = vsel %vm9770_vm11, 4294967295, %v13683_v11  ;;  %vm13691_vm13 = vmmov %vm13681_vm0  ;;  %vm13694_vm0 = vnez %v13693_v61  ;;  %v1479_v61 = vrot.slane %v9349_v41, 1 }
 0x229   :  { %3345 = vmatmul.mubr.f32.gmra.mrb[108].mxu1 %v13428_v3  ;;  %13685 = vst [vmem:[#allocation305_spill] sm:$0xff] %v13684_v11  ;;  %v9783_v63 = vsel %vm13691_vm13, %v1476_v4, %v1477_v10  ;;  %vm13695_vm12 = vmmov %vm13690_vm15  ;;  %v13698_v3 = vld [vmem:[#allocation88_spill] sm:$0xff] }
 0x22a   :  { %3349 = vmatprep.mubr.f32.mxu1 %v9765_v20  ;;  %13692 = vst [vmem:[#allocation306_spill] sm:$0xff] %v9783_v63  ;;  %vm1305_vm10 = vmand %vm13695_vm12, %vm13694_vm0  ;;  %v13714_v20 = vld [vmem:[#allocation119_spill] sm:$0xff] }
 0x22b   :  { %5240 = vmatmul.mubr.msk.f32.gmra.mrb[134].mxu0 %vm13687_vm9, %v13686_v56  ;;  %v837_v56 = vand.u32 15, %v9154_v45  ;;  %vm13699_vm9 = vcmp.ge.s32.totalorder %v13698_v3, 1  ;;  %v13705_v45 = vld [vmem:[#allocation111_spill] sm:$0xff]  ;;  %v2415_v3 = vld [vmem:[#allocation2 + $0x3c8] sm:$0xff] }
 0x22c   :  { %5241 = vmatprep.mubr.msk.f32.mxu0 %vm13690_vm15, %v13688_v6  ;;  %vm13700_vm15 = vmmov %vm13691_vm13 }
 0x22d   :  { %3350 = vmatmul.mubr.f32.gmra.mrb[110].mxu1 %v8561_v29  ;;  %v13697_v29 = vld [vmem:[#allocation93_spill] sm:$0xff]  ;;  %v9801_v4 = vsel %vm13700_vm15, %v1477_v10, %v1478_v1  ;;  %vm9805_vm12 = vcmp.lt.s32.totalorder %v837_v56, 15  ;;  %v1480_v56 = vrot.slane %v9404_v57, 1 }
 0x22e   :  { %5400 = vmatprep.mubr.msk.f32.mxu1 %vm9770_vm11, %v9783_v63  ;;  %13701 = vst [vmem:[#allocation307_spill] sm:$0xff] %v9801_v4  ;;  %v13703_v60 = vsel %vm9805_vm12, 4294967295, %v13702_v60  ;;  %v13708_v63 = vld [vmem:[#allocation90_spill] sm:$0xff] }
 0x22f   :  { %5242 = vmatmul.mubr.msk.f32.gmra.mrb[136].mxu0 %vm1305_vm10, %v13696_v49  ;;  %13704 = vst [vmem:[#allocation308_spill] sm:$0xff] %v13703_v60  ;;  %vm13706_vm10 = vmmov %vm13699_vm9  ;;  %v13707_v49 = vld [vmem:[#allocation102_spill] sm:$0xff]  ;;  %vm13709_vm13 = vcmp.ge.s32.totalorder %v13708_v63, 1  ;;  %v1481_v63 = vrot.slane %v9461_v47, 1 }
 0x230   :  { %5243 = vmatprep.mubr.msk.f32.mxu0 %vm13699_vm9, %v13697_v29  ;;  %vm13710_vm9 = vmmov %vm13700_vm15 }
 0x231   :  { %3355 = vmatmul.mubr.f32.gmra.mrb[112].mxu1 %v8526_v5  ;;  %v9818_v10 = vsel %vm13710_vm9, %v1478_v1, %v1479_v61  ;;  %v13711_v5 = vld [vmem:[#allocation114_spill] sm:$0xff]  ;;  %vm13713_vm0 = vmmov %vm13709_vm13 }
 0x232   :  { %3359 = vmatprep.mubr.f32.mxu1 %v9801_v4  ;;  %vm13712_vm15 = vnez %v13711_v5  ;;  %v2414_v4 = vld [vmem:[#allocation2 + $0x3c0] sm:$0xff]  ;;  %v13715_v1 = vld [vmem:[#allocation110_spill] sm:$0xff] }
 0x233   :  { %5244 = vmatmul.mubr.msk.f32.gmra.mrb[138].mxu0 %vm13706_vm10, %v13705_v45  ;;  %vm1307_vm11 = vmand %vm13713_vm0, %vm13712_vm15  ;;  %v6385_v45 = vpack.c.bf16 %v2415_v3, %v2414_v4  ;;  %vm13717_vm10 = vcmp.ge.s32.totalorder %v13716_v59, 1  ;;  %v13719_v3 = vmov 0  ;;  %v13723_v4 = vld [vmem:[#allocation118_spill] sm:$0xff]  ;;  %v13732_v59 = vld [vmem:[#allocation127_spill] sm:$0xff] }
 0x234   :  { %5245 = vmatprep.mubr.msk.f32.mxu0 %vm13709_vm13, %v13707_v49  ;;  %vm13718_vm0 = vmmov %vm13710_vm9 }
 0x235   :  { %3360 = vmatmul.mubr.f32.gmra.mrb[114].mxu1 %v8652_v51  ;;  %v839_v51 = vand.u32 15, %v9243_v39  ;;  %v9836_v5 = vsel %vm13718_vm0, %v1479_v61, %v1480_v56  ;;  %v13721_v39 = vld [vmem:[#allocation128_spill] sm:$0xff] }
 0x236   :  { %5401 = vmatprep.mubr.msk.f32.mxu1 %vm9805_vm12, %v9818_v10  ;;  %6386 = vmatpush1.bf16.msra.mxu1 %v6385_v45  ;;  %v13724_v45 = vld [vmem:[#allocation95_spill] sm:$0xff] }
 0x237   :  { %5246 = vmatmul.mubr.msk.f32.gmra.mrb[140].mxu0 %vm1307_vm11, %v13714_v20  ;;  %6387 = vmatprep.subr.bf16.mxu1 %v12926_v32  ;;  %vm9841_vm13 = vcmp.lt.s32.totalorder %v839_v51, 15  ;;  %vm13722_vm11 = vmmov %vm13717_vm10  ;;  %vm13725_vm9 = vcmp.ge.s32.totalorder %v13724_v45, 1  ;;  %v13728_v20 = vld [vmem:[#allocation133_spill] sm:$0xff]  ;;  %v841_v51 = vand.u32 15, %v9339_v7  ;;  %v13738_v45 = vmov 0  ;;  %v13740_v7 = vld [vmem:[#allocation147_spill] sm:$0xff] }
 0x238   :  { %5247 = vmatprep.mubr.msk.f32.mxu0 %vm13717_vm10, %v13715_v1  ;;  %v13720_v3 = vsel %vm9841_vm13, 4294967295, %v13719_v3  ;;  %vm13726_vm10 = vmmov %vm13718_vm0  ;;  %vm13729_vm0 = vnez %v13728_v20 }
 0x239   :  { %3365 = vmatmul.mubr.f32.gmra.mrb[116].mxu1 %v8644_v44  ;;  %v9854_v61 = vsel %vm13726_vm10, %v1480_v56, %v1481_v63  ;;  %vm13730_vm15 = vmmov %vm13725_vm9  ;;  %v13733_v44 = vld [vmem:[#allocation98_spill] sm:$0xff]  ;;  %v13735_v56 = vrot.slane %v13572_v9, 1 }
 0x23a   :  { %3369 = vmatprep.mubr.f32.mxu1 %v9836_v5  ;;  %13727 = vst [vmem:[#allocation309_spill] sm:$0xff] %v9854_v61  ;;  %vm1309_vm12 = vmand %vm13730_vm15, %vm13729_vm0  ;;  %vm9876_vm15 = vcmp.lt.s32.totalorder %v841_v51, 15  ;;  %v2417_v51 = vld [vmem:[#allocation2 + $0x3d8] sm:$0xff] }
 0x23b   :  { %5248 = vmatmul.mubr.msk.f32.gmra.mrb[142].mxu0 %vm13722_vm11, %v13721_v39  ;;  %v13731_v39 = vld [vmem:[#allocation139_spill] sm:$0xff]  ;;  %vm13734_vm11 = vcmp.ge.s32.totalorder %v13733_v44, 1  ;;  %v13739_v45 = vsel %vm9876_vm15, 4294967295, %v13738_v45 }
 0x23c   :  { %5249 = vmatprep.mubr.msk.f32.mxu0 %vm13725_vm9, %v13723_v4  ;;  %vm13736_vm9 = vmmov %vm13726_vm10  ;;  %v13749_v44 = vld [vmem:[#allocation159_spill] sm:$0xff] }
 0x23d   :  { %3370 = vmatmul.mubr.f32.gmra.mrb[118].mxu1 %v9349_v41  ;;  %v9873_v20 = vsel %vm13736_vm9, %v1481_v63, %v13735_v56  ;;  %v13743_v41 = vld [vmem:[#allocation101_spill] sm:$0xff]  ;;  %v2416_v63 = vld [vmem:[#allocation2 + $0x3d0] sm:$0xff]  ;;  %v13748_v56 = vld [vmem:[#allocation40_spill] sm:$0xff] }
 0x23e   :  { %5402 = vmatprep.mubr.msk.f32.mxu1 %vm9841_vm13, %v9854_v61  ;;  %13737 = vst [vmem:[#allocation310_spill] sm:$0xff] %v9873_v20  ;;  %vm13744_vm10 = vcmp.ge.s32.totalorder %v13743_v41, 1  ;;  %v13751_v61 = vld [vmem:[#allocation113_spill] sm:$0xff] }
 0x23f   :  { %5250 = vmatmul.mubr.msk.f32.gmra.mrb[144].mxu0 %vm1309_vm12, %v13731_v39  ;;  %vm13741_vm12 = vmmov %vm13734_vm11  ;;  %v13742_v39 = vld [vmem:[#allocation138_spill] sm:$0xff]  ;;  %v13754_v41 = vld [vmem:[#allocation169_spill] sm:$0xff] }
 0x240   :  { %5251 = vmatprep.mubr.msk.f32.mxu0 %vm13734_vm11, %v13732_v59  ;;  %vm13747_vm9 = vmmov %vm13744_vm10 }
 0x241   :  { %3375 = vmatmul.mubr.f32.gmra.mrb[120].mxu1 %v9404_v57  ;;  %v13745_v57 = vld [vmem:[#allocation152_spill] sm:$0xff] }
 0x242   :  { %3379 = vmatprep.mubr.f32.mxu1 %v9873_v20  ;;  %vm13746_vm11 = vnez %v13745_v57  ;;  %v6388_v20 = vpack.c.bf16 %v2417_v51, %v2416_v63  ;;  %v13753_v57 = vld [vmem:[#allocation46_spill] sm:$0xff]  ;;  %v13762_v51 = vld [vmem:[#allocation33_spill] sm:$0xff] }
 0x243   :  { %5252 = vmatmul.mubr.msk.f32.gmra.mrb[146].mxu0 %vm13741_vm12, %v13740_v7  ;;  %vm1311_vm0 = vmand %vm13747_vm9, %vm13746_vm11  ;;  %v13750_v7 = vld [vmem:[#allocation146_spill] sm:$0xff]  ;;  %vm13752_vm12 = vcmp.ge.s32.totalorder %v13751_v61, 1  ;;  %vm13757_vm9 = vcmp.ge.s32.totalorder %v8091_v14, 1  ;;  %v13766_v61 = vld [vmem:[#allocation137_spill] sm:$0xff] }
 0x244   :  { %5253 = vmatprep.mubr.msk.f32.mxu0 %vm13744_vm10, %v13742_v39  ;;  %6389 = vmatpush1.bf16.msra.mxu1 %v6388_v20  ;;  %vm13755_vm10 = vmmov %vm13752_vm12  ;;  %v13758_v20 = vld [vmem:[#allocation173_spill] sm:$0xff]  ;;  %v13761_v63 = vld [vmem:[#allocation50_spill] sm:$0xff] }
 0x245   :  { %3380 = vmatmul.mubr.f32.gmra.mrb[122].mxu1 %v9461_v47  ;;  %6390 = vmatprep.subr.bf16.mxu1 %v12926_v32  ;;  %v13756_v47 = vld [vmem:[#allocation158_spill] sm:$0xff]  ;;  %v13773_v14 = vld [vmem:[#allocation188_spill] sm:$0xff] }
 0x246   :  { %5403 = vmatprep.mubr.msk.f32.mxu1 %vm9876_vm15, %v13748_v56  ;;  %vm13763_vm15 = vnez %v13762_v51  ;;  %v2419_v51 = vld [vmem:[#allocation2 + $0x3e8] sm:$0xff]  ;;  %v13819_v56 = vld [vmem:[#allocation219_spill] sm:$0xff] }
 0x247   :  { %5254 = vmatmul.mubr.msk.f32.gmra.mrb[148].mxu0 %vm1311_vm0, %v13749_v44  ;;  %vm13759_vm0 = vnez %v13758_v20  ;;  %v13764_v44 = vld [vmem:[#allocation177_spill] sm:$0xff]  ;;  %v13771_v20 = vld [vmem:[#allocation176_spill] sm:$0xff] }
 0x248   :  { %5255 = vmatprep.mubr.msk.f32.mxu0 %vm13752_vm12, %v13750_v7  ;;  %vm13760_vm12 = vmmov %vm13757_vm9 }
 0x249   :  { %3385 = vmatmul.mubr.f32.gmra.mrb[124].mxu1 %v13572_v9  ;;  %vm1313_vm11 = vmand %vm13760_vm12, %vm13759_vm0  ;;  %v13765_v9 = vld [vmem:[#allocation168_spill] sm:$0xff]  ;;  %vm13772_vm12 = vcmp.ge.s32.totalorder %v8278_v54, 1  ;;  %v13784_v54 = vld [vmem:[#allocation197_spill] sm:$0xff] }
 0x24a   :  { %3389 = vmatprep.mubr.f32.mxu1 %v13753_v57  ;;  %vm13775_vm0 = vmmov %vm13772_vm12  ;;  %v13781_v57 = vld [vmem:[#allocation21_spill] sm:$0xff] }
 0x24b   :  { %5256 = vmatmul.mubr.msk.f32.gmra.mrb[150].mxu0 %vm13755_vm10, %v13754_v41  ;;  %vm13767_vm10 = vcmp.ge.s32.totalorder %v13766_v61, 1  ;;  %v13768_v41 = vld [vmem:[#allocation57_spill] sm:$0xff] }
 0x24c   :  { %5257 = vmatprep.mubr.msk.f32.mxu0 %vm13757_vm9, %v13756_v47  ;;  %vm13770_vm9 = vmmov %vm13767_vm10  ;;  %v13779_v61 = vld [vmem:[#allocation189_spill] sm:$0xff] }
 0x24d   :  { %3390 = vmatmul.mubr.f32.gmra.mrb[126].mxu1 %v13582_v58  ;;  %v13769_v58 = vld [vmem:[#allocation100_spill] sm:$0xff] }
 0x24e   :  { %5404 = vmatprep.mubr.msk.f32.mxu1 %vm13763_vm15, %v13761_v63  ;;  %v13777_v63 = vld [vmem:[#allocation41_spill] sm:$0xff] }
 0x24f   :  { %5258 = vmatmul.mubr.msk.f32.gmra.mrb[152].mxu0 %vm1313_vm11, %v13764_v44  ;;  %vm13774_vm11 = vnez %v13773_v14  ;;  %v2418_v44 = vld [vmem:[#allocation2 + $0x3e0] sm:$0xff]  ;;  %v13783_v14 = vld [vmem:[#allocation67_spill] sm:$0xff] }
 0x250   :  { %5259 = vmatprep.mubr.msk.f32.mxu0 %vm13767_vm10, %v13765_v9  ;;  %vm1315_vm15 = vmand %vm13775_vm0, %vm13774_vm11  ;;  %vm13778_vm10 = vnez %v13777_v63  ;;  %v2423_v63 = vld [vmem:[#allocation2 + $0x408] sm:$0xff] }
 0x251   :  { %3395 = vmatmul.mubr.f32.gmra.mrb[0].mxu1 %v13592_v27  ;;  %v13776_v27 = vld [vmem:[#allocation63_spill] sm:$0xff] }
 0x252   :  { %3399 = vmatprep.mubr.f32.mxu1 %v13768_v41  ;;  %v6391_v41 = vpack.c.bf16 %v2419_v51, %v2418_v44  ;;  %v13786_v44 = vld [vmem:[#allocation97_spill] sm:$0xff]  ;;  %v13787_v51 = vld [vmem:[#allocation195_spill] sm:$0xff] }
 0x253   :  { %5260 = vmatmul.mubr.msk.f32.gmra.mrb[154].mxu0 %vm13770_vm9, %v13769_v58  ;;  %v13780_v58 = vld [vmem:[#allocation183_spill] sm:$0xff]  ;;  %vm13782_vm9 = vcmp.ge.s32.totalorder %v13781_v57, 1  ;;  %v13796_v57 = vld [vmem:[#allocation196_spill] sm:$0xff] }
 0x254   :  { %5261 = vmatprep.mubr.msk.f32.mxu0 %vm13772_vm12, %v13771_v20  ;;  %6392 = vmatpush1.bf16.msra.mxu1 %v6391_v41  ;;  %vm13785_vm0 = vmmov %vm13782_vm9  ;;  %v13789_v41 = vld [vmem:[#allocation199_spill] sm:$0xff] }
 0x255   :  { %3400 = vmatmul.mubr.f32.gmra.mrb[2].mxu1 %v13601_v48  ;;  %6393 = vmatprep.subr.bf16.mxu1 %v12926_v32  ;;  %v2422_v48 = vld [vmem:[#allocation2 + $0x400] sm:$0xff]  ;;  %vm13790_vm12 = vnez %v13789_v41  ;;  %v13799_v41 = vld [vmem:[#allocation80_spill] sm:$0xff] }
 0x256   :  { %5405 = vmatprep.mubr.msk.f32.mxu1 %vm13778_vm10, %v13776_v27  ;;  %v13792_v32 = vld [vmem:[#allocation73_spill] sm:$0xff]  ;;  %v13813_v27 = vld [vmem:[#allocation214_spill] sm:$0xff] }
 0x257   :  { %5262 = vmatmul.mubr.msk.f32.gmra.mrb[156].mxu0 %vm1315_vm15, %v13779_v61  ;;  %vm13788_vm15 = vcmp.ge.s32.totalorder %v13787_v51, 1  ;;  %v9953_v61 = vpack.c.bf16 %v2423_v63, %v2422_v48  ;;  %v13800_v51 = vld [vmem:[#allocation208_spill] sm:$0xff]  ;;  %v13802_v48 = vld [vmem:[#allocation105_spill] sm:$0xff]  ;;  %v13803_v63 = vld [vmem:[#allocation210_spill] sm:$0xff] }
 0x258   :  { %5263 = vmatprep.mubr.msk.f32.mxu0 %vm13782_vm9, %v13780_v58  ;;  %vm13791_vm9 = vmmov %vm13788_vm15 }
 0x259   :  { %3405 = vmatmul.mubr.f32.gmra.mrb[4].mxu1 %v13609_v35  ;;  %vm1317_vm11 = vmand %vm13791_vm9, %vm13790_vm12  ;;  %v13793_v35 = vld [vmem:[#allocation54_spill] sm:$0xff]  ;;  %6397 = vmatprep.subr.bf16.mxu0 %v9953_v61  ;;  %vm13804_vm9 = vcmp.ge.s32.totalorder %v13803_v63, 1  ;;  %v13816_v63 = vld [vmem:[#allocation125_spill] sm:$0xff] }
 0x25a   :  { %3409 = vmatprep.mubr.f32.mxu1 %v13783_v14  ;;  %vm13794_vm10 = vnez %v13793_v35  ;;  %v13797_v14 = vld [vmem:[#allocation203_spill] sm:$0xff]  ;;  %vm13807_vm12 = vmmov %vm13804_vm9  ;;  %v2421_v35 = vld [vmem:[#allocation2 + $0x3f8] sm:$0xff] }
 0x25b   :  { %5264 = vmatmul.mubr.msk.f32.gmra.mrb[158].mxu0 %vm13785_vm0, %v13784_v54  ;;  %v13795_v54 = vld [vmem:[#allocation201_spill] sm:$0xff]  ;;  %vm13798_vm0 = vcmp.ge.s32.totalorder %v13797_v14, 1  ;;  %v13811_v14 = vld [vmem:[#allocation115_spill] sm:$0xff] }
 0x25c   :  { %5265 = vmatprep.mubr.msk.f32.mxu0 %vm13788_vm15, %v13786_v44  ;;  %vm13801_vm15 = vmmov %vm13798_vm0 }
 0x25d   :  { %3410 = vmatmul.mubr.f32.gmra.mrb[6].mxu1 %v13618_v23  ;;  %v13805_v23 = vld [vmem:[#allocation211_spill] sm:$0xff] }
 0x25e   :  { %5406 = vmatprep.mubr.msk.f32.mxu1 %vm13794_vm10, %v13792_v32  ;;  %v13809_v32 = vld [vmem:[#allocation61_spill] sm:$0xff] }
 0x25f   :  { %5266 = vmatmul.mubr.msk.f32.gmra.mrb[160].mxu0 %vm1317_vm11, %v13795_v54  ;;  %vm13806_vm11 = vnez %v13805_v23  ;;  %v2420_v54 = vld [vmem:[#allocation2 + $0x3f0] sm:$0xff] }
 0x260   :  { %5267 = vmatprep.mubr.msk.f32.mxu0 %vm13798_vm0, %v13796_v57  ;;  %vm1319_vm10 = vmand %vm13807_vm12, %vm13806_vm11  ;;  %vm13810_vm0 = vnez %v13809_v32  ;;  %v13815_v23 = vld [vmem:[#allocation91_spill] sm:$0xff]  ;;  %v13965_v32 = vld [vmem:[#allocation209_spill] sm:$0xff] }
 0x261   :  { %3415 = vmatmul.mubr.f32.gmra.mrb[8].mxu1 %v13626_v40  ;;  %v13808_v40 = vld [vmem:[#allocation85_spill] sm:$0xff] }
 0x262   :  { %3419 = vmatprep.mubr.f32.mxu1 %v13799_v41  ;;  %v6394_v41 = vpack.c.bf16 %v2421_v35, %v2420_v54  ;;  %v13823_v35 = vld [vmem:[#allocation99_spill] sm:$0xff]  ;;  %v13833_v54 = vld [vmem:[#allocation122_spill] sm:$0xff] }
 0x263   :  { %5268 = vmatmul.mubr.msk.f32.gmra.mrb[162].mxu0 %vm13801_vm15, %v13800_v51  ;;  %v13812_v51 = vld [vmem:[#allocation207_spill] sm:$0xff]  ;;  %vm13814_vm15 = vcmp.ge.s32.totalorder %v13813_v27, 1  ;;  %v13828_v27 = vld [vmem:[#allocation224_spill] sm:$0xff] }
 0x264   :  { %5269 = vmatprep.mubr.msk.f32.mxu0 %vm13804_vm9, %v13802_v48  ;;  %6395 = vmatpush1.bf16.msra.mxu1 %v6394_v41  ;;  %vm13817_vm12 = vmmov %vm13814_vm15  ;;  %vm13820_vm9 = vcmp.ge.s32.totalorder %v13819_v56, 1  ;;  %v13824_v41 = vld [vmem:[#allocation68_spill] sm:$0xff]  ;;  %v13834_v56 = vld [vmem:[#allocation229_spill] sm:$0xff] }
 0x265   :  { %3420 = vmatmul.mubr.f32.gmra.mrb[10].mxu1 %v13635_v21  ;;  %v13818_v21 = vld [vmem:[#allocation27_spill] sm:$0xff] }
 0x266   :  { %5407 = vmatprep.mubr.msk.f32.mxu1 %vm13810_vm0, %v13808_v40  ;;  %v13976_v40 = vld [vmem:[#allocation225_spill] sm:$0xff] }
 0x267   :  { %5270 = vmatmul.mubr.msk.f32.gmra.mrb[164].mxu0 %vm1319_vm10, %v13811_v14  ;;  %vm13822_vm10 = vmmov %vm13820_vm9  ;;  %v13826_v14 = vld [vmem:[#allocation221_spill] sm:$0xff] }
 0x268   :  { %5271 = vmatprep.mubr.msk.f32.mxu0 %vm13814_vm15, %v13812_v51  ;;  %vm1321_vm11 = vmand %vm13822_vm10, %vm8801_vm7  ;;  %vm13825_vm15 = vnez %v13824_v41  ;;  %vm13835_vm10 = vcmp.ge.s32.totalorder %v13834_v56, 1  ;;  %v13848_v41 = vld [vmem:[#allocation132_spill] sm:$0xff]  ;;  %v13862_v56 = vld [vmem:[#allocation142_spill] sm:$0xff] }
 0x269   :  { %3425 = vmatmul.mubr.f32.gmra.mrb[12].mxu1 %v13642_v43  ;;  %v13827_v43 = vld [vmem:[#allocation216_spill] sm:$0xff] }
 0x26a   :  { %3429 = vmatprep.mubr.f32.mxu1 %v13815_v23  ;;  %v13970_v23 = vld [vmem:[#allocation15_spill] sm:$0xff] }
 0x26b   :  { %5272 = vmatmul.mubr.msk.f32.gmra.mrb[166].mxu0 %vm13817_vm12, %v13816_v63  ;;  %vm13829_vm12 = vcmp.ge.s32.totalorder %v13828_v27, 1  ;;  %v13830_v63 = vld [vmem:[#allocation108_spill] sm:$0xff] }
 0x26c   :  { %5273 = vmatprep.mubr.msk.f32.mxu0 %vm13820_vm9, %v13818_v21  ;;  %vm13832_vm9 = vmmov %vm13829_vm12  ;;  %v13843_v27 = vld [vmem:[#allocation236_spill] sm:$0xff] }
 0x26d   :  { %3430 = vmatmul.mubr.f32.gmra.mrb[14].mxu1 %v13651_v16  ;;  %v13831_v16 = vld [vmem:[#allocation136_spill] sm:$0xff] }
 0x26e   :  { %5408 = vmatprep.mubr.msk.f32.mxu1 %vm13825_vm15, %v13823_v35  ;;  %v13839_v35 = vld [vmem:[#allocation78_spill] sm:$0xff] }
 0x26f   :  { %5274 = vmatmul.mubr.msk.f32.gmra.mrb[168].mxu0 %vm1321_vm11, %v13826_v14  ;;  %vm13837_vm11 = vmmov %vm13835_vm10  ;;  %v13838_v14 = vld [vmem:[#allocation117_spill] sm:$0xff] }
 0x270   :  { %5275 = vmatprep.mubr.msk.f32.mxu0 %vm13829_vm12, %v13827_v43  ;;  %vm1323_vm7 = vmand %vm13837_vm11, %vm8903_vm6  ;;  %vm13840_vm12 = vnez %v13839_v35  ;;  %vm13849_vm11 = vcmp.ge.s32.totalorder %v9012_v62, 1  ;;  %v13853_v35 = vld [vmem:[#allocation89_spill] sm:$0xff]  ;;  %v13867_v62 = vld [vmem:[#allocation106_spill] sm:$0xff] }
 0x271   :  { %3435 = vmatmul.mubr.f32.gmra.mrb[16].mxu1 %v13659_v22  ;;  %v13841_v22 = vld [vmem:[#allocation230_spill] sm:$0xff] }
 0x272   :  { %3439 = vmatprep.mubr.f32.mxu1 %v13830_v63  ;;  %v13842_v63 = vld [vmem:[#allocation226_spill] sm:$0xff] }
 0x273   :  { %5276 = vmatmul.mubr.msk.f32.gmra.mrb[170].mxu0 %vm13832_vm9, %v13831_v16  ;;  %vm13844_vm9 = vcmp.ge.s32.totalorder %v13843_v27, 1  ;;  %v13845_v16 = vld [vmem:[#allocation124_spill] sm:$0xff]  ;;  %v13857_v27 = vld [vmem:[#allocation246_spill] sm:$0xff] }
 0x274   :  { %5277 = vmatprep.mubr.msk.f32.mxu0 %vm13835_vm10, %v13833_v54  ;;  %vm13847_vm10 = vmmov %vm13844_vm9 }
 0x275   :  { %3440 = vmatmul.mubr.f32.gmra.mrb[18].mxu1 %v13669_v28  ;;  %v13846_v28 = vld [vmem:[#allocation145_spill] sm:$0xff] }
 0x276   :  { %5409 = vmatprep.mubr.msk.f32.mxu1 %vm13840_vm12, %v13838_v14  ;;  %v13951_v14 = vld [vmem:[#allocation192_spill] sm:$0xff] }
 0x277   :  { %5278 = vmatmul.mubr.msk.f32.gmra.mrb[172].mxu0 %vm1323_vm7, %v13841_v22  ;;  %vm13851_vm7 = vmmov %vm13849_vm11  ;;  %v13852_v22 = vld [vmem:[#allocation135_spill] sm:$0xff] }
 0x278   :  { %5279 = vmatprep.mubr.msk.f32.mxu0 %vm13844_vm9, %v13842_v63  ;;  %vm1325_vm6 = vmand %vm13851_vm7, %vm9022_vm8  ;;  %vm13854_vm9 = vnez %v13853_v35  ;;  %vm13863_vm7 = vcmp.ge.s32.totalorder %v9161_v55, 1  ;;  %v13870_v35 = vld [vmem:[#allocation243_spill] sm:$0xff]  ;;  %v13877_v55 = vld [vmem:[#allocation265_spill] sm:$0xff] }
 0x279   :  { %3445 = vmatmul.mubr.f32.gmra.mrb[20].mxu1 %v13678_v46  ;;  %v13855_v46 = vld [vmem:[#allocation241_spill] sm:$0xff]  ;;  %vm13865_vm8 = vmmov %vm13863_vm7 }
 0x27a   :  { %3449 = vmatprep.mubr.f32.mxu1 %v13845_v16  ;;  %v13856_v16 = vld [vmem:[#allocation235_spill] sm:$0xff] }
 0x27b   :  { %5280 = vmatmul.mubr.msk.f32.gmra.mrb[174].mxu0 %vm13847_vm10, %v13846_v28  ;;  %vm13858_vm10 = vcmp.ge.s32.totalorder %v13857_v27, 1  ;;  %v13859_v28 = vld [vmem:[#allocation144_spill] sm:$0xff]  ;;  %v13881_v27 = vld [vmem:[#allocation123_spill] sm:$0xff] }
 0x27c   :  { %5281 = vmatprep.mubr.msk.f32.mxu0 %vm13849_vm11, %v13848_v41  ;;  %vm13861_vm11 = vmmov %vm13858_vm10 }
 0x27d   :  { %3450 = vmatmul.mubr.f32.gmra.mrb[22].mxu1 %v13688_v6  ;;  %v13860_v6 = vld [vmem:[#allocation157_spill] sm:$0xff] }
 0x27e   :  { %5410 = vmatprep.mubr.msk.f32.mxu1 %vm13854_vm9, %v13852_v22  ;;  %v13948_v22 = vld [vmem:[#allocation205_spill] sm:$0xff] }
 0x27f   :  { %5282 = vmatmul.mubr.msk.f32.gmra.mrb[176].mxu0 %vm1325_vm6, %v13855_v46  ;;  %vm13864_vm6 = vnez %v13444_v25  ;;  %v13866_v46 = vld [vmem:[#allocation156_spill] sm:$0xff]  ;;  %v13875_v25 = vld [vmem:[#allocation151_spill] sm:$0xff] }
 0x280   :  { %5283 = vmatprep.mubr.msk.f32.mxu0 %vm13858_vm10, %v13856_v16  ;;  %vm1327_vm9 = vmand %vm13865_vm8, %vm13864_vm6  ;;  %vm13868_vm10 = vnez %v13867_v62  ;;  %vm13876_vm8 = vcmp.ge.s32.totalorder %v9296_v13, 1  ;;  %v13884_v62 = vld [vmem:[#allocation253_spill] sm:$0xff] }
 0x281   :  { %3455 = vmatmul.mubr.f32.gmra.mrb[24].mxu1 %v13697_v29  ;;  %v13869_v29 = vld [vmem:[#allocation248_spill] sm:$0xff]  ;;  %vm13879_vm6 = vmmov %vm13876_vm8  ;;  %v13901_v13 = vld [vmem:[#allocation161_spill] sm:$0xff] }
 0x282   :  { %3459 = vmatprep.mubr.f32.mxu1 %v13859_v28  ;;  %v13945_v28 = vld [vmem:[#allocation202_spill] sm:$0xff] }
 0x283   :  { %5284 = vmatmul.mubr.msk.f32.gmra.mrb[178].mxu0 %vm13861_vm11, %v13860_v6  ;;  %vm13871_vm11 = vcmp.ge.s32.totalorder %v9211_v38, 1  ;;  %v13872_v6 = vld [vmem:[#allocation166_spill] sm:$0xff] }
 0x284   :  { %5285 = vmatprep.mubr.msk.f32.mxu0 %vm13863_vm7, %v13862_v56  ;;  %vm13874_vm7 = vmmov %vm13871_vm11 }
 0x285   :  { %3460 = vmatmul.mubr.f32.gmra.mrb[26].mxu1 %v13707_v49  ;;  %v13873_v49 = vld [vmem:[#allocation254_spill] sm:$0xff] }
 0x286   :  { %5411 = vmatprep.mubr.msk.f32.mxu1 %vm13868_vm10, %v13866_v46  ;;  %v13938_v46 = vld [vmem:[#allocation164_spill] sm:$0xff] }
 0x287   :  { %5286 = vmatmul.mubr.msk.f32.gmra.mrb[180].mxu0 %vm1327_vm9, %v13869_v29  ;;  %vm13878_vm9 = vnez %v13877_v55  ;;  %v13880_v29 = vld [vmem:[#allocation175_spill] sm:$0xff]  ;;  %v13892_v55 = vld [vmem:[#allocation22_spill] sm:$0xff] }
 0x288   :  { %5287 = vmatprep.mubr.msk.f32.mxu0 %vm13871_vm11, %v13870_v35  ;;  %vm1329_vm10 = vmand %vm13879_vm6, %vm13878_vm9  ;;  %vm13882_vm11 = vnez %v13881_v27  ;;  %vm13889_vm6 = vcmp.ge.s32.totalorder %v9380_v24, 1  ;;  %v2425_v24 = vld [vmem:[#allocation2 + $0x418] sm:$0xff]  ;;  %v2427_v27 = vld [vmem:[#allocation2 + $0x428] sm:$0xff] }
 0x289   :  { %3465 = vmatmul.mubr.f32.gmra.mrb[28].mxu1 %v13715_v1  ;;  %v13883_v1 = vld [vmem:[#allocation257_spill] sm:$0xff]  ;;  %vm13891_vm9 = vmmov %vm13889_vm6 }
 0x28a   :  { %3469 = vmatprep.mubr.f32.mxu1 %v13872_v6  ;;  %v13935_v6 = vld [vmem:[#allocation5_spill] sm:$0xff] }
 0x28b   :  { %5288 = vmatmul.mubr.msk.f32.gmra.mrb[182].mxu0 %vm13874_vm7, %v13873_v49  ;;  %vm13885_vm7 = vcmp.ge.s32.totalorder %v9304_v37, 1  ;;  %v13886_v49 = vld [vmem:[#allocation184_spill] sm:$0xff] }
 0x28c   :  { %5289 = vmatprep.mubr.msk.f32.mxu0 %vm13876_vm8, %v13875_v25  ;;  %vm13888_vm8 = vmmov %vm13885_vm7  ;;  %v13900_v37 = vld [vmem:[#allocation24_spill] sm:$0xff] }
 0x28d   :  { %3470 = vmatmul.mubr.f32.gmra.mrb[30].mxu1 %v13723_v4  ;;  %v13887_v4 = vld [vmem:[#allocation262_spill] sm:$0xff] }
 0x28e   :  { %5412 = vmatprep.mubr.msk.f32.mxu1 %vm13882_vm11, %v13880_v29  ;;  %v13919_v29 = vld [vmem:[#allocation178_spill] sm:$0xff] }
 0x28f   :  { %5290 = vmatmul.mubr.msk.f32.gmra.mrb[184].mxu0 %vm1329_vm10, %v13883_v1  ;;  %vm13890_vm10 = vnez %v13528_v18  ;;  %v13893_v1 = vld [vmem:[#allocation143_spill] sm:$0xff] }
 0x290   :  { %5291 = vmatprep.mubr.msk.f32.mxu0 %vm13885_vm7, %v13884_v62  ;;  %vm1331_vm11 = vmand %vm13891_vm9, %vm13890_vm10  ;;  %vm13894_vm7 = vnez %v13893_v1  ;;  %v2424_v18 = vld [vmem:[#allocation2 + $0x410] sm:$0xff]  ;;  %vm13902_vm9 = vnez %v13901_v13  ;;  %v13904_v1 = vld [vmem:[#allocation6_spill] sm:$0xff] }
 0x291   :  { %3475 = vmatmul.mubr.f32.gmra.mrb[32].mxu1 %v13732_v59  ;;  %v13895_v59 = vld [vmem:[#allocation267_spill] sm:$0xff]  ;;  %v14067_v13 = vld [vmem:[#allocation116_spill] sm:$0xff] }
 0x292   :  { %3479 = vmatprep.mubr.f32.mxu1 %v13886_v49  ;;  %v13918_v49 = vld [vmem:[#allocation150_spill] sm:$0xff] }
 0x293   :  { %5292 = vmatmul.mubr.msk.f32.gmra.mrb[186].mxu0 %vm13888_vm8, %v13887_v4  ;;  %vm13896_vm8 = vcmp.ge.s32.totalorder %v9396_v30, 1  ;;  %v13897_v4 = vld [vmem:[#allocation194_spill] sm:$0xff] }
 0x294   :  { %5293 = vmatprep.mubr.msk.f32.mxu0 %vm13889_vm6, %v9217_v34  ;;  %vm13899_vm6 = vmmov %vm13896_vm8 }
 0x295   :  { %3480 = vmatmul.mubr.f32.gmra.mrb[34].mxu1 %v13742_v39  ;;  %v13898_v39 = vld [vmem:[#allocation273_spill] sm:$0xff] }
 0x296   :  { %5413 = vmatprep.mubr.msk.f32.mxu1 %vm13894_vm7, %v13892_v55  ;;  %v13905_v55 = vld [vmem:[#allocation163_spill] sm:$0xff] }
 0x297   :  { %5294 = vmatmul.mubr.msk.f32.gmra.mrb[188].mxu0 %vm1331_vm11, %v13895_v59  ;;  %v13903_v59 = vld [vmem:[#allocation179_spill] sm:$0xff]  ;;  %vm13906_vm11 = vnez %v13905_v55  ;;  %v13913_v55 = vld [vmem:[#allocation126_spill] sm:$0xff] }
 0x298   :  { %5295 = vmatprep.mubr.msk.f32.mxu0 %vm13896_vm8, %v13518_v17  ;;  %v1524_v38 = vrot.slane %v13903_v59, 1  ;;  %vm13908_vm8 = vcmp.lt.s32.totalorder %v7406_v19, 7  ;;  %vm13914_vm10 = vcmp.ge.s32.totalorder %v13913_v55, 1 }
 0x299   :  { %3485 = vmatmul.mubr.f32.gmra.mrb[36].mxu1 %v13750_v7  ;;  %v13907_v7 = vrot.slane %v13546_v31, 1 }
 0x29a   :  { %3489 = vmatprep.mubr.f32.mxu1 %v13897_v4  ;;  %v13910_v4 = vld [vmem:[#allocation109_spill] sm:$0xff] }
 0x29b   :  { %5296 = vmatmul.mubr.msk.f32.gmra.mrb[190].mxu0 %vm13899_vm6, %v13898_v39  ;;  %v10120_v30 = vsel %vm13908_vm8, %v13907_v7, %v1524_v38  ;;  %v6400_v39 = vpack.c.bf16 %v2425_v24, %v2424_v18  ;;  %vm13911_vm6 = vcmp.ge.s32.totalorder %v13910_v4, 1  ;;  %v13916_v24 = vrot.slane %v7978_v15, 1  ;;  %v13927_v15 = vld [vmem:[#allocation140_spill] sm:$0xff] }
 0x29c   :  { %5297 = vmatprep.mubr.msk.f32.mxu0 %vm13902_vm9, %v13900_v37  ;;  %13909 = vst [vmem:[#allocation161_spill] sm:$0xff] %v10120_v30  ;;  %v2426_v37 = vld [vmem:[#allocation2 + $0x420] sm:$0xff] }
 0x29d   :  { %3490 = vmatmul.mubr.f32.gmra.mrb[38].mxu1 %v13756_v47  ;;  %v13912_v47 = vld [vmem:[#allocation149_spill] sm:$0xff]  ;;  %v10137_v18 = vsel %vm13908_vm8, %v1524_v38, %v13916_v24  ;;  %v6404_v7 = vpack.c.bf16 %v2427_v27, %v2426_v37  ;;  %v13924_v38 = vld [vmem:[#allocation134_spill] sm:$0xff] }
 0x29e   :  { %5414 = vmatprep.mubr.msk.f32.mxu1 %vm13906_vm11, %v13904_v1  ;;  %vm1655_vm11 = vmand %vm13914_vm10, %vm9497_vm3  ;;  %v13915_v1 = vld [vmem:[#allocation206_spill] sm:$0xff]  ;;  %13917 = vst [vmem:[#allocation109_spill] sm:$0xff] %v10137_v18  ;;  %vm13925_vm8 = vcmp.ge.s32.totalorder %v13924_v38, 1  ;;  %v2430_v37 = vld [vmem:[#allocation2 + $0x440] sm:$0xff] }
 0x29f   :  { %5298 = vmatmul.mubr.msk.f32.vlgmr.msra.gmra.mrb[64].mxu0 %vm13911_vm6, %v10120_v30  ;;  %vm13920_vm6 = vnez %v13919_v29  ;;  %v2431_v27 = vld [vmem:[#allocation2 + $0x448] sm:$0xff]  ;;  %v13926_v24 = vld [vmem:[#allocation153_spill] sm:$0xff] }
 0x2a0   :  { %2899 = vmatprep.mubr.f32.mxu0 %v13912_v47  ;;  %6399 = vmatpush3.bf16.msra.mxu0 %v9953_v61  ;;  %v2428_v47 = vld [vmem:[#allocation2 + $0x430] sm:$0xff]  ;;  %v13922_v61 = vld [vmem:[#allocation181_spill] sm:$0xff] }
 0x2a1   :  { %3495 = vmatmul.mubr.f32.gmra.mrb[40].mxu1 %v13765_v9  ;;  %6401 = vmatprep.subr.bf16.mxu0 %v6400_v39  ;;  %v2429_v9 = vld [vmem:[#allocation2 + $0x438] sm:$0xff]  ;;  %vm13923_vm10 = vnez %v13922_v61  ;;  %v13931_v61 = vld [vmem:[#allocation154_spill] sm:$0xff] }
 0x2a2   :  { %3499 = vmatprep.mubr.f32.mxu1 %v13915_v1  ;;  %v13921_v1 = vld [vmem:[#allocation8_spill] sm:$0xff]  ;;  %v6408_v19 = vpack.c.bf16 %v2429_v9, %v2428_v47  ;;  %v6412_v47 = vpack.c.bf16 %v2431_v27, %v2430_v37  ;;  %v13930_v9 = vld [vmem:[#allocation291_spill] sm:$0xff]  ;;  %v2434_v37 = vld [vmem:[#allocation2 + $0x460] sm:$0xff] }
 0x2a3   :  { %5299 = vmatmul.mubr.msk.f32.gmra.mrb[66].mxu0 %vm1655_vm11, %v10137_v18  ;;  %vm13928_vm11 = vcmp.ge.s32.totalorder %v13927_v15, 1  ;;  %v2435_v27 = vld [vmem:[#allocation2 + $0x468] sm:$0xff] }
 0x2a4   :  { %5300 = vmatprep.mubr.msk.f32.mxu0 %vm13920_vm6, %v13918_v49  ;;  %6403 = vmatpush3.bf16.msra.mxu0 %v6400_v39  ;;  %vm1657_vm7 = vmand %vm13928_vm11, %vm9543_vm4  ;;  %v2432_v39 = vld [vmem:[#allocation2 + $0x450] sm:$0xff]  ;;  %vm13939_vm11 = vcmp.ge.s32.totalorder %v13938_v46, 1 }
 0x2a5   :  { %3500 = vmatmul.mubr.f32.gmra.mrb[42].mxu1 %v13771_v20  ;;  %6405 = vmatprep.subr.bf16.mxu0 %v6404_v7  ;;  %v13929_v20 = vld [vmem:[#allocation9_spill] sm:$0xff] }
 0x2a6   :  { %5415 = vmatprep.mubr.msk.f32.mxu1 %vm13923_vm10, %v13921_v1  ;;  %v13932_v1 = vld [vmem:[#allocation23_spill] sm:$0xff]  ;;  %vm13936_vm10 = vnez %v13935_v6 }
 0x2a7   :  { %5301 = vmatmul.mubr.msk.f32.gmra.mrb[68].mxu0 %vm13925_vm8, %v9484_v52  ;;  %v2433_v52 = vld [vmem:[#allocation2 + $0x458] sm:$0xff]  ;;  %vm13933_vm8 = vnez %v13932_v1  ;;  %v13943_v6 = vld [vmem:[#allocation11_spill] sm:$0xff] }
 0x2a8   :  { %2909 = vmatprep.mubr.f32.mxu0 %v13926_v24  ;;  %6407 = vmatpush3.bf16.msra.mxu0 %v6404_v7  ;;  %v13937_v7 = vld [vmem:[#allocation120_spill] sm:$0xff] }
 0x2a9   :  { %3505 = vmatmul.mubr.f32.gmra.mrb[44].mxu1 %v13780_v58  ;;  %6409 = vmatprep.subr.bf16.mxu0 %v6408_v19  ;;  %v13934_v58 = vld [vmem:[#allocation10_spill] sm:$0xff] }
 0x2aa   :  { %3509 = vmatprep.mubr.f32.mxu1 %v13929_v20  ;;  %v6416_v20 = vpack.c.bf16 %v2433_v52, %v2432_v39  ;;  %v6420_v52 = vpack.c.bf16 %v2435_v27, %v2434_v37  ;;  %v2437_v39 = vld [vmem:[#allocation2 + $0x478] sm:$0xff]  ;;  %v13953_v37 = vld [vmem:[#allocation25_spill] sm:$0xff] }
 0x2ab   :  { %5302 = vmatmul.mubr.msk.f32.gmra.mrb[70].mxu0 %vm1657_vm7, %v13930_v9  ;;  %v13940_v9 = vld [vmem:[#allocation174_spill] sm:$0xff]  ;;  %v13954_v27 = vld [vmem:[#allocation200_spill] sm:$0xff] }
 0x2ac   :  { %5303 = vmatprep.mubr.msk.f32.mxu0 %vm13933_vm8, %v13931_v61  ;;  %6411 = vmatpush3.bf16.msra.mxu0 %v6408_v19  ;;  %v2436_v19 = vld [vmem:[#allocation2 + $0x470] sm:$0xff] }
 0x2ad   :  { %3510 = vmatmul.mubr.f32.gmra.mrb[46].mxu1 %v13786_v44  ;;  %6413 = vmatprep.subr.bf16.mxu0 %v6412_v47  ;;  %v13941_v44 = vld [vmem:[#allocation182_spill] sm:$0xff] }
 0x2ae   :  { %5416 = vmatprep.mubr.msk.f32.mxu1 %vm13936_vm10, %v13934_v58  ;;  %vm13942_vm7 = vcmp.ge.s32.totalorder %v13941_v44, 1  ;;  %v13944_v58 = vld [vmem:[#allocation185_spill] sm:$0xff]  ;;  %vm13949_vm10 = vnez %v13948_v22  ;;  %v13961_v22 = vld [vmem:[#allocation14_spill] sm:$0xff] }
 0x2af   :  { %5304 = vmatmul.mubr.msk.f32.gmra.mrb[72].mxu0 %vm13939_vm11, %v13937_v7  ;;  %vm1659_vm12 = vmand %vm13942_vm7, %vm9586_vm2  ;;  %vm13946_vm11 = vnez %v13945_v28  ;;  %vm13952_vm7 = vcmp.ge.s32.totalorder %v13951_v14, 1  ;;  %v14080_v28 = vld [vmem:[#allocation233_spill] sm:$0xff] }
 0x2b0   :  { %2919 = vmatprep.mubr.f32.mxu0 %v13940_v9  ;;  %6415 = vmatpush3.bf16.msra.mxu0 %v6412_v47  ;;  %v13950_v47 = vld [vmem:[#allocation162_spill] sm:$0xff] }
 0x2b1   :  { %3515 = vmatmul.mubr.f32.gmra.mrb[48].mxu1 %v13796_v57  ;;  %6417 = vmatprep.subr.bf16.mxu0 %v6416_v20  ;;  %v13947_v57 = vld [vmem:[#allocation12_spill] sm:$0xff] }
 0x2b2   :  { %3519 = vmatprep.mubr.f32.mxu1 %v13943_v6  ;;  %v6424_v6 = vpack.c.bf16 %v2437_v39, %v2436_v19  ;;  %v13958_v19 = vld [vmem:[#allocation220_spill] sm:$0xff] }
 0x2b3   :  { %5305 = vmatmul.mubr.msk.f32.gmra.mrb[74].mxu0 %vm1659_vm12, %v9557_v12  ;;  %vm13955_vm12 = vcmp.ge.s32.totalorder %v13954_v27, 1  ;;  %v13959_v39 = vld [vmem:[#allocation212_spill] sm:$0xff] }
 0x2b4   :  { %5306 = vmatprep.mubr.msk.f32.mxu0 %vm13946_vm11, %v13944_v58  ;;  %6419 = vmatpush3.bf16.msra.mxu0 %v6416_v20  ;;  %vm1661_vm15 = vmand %vm13955_vm12, %vm9623_vm14  ;;  %v13957_v20 = vld [vmem:[#allocation295_spill] sm:$0xff]  ;;  %vm13966_vm12 = vcmp.ge.s32.totalorder %v13965_v32, 1 }
 0x2b5   :  { %3520 = vmatmul.mubr.f32.gmra.mrb[50].mxu1 %v13802_v48  ;;  %6421 = vmatprep.subr.bf16.mxu0 %v6420_v52  ;;  %v13956_v48 = vld [vmem:[#allocation13_spill] sm:$0xff] }
 0x2b6   :  { %5417 = vmatprep.mubr.msk.f32.mxu1 %vm13949_vm10, %v13947_v57  ;;  %vm13960_vm10 = vnez %v13959_v39  ;;  %v13962_v57 = vld [vmem:[#allocation215_spill] sm:$0xff]  ;;  %v13979_v39 = vld [vmem:[#allocation217_spill] sm:$0xff] }
 0x2b7   :  { %5307 = vmatmul.mubr.msk.f32.gmra.mrb[76].mxu0 %vm13952_vm7, %v13950_v47  ;;  %vm13963_vm7 = vnez %v13962_v57  ;;  %v13972_v57 = vld [vmem:[#allocation232_spill] sm:$0xff] }
 0x2b8   :  { %2929 = vmatprep.mubr.f32.mxu0 %v13953_v37  ;;  %6423 = vmatpush3.bf16.msra.mxu0 %v6420_v52  ;;  %v13968_v52 = vld [vmem:[#allocation213_spill] sm:$0xff] }
 0x2b9   :  { %3525 = vmatmul.mubr.f32.gmra.mrb[52].mxu1 %v13812_v51  ;;  %6425 = vmatprep.subr.bf16.mxu0 %v6424_v6  ;;  %v13964_v51 = vld [vmem:[#allocation296_spill] sm:$0xff] }
 0x2ba   :  { %3529 = vmatprep.mubr.f32.mxu1 %v13956_v48  ;;  %v13967_v48 = vld [vmem:[#allocation228_spill] sm:$0xff] }
 0x2bb   :  { %5308 = vmatmul.mubr.msk.f32.gmra.mrb[78].mxu0 %vm1661_vm15, %v13957_v20  ;;  %vm13969_vm15 = vcmp.ge.s32.totalorder %v13968_v52, 1 }
 0x2bc   :  { %5309 = vmatprep.mubr.msk.f32.mxu0 %vm13960_vm10, %v13958_v19  ;;  %6427 = vmatpush3.bf16.msra.mxu0 %v6424_v6  ;;  %vm1663_vm0 = vmand %vm13969_vm15, %vm9660_vm1  ;;  %v13975_v6 = vld [vmem:[#allocation16_spill] sm:$0xff]  ;;  %vm13980_vm10 = vcmp.ge.s32.totalorder %v13979_v39, 1 }
 0x2bd   :  { %3530 = vmatmul.mubr.f32.gmra.mrb[54].mxu1 %v13818_v21  ;;  %v13971_v21 = vld [vmem:[#allocation297_spill] sm:$0xff] }
 0x2be   :  { %5418 = vmatprep.mubr.msk.f32.mxu1 %vm13963_vm7, %v13961_v22  ;;  %v13973_v22 = vld [vmem:[#allocation222_spill] sm:$0xff] }
 0x2bf   :  { %5310 = vmatmul.mubr.msk.f32.gmra.mrb[80].mxu0 %vm13966_vm12, %v13964_v51  ;;  %vm13974_vm7 = vnez %v13973_v22  ;;  %vm13977_vm12 = vnez %v13976_v40  ;;  %v13984_v22 = vld [vmem:[#allocation17_spill] sm:$0xff]  ;;  %v13986_v40 = vld [vmem:[#allocation234_spill] sm:$0xff] }
 0x2c0   :  { %2939 = vmatprep.mubr.f32.mxu0 %v13967_v48  ;;  %v13981_v48 = vld [vmem:[#allocation242_spill] sm:$0xff] }
 0x2c1   :  { %3535 = vmatmul.mubr.f32.gmra.mrb[56].mxu1 %v13827_v43  ;;  %v13978_v43 = vld [vmem:[#allocation298_spill] sm:$0xff] }
 0x2c2   :  { %3539 = vmatprep.mubr.f32.mxu1 %v13970_v23  ;;  %v13982_v23 = vld [vmem:[#allocation223_spill] sm:$0xff] }
 0x2c3   :  { %5311 = vmatmul.mubr.msk.f32.gmra.mrb[82].mxu0 %vm1663_vm0, %v13971_v21  ;;  %vm13983_vm0 = vcmp.ge.s32.totalorder %v13982_v23, 1 }
 0x2c4   :  { %5312 = vmatprep.mubr.msk.f32.mxu0 %vm13974_vm7, %v13972_v57  ;;  %vm1665_vm15 = vmand %vm13983_vm0, %vm9697_vm5  ;;  %v13989_v57 = vld [vmem:[#allocation237_spill] sm:$0xff]  ;;  %vm13993_vm0 = vcmp.ge.s32.totalorder %v13992_v0, 1 }
 0x2c5   :  { %3540 = vmatmul.mubr.f32.gmra.mrb[58].mxu1 %v13833_v54  ;;  %v13985_v54 = vld [vmem:[#allocation244_spill] sm:$0xff]  ;;  %v14008_v0 = vld [vmem:[#allocation301_spill] sm:$0xff] }
 0x2c6   :  { %5419 = vmatprep.mubr.msk.f32.mxu1 %vm13977_vm12, %v13975_v6  ;;  %vm13987_vm12 = vnez %v13986_v40  ;;  %v13988_v6 = vld [vmem:[#allocation256_spill] sm:$0xff]  ;;  %v13996_v40 = vld [vmem:[#allocation233_spill] sm:$0xff] }
 0x2c7   :  { %5313 = vmatmul.mubr.msk.f32.gmra.mrb[84].mxu0 %vm13980_vm10, %v13978_v43  ;;  %vm13990_vm10 = vnez %v13989_v57 }
 0x2c8   :  { %2949 = vmatprep.mubr.f32.mxu0 %v13981_v48 }
 0x2c9   :  { %3545 = vmatmul.mubr.f32.gmra.mrb[60].mxu1 %v13842_v63 }
 0x2ca   :  { %3549 = vmatprep.mubr.f32.mxu1 %v13984_v22  ;;  %v13994_v22 = vld [vmem:[#allocation251_spill] sm:$0xff] }
 0x2cb   :  { %5314 = vmatmul.mubr.msk.f32.gmra.mrb[86].mxu0 %vm1665_vm15, %v9674_v53  ;;  %vm13995_vm15 = vnez %v13665_v2 }
 0x2cc   :  { %5315 = vmatprep.mubr.msk.f32.mxu0 %vm13987_vm12, %v13985_v54  ;;  %vm13997_vm12 = vcmp.ge.s32.totalorder %v13996_v40, 1  ;;  %v14002_v54 = vld [vmem:[#allocation247_spill] sm:$0xff] }
 0x2cd   :  { %3550 = vmatmul.mubr.f32.gmra.mrb[62].mxu1 %v13848_v41  ;;  %vm1667_vm7 = vmand %vm13997_vm12, %vm13995_vm15  ;;  %v13998_v41 = vld [vmem:[#allocation19_spill] sm:$0xff] }
 0x2ce   :  { %5420 = vmatprep.mubr.msk.f32.mxu1 %vm13990_vm10, %v13988_v6  ;;  %v10237_v63 = vpop.f32.mrb[110].mxu0  ;;  %vm14003_vm10 = vnez %v14002_v54  ;;  %v14019_v54 = vld [vmem:[#allocation259_spill] sm:$0xff] }
 0x2cf   :  { %13991 = vst [vmem:[#allocation126_spill] sm:$0xff] %v10237_v63  ;;  %v2628_v48 = vpop.f32.mrb[111].mxu0  ;;  %5316 = vmatmul.mubr.msk.f32.gmra.mrb[88].mxu0 %vm13993_vm0, %v9693_v42  ;;  %v14000_v63 = vld [vmem:[#allocation300_spill] sm:$0xff] }
 0x2d0   :  { %2959 = vmatprep.mubr.f32.mxu0 %v13994_v22  ;;  %v14001_v48 = vld [vmem:[#allocation258_spill] sm:$0xff]  ;;  %v14004_v22 = vld [vmem:[#allocation20_spill] sm:$0xff] }
 0x2d1   :  { %3555 = vmatmul.mubr.f32.gmra.mrb[64].mxu1 %v13856_v16  ;;  %v14005_v16 = vld [vmem:[#allocation249_spill] sm:$0xff] }
 0x2d2   :  { %3559 = vmatprep.mubr.f32.mxu1 %v13998_v41  ;;  %v10249_v57 = vpop.f32.mrb[112].mxu0  ;;  %vm14006_vm0 = vnez %v14005_v16  ;;  %v14009_v41 = vld [vmem:[#allocation240_spill] sm:$0xff] }
 0x2d3   :  { %13999 = vst [vmem:[#allocation150_spill] sm:$0xff] %v10249_v57  ;;  %v2633_v6 = vpop.f32.mrb[113].mxu0  ;;  %5317 = vmatmul.mubr.msk.f32.gmra.mrb[90].mxu0 %vm1667_vm7, %v14000_v63  ;;  %vm14010_vm12 = vcmp.ge.s32.totalorder %v14009_v41, 1  ;;  %vm14012_vm7 = vnez %v13684_v11  ;;  %v14013_v57 = vld [vmem:[#allocation245_spill] sm:$0xff] }
 0x2d4   :  { %5318 = vmatprep.mubr.msk.f32.mxu0 %vm14003_vm10, %v14001_v48  ;;  %v14011_v6 = vld [vmem:[#allocation268_spill] sm:$0xff]  ;;  %vm14014_vm10 = vcmp.ge.s32.totalorder %v14013_v57, 1 }
 0x2d5   :  { %3560 = vmatmul.mubr.f32.gmra.mrb[66].mxu1 %v13862_v56  ;;  %vm1669_vm15 = vmand %vm14014_vm10, %vm14012_vm7  ;;  %v14015_v56 = vld [vmem:[#allocation272_spill] sm:$0xff] }
 0x2d6   :  { %5421 = vmatprep.mubr.msk.f32.mxu1 %vm14006_vm0, %v14004_v22  ;;  %v10259_v2 = vpop.f32.mrb[114].mxu0  ;;  %vm14020_vm0 = vnez %v14019_v54  ;;  %v14025_v57 = vld [vmem:[#allocation304_spill] sm:$0xff]  ;;  %v14036_v54 = vld [vmem:[#allocation269_spill] sm:$0xff] }
 0x2d7   :  { %14007 = vst [vmem:[#allocation178_spill] sm:$0xff] %v10259_v2  ;;  %v2638_v40 = vpop.f32.mrb[115].mxu0  ;;  %5319 = vmatmul.mubr.msk.f32.gmra.mrb[92].mxu0 %vm14010_vm12, %v14008_v0  ;;  %v14017_v2 = vld [vmem:[#allocation303_spill] sm:$0xff] }
 0x2d8   :  { %2969 = vmatprep.mubr.f32.mxu0 %v14011_v6  ;;  %v14018_v40 = vld [vmem:[#allocation274_spill] sm:$0xff]  ;;  %v14021_v6 = vld [vmem:[#allocation279_spill] sm:$0xff] }
 0x2d9   :  { %3565 = vmatmul.mubr.f32.gmra.mrb[68].mxu1 %v13870_v35  ;;  %v14022_v35 = vld [vmem:[#allocation261_spill] sm:$0xff] }
 0x2da   :  { %3569 = vmatprep.mubr.f32.mxu1 %v14015_v56  ;;  %v10271_v16 = vpop.f32.mrb[116].mxu0  ;;  %vm14023_vm12 = vnez %v14022_v35  ;;  %v14026_v56 = vld [vmem:[#allocation167_spill] sm:$0xff] }
 0x2db   :  { %14016 = vst [vmem:[#allocation134_spill] sm:$0xff] %v10271_v16  ;;  %v2643_v22 = vpop.f32.mrb[117].mxu0  ;;  %5320 = vmatmul.mubr.msk.f32.gmra.mrb[94].mxu0 %vm1669_vm15, %v14017_v2  ;;  %vm14027_vm10 = vcmp.ge.s32.totalorder %v14026_v56, 1  ;;  %vm14029_vm15 = vnez %v13703_v60  ;;  %v14030_v16 = vld [vmem:[#allocation260_spill] sm:$0xff] }
 0x2dc   :  { %5321 = vmatprep.mubr.msk.f32.mxu0 %vm14020_vm0, %v14018_v40  ;;  %v14028_v22 = vld [vmem:[#allocation282_spill] sm:$0xff]  ;;  %vm14031_vm0 = vcmp.ge.s32.totalorder %v14030_v16, 1  ;;  %v14042_v16 = vld [vmem:[#allocation307_spill] sm:$0xff] }
 0x2dd   :  { %3570 = vmatmul.mubr.f32.gmra.mrb[70].mxu1 %v13875_v25  ;;  %vm1671_vm7 = vmand %vm14031_vm0, %vm14029_vm15  ;;  %v14032_v25 = vld [vmem:[#allocation284_spill] sm:$0xff] }
 0x2de   :  { %5422 = vmatprep.mubr.msk.f32.mxu1 %vm14023_vm12, %v14021_v6  ;;  %v10281_v48 = vpop.f32.mrb[118].mxu0  ;;  %vm14037_vm12 = vnez %v14036_v54 }
 0x2df   :  { %14024 = vst [vmem:[#allocation153_spill] sm:$0xff] %v10281_v48  ;;  %v2648_v11 = vpop.f32.mrb[119].mxu0  ;;  %5322 = vmatmul.mubr.msk.f32.gmra.mrb[96].mxu0 %vm14027_vm10, %v14025_v57  ;;  %v14034_v48 = vld [vmem:[#allocation306_spill] sm:$0xff] }
 0x2e0   :  { %2979 = vmatprep.mubr.f32.mxu0 %v14028_v22  ;;  %v14035_v11 = vld [vmem:[#allocation287_spill] sm:$0xff] }
 0x2e1   :  { %3575 = vmatmul.mubr.f32.gmra.mrb[72].mxu1 %v13884_v62  ;;  %v14038_v22 = vld [vmem:[#allocation107_spill] sm:$0xff] }
 0x2e2   :  { %3579 = vmatprep.mubr.f32.mxu1 %v14032_v25  ;;  %v10293_v35 = vpop.f32.mrb[120].mxu0  ;;  %v14039_v62 = vld [vmem:[#allocation271_spill] sm:$0xff] }
 0x2e3   :  { %14033 = vst [vmem:[#allocation140_spill] sm:$0xff] %v10293_v35  ;;  %v2653_v6 = vpop.f32.mrb[121].mxu0  ;;  %5323 = vmatmul.mubr.msk.f32.gmra.mrb[98].mxu0 %vm1671_vm7, %v14034_v48  ;;  %vm14040_vm10 = vnez %v14039_v62  ;;  %v14043_v25 = vld [vmem:[#allocation263_spill] sm:$0xff]  ;;  %v14046_v35 = vld [vmem:[#allocation270_spill] sm:$0xff] }
 0x2e4   :  { %5324 = vmatprep.mubr.msk.f32.mxu0 %vm14037_vm12, %v14035_v11  ;;  %vm14044_vm0 = vcmp.ge.s32.totalorder %v14043_v25, 1  ;;  %v14045_v6 = vld [vmem:[#allocation290_spill] sm:$0xff]  ;;  %vm14047_vm7 = vcmp.ge.s32.totalorder %v14046_v35, 1 }
 0x2e5   :  { %3580 = vmatmul.mubr.f32.gmra.mrb[74].mxu1 %v9217_v34  ;;  %vm1673_vm12 = vmand %vm14047_vm7, %vm9841_vm13  ;;  %vm1910_vm7 = vcmp.lt.s32.totalorder %v13910_v4, 15 }
 0x2e6   :  { %5423 = vmatprep.mubr.msk.f32.mxu1 %vm14040_vm10, %v14038_v22  ;;  %v10303_v40 = vpop.f32.mrb[122].mxu0 }
 0x2e7   :  { %14041 = vst [vmem:[#allocation154_spill] sm:$0xff] %v10303_v40  ;;  %v2658_v60 = vpop.f32.mrb[123].mxu0  ;;  %5325 = vmatmul.mubr.msk.f32.gmra.mrb[100].mxu0 %vm14044_vm0, %v14042_v16  ;;  %v14050_v40 = vld [vmem:[#allocation28_spill] sm:$0xff] }
 0x2e8   :  { %2989 = vmatprep.mubr.f32.mxu0 %v14045_v6  ;;  %v14049_v60 = vld [vmem:[#allocation292_spill] sm:$0xff]  ;;  %vm14051_vm10 = vnez %v14050_v40  ;;  %v14065_v40 = vld [vmem:[#allocation289_spill] sm:$0xff] }
 0x2e9   :  { %3585 = vmatmul.mubr.f32.gmra.mrb[76].mxu1 %v13518_v17  ;;  %v14052_v17 = vld [vmem:[#allocation283_spill] sm:$0xff]  ;;  %vm14066_vm5 = vnez %v14065_v40 }
 0x2ea   :  { %3589 = vmatprep.mubr.f32.mxu1 %v10120_v30  ;;  %v10315_v34 = vpop.f32.mrb[124].mxu0  ;;  %vm14053_vm0 = vnez %v14052_v17 }
 0x2eb   :  { %14048 = vst [vmem:[#allocation23_spill] sm:$0xff] %v10315_v34  ;;  %v2663_v62 = vpop.f32.mrb[125].mxu0  ;;  %5326 = vmatmul.mubr.msk.f32.gmra.mrb[102].mxu0 %vm1673_vm12, %v9818_v10  ;;  %v14055_v34 = vld [vmem:[#allocation276_spill] sm:$0xff]  ;;  %vm14058_vm12 = vnez %v13739_v45  ;;  %v14109_v45 = vld [vmem:[#allocation50_spill] sm:$0xff] }
 0x2ec   :  { %5327 = vmatprep.mubr.msk.f32.mxu0 %vm14051_vm10, %v14049_v60  ;;  %vm14056_vm13 = vcmp.ge.s32.totalorder %v14055_v34, 1  ;;  %v14057_v62 = vld [vmem:[#allocation293_spill] sm:$0xff]  ;;  %v14068_v60 = vld [vmem:[#allocation310_spill] sm:$0xff] }
 0x2ed   :  { %3590 = vmatmul.mubr.f32.gmra.mrb[78].mxu1 %v13546_v31  ;;  %v14059_v31 = vld [vmem:[#allocation281_spill] sm:$0xff] }
 0x2ee   :  { %5424 = vmatprep.mubr.msk.f32.mxu1 %vm14053_vm0, %v10137_v18  ;;  %v10325_v22 = vpop.f32.mrb[126].mxu0  ;;  %vm14060_vm10 = vcmp.ge.s32.totalorder %v14059_v31, 1  ;;  %vm1974_vm0 = vmand %vm1910_vm7, %vm13902_vm9  ;;  %v14064_v18 = vld [vmem:[#allocation294_spill] sm:$0xff]  ;;  %vm1912_vm9 = vcmp.lt.s32.totalorder %v13924_v38, 15  ;;  %v14088_v38 = vld [vmem:[#allocation232_spill] sm:$0xff] }
 0x2ef   :  { %14054 = vst [vmem:[#allocation120_spill] sm:$0xff] %v10325_v22  ;;  %v2668_v30 = vpop.f32.mrb[127].mxu0  ;;  %5328 = vmatmul.mubr.msk.f32.gmra.mrb[104].mxu0 %vm14056_vm13, %v9836_v5  ;;  %vm1675_vm15 = vmand %vm14060_vm10, %vm14058_vm12  ;;  %v14061_v22 = vld [vmem:[#allocation121_spill] sm:$0xff]  ;;  %vm1911_vm13 = vcmp.lt.s32.totalorder %v13913_v55, 15  ;;  %v14071_v55 = vld [vmem:[#allocation131_spill] sm:$0xff] }
 0x2f0   :  { %2999 = vmatprep.mubr.f32.mxu0 %v14057_v62 }
 0x2f1   :  { %3595 = vmatmul.mubr.f32.gmra.mrb[80].mxu1 %v13903_v59  ;;  %v14063_v59 = vld [vmem:[#allocation309_spill] sm:$0xff] }
 0x2f2   :  { %5425 = vmatprep.mubr.msk.f32.mxu1 %vm1910_vm7, %v14061_v22  ;;  %v10344_v30 = vpop.f32.mrb[128].mxu0 }
 0x2f3   :  { %14062 = vst [vmem:[#allocation164_spill] sm:$0xff] %v10344_v30  ;;  %v2673_v17 = vpop.f32.mrb[129].mxu0  ;;  %5329 = vmatmul.mubr.msk.f32.gmra.mrb[106].mxu0 %vm1675_vm15, %v14063_v59  ;;  %v14069_v30 = vld [vmem:[#allocation285_spill] sm:$0xff]  ;;  %vm2167_vm15 = vmand %vm1911_vm13, %vm9497_vm3 }
 0x2f4   :  { %5330 = vmatprep.mubr.msk.f32.mxu0 %vm14066_vm5, %v14064_v18  ;;  %vm14070_vm10 = vcmp.ge.s32.totalorder %v14069_v30, 1  ;;  %vm1913_vm5 = vcmp.lt.s32.totalorder %v13927_v15, 15 }
 0x2f5   :  { %5426 = vmatmul.mubr.msk.f32.vlgmr.msra.gmra.mrb[82].mxu1 %vm1974_vm0, %v13918_v49  ;;  %vm1976_vm0 = vmand %vm1912_vm9, %vm13920_vm6  ;;  %vm1915_vm6 = vcmp.lt.s32.totalorder %v13941_v44, 15  ;;  %v14081_v44 = vld [vmem:[#allocation228_spill] sm:$0xff] }
 0x2f6   :  { %5427 = vmatprep.mubr.msk.f32.mxu1 %vm1911_vm13, %v14067_v13  ;;  %v10353_v62 = vpop.f32.mrb[130].mxu0  ;;  %vm2169_vm3 = vmand %vm1913_vm5, %vm9543_vm4  ;;  %v14103_v13 = vld [vmem:[#allocation251_spill] sm:$0xff] }
 0x2f7   :  { %v2678_v22 = vpop.f32.mrb[131].mxu0  ;;  %5331 = vmatmul.mubr.msk.f32.gmra.mrb[108].mxu0 %vm14070_vm10, %v14068_v60  ;;  %vm2171_vm4 = vmand %vm1915_vm6, %vm9586_vm2  ;;  %vm1917_vm10 = vcmp.lt.s32.totalorder %v13954_v27, 15  ;;  %v14096_v27 = vld [vmem:[#allocation191_spill] sm:$0xff] }
 0x2f8   :  { %5976 = vmatprep.mubr.msk.f32.mxu0 %vm1910_vm7, %v13937_v7  ;;  %vm1914_vm7 = vcmp.lt.s32.totalorder %v13938_v46, 15  ;;  %vm2173_vm2 = vmand %vm1917_vm10, %vm9623_vm14  ;;  %v14106_v22 = vld [vmem:[#allocation234_spill] sm:$0xff] }
 0x2f9   :  { %5428 = vmatmul.mubr.msk.f32.gmra.mrb[84].mxu1 %vm1911_vm13, %v13926_v24  ;;  %vm1978_vm13 = vmand %vm1914_vm7, %vm13933_vm8  ;;  %vm1919_vm8 = vcmp.lt.s32.totalorder %v13968_v52, 15  ;;  %v14089_v24 = vld [vmem:[#allocation305_spill] sm:$0xff] }
 0x2fa   :  { %5429 = vmatprep.mubr.msk.f32.mxu1 %vm1912_vm9, %v14071_v55  ;;  %v10369_v17 = vpop.f32.mrb[132].mxu0  ;;  %vm2175_vm14 = vmand %vm1919_vm8, %vm9660_vm1  ;;  %vm14077_vm1 = vnez %v14076_v8  ;;  %v14117_v8 = vld [vmem:[#allocation63_spill] sm:$0xff] }
 0x2fb   :  { %v2683_v49 = vpop.f32.mrb[133].mxu0  ;;  %5977 = vmatmul.mubr.msk.f32.vlgmr.msra.gmra.mrb[192].mxu0 %vm2167_vm15, %v9557_v12 }
 0x2fc   :  { %5979 = vmatprep.mubr.msk.f32.mxu0 %vm1912_vm9, %v13950_v47  ;;  %vm1916_vm9 = vcmp.lt.s32.totalorder %v13951_v14, 15  ;;  %v14078_v14 = vld [vmem:[#allocation155_spill] sm:$0xff] }
 0x2fd   :  { %5430 = vmatmul.mubr.msk.f32.gmra.mrb[86].mxu1 %vm1976_vm0, %v13931_v61  ;;  %vm1980_vm15 = vmand %vm1916_vm9, %vm13946_vm11  ;;  %vm1920_vm0 = vcmp.lt.s32.totalorder %v13979_v39, 15  ;;  %v14101_v39 = vld [vmem:[#allocation186_spill] sm:$0xff] }
 0x2fe   :  { %5431 = vmatprep.mubr.msk.f32.mxu1 %vm1913_vm5, %v14072_v26  ;;  %v10379_v29 = vpop.f32.mrb[134].mxu0  ;;  %v14110_v26 = vld [vmem:[#allocation258_spill] sm:$0xff] }
 0x2ff   :  { %v2688_v15 = vpop.f32.mrb[135].mxu0  ;;  %5980 = vmatmul.mubr.msk.f32.gmra.mrb[194].mxu0 %vm2169_vm3, %v13957_v20  ;;  %vm1921_vm3 = vcmp.lt.s32.totalorder %v13982_v23, 15  ;;  %v14097_v20 = vld [vmem:[#allocation222_spill] sm:$0xff]  ;;  %v14108_v23 = vld [vmem:[#allocation29_spill] sm:$0xff] }
 0x300   :  { %5982 = vmatprep.mubr.msk.f32.mxu0 %vm1914_vm7, %v13964_v51  ;;  %vm2177_vm11 = vmand %vm1921_vm3, %vm14077_vm1  ;;  %v14084_v51 = vld [vmem:[#allocation171_spill] sm:$0xff]  ;;  %vm1926_vm1 = vcmp.lt.s32.totalorder %v14026_v56, 15  ;;  %v14111_v15 = vld [vmem:[#allocation57_spill] sm:$0xff] }
 0x301   :  { %5432 = vmatmul.mubr.msk.f32.gmra.mrb[88].mxu1 %vm1913_vm5, %v13940_v9  ;;  %vm1918_vm5 = vcmp.lt.s32.totalorder %v13965_v32, 15  ;;  %v14091_v32 = vld [vmem:[#allocation170_spill] sm:$0xff]  ;;  %v14092_v9 = vld [vmem:[#allocation260_spill] sm:$0xff] }
 0x302   :  { %5433 = vmatprep.mubr.msk.f32.mxu1 %vm1914_vm7, %v14073_v50  ;;  %v10393_v12 = vpop.f32.mrb[136].mxu0  ;;  %v14112_v50 = vld [vmem:[#allocation33_spill] sm:$0xff]  ;;  %v14149_v56 = vld [vmem:[#allocation280_spill] sm:$0xff] }
 0x303   :  { %v2693_v46 = vpop.f32.mrb[137].mxu0  ;;  %5983 = vmatmul.mubr.msk.f32.gmra.mrb[196].mxu0 %vm2171_vm4, %v13971_v21 }
 0x304   :  { %5985 = vmatprep.mubr.msk.f32.mxu0 %vm1916_vm9, %v13978_v43  ;;  %v14079_v43 = vld [vmem:[#allocation231_spill] sm:$0xff]  ;;  %v14114_v46 = vld [vmem:[#allocation193_spill] sm:$0xff] }
 0x305   :  { %5434 = vmatmul.mubr.msk.f32.gmra.mrb[90].mxu1 %vm1978_vm13, %v13944_v58  ;;  %vm1922_vm7 = vcmp.lt.s32.totalorder %v14079_v43, 15  ;;  %v14119_v43 = vld [vmem:[#allocation67_spill] sm:$0xff] }
 0x306   :  { %5435 = vmatprep.mubr.msk.f32.mxu1 %vm1915_vm6, %v14074_v33  ;;  %v10409_v21 = vpop.f32.mrb[138].mxu0  ;;  %v14115_v33 = vld [vmem:[#allocation35_spill] sm:$0xff] }
 0x307   :  { %v2698_v58 = vpop.f32.mrb[139].mxu0  ;;  %5986 = vmatmul.mubr.msk.f32.gmra.mrb[198].mxu0 %vm2173_vm2, %v9674_v53 }
 0x308   :  { %5988 = vmatprep.mubr.msk.f32.mxu0 %vm1918_vm5, %v9693_v42  ;;  %v14116_v58 = vld [vmem:[#allocation37_spill] sm:$0xff] }
 0x309   :  { %5436 = vmatmul.mubr.msk.f32.gmra.mrb[92].mxu1 %vm1915_vm6, %v13953_v37  ;;  %vm1923_vm6 = vcmp.lt.s32.totalorder %v14080_v28, 15  ;;  %v14093_v37 = vld [vmem:[#allocation242_spill] sm:$0xff]  ;;  %v14125_v28 = vld [vmem:[#allocation45_spill] sm:$0xff] }
 0x30a   :  { %5437 = vmatprep.mubr.msk.f32.mxu1 %vm1916_vm9, %v14075_v36  ;;  %v10431_v53 = vpop.f32.mrb[140].mxu0 }
 0x30b   :  { %v2703_v42 = vpop.f32.mrb[141].mxu0  ;;  %5989 = vmatmul.mubr.msk.f32.gmra.mrb[200].mxu0 %vm2175_vm14, %v14000_v63  ;;  %v14085_v63 = vld [vmem:[#allocation212_spill] sm:$0xff] }
 0x30c   :  { %5991 = vmatprep.mubr.msk.f32.mxu0 %vm1920_vm0, %v14008_v0  ;;  %v14082_v0 = vld [vmem:[#allocation302_spill] sm:$0xff]  ;;  %vm14086_vm9 = vnez %v14085_v63 }
 0x30d   :  { %5438 = vmatmul.mubr.msk.f32.gmra.mrb[94].mxu1 %vm1980_vm15, %v13958_v19  ;;  %vm14083_vm4 = vnez %v14082_v0  ;;  %vm1982_vm2 = vmand %vm1918_vm5, %vm14086_vm9  ;;  %vm14090_vm15 = vnez %v14089_v24  ;;  %vm14098_vm9 = vnez %v14097_v20  ;;  %v14099_v19 = vld [vmem:[#allocation244_spill] sm:$0xff]  ;;  %v14123_v0 = vld [vmem:[#allocation247_spill] sm:$0xff] }
 0x30e   :  { %5439 = vmatprep.mubr.msk.f32.mxu1 %vm1917_vm10, %v14078_v14  ;;  %v10447_v1 = vpop.f32.mrb[142].mxu0  ;;  %vm2179_vm13 = vmand %vm1923_vm6, %vm14083_vm4  ;;  %v14118_v14 = vld [vmem:[#allocation268_spill] sm:$0xff]  ;;  %v14128_v24 = vld [vmem:[#allocation274_spill] sm:$0xff] }
 0x30f   :  { %v2708_v4 = vpop.f32.mrb[143].mxu0  ;;  %5992 = vmatmul.mubr.msk.f32.gmra.mrb[202].mxu0 %vm2177_vm11, %v14017_v2  ;;  %v14087_v2 = vld [vmem:[#allocation245_spill] sm:$0xff]  ;;  %vm1927_vm11 = vcmp.lt.s32.totalorder %v14092_v9, 15 }
 0x310   :  { %5994 = vmatprep.mubr.msk.f32.mxu0 %vm1922_vm7, %v14025_v57  ;;  %vm1925_vm14 = vcmp.lt.s32.totalorder %v14087_v2, 15  ;;  %v14120_v4 = vld [vmem:[#allocation41_spill] sm:$0xff]  ;;  %v14143_v2 = vld [vmem:[#allocation60_spill] sm:$0xff] }
 0x311   :  { %5440 = vmatmul.mubr.msk.f32.gmra.mrb[96].mxu1 %vm1917_vm10, %v14081_v44  ;;  %vm1924_vm10 = vcmp.lt.s32.totalorder %v14009_v41, 15  ;;  %v14122_v44 = vld [vmem:[#allocation7_spill] sm:$0xff]  ;;  %v14132_v41 = vld [vmem:[#allocation204_spill] sm:$0xff]  ;;  %v14158_v9 = vld [vmem:[#allocation77_spill] sm:$0xff] }
 0x312   :  { %5441 = vmatprep.mubr.msk.f32.mxu1 %vm1918_vm5, %v14084_v51  ;;  %v10469_v61 = vpop.f32.mrb[144].mxu0  ;;  %vm2181_vm5 = vmand %vm1925_vm14, %vm14090_vm15  ;;  %vm1929_vm15 = vcmp.lt.s32.totalorder %v14046_v35, 15  ;;  %v14126_v51 = vld [vmem:[#allocation47_spill] sm:$0xff]  ;;  %v14178_v35 = vld [vmem:[#allocation90_spill] sm:$0xff] }
 0x313   :  { %v2713_v57 = vpop.f32.mrb[145].mxu0  ;;  %5995 = vmatmul.mubr.msk.f32.gmra.mrb[204].mxu0 %vm2179_vm13, %v14034_v48  ;;  %v14102_v48 = vld [vmem:[#allocation40_spill] sm:$0xff] }
 0x314   :  { %5997 = vmatprep.mubr.msk.f32.mxu0 %vm1924_vm10, %v14042_v16  ;;  %v14094_v16 = vld [vmem:[#allocation308_spill] sm:$0xff] }
 0x315   :  { %5442 = vmatmul.mubr.msk.f32.gmra.mrb[98].mxu1 %vm1982_vm2, %v14088_v38  ;;  %vm14095_vm4 = vnez %v14094_v16  ;;  %vm1984_vm2 = vmand %vm1920_vm0, %vm14098_vm9  ;;  %vm12850_vm9 = vcmp.lt.s32.totalorder %v14059_v31, 15  ;;  %v14127_v38 = vld [vmem:[#allocation73_spill] sm:$0xff]  ;;  %v14134_v16 = vld [vmem:[#allocation55_spill] sm:$0xff] }
 0x316   :  { %5443 = vmatprep.mubr.msk.f32.mxu1 %vm1919_vm8, %v14091_v32  ;;  %v10485_v7 = vpop.f32.mrb[146].mxu0  ;;  %vm2183_vm13 = vmand %vm1927_vm11, %vm14095_vm4  ;;  %vm1930_vm4 = vcmp.lt.s32.totalorder %v14055_v34, 15  ;;  %v14129_v32 = vld [vmem:[#allocation80_spill] sm:$0xff]  ;;  %v14181_v34 = vld [vmem:[#allocation175_spill] sm:$0xff] }
 0x317   :  { %v2718_v47 = vpop.f32.mrb[147].mxu0  ;;  %5998 = vmatmul.mubr.msk.f32.gmra.mrb[206].mxu0 %vm2181_vm5, %v9818_v10  ;;  %vm14100_vm5 = vnez %v13720_v3  ;;  %v14104_v3 = vld [vmem:[#allocation46_spill] sm:$0xff] }
 0x318   :  { %6000 = vmatprep.mubr.msk.f32.mxu0 %vm1926_vm1, %v9836_v5  ;;  %v14130_v47 = vld [vmem:[#allocation54_spill] sm:$0xff] }
 0x319   :  { %5444 = vmatmul.mubr.msk.f32.gmra.mrb[100].mxu1 %vm1919_vm8, %v14093_v37  ;;  %vm1928_vm8 = vcmp.lt.s32.totalorder %v14043_v25, 15  ;;  %v14133_v37 = vld [vmem:[#allocation51_spill] sm:$0xff] }
 0x31a   :  { %5445 = vmatprep.mubr.msk.f32.mxu1 %vm1920_vm0, %v14096_v27  ;;  %v10507_v10 = vpop.f32.mrb[148].mxu0  ;;  %vm2185_vm0 = vmand %vm1929_vm15, %vm14100_vm5  ;;  %v14161_v25 = vld [vmem:[#allocation135_spill] sm:$0xff] }
 0x31b   :  { %v2723_v5 = vpop.f32.mrb[149].mxu0  ;;  %6001 = vmatmul.mubr.msk.f32.gmra.mrb[208].mxu0 %vm2183_vm13, %v14063_v59  ;;  %vm2187_vm13 = vmand %vm12850_vm9, %vm14058_vm12  ;;  %vm14113_vm12 = vnez %v14112_v50  ;;  %vm12852_vm9 = vcmp.lt.s32.totalorder %v14116_v58, 15  ;;  %v14151_v50 = vld [vmem:[#allocation72_spill] sm:$0xff] }
 0x31c   :  { %6003 = vmatprep.mubr.msk.f32.mxu0 %vm1928_vm8, %v14068_v60  ;;  %v14105_v60 = vld [vmem:[#allocation198_spill] sm:$0xff]  ;;  %v14135_v5 = vld [vmem:[#allocation85_spill] sm:$0xff] }
 0x31d   :  { %5446 = vmatmul.mubr.msk.f32.gmra.mrb[102].mxu1 %vm1984_vm2, %v14099_v19  ;;  %vm14107_vm2 = vnez %v14106_v22  ;;  %v14136_v19 = vld [vmem:[#allocation282_spill] sm:$0xff] }
 0x31e   :  { %5447 = vmatprep.mubr.msk.f32.mxu1 %vm1921_vm3, %v14101_v39  ;;  %v10523_v59 = vpop.f32.mrb[150].mxu0  ;;  %vm1986_vm5 = vmand %vm1922_vm7, %vm14107_vm2  ;;  %vm1934_vm2 = vcmp.lt.s32.totalorder %v14115_v33, 15  ;;  %v14137_v39 = vld [vmem:[#allocation91_spill] sm:$0xff] }
 0x31f   :  { %v2728_v52 = vpop.f32.mrb[151].mxu0  ;;  %6004 = vmatmul.mubr.msk.f32.gmra.mrb[210].mxu0 %vm2185_vm0, %v14102_v48  ;;  %vm12851_vm0 = vcmp.lt.s32.totalorder %v14108_v23, 15  ;;  %v14140_v48 = vld [vmem:[#allocation26_spill] sm:$0xff] }
 0x320   :  { %6006 = vmatprep.mubr.msk.f32.mxu0 %vm1930_vm4, %v14104_v3  ;;  %v14138_v52 = vld [vmem:[#allocation61_spill] sm:$0xff]  ;;  %v14144_v3 = vld [vmem:[#allocation62_spill] sm:$0xff] }
 0x321   :  { %5448 = vmatmul.mubr.msk.f32.gmra.mrb[104].mxu1 %vm1921_vm3, %v14103_v13  ;;  %vm1932_vm3 = vcmp.lt.s32.totalorder %v14069_v30, 15  ;;  %v14141_v13 = vld [vmem:[#allocation259_spill] sm:$0xff]  ;;  %v14201_v30 = vld [vmem:[#allocation6_spill] sm:$0xff] }
 0x322   :  { %5449 = vmatprep.mubr.msk.f32.mxu1 %vm1922_vm7, %v14105_v60  ;;  %v10545_v55 = vpop.f32.mrb[152].mxu0  ;;  %vm2189_vm7 = vmand %vm12851_vm0, %vm14113_vm12  ;;  %vm14124_vm12 = vnez %v14123_v0  ;;  %vm12853_vm0 = vcmp.lt.s32.totalorder %v14126_v51, 15  ;;  %v14156_v0 = vld [vmem:[#allocation286_spill] sm:$0xff] }
 0x323   :  { %v2733_v49 = vpop.f32.mrb[153].mxu0  ;;  %6007 = vmatmul.mubr.msk.f32.gmra.mrb[212].mxu0 %vm2187_vm13, %v14109_v45  ;;  %vm14121_vm13 = vnez %v14120_v4  ;;  %v14146_v45 = vld [vmem:[#allocation108_spill] sm:$0xff] }
 0x324   :  { %6009 = vmatprep.mubr.msk.f32.mxu0 %vm1932_vm3, %v14111_v15  ;;  %v14145_v49 = vld [vmem:[#allocation99_spill] sm:$0xff]  ;;  %v14153_v4 = vld [vmem:[#allocation124_spill] sm:$0xff] }
 0x325   :  { %5450 = vmatmul.mubr.msk.f32.gmra.mrb[106].mxu1 %vm1986_vm5, %v14110_v26  ;;  %vm2191_vm5 = vmand %vm12852_vm9, %vm14121_vm13  ;;  %vm14131_vm13 = vnez %v14130_v47  ;;  %vm12854_vm9 = vcmp.lt.s32.totalorder %v14134_v16, 15  ;;  %v14147_v26 = vld [vmem:[#allocation68_spill] sm:$0xff]  ;;  %v14150_v15 = vld [vmem:[#allocation71_spill] sm:$0xff] }
 0x326   :  { %5451 = vmatprep.mubr.msk.f32.mxu1 %vm1923_vm6, %v14114_v46  ;;  %v10561_v36 = vpop.f32.mrb[154].mxu0  ;;  %v4435_v46 = vld [vmem:[%s12040_s3 + $0x8] sm:$0xff]  ;;  %v14162_v47 = vld [vmem:[#allocation292_spill] sm:$0xff] }
 0x327   :  { %v2738_v42 = vpop.f32.mrb[155].mxu0  ;;  %6010 = vmatmul.mubr.msk.f32.gmra.mrb[214].mxu0 %vm2189_vm7, %v14117_v8  ;;  %vm1988_vm7 = vmand %vm1924_vm10, %vm14124_vm12  ;;  %vm1938_vm12 = vcmp.lt.s32.totalorder %v14133_v37, 15  ;;  %v14272_v37 = vld [vmem:[#allocation69_spill] sm:$0xff] }
 0x328   :  { %6012 = vmatprep.mubr.msk.f32.mxu0 %vm1934_vm2, %v14119_v43  ;;  %v14152_v43 = vld [vmem:[#allocation117_spill] sm:$0xff] }
 0x329   :  { %5452 = vmatmul.mubr.msk.f32.gmra.mrb[108].mxu1 %vm1923_vm6, %v14118_v14  ;;  %vm1936_vm6 = vcmp.lt.s32.totalorder %v14125_v28, 15  ;;  %v14250_v28 = vld [vmem:[#allocation58_spill] sm:$0xff] }
 0x32a   :  { %5453 = vmatprep.mubr.msk.f32.mxu1 %vm1924_vm10, %v14122_v44  ;;  %v10583_v63 = vpop.f32.mrb[156].mxu0  ;;  %vm2193_vm10 = vmand %vm12853_vm0, %vm14131_vm13  ;;  %vm14142_vm13 = vnez %v14141_v13  ;;  %vm12855_vm0 = vcmp.lt.s32.totalorder %v14144_v3, 15  ;;  %v14154_v44 = vld [vmem:[#allocation78_spill] sm:$0xff] }
 0x32b   :  { %v2743_v57 = vpop.f32.mrb[157].mxu0  ;;  %6013 = vmatmul.mubr.msk.f32.gmra.mrb[216].mxu0 %vm2191_vm5, %v14127_v38  ;;  %vm14139_vm5 = vnez %v14138_v52  ;;  %v4437_v38 = vld [vmem:[%s12040_s3 + $0x18] sm:$0xff]  ;;  %v4438_v52 = vld [vmem:[%s12040_s3 + $0x20] sm:$0xff] }
 0x32c   :  { %6015 = vmatprep.mubr.msk.f32.mxu0 %vm1936_vm6, %v14129_v32  ;;  %v4436_v57 = vld [vmem:[%s12040_s3 + $0x10] sm:$0xff] }
 0x32d   :  { %5454 = vmatmul.mubr.msk.f32.gmra.mrb[110].mxu1 %vm1988_vm7, %v14128_v24  ;;  %vm2195_vm7 = vmand %vm12854_vm9, %vm14139_vm5  ;;  %vm14148_vm5 = vnez %v14147_v26  ;;  %vm12856_vm9 = vcmp.lt.s32.totalorder %v14151_v50, 15  ;;  %v14171_v26 = vld [vmem:[#allocation293_spill] sm:$0xff] }
 0x32e   :  { %5455 = vmatprep.mubr.msk.f32.mxu1 %vm1925_vm14, %v14132_v41  ;;  %v10599_v27 = vpop.f32.mrb[158].mxu0  ;;  %v14163_v41 = vld [vmem:[#allocation144_spill] sm:$0xff] }
 0x32f   :  { %v2748_v20 = vpop.f32.mrb[159].mxu0  ;;  %6016 = vmatmul.mubr.msk.f32.gmra.mrb[218].mxu0 %vm2193_vm10, %v14135_v5  ;;  %vm1990_vm10 = vmand %vm1926_vm1, %vm14142_vm13  ;;  %vm1942_vm13 = vcmp.lt.s32.totalorder %v14150_v15, 15  ;;  %v14166_v5 = vld [vmem:[#allocation30_spill] sm:$0xff]  ;;  %v14315_v15 = vld [vmem:[#allocation93_spill] sm:$0xff] }
 0x330   :  { %6018 = vmatprep.mubr.msk.f32.mxu0 %vm1938_vm12, %v14137_v39  ;;  %v14164_v20 = vld [vmem:[#allocation89_spill] sm:$0xff]  ;;  %v14168_v39 = vld [vmem:[#allocation88_spill] sm:$0xff] }
 0x331   :  { %5456 = vmatmul.mubr.msk.f32.gmra.mrb[112].mxu1 %vm1925_vm14, %v14136_v19  ;;  %vm1940_vm14 = vcmp.lt.s32.totalorder %v14143_v2, 15  ;;  %v14167_v19 = vld [vmem:[#allocation83_spill] sm:$0xff]  ;;  %v14294_v2 = vld [vmem:[#allocation81_spill] sm:$0xff] }
 0x332   :  { %5457 = vmatprep.mubr.msk.f32.mxu1 %vm1926_vm1, %v14140_v48  ;;  %v10621_v60 = vpop.f32.mrb[160].mxu0  ;;  %vm2197_vm1 = vmand %vm12855_vm0, %vm14148_vm5  ;;  %vm14157_vm5 = vnez %v14036_v54  ;;  %v6432_v54 = vpack.c.bf16 %v4437_v38, %v4436_v57  ;;  %v4439_v48 = vld [vmem:[%s12040_s3 + $0x28] sm:$0xff]  ;;  %v14182_v38 = vld [vmem:[#allocation184_spill] sm:$0xff] }
 0x333   :  { %v2753_v22 = vpop.f32.mrb[161].mxu0  ;;  %6019 = vmatmul.mubr.msk.f32.gmra.mrb[220].mxu0 %vm2195_vm7, %v14145_v49  ;;  %vm14155_vm7 = vnez %v14154_v44 }
 0x334   :  { %6021 = vmatprep.mubr.msk.f32.mxu0 %vm1940_vm14, %v14146_v45  ;;  %v6436_v22 = vpack.c.bf16 %v4439_v48, %v4438_v52  ;;  %v14170_v45 = vld [vmem:[#allocation156_spill] sm:$0xff]  ;;  %v14190_v48 = vld [vmem:[#allocation22_spill] sm:$0xff] }
 0x335   :  { %5458 = vmatmul.mubr.msk.f32.gmra.mrb[114].mxu1 %vm1990_vm10, %v14035_v11  ;;  %v4434_v11 = vld [vmem:[%s12040_s3] sm:$0xff]  ;;  %vm2199_vm10 = vmand %vm12856_vm9, %vm14155_vm7  ;;  %vm12858_vm9 = vcmp.lt.s32.totalorder %v14168_v39, 15 }
 0x336   :  { %5459 = vmatprep.mubr.msk.f32.mxu1 %vm1927_vm11, %v14149_v56  ;;  %v10643_v42 = vpop.f32.mrb[162].mxu0  ;;  %v6428_v8 = vpack.c.bf16 %v4435_v46, %v4434_v11  ;;  %v14172_v56 = vld [vmem:[#allocation166_spill] sm:$0xff]  ;;  %v14175_v46 = vld [vmem:[#allocation32_spill] sm:$0xff] }
 0x337   :  { %v2758_v14 = vpop.f32.mrb[163].mxu0  ;;  %6022 = vmatmul.mubr.msk.f32.gmra.mrb[222].mxu0 %vm2197_vm1, %v14152_v43  ;;  %vm1992_vm1 = vmand %vm1928_vm8, %vm14157_vm5  ;;  %vm12859_vm5 = vcmp.lt.s32.totalorder %v14167_v19, 15  ;;  %v14173_v11 = vld [vmem:[#allocation106_spill] sm:$0xff]  ;;  %v4440_v43 = vld [vmem:[%s12040_s3 + $0x30] sm:$0xff] }
 0x338   :  { %6024 = vmatprep.mubr.msk.f32.mxu0 %vm1942_vm13, %v14153_v4  ;;  %6429 = vmatprep.subr.bf16.mxu0 %v6428_v8  ;;  %v14179_v14 = vld [vmem:[#allocation92_spill] sm:$0xff] }
 0x339   :  { %5460 = vmatmul.mubr.msk.f32.gmra.mrb[116].mxu1 %vm1927_vm11, %v14045_v6  ;;  %vm1944_vm11 = vcmp.lt.s32.totalorder %v14158_v9, 15  ;;  %v14159_v6 = vld [vmem:[#allocation79_spill] sm:$0xff]  ;;  %6431 = vmatpush3.bf16.msra.mxu0 %v6428_v8  ;;  %v14176_v8 = vld [vmem:[#allocation28_spill] sm:$0xff] }
 0x33a   :  { %5461 = vmatprep.mubr.msk.f32.mxu1 %vm1928_vm8, %v14156_v0  ;;  %vm12857_vm0 = vcmp.lt.s32.totalorder %v14159_v6, 15  ;;  %v10671_v24 = vpop.f32.mrb[164].mxu0  ;;  %vm14165_vm8 = vnez %v14164_v20  ;;  %6433 = vmatprep.subr.bf16.mxu0 %v6432_v54  ;;  %v4441_v4 = vld [vmem:[%s12040_s3 + $0x38] sm:$0xff] }
 0x33b   :  { %14160 = vst [vmem:[#allocation174_spill] sm:$0xff] %v10671_v24  ;;  %v2763_v32 = vpop.f32.mrb[165].mxu0  ;;  %6025 = vmatmul.mubr.msk.f32.gmra.mrb[224].mxu0 %vm2199_vm10, %v14161_v25  ;;  %vm2201_vm7 = vmand %vm12857_vm0, %vm14165_vm8  ;;  %vm14174_vm10 = vnez %v14173_v11  ;;  %vm14177_vm8 = vnez %v14176_v8  ;;  %vm12860_vm0 = vcmp.lt.s32.totalorder %v14179_v14, 15  ;;  %v6440_v0 = vpack.c.bf16 %v4441_v4, %v4440_v43  ;;  %v14187_v25 = vld [vmem:[#allocation95_spill] sm:$0xff]  ;;  %v14330_v9 = vld [vmem:[#allocation96_spill] sm:$0xff] }
 0x33c   :  { %6027 = vmatprep.mubr.msk.f32.mxu0 %vm1944_vm11, %v14163_v41  ;;  %v14185_v32 = vld [vmem:[#allocation31_spill] sm:$0xff]  ;;  %v4443_v41 = vld [vmem:[%s12040_s3 + $0x48] sm:$0xff] }
 0x33d   :  { %5462 = vmatmul.mubr.msk.f32.gmra.mrb[118].mxu1 %vm1992_vm1, %v14162_v47  ;;  %6435 = vmatpush3.bf16.msra.mxu0 %v6432_v54  ;;  %vm2203_vm1 = vmand %vm12858_vm9, %vm14174_vm10  ;;  %v14183_v54 = vld [vmem:[#allocation123_spill] sm:$0xff]  ;;  %vm12862_vm9 = vcmp.lt.s32.totalorder %v14187_v25, 15  ;;  %v14188_v47 = vld [vmem:[#allocation98_spill] sm:$0xff] }
 0x33e   :  { %5463 = vmatprep.mubr.msk.f32.mxu1 %vm1929_vm15, %v14166_v5  ;;  %v10693_v13 = vpop.f32.mrb[166].mxu0  ;;  %6437 = vmatprep.subr.bf16.mxu0 %v6436_v22  ;;  %v4444_v11 = vld [vmem:[%s12040_s3 + $0x50] sm:$0xff] }
 0x33f   :  { %14169 = vst [vmem:[#allocation182_spill] sm:$0xff] %v10693_v13  ;;  %v2768_v49 = vpop.f32.mrb[167].mxu0  ;;  %6028 = vmatmul.mubr.msk.f32.gmra.mrb[226].mxu0 %vm2201_vm7, %v14170_v45  ;;  %vm1994_vm7 = vmand %vm1930_vm4, %vm14177_vm8  ;;  %vm14186_vm8 = vcmp.lt.s32.totalorder %v14059_v31, 15  ;;  %v14194_v45 = vld [vmem:[#allocation143_spill] sm:$0xff]  ;;  %v14198_v31 = vld [vmem:[#allocation101_spill] sm:$0xff] }
 0x340   :  { %6030 = vmatprep.mubr.msk.f32.mxu0 %vm12859_vm5, %v14172_v56  ;;  %vm12861_vm5 = vcmp.lt.s32.totalorder %v14188_v47, 15  ;;  %v14193_v49 = vld [vmem:[#allocation194_spill] sm:$0xff]  ;;  %v14199_v56 = vld [vmem:[#allocation113_spill] sm:$0xff]  ;;  %v14202_v4 = vld [vmem:[#allocation43_spill] sm:$0xff] }
 0x341   :  { %5464 = vmatmul.mubr.msk.f32.gmra.mrb[120].mxu1 %vm1929_vm15, %v14171_v26  ;;  %vm1948_vm15 = vcmp.lt.s32.totalorder %v14178_v35, 15  ;;  %6439 = vmatpush3.bf16.msra.mxu0 %v6436_v22  ;;  %v14191_v22 = vld [vmem:[#allocation39_spill] sm:$0xff]  ;;  %v14196_v26 = vld [vmem:[#allocation38_spill] sm:$0xff]  ;;  %v14348_v35 = vld [vmem:[#allocation133_spill] sm:$0xff] }
 0x342   :  { %5465 = vmatprep.mubr.msk.f32.mxu1 %vm1930_vm4, %v14175_v46  ;;  %v10721_v44 = vpop.f32.mrb[168].mxu0  ;;  %vm14184_vm4 = vnez %v14183_v54  ;;  %6441 = vmatprep.subr.bf16.mxu0 %v6440_v0  ;;  %v4445_v46 = vld [vmem:[%s12040_s3 + $0x58] sm:$0xff]  ;;  %v14209_v54 = vld [vmem:[#allocation137_spill] sm:$0xff] }
 0x343   :  { %14180 = vst [vmem:[#allocation185_spill] sm:$0xff] %v10721_v44  ;;  %v2773_v57 = vpop.f32.mrb[169].mxu0  ;;  %6031 = vmatmul.mubr.msk.f32.gmra.mrb[228].mxu0 %vm2203_vm1, %v14181_v34  ;;  %vm2205_vm10 = vmand %vm12860_vm0, %vm14184_vm4  ;;  %vm12863_vm0 = vcmp.lt.s32.totalorder %v14199_v56, 15  ;;  %v14206_v34 = vld [vmem:[#allocation36_spill] sm:$0xff] }
 0x344   :  { %6033 = vmatprep.mubr.msk.f32.mxu0 %vm1948_vm15, %v14182_v38  ;;  %vm14192_vm1 = vmmov %vm14186_vm8  ;;  %v14204_v57 = vld [vmem:[#allocation163_spill] sm:$0xff]  ;;  %v14208_v38 = vld [vmem:[#allocation130_spill] sm:$0xff] }
 0x345   :  { %5466 = vmatmul.mubr.msk.f32.gmra.mrb[122].mxu1 %vm1994_vm7, %v14064_v18  ;;  %v4442_v18 = vld [vmem:[%s12040_s3 + $0x40] sm:$0xff]  ;;  %6443 = vmatpush3.bf16.msra.mxu0 %v6440_v0  ;;  %vm14195_vm7 = vnez %v14194_v45  ;;  %v14203_v0 = vld [vmem:[#allocation206_spill] sm:$0xff] }
 0x346   :  { %5467 = vmatprep.mubr.msk.f32.mxu1 %vm14186_vm8, %v14185_v32  ;;  %v10743_v20 = vpop.f32.mrb[170].mxu0  ;;  %v6444_v5 = vpack.c.bf16 %v4443_v41, %v4442_v18  ;;  %vm2207_vm4 = vmand %vm12861_vm5, %vm14195_vm7  ;;  %vm14197_vm8 = vnez %v14065_v40  ;;  %v6448_v40 = vpack.c.bf16 %v4445_v46, %v4444_v11  ;;  %vm1954_vm5 = vcmp.lt.s32.totalorder %v14208_v38, 15  ;;  %v4446_v32 = vld [vmem:[%s12040_s3 + $0x60] sm:$0xff]  ;;  %v4447_v18 = vld [vmem:[%s12040_s3 + $0x68] sm:$0xff] }
 0x347   :  { %14189 = vst [vmem:[#allocation202_spill] sm:$0xff] %v10743_v20  ;;  %v2778_v52 = vpop.f32.mrb[171].mxu0  ;;  %6034 = vmatmul.mubr.msk.f32.gmra.mrb[230].mxu0 %vm2205_vm10, %v14190_v48  ;;  %vm1996_vm10 = vmand %vm1932_vm3, %vm14197_vm8  ;;  %vm14207_vm8 = vcmp.lt.s32.totalorder %v14108_v23, 15  ;;  %v14211_v48 = vld [vmem:[#allocation8_spill] sm:$0xff]  ;;  %v14215_v45 = vld [vmem:[#allocation181_spill] sm:$0xff] }
 0x348   :  { %6036 = vmatprep.mubr.msk.f32.mxu0 %vm12862_vm9, %v14193_v49  ;;  %6445 = vmatprep.subr.bf16.mxu0 %v6444_v5  ;;  %vm12864_vm9 = vcmp.lt.s32.totalorder %v14209_v54, 15  ;;  %v14214_v49 = vld [vmem:[#allocation9_spill] sm:$0xff]  ;;  %v14218_v11 = vld [vmem:[#allocation34_spill] sm:$0xff]  ;;  %v14374_v38 = vld [vmem:[#allocation188_spill] sm:$0xff] }
 0x349   :  { %5468 = vmatmul.mubr.msk.f32.gmra.mrb[124].mxu1 %vm14192_vm1, %v14191_v22  ;;  %vm1952_vm1 = vcmp.lt.s32.totalorder %v14198_v31, 15  ;;  %6447 = vmatpush3.bf16.msra.mxu0 %v6444_v5  ;;  %v6452_v5 = vpack.c.bf16 %v4447_v18, %v4446_v32  ;;  %v14212_v22 = vld [vmem:[#allocation49_spill] sm:$0xff]  ;;  %v14228_v18 = vld [vmem:[#allocation48_spill] sm:$0xff] }
 0x34a   :  { %5469 = vmatprep.mubr.msk.f32.mxu1 %vm1932_vm3, %v14196_v26  ;;  %v10771_v8 = vpop.f32.mrb[172].mxu0  ;;  %vm14205_vm3 = vnez %v14204_v57  ;;  %6449 = vmatprep.subr.bf16.mxu0 %v6448_v40  ;;  %v14217_v26 = vld [vmem:[#allocation42_spill] sm:$0xff]  ;;  %v14220_v23 = vld [vmem:[#allocation165_spill] sm:$0xff] }
 0x34b   :  { %14200 = vst [vmem:[#allocation162_spill] sm:$0xff] %v10771_v8  ;;  %v2783_v43 = vpop.f32.mrb[173].mxu0  ;;  %6037 = vmatmul.mubr.msk.f32.gmra.mrb[232].mxu0 %vm2207_vm4, %v14201_v30  ;;  %vm2209_vm7 = vmand %vm12863_vm0, %vm14205_vm3  ;;  %v14221_v46 = vld [vmem:[#allocation21_spill] sm:$0xff]  ;;  %v4449_v30 = vld [vmem:[%s12040_s3 + $0x78] sm:$0xff] }
 0x34c   :  { %6039 = vmatprep.mubr.msk.f32.mxu0 %vm1952_vm1, %v14203_v0  ;;  %vm14213_vm4 = vmmov %vm14207_vm8  ;;  %vm12865_vm0 = vcmp.lt.s32.totalorder %v14221_v46, 15  ;;  %v4448_v43 = vld [vmem:[%s12040_s3 + $0x70] sm:$0xff]  ;;  %v14223_v0 = vld [vmem:[#allocation10_spill] sm:$0xff] }
 0x34d   :  { %5470 = vmatmul.mubr.msk.f32.gmra.mrb[126].mxu1 %vm1996_vm10, %v14202_v4  ;;  %6451 = vmatpush3.bf16.msra.mxu0 %v6448_v40  ;;  %vm14216_vm10 = vnez %v14215_v45  ;;  %v6456_v33 = vpack.c.bf16 %v4449_v30, %v4448_v43  ;;  %v14224_v57 = vld [vmem:[#allocation53_spill] sm:$0xff]  ;;  %v14234_v45 = vld [vmem:[#allocation59_spill] sm:$0xff]  ;;  %v14239_v43 = vld [vmem:[#allocation52_spill] sm:$0xff] }
 0x34e   :  { %5471 = vmatprep.mubr.msk.f32.mxu1 %vm14207_vm8, %v14206_v34  ;;  %v10793_v41 = vpop.f32.mrb[174].mxu0  ;;  %vm2211_vm3 = vmand %vm12864_vm9, %vm14216_vm10  ;;  %vm14219_vm8 = vnez %v14218_v11  ;;  %6453 = vmatprep.subr.bf16.mxu0 %v6452_v5  ;;  %v14225_v34 = vld [vmem:[#allocation11_spill] sm:$0xff]  ;;  %v14226_v32 = vld [vmem:[#allocation5_spill] sm:$0xff] }
 0x34f   :  { %14210 = vst [vmem:[#allocation192_spill] sm:$0xff] %v10793_v41  ;;  %v2788_v52 = vpop.f32.mrb[175].mxu0  ;;  %6040 = vmatmul.mubr.msk.f32.gmra.mrb[234].mxu0 %vm2209_vm7, %v14211_v48  ;;  %vm1998_vm7 = vmand %vm1934_vm2, %vm14219_vm8  ;;  %vm14229_vm8 = vcmp.lt.s32.totalorder %v14116_v58, 15  ;;  %v14237_v11 = vld [vmem:[#allocation205_spill] sm:$0xff]  ;;  %v14240_v30 = vld [vmem:[#allocation44_spill] sm:$0xff] }
 0x350   :  { %6042 = vmatprep.mubr.msk.f32.mxu0 %vm1954_vm5, %v14214_v49  ;;  %v14231_v52 = vld [vmem:[#allocation203_spill] sm:$0xff]  ;;  %v14233_v49 = vld [vmem:[#allocation12_spill] sm:$0xff]  ;;  %v14242_v58 = vld [vmem:[#allocation210_spill] sm:$0xff] }
 0x351   :  { %5472 = vmatmul.mubr.msk.f32.gmra.mrb[0].mxu1 %vm14213_vm4, %v14212_v22  ;;  %vm12866_vm4 = vcmp.lt.s32.totalorder %v14220_v23, 15  ;;  %6455 = vmatpush3.bf16.msra.mxu0 %v6452_v5  ;;  %v14230_v5 = vld [vmem:[#allocation195_spill] sm:$0xff]  ;;  %v14365_v31 = vld [vmem:[#allocation173_spill] sm:$0xff] }
 0x352   :  { %5473 = vmatprep.mubr.msk.f32.mxu1 %vm1934_vm2, %v14217_v26  ;;  %v10815_v40 = vpop.f32.mrb[176].mxu0  ;;  %vm14227_vm2 = vnez %v14226_v32  ;;  %vm12868_vm9 = vcmp.lt.s32.totalorder %v14230_v5, 15  ;;  %6457 = vmatprep.subr.bf16.mxu0 %v6456_v33  ;;  %v14236_v26 = vld [vmem:[#allocation13_spill] sm:$0xff]  ;;  %v14247_v32 = vld [vmem:[#allocation15_spill] sm:$0xff] }
 0x353   :  { %14222 = vst [vmem:[#allocation25_spill] sm:$0xff] %v10815_v40  ;;  %v2793_v4 = vpop.f32.mrb[177].mxu0  ;;  %6043 = vmatmul.mubr.msk.f32.gmra.mrb[236].mxu0 %vm2211_vm3, %v14223_v0  ;;  %vm2213_vm10 = vmand %vm12865_vm0, %vm14227_vm2  ;;  %vm12867_vm3 = vcmp.lt.s32.totalorder %v14231_v52, 15  ;;  %vm14238_vm2 = vnez %v14237_v11  ;;  %vm14241_vm0 = vnez %v14240_v30  ;;  %v14255_v11 = vld [vmem:[#allocation16_spill] sm:$0xff]  ;;  %v14258_v30 = vld [vmem:[#allocation17_spill] sm:$0xff] }
 0x354   :  { %6045 = vmatprep.mubr.msk.f32.mxu0 %vm12866_vm4, %v14225_v34  ;;  %v14243_v4 = vld [vmem:[#allocation214_spill] sm:$0xff]  ;;  %v14323_v40 = vld [vmem:[#allocation119_spill] sm:$0xff]  ;;  %v14408_v41 = vld [vmem:[#allocation157_spill] sm:$0xff] }
 0x355   :  { %5474 = vmatmul.mubr.msk.f32.gmra.mrb[2].mxu1 %vm1998_vm7, %v14224_v57  ;;  %6459 = vmatpush3.bf16.msra.mxu0 %v6456_v33  ;;  %vm14235_vm7 = vmmov %vm14229_vm8  ;;  %vm12869_vm4 = vcmp.lt.s32.totalorder %v14243_v4, 15  ;;  %v14245_v57 = vld [vmem:[#allocation14_spill] sm:$0xff]  ;;  %v14411_v8 = vld [vmem:[#allocation227_spill] sm:$0xff] }
 0x356   :  { %5475 = vmatprep.mubr.msk.f32.mxu1 %vm14229_vm8, %v14228_v18  ;;  %v10837_v48 = vpop.f32.mrb[178].mxu0  ;;  %vm2215_vm8 = vmand %vm12867_vm3, %vm14238_vm2  ;;  %v14246_v34 = vld [vmem:[#allocation66_spill] sm:$0xff]  ;;  %v14248_v18 = vld [vmem:[#allocation215_spill] sm:$0xff] }
 0x357   :  { %14232 = vst [vmem:[#allocation200_spill] sm:$0xff] %v10837_v48  ;;  %v2798_v22 = vpop.f32.mrb[179].mxu0  ;;  %6046 = vmatmul.mubr.msk.f32.gmra.mrb[238].mxu0 %vm2213_vm10, %v14233_v49  ;;  %vm2000_vm10 = vmand %vm1936_vm6, %vm14241_vm0  ;;  %vm14249_vm2 = vnez %v14248_v18  ;;  %v14253_v49 = vld [vmem:[#allocation224_spill] sm:$0xff]  ;;  %v14317_v48 = vld [vmem:[#allocation291_spill] sm:$0xff] }
 0x358   :  { %6048 = vmatprep.mubr.msk.f32.mxu0 %vm12868_vm9, %v14236_v26  ;;  %vm2217_vm0 = vmand %vm12869_vm4, %vm14249_vm2  ;;  %v14252_v22 = vld [vmem:[#allocation219_spill] sm:$0xff]  ;;  %vm12870_vm9 = vcmp.lt.s32.totalorder %v14253_v49, 15 }
 0x359   :  { %5476 = vmatmul.mubr.msk.f32.gmra.mrb[4].mxu1 %vm14235_vm7, %v14234_v45  ;;  %vm1960_vm7 = vcmp.lt.s32.totalorder %v14242_v58, 15  ;;  %vm12871_vm3 = vcmp.lt.s32.totalorder %v14252_v22, 15  ;;  %v14402_v58 = vld [vmem:[#allocation218_spill] sm:$0xff] }
 0x35a   :  { %5477 = vmatprep.mubr.msk.f32.mxu1 %vm1936_vm6, %v14239_v43  ;;  %v10859_v0 = vpop.f32.mrb[180].mxu0  ;;  %vm14251_vm6 = vcmp.lt.s32.totalorder %v14126_v51, 15  ;;  %v14256_v43 = vld [vmem:[#allocation70_spill] sm:$0xff]  ;;  %v14264_v51 = vld [vmem:[#allocation229_spill] sm:$0xff] }
 0x35b   :  { %14244 = vst [vmem:[#allocation295_spill] sm:$0xff] %v10859_v0  ;;  %v2803_v33 = vpop.f32.mrb[181].mxu0  ;;  %6049 = vmatmul.mubr.msk.f32.gmra.mrb[240].mxu0 %vm2215_vm8, %v14245_v57  ;;  %vm14257_vm8 = vmmov %vm14251_vm6  ;;  %v14261_v57 = vld [vmem:[#allocation65_spill] sm:$0xff]  ;;  %v14312_v0 = vld [vmem:[#allocation288_spill] sm:$0xff] }
 0x35c   :  { %6051 = vmatprep.mubr.msk.f32.mxu0 %vm1960_vm7, %v14247_v32  ;;  %v14259_v33 = vld [vmem:[#allocation225_spill] sm:$0xff]  ;;  %v14265_v32 = vld [vmem:[#allocation236_spill] sm:$0xff] }
 0x35d   :  { %5478 = vmatmul.mubr.msk.f32.gmra.mrb[6].mxu1 %vm2000_vm10, %v14246_v34  ;;  %vm14260_vm10 = vnez %v14259_v33  ;;  %v14262_v34 = vld [vmem:[#allocation56_spill] sm:$0xff]  ;;  %vm12872_vm4 = vcmp.lt.s32.totalorder %v14265_v32, 15  ;;  %v14274_v33 = vld [vmem:[#allocation238_spill] sm:$0xff] }
 0x35e   :  { %5479 = vmatprep.mubr.msk.f32.mxu1 %vm14251_vm6, %v14250_v28  ;;  %v10875_v45 = vpop.f32.mrb[182].mxu0  ;;  %vm2219_vm2 = vmand %vm12870_vm9, %vm14260_vm10  ;;  %vm14263_vm6 = vnez %v14262_v34  ;;  %vm12874_vm9 = vcmp.lt.s32.totalorder %v14274_v33, 15 }
 0x35f   :  { %14254 = vst [vmem:[#allocation220_spill] sm:$0xff] %v10875_v45  ;;  %v2808_v26 = vpop.f32.mrb[183].mxu0  ;;  %6052 = vmatmul.mubr.msk.f32.gmra.mrb[242].mxu0 %vm2217_vm0, %v14255_v11  ;;  %vm2002_vm0 = vmand %vm1938_vm12, %vm14263_vm6  ;;  %v14268_v11 = vld [vmem:[#allocation76_spill] sm:$0xff]  ;;  %vm14273_vm6 = vcmp.lt.s32.totalorder %v14134_v16, 15  ;;  %v14300_v45 = vld [vmem:[#allocation94_spill] sm:$0xff] }
 0x360   :  { %6054 = vmatprep.mubr.msk.f32.mxu0 %vm12871_vm3, %v14258_v30  ;;  %v14267_v26 = vld [vmem:[#allocation256_spill] sm:$0xff]  ;;  %v14270_v30 = vld [vmem:[#allocation237_spill] sm:$0xff] }
 0x361   :  { %5480 = vmatmul.mubr.msk.f32.gmra.mrb[8].mxu1 %vm14257_vm8, %v14256_v43  ;;  %vm1964_vm8 = vcmp.lt.s32.totalorder %v14264_v51, 15  ;;  %v14269_v43 = vld [vmem:[#allocation19_spill] sm:$0xff]  ;;  %vm14271_vm10 = vnez %v14270_v30  ;;  %v14281_v30 = vld [vmem:[#allocation249_spill] sm:$0xff]  ;;  %v14286_v16 = vld [vmem:[#allocation252_spill] sm:$0xff] }
 0x362   :  { %5481 = vmatprep.mubr.msk.f32.mxu1 %vm1938_vm12, %v14261_v57  ;;  %v10897_v18 = vpop.f32.mrb[184].mxu0  ;;  %vm2221_vm12 = vmand %vm12872_vm4, %vm14271_vm10  ;;  %v14275_v57 = vld [vmem:[#allocation246_spill] sm:$0xff] }
 0x363   :  { %14266 = vst [vmem:[#allocation296_spill] sm:$0xff] %v10897_v18  ;;  %v2813_v28 = vpop.f32.mrb[185].mxu0  ;;  %6055 = vmatmul.mubr.msk.f32.gmra.mrb[244].mxu0 %vm2219_vm2, %v14267_v26  ;;  %vm12873_vm3 = vcmp.lt.s32.totalorder %v14275_v57, 15  ;;  %v14277_v26 = vld [vmem:[#allocation20_spill] sm:$0xff]  ;;  %vm14279_vm2 = vmmov %vm14273_vm6 }
 0x364   :  { %6057 = vmatprep.mubr.msk.f32.mxu0 %vm1964_vm8, %v14269_v43  ;;  %v14280_v43 = vld [vmem:[#allocation272_spill] sm:$0xff] }
 0x365   :  { %5482 = vmatmul.mubr.msk.f32.gmra.mrb[10].mxu1 %vm2002_vm0, %v14268_v11  ;;  %v14278_v11 = vld [vmem:[#allocation82_spill] sm:$0xff]  ;;  %vm14282_vm0 = vnez %v14281_v30  ;;  %v14289_v30 = vld [vmem:[#allocation279_spill] sm:$0xff]  ;;  %v14291_v18 = vld [vmem:[#allocation284_spill] sm:$0xff] }
 0x366   :  { %5483 = vmatprep.mubr.msk.f32.mxu1 %vm14273_vm6, %v14272_v37  ;;  %v10913_v34 = vpop.f32.mrb[186].mxu0  ;;  %vm2223_vm10 = vmand %vm12873_vm3, %vm14282_vm0  ;;  %v14283_v37 = vld [vmem:[#allocation75_spill] sm:$0xff] }
 0x367   :  { %14276 = vst [vmem:[#allocation209_spill] sm:$0xff] %v10913_v34  ;;  %v2818_v28 = vpop.f32.mrb[187].mxu0  ;;  %6058 = vmatmul.mubr.msk.f32.gmra.mrb[246].mxu0 %vm2221_vm12, %v14277_v26  ;;  %v14287_v26 = vld [vmem:[#allocation255_spill] sm:$0xff] }
 0x368   :  { %6060 = vmatprep.mubr.msk.f32.mxu0 %vm12874_vm9, %v14280_v43  ;;  %v14284_v28 = vld [vmem:[#allocation64_spill] sm:$0xff]  ;;  %vm12875_vm4 = vcmp.lt.s32.totalorder %v14287_v26, 15  ;;  %v14290_v34 = vld [vmem:[#allocation87_spill] sm:$0xff] }
 0x369   :  { %5484 = vmatmul.mubr.msk.f32.gmra.mrb[12].mxu1 %vm14279_vm2, %v14278_v11  ;;  %vm14285_vm6 = vnez %v14284_v28  ;;  %vm1968_vm2 = vcmp.lt.s32.totalorder %v14286_v16, 15  ;;  %v14296_v28 = vld [vmem:[#allocation264_spill] sm:$0xff] }
 0x36a   :  { %5485 = vmatprep.mubr.msk.f32.mxu1 %vm1940_vm14, %v14283_v37  ;;  %vm2004_vm12 = vmand %vm1940_vm14, %vm14285_vm6  ;;  %v10935_v11 = vpop.f32.mrb[188].mxu0  ;;  %v14292_v37 = vld [vmem:[#allocation261_spill] sm:$0xff]  ;;  %vm14295_vm6 = vcmp.lt.s32.totalorder %v14144_v3, 15  ;;  %vm1970_vm3 = vcmp.lt.s32.totalorder %v14296_v28, 15  ;;  %v14308_v3 = vld [vmem:[#allocation275_spill] sm:$0xff] }
 0x36b   :  { %14288 = vst [vmem:[#allocation213_spill] sm:$0xff] %v10935_v11  ;;  %v2823_v43 = vpop.f32.mrb[189].mxu0  ;;  %6061 = vmatmul.mubr.msk.f32.gmra.mrb[248].mxu0 %vm2223_vm10, %v14289_v30  ;;  %vm14293_vm0 = vnez %v14292_v37  ;;  %v14299_v11 = vld [vmem:[#allocation107_spill] sm:$0xff]  ;;  %vm14301_vm10 = vmmov %vm14295_vm6 }
 0x36c   :  { %6063 = vmatprep.mubr.msk.f32.mxu0 %vm1968_vm2, %v14291_v18  ;;  %vm2225_vm14 = vmand %vm12875_vm4, %vm14293_vm0  ;;  %v14297_v43 = vld [vmem:[#allocation266_spill] sm:$0xff]  ;;  %v14302_v18 = vld [vmem:[#allocation161_spill] sm:$0xff] }
 0x36d   :  { %5486 = vmatmul.mubr.msk.f32.gmra.mrb[14].mxu1 %vm2004_vm12, %v14290_v34  ;;  %vm1971_vm9 = vcmp.lt.s32.totalorder %v14297_v43, 15  ;;  %v14303_v37 = vld [vmem:[#allocation271_spill] sm:$0xff] }
 0x36e   :  { %5487 = vmatprep.mubr.msk.f32.mxu1 %vm14295_vm6, %v14294_v2  ;;  %v10951_v30 = vpop.f32.mrb[190].mxu0  ;;  %vm14304_vm12 = vnez %v14303_v37  ;;  %v14305_v2 = vld [vmem:[#allocation86_spill] sm:$0xff]  ;;  %v14310_v37 = vld [vmem:[#allocation109_spill] sm:$0xff] }
 0x36f   :  { %14298 = vst [vmem:[#allocation297_spill] sm:$0xff] %v10951_v30  ;;  %v2828_v34 = vpop.f32.mrb[191].mxu0  ;;  %6064 = vmatmul.mubr.msk.f32.gmra.mrb[250].mxu0 %vm2225_vm14, %v14299_v11  ;;  %vm2227_vm0 = vmand %vm1971_vm9, %vm14304_vm12  ;;  %v14311_v30 = vld [vmem:[#allocation103_spill] sm:$0xff] }
 0x370   :  { %6066 = vmatprep.mubr.msk.f32.mxu0 %vm1970_vm3, %v14302_v18  ;;  %v14306_v34 = vld [vmem:[#allocation74_spill] sm:$0xff] }
 0x371   :  { %5488 = vmatmul.mubr.msk.f32.gmra.mrb[16].mxu1 %vm14301_vm10, %v14300_v45  ;;  %vm14307_vm6 = vnez %v14306_v34  ;;  %vm1972_vm10 = vcmp.lt.s32.totalorder %v14308_v3, 15  ;;  %v14309_v45 = vld [vmem:[#allocation278_spill] sm:$0xff] }
 0x372   :  { %5489 = vmatprep.mubr.msk.f32.mxu1 %vm1942_vm13, %v14305_v2  ;;  %vm2006_vm14 = vmand %vm1942_vm13, %vm14307_vm6  ;;  %vm1973_vm4 = vcmp.lt.s32.totalorder %v14309_v45, 15  ;;  %v10973_v11 = vpop.f32.mrb[64].mxu0  ;;  %v14313_v2 = vld [vmem:[#allocation283_spill] sm:$0xff]  ;;  %vm14316_vm6 = vcmp.lt.s32.totalorder %v14151_v50, 15 }
 0x373   :  { %v2898_v18 = vpop.f32.mrb[65].mxu0  ;;  %6067 = vmatmul.mubr.msk.f32.gmra.mrb[252].mxu0 %vm2227_vm0, %v14310_v37  ;;  %vm14314_vm12 = vnez %v14313_v2  ;;  %v14318_v37 = vld [vmem:[#allocation111_spill] sm:$0xff]  ;;  %vm14319_vm0 = vmmov %vm14316_vm6 }
 0x374   :  { %6069 = vmatprep.mubr.msk.f32.mxu0 %vm1972_vm10, %v14312_v0  ;;  %vm2229_vm13 = vmand %vm1973_vm4, %vm14314_vm12  ;;  %v14321_v0 = vld [vmem:[#allocation84_spill] sm:$0xff] }
 0x375   :  { %5490 = vmatmul.mubr.msk.f32.gmra.mrb[18].mxu1 %vm2006_vm14, %v14311_v30  ;;  %v14320_v30 = vld [vmem:[#allocation102_spill] sm:$0xff]  ;;  %vm14322_vm14 = vnez %v14321_v0 }
 0x376   :  { %5491 = vmatprep.mubr.msk.f32.mxu1 %vm14316_vm6, %v14315_v15  ;;  %v10987_v34 = vpop.f32.mrb[66].mxu0  ;;  %vm2008_vm12 = vmand %vm1944_vm11, %vm14322_vm14 }
 0x377   :  { %v2903_v18 = vpop.f32.mrb[67].mxu0  ;;  %6070 = vmatmul.mubr.msk.f32.gmra.mrb[254].mxu0 %vm2229_vm13, %v14317_v48  ;;  %vm14325_vm13 = vcmp.lt.s32.totalorder %v14159_v6, 15 }
 0x378   :  { %v14324_v18 = vld [vmem:[#allocation110_spill] sm:$0xff]  ;;  %vm14327_vm6 = vmmov %vm14325_vm13 }
 0x379   :  { %5492 = vmatmul.mubr.msk.f32.gmra.mrb[20].mxu1 %vm14319_vm0, %v14318_v37  ;;  %v14326_v37 = vld [vmem:[#allocation128_spill] sm:$0xff]  ;;  %vm14329_vm0 = vcmp.lt.s32.totalorder %v14167_v19, 15  ;;  %v14339_v19 = vld [vmem:[#allocation114_spill] sm:$0xff] }
 0x37a   :  { %5493 = vmatprep.mubr.msk.f32.mxu1 %vm1944_vm11, %v14320_v30  ;;  %v11000_v2 = vpop.f32.mrb[68].mxu0  ;;  %v14328_v30 = vld [vmem:[#allocation118_spill] sm:$0xff]  ;;  %vm14331_vm11 = vnez %v14330_v9  ;;  %vm14332_vm14 = vmmov %vm14329_vm0 }
 0x37b   :  { %v2908_v15 = vpop.f32.mrb[69].mxu0 }
 0x37c   :  { %v14333_v15 = vld [vmem:[#allocation139_spill] sm:$0xff] }
 0x37d   :  { %5494 = vmatmul.mubr.msk.f32.gmra.mrb[22].mxu1 %vm2008_vm12, %v14323_v40  ;;  %vm2010_vm12 = vmand %vm14332_vm14, %vm14331_vm11  ;;  %vm14343_vm14 = vcmp.lt.s32.totalorder %v14179_v14, 15 }
 0x37e   :  { %5495 = vmatprep.mubr.msk.f32.mxu1 %vm14325_vm13, %v14324_v18  ;;  %v11006_v50 = vpop.f32.mrb[70].mxu0  ;;  %v14334_v18 = vld [vmem:[#allocation127_spill] sm:$0xff]  ;;  %vm14335_vm13 = vcmp.lt.s32.totalorder %v14168_v39, 15 }
 0x37f   :  { %v2913_v48 = vpop.f32.mrb[71].mxu0 }
 0x381   :  { %5496 = vmatmul.mubr.msk.f32.gmra.mrb[24].mxu1 %vm14327_vm6, %v14326_v37  ;;  %v14336_v37 = vld [vmem:[#allocation147_spill] sm:$0xff]  ;;  %vm14337_vm6 = vmmov %vm14335_vm13 }
 0x382   :  { %5497 = vmatprep.mubr.msk.f32.mxu1 %vm14329_vm0, %v14328_v30  ;;  %v11018_v40 = vpop.f32.mrb[72].mxu0  ;;  %v14338_v30 = vld [vmem:[#allocation138_spill] sm:$0xff]  ;;  %vm14340_vm0 = vnez %v14339_v19 }
 0x383   :  { %v2918_v0 = vpop.f32.mrb[73].mxu0  ;;  %vm2012_vm11 = vmand %vm1948_vm15, %vm14340_vm0 }
 0x385   :  { %5498 = vmatmul.mubr.msk.f32.gmra.mrb[26].mxu1 %vm2010_vm12, %v14333_v15  ;;  %v14341_v15 = vld [vmem:[#allocation159_spill] sm:$0xff]  ;;  %vm14345_vm12 = vmmov %vm14343_vm14 }
 0x386   :  { %5499 = vmatprep.mubr.msk.f32.mxu1 %vm14335_vm13, %v14334_v18  ;;  %v11024_v6 = vpop.f32.mrb[74].mxu0  ;;  %v14342_v18 = vld [vmem:[#allocation146_spill] sm:$0xff]  ;;  %vm14347_vm13 = vcmp.lt.s32.totalorder %v14187_v25, 15  ;;  %v14357_v25 = vld [vmem:[#allocation152_spill] sm:$0xff] }
 0x387   :  { %v2923_v48 = vpop.f32.mrb[75].mxu0 }
 0x389   :  { %5500 = vmatmul.mubr.msk.f32.gmra.mrb[28].mxu1 %vm14337_vm6, %v14336_v37  ;;  %v14344_v37 = vld [vmem:[#allocation169_spill] sm:$0xff]  ;;  %vm14350_vm6 = vmmov %vm14347_vm13 }
 0x38a   :  { %5501 = vmatprep.mubr.msk.f32.mxu1 %vm1948_vm15, %v14338_v30  ;;  %v11036_v9 = vpop.f32.mrb[76].mxu0  ;;  %v14346_v30 = vld [vmem:[#allocation158_spill] sm:$0xff]  ;;  %vm14349_vm15 = vnez %v14348_v35 }
 0x38b   :  { %v2928_v0 = vpop.f32.mrb[77].mxu0  ;;  %vm2014_vm0 = vmand %vm14350_vm6, %vm14349_vm15  ;;  %vm14361_vm15 = vcmp.lt.s32.totalorder %v14199_v56, 15 }
 0x38c   :  { %vm14363_vm6 = vmmov %vm14361_vm15 }
 0x38d   :  { %5502 = vmatmul.mubr.msk.f32.gmra.mrb[30].mxu1 %vm2012_vm11, %v14341_v15  ;;  %v14351_v15 = vld [vmem:[#allocation177_spill] sm:$0xff]  ;;  %vm14353_vm11 = vcmp.lt.s32.totalorder %v14188_v47, 15 }
 0x38e   :  { %5503 = vmatprep.mubr.msk.f32.mxu1 %vm14343_vm14, %v14342_v18  ;;  %v11042_v39 = vpop.f32.mrb[78].mxu0  ;;  %v14352_v18 = vld [vmem:[#allocation168_spill] sm:$0xff]  ;;  %vm14355_vm14 = vmmov %vm14353_vm11 }
 0x38f   :  { %v2933_v48 = vpop.f32.mrb[79].mxu0 }
 0x391   :  { %5504 = vmatmul.mubr.msk.f32.gmra.mrb[32].mxu1 %vm14345_vm12, %v14344_v37  ;;  %v14354_v37 = vld [vmem:[#allocation100_spill] sm:$0xff]  ;;  %vm14358_vm12 = vnez %v14357_v25 }
 0x392   :  { %5505 = vmatprep.mubr.msk.f32.mxu1 %vm14347_vm13, %v14346_v30  ;;  %v11054_v19 = vpop.f32.mrb[80].mxu0  ;;  %v14356_v30 = vld [vmem:[#allocation176_spill] sm:$0xff]  ;;  %vm2016_vm13 = vmand %vm1952_vm1, %vm14358_vm12  ;;  %vm14373_vm12 = vcmp.lt.s32.totalorder %v14220_v23, 15  ;;  %v14384_v23 = vld [vmem:[#allocation199_spill] sm:$0xff] }
 0x393   :  { %v2938_v0 = vpop.f32.mrb[81].mxu0 }
 0x395   :  { %5506 = vmatmul.mubr.msk.f32.gmra.mrb[34].mxu1 %vm2014_vm0, %v14351_v15  ;;  %v14359_v15 = vld [vmem:[#allocation189_spill] sm:$0xff] }
 0x396   :  { %5507 = vmatprep.mubr.msk.f32.mxu1 %vm14353_vm11, %v14352_v18  ;;  %v11060_v14 = vpop.f32.mrb[82].mxu0  ;;  %v14360_v18 = vld [vmem:[#allocation183_spill] sm:$0xff]  ;;  %vm14369_vm11 = vcmp.lt.s32.totalorder %v14209_v54, 15 }
 0x397   :  { %v2943_v48 = vpop.f32.mrb[83].mxu0 }
 0x399   :  { %5508 = vmatmul.mubr.msk.f32.gmra.mrb[36].mxu1 %vm14355_vm14, %v14354_v37  ;;  %v14362_v37 = vld [vmem:[#allocation197_spill] sm:$0xff]  ;;  %vm14371_vm14 = vmmov %vm14369_vm11 }
 0x39a   :  { %5509 = vmatprep.mubr.msk.f32.mxu1 %vm1952_vm1, %v14356_v30  ;;  %v11072_v35 = vpop.f32.mrb[84].mxu0  ;;  %v14364_v30 = vld [vmem:[#allocation97_spill] sm:$0xff]  ;;  %vm14366_vm1 = vnez %v14365_v31 }
 0x39b   :  { %v2948_v0 = vpop.f32.mrb[85].mxu0  ;;  %vm2018_vm0 = vmand %vm1954_vm5, %vm14366_vm1 }
 0x39d   :  { %5510 = vmatmul.mubr.msk.f32.gmra.mrb[38].mxu1 %vm2016_vm13, %v14359_v15  ;;  %v14367_v15 = vld [vmem:[#allocation201_spill] sm:$0xff]  ;;  %vm14376_vm13 = vmmov %vm14373_vm12 }
 0x39e   :  { %5511 = vmatprep.mubr.msk.f32.mxu1 %vm14361_vm15, %v14360_v18  ;;  %v11078_v47 = vpop.f32.mrb[86].mxu0  ;;  %v14368_v18 = vld [vmem:[#allocation196_spill] sm:$0xff] }
 0x39f   :  { %v2953_v48 = vpop.f32.mrb[87].mxu0 }
 0x3a1   :  { %5512 = vmatmul.mubr.msk.f32.gmra.mrb[40].mxu1 %vm14363_vm6, %v14362_v37  ;;  %v14370_v37 = vld [vmem:[#allocation208_spill] sm:$0xff]  ;;  %vm14379_vm6 = vcmp.lt.s32.totalorder %v14221_v46, 15 }
 0x3a2   :  { %5513 = vmatprep.mubr.msk.f32.mxu1 %vm1954_vm5, %v14364_v30  ;;  %v11090_v25 = vpop.f32.mrb[88].mxu0  ;;  %v14372_v30 = vld [vmem:[#allocation105_spill] sm:$0xff]  ;;  %vm14375_vm5 = vnez %v14374_v38  ;;  %vm14381_vm1 = vmmov %vm14379_vm6 }
 0x3a3   :  { %v2958_v0 = vpop.f32.mrb[89].mxu0  ;;  %vm2020_vm15 = vmand %vm14376_vm13, %vm14375_vm5  ;;  %vm14389_vm5 = vcmp.lt.s32.totalorder %v14231_v52, 15 }
 0x3a4   :  { %vm14391_vm13 = vmmov %vm14389_vm5 }
 0x3a5   :  { %5514 = vmatmul.mubr.msk.f32.gmra.mrb[42].mxu1 %vm2018_vm0, %v14367_v15  ;;  %v14377_v15 = vld [vmem:[#allocation115_spill] sm:$0xff]  ;;  %vm14383_vm0 = vcmp.lt.s32.totalorder %v14230_v5, 15 }
 0x3a6   :  { %5515 = vmatprep.mubr.msk.f32.mxu1 %vm14369_vm11, %v14368_v18  ;;  %v11096_v56 = vpop.f32.mrb[90].mxu0  ;;  %v14378_v18 = vld [vmem:[#allocation207_spill] sm:$0xff]  ;;  %vm14385_vm11 = vnez %v14384_v23 }
 0x3a7   :  { %v2963_v48 = vpop.f32.mrb[91].mxu0  ;;  %v14393_v5 = vld [vmem:[#allocation211_spill] sm:$0xff] }
 0x3a9   :  { %5516 = vmatmul.mubr.msk.f32.gmra.mrb[44].mxu1 %vm14371_vm14, %v14370_v37  ;;  %v14380_v37 = vld [vmem:[#allocation125_spill] sm:$0xff]  ;;  %vm14386_vm14 = vmmov %vm14383_vm0 }
 0x3aa   :  { %5517 = vmatprep.mubr.msk.f32.mxu1 %vm14373_vm12, %v14372_v30  ;;  %v11108_v31 = vpop.f32.mrb[92].mxu0  ;;  %v14382_v30 = vld [vmem:[#allocation27_spill] sm:$0xff]  ;;  %vm2022_vm12 = vmand %vm14386_vm14, %vm14385_vm11  ;;  %vm14401_vm11 = vcmp.lt.s32.totalorder %v14252_v22, 15 }
 0x3ab   :  { %v2968_v0 = vpop.f32.mrb[93].mxu0  ;;  %vm14404_vm14 = vmmov %vm14401_vm11 }
 0x3ad   :  { %5518 = vmatmul.mubr.msk.f32.gmra.mrb[46].mxu1 %vm2020_vm15, %v14377_v15  ;;  %v14387_v15 = vld [vmem:[#allocation221_spill] sm:$0xff]  ;;  %vm14394_vm15 = vnez %v14393_v5 }
 0x3ae   :  { %5519 = vmatprep.mubr.msk.f32.mxu1 %vm14379_vm6, %v14378_v18  ;;  %v11114_v54 = vpop.f32.mrb[94].mxu0  ;;  %v14388_v18 = vld [vmem:[#allocation216_spill] sm:$0xff]  ;;  %vm2024_vm6 = vmand %vm1960_vm7, %vm14394_vm15  ;;  %vm14412_vm15 = vnez %v14411_v8 }
 0x3af   :  { %v2973_v48 = vpop.f32.mrb[95].mxu0 }
 0x3b1   :  { %5520 = vmatmul.mubr.msk.f32.gmra.mrb[48].mxu1 %vm14381_vm1, %v14380_v37  ;;  %v14390_v37 = vld [vmem:[#allocation136_spill] sm:$0xff]  ;;  %vm14397_vm1 = vcmp.lt.s32.totalorder %v14243_v4, 15  ;;  %v14406_v4 = vld [vmem:[#allocation235_spill] sm:$0xff] }
 0x3b2   :  { %5521 = vmatprep.mubr.msk.f32.mxu1 %vm14383_vm0, %v14382_v30  ;;  %v11126_v38 = vpop.f32.mrb[96].mxu0  ;;  %v14392_v30 = vld [vmem:[#allocation122_spill] sm:$0xff]  ;;  %vm14399_vm0 = vmmov %vm14397_vm1 }
 0x3b3   :  { %v2978_v0 = vpop.f32.mrb[97].mxu0 }
 0x3b5   :  { %5522 = vmatmul.mubr.msk.f32.gmra.mrb[50].mxu1 %vm2022_vm12, %v14387_v15  ;;  %v14395_v15 = vld [vmem:[#allocation230_spill] sm:$0xff] }
 0x3b6   :  { %5523 = vmatprep.mubr.msk.f32.mxu1 %vm14389_vm5, %v14388_v18  ;;  %v11132_v46 = vpop.f32.mrb[98].mxu0  ;;  %v14396_v18 = vld [vmem:[#allocation226_spill] sm:$0xff]  ;;  %vm14407_vm5 = vcmp.lt.s32.totalorder %v14253_v49, 15  ;;  %v14413_v49 = vld [vmem:[#allocation248_spill] sm:$0xff] }
 0x3b7   :  { %v2983_v48 = vpop.f32.mrb[99].mxu0 }
 0x3b9   :  { %5524 = vmatmul.mubr.msk.f32.gmra.mrb[52].mxu1 %vm14391_vm13, %v14390_v37  ;;  %v14398_v37 = vld [vmem:[#allocation145_spill] sm:$0xff]  ;;  %vm14409_vm13 = vmmov %vm14407_vm5 }
 0x3ba   :  { %5525 = vmatprep.mubr.msk.f32.mxu1 %vm1960_vm7, %v14392_v30  ;;  %v11144_v23 = vpop.f32.mrb[100].mxu0  ;;  %v14400_v30 = vld [vmem:[#allocation132_spill] sm:$0xff]  ;;  %vm14403_vm7 = vnez %v14402_v58 }
 0x3bb   :  { %v2988_v0 = vpop.f32.mrb[101].mxu0  ;;  %vm2026_vm12 = vmand %vm14404_vm14, %vm14403_vm7 }
 0x3bd   :  { %5526 = vmatmul.mubr.msk.f32.gmra.mrb[54].mxu1 %vm2024_vm6, %v14395_v15  ;;  %v14405_v15 = vld [vmem:[#allocation241_spill] sm:$0xff]  ;;  %vm2028_vm6 = vmand %vm1964_vm8, %vm14412_vm15 }
 0x3be   :  { %5527 = vmatprep.mubr.msk.f32.mxu1 %vm14397_vm1, %v14396_v18  ;;  %v11150_v52 = vpop.f32.mrb[102].mxu0  ;;  %v11168_v18 = vld [vmem:[%s12042_s5] ss:$0 sm:$0xff]  ;;  %vm14415_vm1 = vcmp.lt.s32.totalorder %v14265_v32, 15 }
 0x3bf   :  { %v2993_v48 = vpop.f32.mrb[103].mxu0  ;;  %v6496_v8 = vadd.f32 %v11168_v18, %v11000_v2  ;;  %v6498_v2 = vadd.f32 %v11168_v18, %v11006_v50  ;;  %v6504_v16 = vadd.f32 %v11168_v18, %v11036_v9  ;;  %v6506_v9 = vadd.f32 %v11168_v18, %v11042_v39 }
 0x3c0   :  { %v6492_v48 = vadd.f32 %v11168_v18, %v10973_v11  ;;  %v6494_v11 = vadd.f32 %v11168_v18, %v10987_v34  ;;  %v6508_v28 = vadd.f32 %v11168_v18, %v11054_v19  ;;  %v6510_v19 = vadd.f32 %v11168_v18, %v11060_v14 }
 0x3c1   :  { %5528 = vmatmul.mubr.msk.f32.gmra.mrb[56].mxu1 %vm14399_vm0, %v14398_v37  ;;  %vm14419_vm0 = vcmp.lt.s32.totalorder %v14274_v33, 15  ;;  %v6500_v33 = vadd.f32 %v11168_v18, %v11018_v40  ;;  %v6502_v40 = vadd.f32 %v11168_v18, %v11024_v6  ;;  %v6512_v3 = vadd.f32 %v11168_v18, %v11072_v35 }
 0x3c2   :  { %5529 = vmatprep.mubr.msk.f32.mxu1 %vm14401_vm11, %v14400_v30  ;;  %v11162_v5 = vpop.f32.mrb[104].mxu0  ;;  %vm14422_vm7 = vmmov %vm14419_vm0 }
 0x3c3   :  { %v2998_v0 = vpop.f32.mrb[105].mxu0 }
 0x3c5   :  { %5530 = vmatmul.mubr.msk.f32.gmra.mrb[58].mxu1 %vm2026_vm12, %v14405_v15  ;;  %v14410_v15 = vld [vmem:[#allocation142_spill] sm:$0xff]  ;;  %vm14425_vm12 = vcmp.lt.s32.totalorder %v14275_v57, 15 }
 0x3c6   :  { %5531 = vmatprep.mubr.msk.f32.mxu1 %vm14407_vm5, %v14406_v4  ;;  %v11175_v37 = vpop.f32.mrb[106].mxu0  ;;  %vm14427_vm5 = vmmov %vm14425_vm12 }
 0x3c7   :  { %v3003_v22 = vpop.f32.mrb[107].mxu0 }
 0x3c8   :  { %v3666_v30 = vpop.f32.mrb[82].mxu1 }
 0x3c9   :  { %v6493_v58 = vadd.f32 %v6492_v48, %v3666_v30  ;;  %v3668_v0 = vpop.f32.mrb[83].mxu1  ;;  %5532 = vmatmul.mubr.msk.f32.gmra.mrb[60].mxu1 %vm14409_vm13, %v14408_v41  ;;  %v14414_v41 = vld [vmem:[#allocation243_spill] sm:$0xff] }
 0x3ca   :  { %5533 = vmatprep.mubr.msk.f32.mxu1 %vm1964_vm8, %v14410_v15  ;;  %v11189_v4 = vpop.f32.mrb[108].mxu0  ;;  %vm14417_vm8 = vmmov %vm14415_vm1 }
 0x3cb   :  { %v3008_v48 = vpop.f32.mrb[109].mxu0 }
 0x3cc   :  { %v3671_v22 = vpop.f32.mrb[84].mxu1  ;;  %v14416_v48 = vld [vmem:[#allocation254_spill] sm:$0xff] }
 0x3cd   :  { %v6495_v30 = vadd.f32 %v6494_v11, %v3671_v22  ;;  %v3673_v0 = vpop.f32.mrb[85].mxu1  ;;  %5534 = vmatmul.mubr.msk.f32.gmra.mrb[62].mxu1 %vm2028_vm6, %v14413_v49  ;;  %v14418_v11 = vld [vmem:[#allocation151_spill] sm:$0xff]  ;;  %vm14433_vm6 = vcmp.lt.s32.totalorder %v14287_v26, 15 }
 0x3ce   :  { %5535 = vmatprep.mubr.msk.f32.mxu1 %vm14415_vm1, %v14414_v41  ;;  %v5978_v51 = vpop.f32.mrb[192].mxu0  ;;  %v14420_v22 = vld [vmem:[#allocation239_spill] sm:$0xff]  ;;  %v14423_v41 = vld [vmem:[#allocation257_spill] sm:$0xff] }
 0x3cf   :  { %v4057_v15 = vadd.f32 %v6495_v30, %v5978_v51  ;;  %v4051_v44 = vpop.f32.mrb[193].mxu0  ;;  %vm14421_vm11 = vnez %v14420_v22 }
 0x3d0   :  { %v3676_v20 = vpop.f32.mrb[86].mxu1  ;;  %v4052_v13 = vadd.f32 %v6493_v58, %v4051_v44  ;;  %vm2030_vm14 = vmand %vm14422_vm7, %vm14421_vm11 }
 0x3d1   :  { %v6497_v34 = vadd.f32 %v6496_v8, %v3676_v20  ;;  %v3678_v24 = vpop.f32.mrb[87].mxu1  ;;  %5536 = vmatmul.mubr.msk.f32.gmra.mrb[64].mxu1 %vm14417_vm8, %v14416_v48  ;;  %v4371_v44 = vmax.f32 %v4057_v15, 0.0  ;;  %v14424_v8 = vld [vmem:[#allocation253_spill] sm:$0xff] }
 0x3d2   :  { %5537 = vmatprep.mubr.msk.f32.mxu1 %vm14419_vm0, %v14418_v11  ;;  %v4370_v30 = vmax.f32 %v4052_v13, 0.0  ;;  %v5981_v20 = vpop.f32.mrb[194].mxu0 }
 0x3d3   :  { %v4061_v58 = vpop.f32.mrb[195].mxu0 }
 0x3d4   :  { %v3681_v24 = vpop.f32.mrb[88].mxu1  ;;  %v4062_v32 = vadd.f32 %v6497_v34, %v4061_v58  ;;  %6104 = vmatprep.mubr.f32.mxu0 %v4370_v30  ;;  %v14428_v30 = vld [vmem:[#allocation18_spill] sm:$0xff] }
 0x3d5   :  { %v6499_v0 = vadd.f32 %v6498_v2, %v3681_v24  ;;  %v3683_v49 = vpop.f32.mrb[89].mxu1  ;;  %5538 = vmatmul.mubr.msk.f32.gmra.mrb[66].mxu1 %vm2030_vm14, %v14423_v41  ;;  %6105 = vmatmul.mubr.f32.vlgmr.msra.gmra.mrb[0].mxu0 %v4371_v44  ;;  %v14426_v2 = vld [vmem:[#allocation262_spill] sm:$0xff]  ;;  %v14431_v41 = vld [vmem:[#allocation267_spill] sm:$0xff] }
 0x3d6   :  { %5539 = vmatprep.mubr.msk.f32.mxu1 %vm14425_vm12, %v14424_v8  ;;  %v4372_v13 = vmax.f32 %v4062_v32, 0.0  ;;  %v5984_v51 = vpop.f32.mrb[196].mxu0  ;;  %v14429_v44 = vld [vmem:[#allocation250_spill] sm:$0xff]  ;;  %v14432_v8 = vld [vmem:[#allocation172_spill] sm:$0xff] }
 0x3d7   :  { %v4067_v50 = vadd.f32 %v6499_v0, %v5981_v20  ;;  %v4071_v48 = vpop.f32.mrb[197].mxu0  ;;  %vm14430_vm13 = vnez %v14429_v44 }
 0x3d8   :  { %v3686_v15 = vpop.f32.mrb[90].mxu1  ;;  %6107 = vmatprep.mubr.f32.mxu0 %v4372_v13  ;;  %vm2032_vm15 = vmand %vm1968_vm2, %vm14430_vm13 }
 0x3d9   :  { %v4373_v11 = vmax.f32 %v4067_v50, 0.0  ;;  %v6501_v22 = vadd.f32 %v6500_v33, %v3686_v15  ;;  %v3688_v34 = vpop.f32.mrb[91].mxu1  ;;  %5540 = vmatmul.mubr.msk.f32.gmra.mrb[68].mxu1 %vm14427_vm5, %v14426_v2  ;;  %v14437_v2 = vld [vmem:[#allocation265_spill] sm:$0xff] }
 0x3da   :  { %5541 = vmatprep.mubr.msk.f32.mxu1 %vm1968_vm2, %v14428_v30  ;;  %v5987_v24 = vpop.f32.mrb[198].mxu0  ;;  %vm14435_vm2 = vmmov %vm14433_vm6  ;;  %v14436_v34 = vld [vmem:[#allocation180_spill] sm:$0xff]  ;;  %vm14438_vm1 = vnez %v14437_v2 }
 0x3db   :  { %v4072_v20 = vadd.f32 %v6501_v22, %v4071_v48  ;;  %6108 = vmatmul.mubr.f32.gmra.mrb[2].mxu0 %v4373_v11  ;;  %v4081_v0 = vpop.f32.mrb[199].mxu0  ;;  %v14434_v22 = vld [vmem:[#allocation273_spill] sm:$0xff]  ;;  %vm2034_vm8 = vmand %vm1970_vm3, %vm14438_vm1 }
 0x3dc   :  { %v3691_v58 = vpop.f32.mrb[92].mxu1 }
 0x3dd   :  { %v4374_v57 = vmax.f32 %v4072_v20, 0.0  ;;  %v6503_v32 = vadd.f32 %v6502_v40, %v3691_v58  ;;  %v3693_v49 = vpop.f32.mrb[93].mxu1  ;;  %5542 = vmatmul.mubr.msk.f32.gmra.mrb[70].mxu1 %vm2032_vm15, %v14431_v41 }
 0x3de   :  { %5543 = vmatprep.mubr.msk.f32.mxu1 %vm14433_vm6, %v14432_v8  ;;  %v5990_v50 = vpop.f32.mrb[200].mxu0 }
 0x3df   :  { %v4077_v33 = vadd.f32 %v6503_v32, %v5984_v51  ;;  %6110 = vmatprep.mubr.f32.mxu0 %v4374_v57  ;;  %v4091_v13 = vpop.f32.mrb[201].mxu0  ;;  %v14439_v57 = vld [vmem:[#allocation187_spill] sm:$0xff] }
 0x3e0   :  { %v3696_v6 = vpop.f32.mrb[94].mxu1  ;;  %v14440_v32 = vld [vmem:[#allocation179_spill] sm:$0xff] }
 0x3e1   :  { %v4375_v15 = vmax.f32 %v4077_v33, 0.0  ;;  %v6505_v48 = vadd.f32 %v6504_v16, %v3696_v6  ;;  %v3698_v11 = vpop.f32.mrb[95].mxu1  ;;  %5544 = vmatmul.mubr.msk.f32.gmra.mrb[72].mxu1 %vm14435_vm2, %v14434_v22  ;;  %v14441_v6 = vld [vmem:[#allocation190_spill] sm:$0xff] }
 0x3e2   :  { %5545 = vmatprep.mubr.msk.f32.mxu1 %vm1970_vm3, %v14436_v34  ;;  %v5993_v30 = vpop.f32.mrb[202].mxu0 }
 0x3e3   :  { %v4082_v51 = vadd.f32 %v6505_v48, %v4081_v0  ;;  %6111 = vmatmul.mubr.f32.gmra.mrb[4].mxu0 %v4375_v15  ;;  %v4101_v40 = vpop.f32.mrb[203].mxu0  ;;  %v14442_v15 = vld [vmem:[#allocation112_spill] sm:$0xff]  ;;  %v14443_v48 = vld [vmem:[#allocation277_spill] sm:$0xff] }
 0x3e4   :  { %v3701_v44 = vpop.f32.mrb[96].mxu1  ;;  %vm14444_vm3 = vnez %v14443_v48 }
 0x3e5   :  { %v4376_v20 = vmax.f32 %v4082_v51, 0.0  ;;  %v6507_v26 = vadd.f32 %v6506_v9, %v3701_v44  ;;  %v3703_v58 = vpop.f32.mrb[97].mxu1  ;;  %5546 = vmatmul.mubr.msk.f32.gmra.mrb[74].mxu1 %vm2034_vm8, %v14439_v57  ;;  %vm2036_vm0 = vmand %vm1972_vm10, %vm14444_vm3  ;;  %v14445_v51 = vld [vmem:[#allocation24_spill] sm:$0xff] }
 0x3e6   :  { %5547 = vmatprep.mubr.msk.f32.mxu1 %vm1971_vm9, %v14440_v32  ;;  %v5996_v41 = vpop.f32.mrb[204].mxu0  ;;  %v14446_v44 = vld [vmem:[#allocation104_spill] sm:$0xff] }
 0x3e7   :  { %v4087_v49 = vadd.f32 %v6507_v26, %v5987_v24  ;;  %6113 = vmatprep.mubr.f32.mxu0 %v4376_v20  ;;  %v4111_v0 = vpop.f32.mrb[205].mxu0 }
 0x3e8   :  { %v3706_v39 = vpop.f32.mrb[98].mxu1 }
 0x3e9   :  { %v4377_v8 = vmax.f32 %v4087_v49, 0.0  ;;  %v6509_v16 = vadd.f32 %v6508_v28, %v3706_v39  ;;  %v3708_v33 = vpop.f32.mrb[99].mxu1  ;;  %5548 = vmatmul.mubr.msk.f32.gmra.mrb[76].mxu1 %vm1971_vm9, %v14441_v6  ;;  %v14447_v28 = vld [vmem:[#allocation149_spill] sm:$0xff]  ;;  %v6514_v49 = vadd.f32 %v11168_v18, %v11078_v47  ;;  %vm14467_vm9 = vcmask 130048  }
 0x3ea   :  { %5549 = vmatprep.mubr.msk.f32.mxu1 %vm1972_vm10, %v14442_v15  ;;  %v11263_v11 = vpop.f32.mrb[206].mxu0  ;;  %v6516_v15 = vadd.f32 %v11168_v18, %v11090_v25 }
 0x3eb   :  { %v4092_v24 = vadd.f32 %v6509_v16, %v4091_v13  ;;  %6114 = vmatmul.mubr.f32.gmra.mrb[6].mxu0 %v4377_v8  ;;  %v4121_v34 = vpop.f32.mrb[207].mxu0 }
 0x3ec   :  { %v3711_v22 = vpop.f32.mrb[100].mxu1 }
 0x3ed   :  { %v4378_v43 = vmax.f32 %v4092_v24, 0.0  ;;  %v6511_v2 = vadd.f32 %v6510_v19, %v3711_v22  ;;  %v3713_v9 = vpop.f32.mrb[101].mxu1  ;;  %5550 = vmatmul.mubr.msk.f32.gmra.mrb[78].mxu1 %vm2036_vm0, %v14445_v51 }
 0x3ee   :  { %5551 = vmatprep.mubr.msk.f32.mxu1 %vm1973_vm4, %v14446_v44  ;;  %v11271_v14 = vpop.f32.mrb[208].mxu0 }
 0x3ef   :  { %v4097_v20 = vadd.f32 %v6511_v2, %v5990_v50  ;;  %6116 = vmatprep.mubr.f32.mxu0 %v4378_v43  ;;  %v4131_v26 = vpop.f32.mrb[209].mxu0  ;;  %v6518_v43 = vadd.f32 %v11168_v18, %v11096_v56 }
 0x3f0   :  { %v3716_v13 = vpop.f32.mrb[102].mxu1 }
 0x3f1   :  { %v4379_v58 = vmax.f32 %v4097_v20, 0.0  ;;  %v6513_v57 = vadd.f32 %v6512_v3, %v3716_v13  ;;  %v3718_v32 = vpop.f32.mrb[103].mxu1  ;;  %5552 = vmatmul.mubr.msk.f32.gmra.mrb[80].mxu1 %vm1973_vm4, %v14447_v28  ;;  %v6520_v20 = vadd.f32 %v11168_v18, %v11108_v31  ;;  %vm14469_vm4 = vmmov %vm14467_vm9 }
 0x3f2   :  { %v11278_v8 = vpop.f32.mrb[210].mxu0  ;;  %vm14471_vm10 = vmmov %vm14469_vm4 }
 0x3f3   :  { %v4102_v39 = vadd.f32 %v6513_v57, %v4101_v40  ;;  %6117 = vmatmul.mubr.f32.gmra.mrb[8].mxu0 %v4379_v58  ;;  %v11280_v50 = vpop.f32.mrb[211].mxu0  ;;  %vm14472_vm11 = vmmov %vm14469_vm4 }
 0x3f4   :  { %v3721_v35 = vpop.f32.mrb[104].mxu1  ;;  %vm14475_vm7 = vmmov %vm14469_vm4 }
 0x3f5   :  { %v4380_v16 = vmax.f32 %v4102_v39, 0.0  ;;  %v6515_v33 = vadd.f32 %v6514_v49, %v3721_v35  ;;  %v3723_v6 = vpop.f32.mrb[105].mxu1  ;;  %v6522_v49 = vadd.f32 %v11168_v18, %v11114_v54  ;;  %vm14476_vm14 = vmmov %vm14469_vm4 }
 0x3f6   :  { %v11284_v19 = vpop.f32.mrb[212].mxu0  ;;  %vm14478_vm12 = vmmov %vm14469_vm4 }
 0x3f7   :  { %v4107_v48 = vadd.f32 %v6515_v33, %v5993_v30  ;;  %6119 = vmatprep.mubr.f32.mxu0 %v4380_v16  ;;  %v11286_v24 = vpop.f32.mrb[213].mxu0  ;;  %vm14479_vm5 = vmmov %vm14469_vm4 }
 0x3f8   :  { %v3726_v45 = vpop.f32.mrb[106].mxu1  ;;  %vm14480_vm13 = vmmov %vm14469_vm4 }
 0x3f9   :  { %v4381_v47 = vmax.f32 %v4107_v48, 0.0  ;;  %v6517_v40 = vadd.f32 %v6516_v15, %v3726_v45  ;;  %v3728_v22 = vpop.f32.mrb[107].mxu1  ;;  %v6524_v15 = vadd.f32 %v11168_v18, %v11126_v38  ;;  %vm14481_vm15 = vmmov %vm14469_vm4 }
 0x3fa   :  { %v11290_v9 = vpop.f32.mrb[214].mxu0  ;;  %vm14482_vm6 = vmmov %vm14469_vm4 }
 0x3fb   :  { %v4112_v2 = vadd.f32 %v6517_v40, %v4111_v0  ;;  %6120 = vmatmul.mubr.f32.gmra.mrb[10].mxu0 %v4381_v47  ;;  %v11292_v44 = vpop.f32.mrb[215].mxu0  ;;  %vm14483_vm2 = vmmov %vm14469_vm4 }
 0x3fc   :  { %v3731_v51 = vpop.f32.mrb[108].mxu1  ;;  %vm14484_vm1 = vmmov %vm14483_vm2 }
 0x3fd   :  { %v4382_v25 = vmax.f32 %v4112_v2, 0.0  ;;  %v6519_v30 = vadd.f32 %v6518_v43, %v3731_v51  ;;  %v3733_v3 = vpop.f32.mrb[109].mxu1  ;;  %v6526_v43 = vadd.f32 %v11168_v18, %v11132_v46  ;;  %vm14485_vm8 = vmmov %vm14484_vm1 }
 0x3fe   :  { %v11296_v58 = vpop.f32.mrb[216].mxu0  ;;  %vm14486_vm3 = vmmov %vm14484_vm1 }
 0x3ff   :  { %v4117_v13 = vadd.f32 %v6519_v30, %v5996_v41  ;;  %6122 = vmatprep.mubr.f32.mxu0 %v4382_v25  ;;  %v11298_v32 = vpop.f32.mrb[217].mxu0  ;;  %vm14487_vm0 = vmmov %vm14484_vm1 }
 0x400   :  { %v3736_v57 = vpop.f32.mrb[110].mxu1 }
 0x401   :  { %v4383_v56 = vmax.f32 %v4117_v13, 0.0  ;;  %v6521_v0 = vadd.f32 %v6520_v20, %v3736_v57  ;;  %v3738_v28 = vpop.f32.mrb[111].mxu1  ;;  %v6528_v20 = vadd.f32 %v11168_v18, %v11144_v23 }
 0x402   :  { %v11302_v35 = vpop.f32.mrb[218].mxu0 }
 0x403   :  { %v4122_v39 = vadd.f32 %v6521_v0, %v4121_v34  ;;  %6123 = vmatmul.mubr.f32.gmra.mrb[12].mxu0 %v4383_v56  ;;  %v11304_v33 = vpop.f32.mrb[219].mxu0 }
 0x404   :  { %v3741_v16 = vpop.f32.mrb[112].mxu1 }
 0x405   :  { %v4384_v31 = vmax.f32 %v4122_v39, 0.0  ;;  %v6523_v41 = vadd.f32 %v6522_v49, %v3741_v16  ;;  %v3743_v6 = vpop.f32.mrb[113].mxu1  ;;  %v6530_v49 = vadd.f32 %v11168_v18, %v11150_v52 }
 0x406   :  { %v11309_v45 = vpop.f32.mrb[220].mxu0 }
 0x407   :  { %v4127_v48 = vadd.f32 %v6523_v41, %v11263_v11  ;;  %6125 = vmatprep.mubr.f32.mxu0 %v4384_v31  ;;  %v11311_v54 = vpop.f32.mrb[221].mxu0 }
 0x408   :  { %v3746_v47 = vpop.f32.mrb[114].mxu1 }
 0x409   :  { %v4385_v34 = vmax.f32 %v4127_v48, 0.0  ;;  %v6525_v40 = vadd.f32 %v6524_v15, %v3746_v47  ;;  %v3748_v22 = vpop.f32.mrb[115].mxu1  ;;  %v6532_v15 = vadd.f32 %v11168_v18, %v11162_v5 }
 0x40a   :  { %v11315_v51 = vpop.f32.mrb[222].mxu0 }
 0x40b   :  { %v4132_v2 = vadd.f32 %v6525_v40, %v4131_v26  ;;  %6126 = vmatmul.mubr.f32.gmra.mrb[14].mxu0 %v4385_v34  ;;  %v11317_v38 = vpop.f32.mrb[223].mxu0 }
 0x40c   :  { %v3751_v25 = vpop.f32.mrb[116].mxu1 }
 0x40d   :  { %v4386_v11 = vmax.f32 %v4132_v2, 0.0  ;;  %v6527_v30 = vadd.f32 %v6526_v43, %v3751_v25  ;;  %v3753_v3 = vpop.f32.mrb[117].mxu1  ;;  %v6534_v43 = vadd.f32 %v11168_v18, %v11175_v37 }
 0x40e   :  { %v11322_v57 = vpop.f32.mrb[224].mxu0 }
 0x40f   :  { %v4137_v13 = vadd.f32 %v6527_v30, %v11271_v14  ;;  %6128 = vmatprep.mubr.f32.mxu0 %v4386_v11  ;;  %v11324_v46 = vpop.f32.mrb[225].mxu0 }
 0x410   :  { %v3756_v56 = vpop.f32.mrb[118].mxu1 }
 0x411   :  { %v4387_v26 = vmax.f32 %v4137_v13, 0.0  ;;  %v6529_v0 = vadd.f32 %v6528_v20, %v3756_v56  ;;  %v3758_v28 = vpop.f32.mrb[119].mxu1  ;;  %v6536_v20 = vadd.f32 %v11168_v18, %v11189_v4 }
 0x412   :  { %v11329_v16 = vpop.f32.mrb[226].mxu0 }
 0x413   :  { %v4142_v39 = vadd.f32 %v6529_v0, %v11280_v50  ;;  %6129 = vmatmul.mubr.f32.gmra.mrb[16].mxu0 %v4387_v26  ;;  %v11331_v31 = vpop.f32.mrb[227].mxu0 }
 0x414   :  { %v3761_v23 = vpop.f32.mrb[120].mxu1 }
 0x415   :  { %v4388_v14 = vmax.f32 %v4142_v39, 0.0  ;;  %v6531_v41 = vadd.f32 %v6530_v49, %v3761_v23  ;;  %v3763_v6 = vpop.f32.mrb[121].mxu1  ;;  %v14448_v49 = vld [vmem:[#allocation126_spill] sm:$0xff] }
 0x416   :  { %v11336_v47 = vpop.f32.mrb[228].mxu0  ;;  %v2627_v39 = vadd.f32 %v11168_v18, %v14448_v49 }
 0x417   :  { %v4147_v48 = vadd.f32 %v6531_v41, %v11278_v8  ;;  %6131 = vmatprep.mubr.f32.mxu0 %v4388_v14  ;;  %v11338_v34 = vpop.f32.mrb[229].mxu0 }
 0x418   :  { %v3766_v52 = vpop.f32.mrb[122].mxu1 }
 0x419   :  { %v4389_v50 = vmax.f32 %v4147_v48, 0.0  ;;  %v6533_v40 = vadd.f32 %v6532_v15, %v3766_v52  ;;  %v3768_v22 = vpop.f32.mrb[123].mxu1  ;;  %v14449_v48 = vld [vmem:[#allocation150_spill] sm:$0xff] }
 0x41a   :  { %v11343_v25 = vpop.f32.mrb[230].mxu0  ;;  %v2632_v52 = vadd.f32 %v11168_v18, %v14449_v48  ;;  %v14452_v48 = vld [vmem:[#allocation153_spill] sm:$0xff] }
 0x41b   :  { %v4152_v2 = vadd.f32 %v6533_v40, %v11286_v24  ;;  %6132 = vmatmul.mubr.f32.gmra.mrb[18].mxu0 %v4389_v50  ;;  %v11345_v11 = vpop.f32.mrb[231].mxu0 }
 0x41c   :  { %v3771_v5 = vpop.f32.mrb[124].mxu1 }
 0x41d   :  { %v4390_v8 = vmax.f32 %v4152_v2, 0.0  ;;  %v6535_v30 = vadd.f32 %v6534_v43, %v3771_v5  ;;  %v3773_v3 = vpop.f32.mrb[125].mxu1 }
 0x41e   :  { %v11350_v56 = vpop.f32.mrb[232].mxu0 }
 0x41f   :  { %v4157_v13 = vadd.f32 %v6535_v30, %v11284_v19  ;;  %6134 = vmatprep.mubr.f32.mxu0 %v4390_v8  ;;  %v11352_v26 = vpop.f32.mrb[233].mxu0  ;;  %v14450_v8 = vld [vmem:[#allocation178_spill] sm:$0xff] }
 0x420   :  { %v3776_v37 = vpop.f32.mrb[126].mxu1  ;;  %v2637_v30 = vadd.f32 %v11168_v18, %v14450_v8 }
 0x421   :  { %v4391_v24 = vmax.f32 %v4157_v13, 0.0  ;;  %v6537_v0 = vadd.f32 %v6536_v20, %v3776_v37  ;;  %v3778_v28 = vpop.f32.mrb[127].mxu1 }
 0x422   :  { %v11357_v14 = vpop.f32.mrb[234].mxu0  ;;  %v14451_v28 = vld [vmem:[#allocation134_spill] sm:$0xff] }
 0x423   :  { %v4162_v23 = vadd.f32 %v6537_v0, %v11292_v44  ;;  %6135 = vmatmul.mubr.f32.gmra.mrb[20].mxu0 %v4391_v24  ;;  %v11359_v41 = vpop.f32.mrb[235].mxu0  ;;  %v2642_v49 = vadd.f32 %v11168_v18, %v14451_v28 }
 0x424   :  { %v3781_v4 = vpop.f32.mrb[0].mxu1 }
 0x425   :  { %v4392_v19 = vmax.f32 %v4162_v23, 0.0  ;;  %v6539_v6 = vadd.f32 %v3781_v4, %v2627_v39  ;;  %v3783_v15 = vpop.f32.mrb[1].mxu1 }
 0x426   :  { %v11364_v40 = vpop.f32.mrb[236].mxu0 }
 0x427   :  { %v4167_v50 = vadd.f32 %v6539_v6, %v11290_v9  ;;  %6137 = vmatprep.mubr.f32.mxu0 %v4392_v19  ;;  %v11366_v43 = vpop.f32.mrb[237].mxu0 }
 0x428   :  { %v3786_v22 = vpop.f32.mrb[2].mxu1 }
 0x429   :  { %v4393_v44 = vmax.f32 %v4167_v50, 0.0  ;;  %v6541_v2 = vadd.f32 %v3786_v22, %v2632_v52  ;;  %v3788_v5 = vpop.f32.mrb[3].mxu1  ;;  %v2647_v52 = vadd.f32 %v11168_v18, %v14452_v48 }
 0x42a   :  { %v11371_v20 = vpop.f32.mrb[238].mxu0 }
 0x42b   :  { %v4172_v3 = vadd.f32 %v6541_v2, %v11298_v32  ;;  %6138 = vmatmul.mubr.f32.gmra.mrb[22].mxu0 %v4393_v44  ;;  %v11373_v37 = vpop.f32.mrb[239].mxu0 }
 0x42c   :  { %v3791_v13 = vpop.f32.mrb[4].mxu1 }
 0x42d   :  { %v4394_v9 = vmax.f32 %v4172_v3, 0.0  ;;  %v6543_v24 = vadd.f32 %v3791_v13, %v2637_v30  ;;  %v3793_v0 = vpop.f32.mrb[5].mxu1  ;;  %v14453_v30 = vld [vmem:[#allocation140_spill] sm:$0xff] }
 0x42e   :  { %v11378_v23 = vpop.f32.mrb[240].mxu0  ;;  %v2652_v3 = vadd.f32 %v11168_v18, %v14453_v30 }
 0x42f   :  { %v4177_v39 = vadd.f32 %v6543_v24, %v11296_v58  ;;  %6140 = vmatprep.mubr.f32.mxu0 %v4394_v9  ;;  %v11380_v19 = vpop.f32.mrb[241].mxu0 }
 0x430   :  { %v3796_v4 = vpop.f32.mrb[6].mxu1 }
 0x431   :  { %v4395_v32 = vmax.f32 %v4177_v39, 0.0  ;;  %v6545_v6 = vadd.f32 %v3796_v4, %v2642_v49  ;;  %v3798_v15 = vpop.f32.mrb[7].mxu1  ;;  %v14454_v39 = vld [vmem:[#allocation154_spill] sm:$0xff] }
 0x432   :  { %v11385_v22 = vpop.f32.mrb[242].mxu0  ;;  %v2657_v4 = vadd.f32 %v11168_v18, %v14454_v39 }
 0x433   :  { %v4182_v50 = vadd.f32 %v6545_v6, %v11304_v33  ;;  %6141 = vmatmul.mubr.f32.gmra.mrb[24].mxu0 %v4395_v32  ;;  %v11387_v2 = vpop.f32.mrb[243].mxu0 }
 0x434   :  { %v3801_v44 = vpop.f32.mrb[8].mxu1 }
 0x435   :  { %v4396_v58 = vmax.f32 %v4182_v50, 0.0  ;;  %v6547_v5 = vadd.f32 %v3801_v44, %v2647_v52  ;;  %v3803_v8 = vpop.f32.mrb[9].mxu1  ;;  %v14455_v44 = vld [vmem:[#allocation23_spill] sm:$0xff] }
 0x436   :  { %v11392_v9 = vpop.f32.mrb[244].mxu0 }
 0x437   :  { %v4187_v13 = vadd.f32 %v6547_v5, %v11302_v35  ;;  %6143 = vmatprep.mubr.f32.mxu0 %v4396_v58  ;;  %v11394_v0 = vpop.f32.mrb[245].mxu0  ;;  %v2662_v58 = vadd.f32 %v11168_v18, %v14455_v44 }
 0x438   :  { %v3806_v24 = vpop.f32.mrb[10].mxu1 }
 0x439   :  { %v4397_v33 = vmax.f32 %v4187_v13, 0.0  ;;  %v6549_v28 = vadd.f32 %v3806_v24, %v2652_v3  ;;  %v3808_v49 = vpop.f32.mrb[11].mxu1 }
 0x43a   :  { %v11399_v6 = vpop.f32.mrb[246].mxu0 }
 0x43b   :  { %v4192_v32 = vadd.f32 %v6549_v28, %v11311_v54  ;;  %6144 = vmatmul.mubr.f32.gmra.mrb[26].mxu0 %v4397_v33  ;;  %v11401_v48 = vpop.f32.mrb[247].mxu0  ;;  %v14456_v33 = vld [vmem:[#allocation120_spill] sm:$0xff] }
 0x43c   :  { %v3811_v15 = vpop.f32.mrb[12].mxu1  ;;  %v2667_v28 = vadd.f32 %v11168_v18, %v14456_v33 }
 0x43d   :  { %v4398_v35 = vmax.f32 %v4192_v32, 0.0  ;;  %v6551_v52 = vadd.f32 %v3811_v15, %v2657_v4  ;;  %v3813_v50 = vpop.f32.mrb[13].mxu1 }
 0x43e   :  { %v11406_v8 = vpop.f32.mrb[248].mxu0 }
 0x43f   :  { %v4197_v5 = vadd.f32 %v6551_v52, %v11309_v45  ;;  %6146 = vmatprep.mubr.f32.mxu0 %v4398_v35  ;;  %v11408_v3 = vpop.f32.mrb[249].mxu0  ;;  %v14457_v52 = vld [vmem:[#allocation164_spill] sm:$0xff] }
 0x440   :  { %v3816_v30 = vpop.f32.mrb[14].mxu1  ;;  %v2672_v50 = vadd.f32 %v11168_v18, %v14457_v52 }
 0x441   :  { %v4399_v54 = vmax.f32 %v4197_v5, 0.0  ;;  %v6553_v13 = vadd.f32 %v3816_v30, %v2662_v58  ;;  %v3818_v24 = vpop.f32.mrb[15].mxu1 }
 0x442   :  { %v11413_v39 = vpop.f32.mrb[250].mxu0  ;;  %v2677_v24 = vadd.f32 %v11168_v18, %v10353_v62 }
 0x443   :  { %v4202_v49 = vadd.f32 %v6553_v13, %v11317_v38  ;;  %6147 = vmatmul.mubr.f32.gmra.mrb[28].mxu0 %v4399_v54  ;;  %v11415_v32 = vpop.f32.mrb[251].mxu0 }
 0x444   :  { %v3821_v4 = vpop.f32.mrb[16].mxu1 }
 0x445   :  { %v4400_v45 = vmax.f32 %v4202_v49, 0.0  ;;  %v6555_v15 = vadd.f32 %v3821_v4, %v2667_v28  ;;  %v3823_v35 = vpop.f32.mrb[17].mxu1 }
 0x446   :  { %v11420_v58 = vpop.f32.mrb[252].mxu0  ;;  %v2682_v35 = vadd.f32 %v11168_v18, %v10369_v17  ;;  %v2692_v17 = vadd.f32 %v11168_v18, %v10393_v12  ;;  %v2702_v12 = vadd.f32 %v11168_v18, %v10431_v53  ;;  %v2712_v53 = vadd.f32 %v11168_v18, %v10469_v61 }
 0x447   :  { %v4207_v44 = vadd.f32 %v6555_v15, %v11315_v51  ;;  %6149 = vmatprep.mubr.f32.mxu0 %v4400_v45  ;;  %v11422_v30 = vpop.f32.mrb[253].mxu0  ;;  %v2722_v61 = vadd.f32 %v11168_v18, %v10507_v10  ;;  %v2732_v10 = vadd.f32 %v11168_v18, %v10545_v55  ;;  %v2742_v55 = vadd.f32 %v11168_v18, %v10583_v63 }
 0x448   :  { %v3826_v5 = vpop.f32.mrb[18].mxu1  ;;  %v2752_v63 = vadd.f32 %v11168_v18, %v10621_v60 }
 0x449   :  { %v4401_v38 = vmax.f32 %v4207_v44, 0.0  ;;  %v6557_v13 = vadd.f32 %v3826_v5, %v2672_v50  ;;  %v3828_v54 = vpop.f32.mrb[19].mxu1 }
 0x44a   :  { %v11427_v28 = vpop.f32.mrb[254].mxu0 }
 0x44b   :  { %v4212_v33 = vadd.f32 %v6557_v13, %v11324_v46  ;;  %6150 = vmatmul.mubr.f32.gmra.mrb[30].mxu0 %v4401_v38  ;;  %v11429_v4 = vpop.f32.mrb[255].mxu0  ;;  %v2687_v46 = vadd.f32 %v11168_v18, %v10379_v29  ;;  %v2697_v29 = vadd.f32 %v11168_v18, %v10409_v21  ;;  %v2707_v21 = vadd.f32 %v11168_v18, %v10447_v1 }
 0x44c   :  { %v3831_v49 = vpop.f32.mrb[20].mxu1  ;;  %v2717_v1 = vadd.f32 %v11168_v18, %v10485_v7  ;;  %v2727_v7 = vadd.f32 %v11168_v18, %v10523_v59  ;;  %v2737_v59 = vadd.f32 %v11168_v18, %v10561_v36  ;;  %v2747_v36 = vadd.f32 %v11168_v18, %v10599_v27 }
 0x44d   :  { %v4402_v51 = vmax.f32 %v4212_v33, 0.0  ;;  %v6559_v15 = vadd.f32 %v3831_v49, %v2677_v24  ;;  %v3833_v45 = vpop.f32.mrb[21].mxu1  ;;  %v2757_v27 = vadd.f32 %v11168_v18, %v10643_v42 }
 0x44f   :  { %v4217_v52 = vadd.f32 %v6559_v15, %v11322_v57  ;;  %6152 = vmatprep.mubr.f32.mxu0 %v4402_v51 }
 0x450   :  { %v3836_v50 = vpop.f32.mrb[22].mxu1 }
 0x451   :  { %v4403_v44 = vmax.f32 %v4217_v52, 0.0  ;;  %v6561_v62 = vadd.f32 %v3836_v50, %v2682_v35  ;;  %v3838_v5 = vpop.f32.mrb[23].mxu1 }
 0x453   :  { %v4222_v38 = vadd.f32 %v6561_v62, %v11331_v31  ;;  %6153 = vmatmul.mubr.f32.gmra.mrb[32].mxu0 %v4403_v44 }
 0x454   :  { %v3841_v13 = vpop.f32.mrb[24].mxu1 }
 0x455   :  { %v4404_v54 = vmax.f32 %v4222_v38, 0.0  ;;  %v6563_v24 = vadd.f32 %v3841_v13, %v2687_v46  ;;  %v3843_v33 = vpop.f32.mrb[25].mxu1 }
 0x457   :  { %v4227_v57 = vadd.f32 %v6563_v24, %v11329_v16  ;;  %6155 = vmatprep.mubr.f32.mxu0 %v4404_v54 }
 0x458   :  { %v3846_v49 = vpop.f32.mrb[26].mxu1 }
 0x459   :  { %v4405_v51 = vmax.f32 %v4227_v57, 0.0  ;;  %v6565_v15 = vadd.f32 %v3846_v49, %v2692_v17  ;;  %v3848_v45 = vpop.f32.mrb[27].mxu1 }
 0x45b   :  { %v4232_v31 = vadd.f32 %v6565_v15, %v11338_v34  ;;  %6156 = vmatmul.mubr.f32.gmra.mrb[34].mxu0 %v4405_v51 }
 0x45c   :  { %v3851_v35 = vpop.f32.mrb[28].mxu1 }
 0x45d   :  { %v4406_v52 = vmax.f32 %v4232_v31, 0.0  ;;  %v6567_v50 = vadd.f32 %v3851_v35, %v2697_v29  ;;  %v3853_v44 = vpop.f32.mrb[29].mxu1 }
 0x45f   :  { %v4237_v16 = vadd.f32 %v6567_v50, %v11336_v47  ;;  %6158 = vmatprep.mubr.f32.mxu0 %v4406_v52 }
 0x460   :  { %v3856_v62 = vpop.f32.mrb[30].mxu1 }
 0x461   :  { %v4407_v5 = vmax.f32 %v4237_v16, 0.0  ;;  %v6569_v46 = vadd.f32 %v3856_v62, %v2702_v12  ;;  %v3858_v38 = vpop.f32.mrb[31].mxu1 }
 0x463   :  { %v4242_v34 = vadd.f32 %v6569_v46, %v11345_v11  ;;  %6159 = vmatmul.mubr.f32.gmra.mrb[36].mxu0 %v4407_v5 }
 0x464   :  { %v3861_v13 = vpop.f32.mrb[32].mxu1 }
 0x465   :  { %v4408_v54 = vmax.f32 %v4242_v34, 0.0  ;;  %v6571_v24 = vadd.f32 %v3861_v13, %v2707_v21  ;;  %v3863_v33 = vpop.f32.mrb[33].mxu1 }
 0x467   :  { %v4247_v47 = vadd.f32 %v6571_v24, %v11343_v25  ;;  %6161 = vmatprep.mubr.f32.mxu0 %v4408_v54 }
 0x468   :  { %v3866_v17 = vpop.f32.mrb[34].mxu1 }
 0x469   :  { %v4409_v57 = vmax.f32 %v4247_v47, 0.0  ;;  %v6573_v49 = vadd.f32 %v3866_v17, %v2712_v53  ;;  %v3868_v51 = vpop.f32.mrb[35].mxu1 }
 0x46b   :  { %v4252_v11 = vadd.f32 %v6573_v49, %v11352_v26  ;;  %6162 = vmatmul.mubr.f32.gmra.mrb[38].mxu0 %v4409_v57 }
 0x46c   :  { %v3871_v15 = vpop.f32.mrb[36].mxu1 }
 0x46d   :  { %v4410_v45 = vmax.f32 %v4252_v11, 0.0  ;;  %v6575_v29 = vadd.f32 %v3871_v15, %v2717_v1  ;;  %v3873_v31 = vpop.f32.mrb[37].mxu1 }
 0x46f   :  { %v4257_v25 = vadd.f32 %v6575_v29, %v11350_v56  ;;  %6164 = vmatprep.mubr.f32.mxu0 %v4410_v45 }
 0x470   :  { %v3876_v35 = vpop.f32.mrb[38].mxu1 }
 0x471   :  { %v4411_v52 = vmax.f32 %v4257_v25, 0.0  ;;  %v6577_v50 = vadd.f32 %v3876_v35, %v2722_v61  ;;  %v3878_v44 = vpop.f32.mrb[39].mxu1 }
 0x473   :  { %v4262_v26 = vadd.f32 %v6577_v50, %v11359_v41  ;;  %6165 = vmatmul.mubr.f32.gmra.mrb[40].mxu0 %v4411_v52  ;;  %v14458_v50 = vld [vmem:[#allocation174_spill] sm:$0xff] }
 0x474   :  { %v3881_v12 = vpop.f32.mrb[40].mxu1  ;;  %v2762_v60 = vadd.f32 %v11168_v18, %v14458_v50 }
 0x475   :  { %v4412_v16 = vmax.f32 %v4262_v26, 0.0  ;;  %v6579_v62 = vadd.f32 %v3881_v12, %v2727_v7  ;;  %v3883_v5 = vpop.f32.mrb[41].mxu1 }
 0x477   :  { %v4267_v56 = vadd.f32 %v6579_v62, %v11357_v14  ;;  %6167 = vmatprep.mubr.f32.mxu0 %v4412_v16  ;;  %v14459_v16 = vld [vmem:[#allocation182_spill] sm:$0xff] }
 0x478   :  { %v3886_v46 = vpop.f32.mrb[42].mxu1  ;;  %v2767_v42 = vadd.f32 %v11168_v18, %v14459_v16 }
 0x479   :  { %v4413_v38 = vmax.f32 %v4267_v56, 0.0  ;;  %v6581_v21 = vadd.f32 %v3886_v46, %v2732_v10  ;;  %v3888_v34 = vpop.f32.mrb[43].mxu1  ;;  %v14460_v46 = vld [vmem:[#allocation185_spill] sm:$0xff] }
 0x47b   :  { %v4272_v41 = vadd.f32 %v6581_v21, %v11366_v43  ;;  %6168 = vmatmul.mubr.f32.gmra.mrb[42].mxu0 %v4413_v38  ;;  %v2772_v38 = vadd.f32 %v11168_v18, %v14460_v46 }
 0x47c   :  { %v3891_v13 = vpop.f32.mrb[44].mxu1 }
 0x47d   :  { %v4414_v54 = vmax.f32 %v4272_v41, 0.0  ;;  %v6583_v24 = vadd.f32 %v3891_v13, %v2737_v59  ;;  %v3893_v33 = vpop.f32.mrb[45].mxu1  ;;  %v14461_v13 = vld [vmem:[#allocation202_spill] sm:$0xff] }
 0x47f   :  { %v4277_v14 = vadd.f32 %v6583_v24, %v11364_v40  ;;  %6170 = vmatprep.mubr.f32.mxu0 %v4414_v54  ;;  %v2777_v54 = vadd.f32 %v11168_v18, %v14461_v13 }
 0x480   :  { %v3896_v53 = vpop.f32.mrb[46].mxu1 }
 0x481   :  { %v4415_v47 = vmax.f32 %v4277_v14, 0.0  ;;  %v6585_v17 = vadd.f32 %v3896_v53, %v2742_v55  ;;  %v3898_v57 = vpop.f32.mrb[47].mxu1  ;;  %v14462_v53 = vld [vmem:[#allocation162_spill] sm:$0xff] }
 0x483   :  { %v4282_v43 = vadd.f32 %v6585_v17, %v11373_v37  ;;  %6171 = vmatmul.mubr.f32.gmra.mrb[44].mxu0 %v4415_v47  ;;  %v2782_v47 = vadd.f32 %v11168_v18, %v14462_v53 }
 0x484   :  { %v3901_v49 = vpop.f32.mrb[48].mxu1 }
 0x485   :  { %v4416_v51 = vmax.f32 %v4282_v43, 0.0  ;;  %v6587_v1 = vadd.f32 %v3901_v49, %v2747_v36  ;;  %v3903_v11 = vpop.f32.mrb[49].mxu1  ;;  %v14463_v49 = vld [vmem:[#allocation192_spill] sm:$0xff] }
 0x487   :  { %v4287_v40 = vadd.f32 %v6587_v1, %v11371_v20  ;;  %6173 = vmatprep.mubr.f32.mxu0 %v4416_v51  ;;  %v2787_v51 = vadd.f32 %v11168_v18, %v14463_v49 }
 0x488   :  { %v3906_v15 = vpop.f32.mrb[50].mxu1 }
 0x489   :  { %v4417_v45 = vmax.f32 %v4287_v40, 0.0  ;;  %v6589_v29 = vadd.f32 %v3906_v15, %v2752_v63  ;;  %v3908_v31 = vpop.f32.mrb[51].mxu1  ;;  %v14464_v15 = vld [vmem:[#allocation25_spill] sm:$0xff] }
 0x48b   :  { %v4292_v37 = vadd.f32 %v6589_v29, %v11380_v19  ;;  %6174 = vmatmul.mubr.f32.gmra.mrb[46].mxu0 %v4417_v45  ;;  %v2792_v45 = vadd.f32 %v11168_v18, %v14464_v15  ;;  %v11503_v29 = vld [vmem:[%s12043_s6] ss:$0 sm:$0xff] }
 0x48c   :  { %v3911_v61 = vpop.f32.mrb[52].mxu1 }
 0x48d   :  { %v4418_v25 = vmax.f32 %v4292_v37, 0.0  ;;  %v6591_v35 = vadd.f32 %v3911_v61, %v2757_v27  ;;  %v3913_v52 = vpop.f32.mrb[53].mxu1 }
 0x48e   :  { %v14465_v52 = vld [vmem:[#allocation200_spill] sm:$0xff] }
 0x48f   :  { %v4297_v20 = vadd.f32 %v6591_v35, %v11378_v23  ;;  %6176 = vmatprep.mubr.f32.mxu0 %v4418_v25  ;;  %v2797_v50 = vadd.f32 %v11168_v18, %v14465_v52 }
 0x490   :  { %v3916_v44 = vpop.f32.mrb[54].mxu1 }
 0x491   :  { %v4419_v7 = vmax.f32 %v4297_v20, 0.0  ;;  %v6593_v26 = vadd.f32 %v3916_v44, %v2762_v60  ;;  %v3918_v12 = vpop.f32.mrb[55].mxu1 }
 0x493   :  { %v4302_v19 = vadd.f32 %v6593_v26, %v11387_v2  ;;  %6177 = vmatmul.mubr.f32.gmra.mrb[48].mxu0 %v4419_v7 }
 0x494   :  { %v3921_v62 = vpop.f32.mrb[56].mxu1 }
 0x495   :  { %v4420_v5 = vmax.f32 %v4302_v19, 0.0  ;;  %v6595_v10 = vadd.f32 %v3921_v62, %v2767_v42  ;;  %v3923_v56 = vpop.f32.mrb[57].mxu1  ;;  %v6881_v42 = vld [vmem:[%s12037_s0 + $0x8] sm:$0xff] }
 0x497   :  { %v4307_v23 = vadd.f32 %v6595_v10, %v11385_v22  ;;  %6179 = vmatprep.mubr.f32.mxu0 %v4420_v5  ;;  %v14466_v5 = vld [vmem:[#allocation295_spill] sm:$0xff] }
 0x498   :  { %v3926_v21 = vpop.f32.mrb[58].mxu1  ;;  %v2802_v10 = vadd.f32 %v11168_v18, %v14466_v5 }
 0x499   :  { %v4421_v34 = vmax.f32 %v4307_v23, 0.0  ;;  %v6597_v59 = vadd.f32 %v3926_v21, %v2772_v38  ;;  %v3928_v41 = vpop.f32.mrb[59].mxu1 }
 0x49b   :  { %v4312_v2 = vadd.f32 %v6597_v59, %v11394_v0  ;;  %6180 = vmatmul.mubr.f32.gmra.mrb[50].mxu0 %v4421_v34 }
 0x49c   :  { %v3931_v24 = vpop.f32.mrb[60].mxu1 }
 0x49d   :  { %v4422_v33 = vmax.f32 %v4312_v2, 0.0  ;;  %v6599_v55 = vadd.f32 %v3931_v24, %v2777_v54  ;;  %v3933_v14 = vpop.f32.mrb[61].mxu1 }
 0x49e   :  { %v6884_v14 = vld [vmem:[%s12037_s0 + $0x18] sm:$0xff] }
 0x49f   :  { %v4317_v22 = vadd.f32 %v6599_v55, %v11392_v9  ;;  %6182 = vmatprep.mubr.f32.mxu0 %v4422_v33  ;;  %v14468_v33 = vld [vmem:[#allocation220_spill] sm:$0xff] }
 0x4a0   :  { %v3936_v17 = vpop.f32.mrb[62].mxu1 }
 0x4a1   :  { %v4423_v57 = vmax.f32 %v4317_v22, 0.0  ;;  %v6601_v36 = vadd.f32 %v3936_v17, %v2782_v47  ;;  %v3938_v43 = vpop.f32.mrb[63].mxu1  ;;  %v6885_v22 = vld [vmem:[%s12037_s0 + $0x10] sm:$0xff] }
 0x4a3   :  { %v4322_v0 = vadd.f32 %v6601_v36, %v11401_v48  ;;  %6183 = vmatmul.mubr.f32.gmra.mrb[52].mxu0 %v4423_v57 }
 0x4a4   :  { %v3941_v1 = vpop.f32.mrb[64].mxu1 }
 0x4a5   :  { %v4424_v11 = vmax.f32 %v4322_v0, 0.0  ;;  %v6603_v63 = vadd.f32 %v3941_v1, %v2787_v51  ;;  %v3943_v40 = vpop.f32.mrb[65].mxu1 }
 0x4a7   :  { %v4327_v9 = vadd.f32 %v6603_v63, %v11399_v6  ;;  %6185 = vmatprep.mubr.f32.mxu0 %v4424_v11  ;;  %v14470_v11 = vld [vmem:[#allocation296_spill] sm:$0xff] }
 0x4a8   :  { %v3946_v31 = vpop.f32.mrb[66].mxu1  ;;  %v6106_v61 = vpop.f32.mrb[0].mxu0 }
 0x4a9   :  { %v4425_v27 = vmax.f32 %v4327_v9, 0.0  ;;  %v6605_v37 = vadd.f32 %v3946_v31, %v2792_v45  ;;  %v3948_v48 = vpop.f32.mrb[67].mxu1  ;;  %v4529_v25 = vadd.f32 %v6106_v61, %v11503_v29  ;;  %v4523_v35 = vpop.f32.mrb[1].mxu0 }
 0x4aa   :  { %v4524_v6 = vadd.f32 %v11503_v29, %v4523_v35 }
 0x4ab   :  { %v4332_v60 = vadd.f32 %v6605_v37, %v11408_v3  ;;  %6186 = vmatmul.mubr.f32.gmra.mrb[54].mxu0 %v4425_v27  ;;  %v4843_v20 = vmax.f32 %v4529_v25, 0.0  ;;  %v6882_v3 = vld [vmem:[%s12037_s0] sm:$0xff] }
 0x4ac   :  { %v3951_v44 = vpop.f32.mrb[68].mxu1  ;;  %v4842_v26 = vmax.f32 %v4524_v6, 0.0  ;;  %v14473_v25 = vld [vmem:[#allocation209_spill] sm:$0xff] }
 0x4ad   :  { %v4426_v7 = vmax.f32 %v4332_v60, 0.0  ;;  %v6607_v12 = vadd.f32 %v3951_v44, %v2797_v50  ;;  %v3953_v16 = vpop.f32.mrb[69].mxu1  ;;  %v4907_v19 = vadd.f32 %v6881_v42, %v4843_v20  ;;  %v6887_v60 = vld [vmem:[%s12037_s0 + $0x20] sm:$0xff] }
 0x4ae   :  { %v6109_v62 = vpop.f32.mrb[2].mxu0  ;;  %v4906_v56 = vadd.f32 %v6882_v3, %v4842_v26 }
 0x4af   :  { %v4337_v46 = vadd.f32 %v6607_v12, %v11406_v8  ;;  %v4539_v38 = vadd.f32 %v6109_v62, %v11503_v29  ;;  %v4533_v23 = vpop.f32.mrb[3].mxu0  ;;  %6188 = vmatprep.mubr.f32.mxu0 %v4426_v7  ;;  %v4971_v21 = vmax.f32 %v4907_v19, 0.0  ;;  %v6883_v8 = vld [vmem:[%s12042_s5] ss:$0 sm:$0xff] }
 0x4b0   :  { %v4534_v34 = vadd.f32 %v11503_v29, %v4533_v23  ;;  %v3956_v59 = vpop.f32.mrb[70].mxu1  ;;  %v4970_v41 = vmax.f32 %v4906_v56, 0.0  ;;  %v2807_v55 = vadd.f32 %v6883_v8, %v14468_v33  ;;  %v2812_v63 = vadd.f32 %v6883_v8, %v14470_v11  ;;  %v14474_v19 = vld [vmem:[#allocation213_spill] sm:$0xff] }
 0x4b1   :  { %v4427_v13 = vmax.f32 %v4337_v46, 0.0  ;;  %v4845_v54 = vmax.f32 %v4539_v38, 0.0  ;;  %v6609_v2 = vadd.f32 %v3956_v59, %v2802_v10  ;;  %v3958_v18 = vpop.f32.mrb[71].mxu1  ;;  %5035 = vst.msk [vmem:[%s12044_s7 + $0x8] sm:$0xff] %vm14467_vm9, %v4971_v21  ;;  %v2817_v35 = vadd.f32 %v6883_v8, %v14473_v25  ;;  %v14477_v59 = vld [vmem:[#allocation297_spill] sm:$0xff]  ;;  %vm14488_vm9 = vmmov %vm14487_vm0 }
 0x4b2   :  { %v4844_v24 = vmax.f32 %v4534_v34, 0.0  ;;  %5034 = vst.msk [vmem:[%s12044_s7] sm:$0xff] %vm14469_vm4, %v4970_v41  ;;  %v2822_v62 = vadd.f32 %v6883_v8, %v14474_v19  ;;  %v2827_v41 = vadd.f32 %v6883_v8, %v14477_v59  ;;  %vm14489_vm4 = vmmov %vm14487_vm0 }
 0x4b3   :  { %v4909_v53 = vadd.f32 %v6884_v14, %v4845_v54  ;;  %v4342_v47 = vadd.f32 %v6609_v2, %v11415_v32  ;;  %6189 = vmatmul.mubr.f32.gmra.mrb[56].mxu0 %v4427_v13  ;;  %v6889_v2 = vld [vmem:[%s12037_s0 + $0x30] sm:$0xff] }
 0x4b4   :  { %v4908_v17 = vadd.f32 %v6885_v22, %v4844_v24  ;;  %v3961_v57 = vpop.f32.mrb[72].mxu1 }
 0x4b5   :  { %v4973_v36 = vmax.f32 %v4909_v53, 0.0  ;;  %v4428_v43 = vmax.f32 %v4342_v47, 0.0  ;;  %v6611_v49 = vadd.f32 %v3961_v57, %v2807_v55  ;;  %v3963_v51 = vpop.f32.mrb[73].mxu1 }
 0x4b6   :  { %v4972_v0 = vmax.f32 %v4908_v17, 0.0  ;;  %v6112_v1 = vpop.f32.mrb[4].mxu0  ;;  %v6890_v51 = vld [vmem:[%s12037_s0 + $0x48] sm:$0xff] }
 0x4b7   :  { %5037 = vst.msk [vmem:[%s12044_s7 + $0x18] sm:$0xff] %vm14471_vm10, %v4973_v36  ;;  %v4347_v32 = vadd.f32 %v6611_v49, %v11413_v39  ;;  %v4549_v40 = vadd.f32 %v6112_v1, %v11503_v29  ;;  %v4543_v15 = vpop.f32.mrb[5].mxu0  ;;  %6191 = vmatprep.mubr.f32.mxu0 %v4428_v43  ;;  %v6886_v39 = vld [vmem:[%s12037_s0 + $0x28] sm:$0xff]  ;;  %vm14490_vm10 = vmmov %vm14487_vm0 }
 0x4b8   :  { %5036 = vst.msk [vmem:[%s12044_s7 + $0x10] sm:$0xff] %vm14472_vm11, %v4972_v0  ;;  %v4544_v45 = vadd.f32 %v11503_v29, %v4543_v15  ;;  %v3966_v9 = vpop.f32.mrb[74].mxu1  ;;  %vm14491_vm11 = vmmov %vm14487_vm0 }
 0x4b9   :  { %v4429_v31 = vmax.f32 %v4347_v32, 0.0  ;;  %v4847_v27 = vmax.f32 %v4549_v40, 0.0  ;;  %v6613_v37 = vadd.f32 %v3966_v9, %v2812_v63  ;;  %v3968_v48 = vpop.f32.mrb[75].mxu1 }
 0x4ba   :  { %v4846_v61 = vmax.f32 %v4544_v45, 0.0  ;;  %v6893_v48 = vld [vmem:[%s12037_s0 + $0x50] sm:$0xff] }
 0x4bb   :  { %v4911_v52 = vadd.f32 %v6886_v39, %v4847_v27  ;;  %v4352_v50 = vadd.f32 %v6613_v37, %v11422_v30  ;;  %6192 = vmatmul.mubr.f32.gmra.mrb[58].mxu0 %v4429_v31  ;;  %v6892_v27 = vld [vmem:[%s12037_s0 + $0x58] sm:$0xff] }
 0x4bc   :  { %v4910_v6 = vadd.f32 %v6887_v60, %v4846_v61  ;;  %v3971_v20 = vpop.f32.mrb[76].mxu1 }
 0x4bd   :  { %v4975_v44 = vmax.f32 %v4911_v52, 0.0  ;;  %v4430_v7 = vmax.f32 %v4352_v50, 0.0  ;;  %v6615_v26 = vadd.f32 %v3971_v20, %v2817_v35  ;;  %v3973_v12 = vpop.f32.mrb[77].mxu1 }
 0x4be   :  { %v4974_v16 = vmax.f32 %v4910_v6, 0.0  ;;  %v6115_v42 = vpop.f32.mrb[6].mxu0 }
 0x4bf   :  { %5039 = vst.msk [vmem:[%s12044_s7 + $0x28] sm:$0xff] %vm14475_vm7, %v4975_v44  ;;  %v4357_v30 = vadd.f32 %v6615_v26, %v11420_v58  ;;  %v4559_v5 = vadd.f32 %v6115_v42, %v11503_v29  ;;  %v4553_v10 = vpop.f32.mrb[7].mxu0  ;;  %6194 = vmatprep.mubr.f32.mxu0 %v4430_v7  ;;  %v6888_v58 = vld [vmem:[%s12037_s0 + $0x38] sm:$0xff]  ;;  %v6894_v44 = vld [vmem:[%s12037_s0 + $0x68] sm:$0xff]  ;;  %v6895_v26 = vld [vmem:[%s12037_s0 + $0x60] sm:$0xff] }
 0x4c0   :  { %5038 = vst.msk [vmem:[%s12044_s7 + $0x20] sm:$0xff] %vm14476_vm14, %v4974_v16  ;;  %v4554_v3 = vadd.f32 %v11503_v29, %v4553_v10  ;;  %v3976_v56 = vpop.f32.mrb[78].mxu1  ;;  %vm14492_vm7 = vmmov %vm14487_vm0 }
 0x4c1   :  { %v4431_v46 = vmax.f32 %v4357_v30, 0.0  ;;  %v4849_v38 = vmax.f32 %v4559_v5, 0.0  ;;  %v6617_v23 = vadd.f32 %v3976_v56, %v2822_v62  ;;  %v3978_v21 = vpop.f32.mrb[79].mxu1  ;;  %v6896_v56 = vld [vmem:[%s12037_s0 + $0x78] sm:$0xff]  ;;  %vm14493_vm14 = vmmov %vm14487_vm0 }
 0x4c2   :  { %v4848_v34 = vmax.f32 %v4554_v3, 0.0 }
 0x4c3   :  { %v4913_v13 = vadd.f32 %v6888_v58, %v4849_v38  ;;  %v4362_v54 = vadd.f32 %v6617_v23, %v11429_v4  ;;  %6195 = vmatmul.mubr.f32.gmra.mrb[60].mxu0 %v4431_v46  ;;  %v6897_v38 = vld [vmem:[%s12037_s0 + $0x70] sm:$0xff] }
 0x4c4   :  { %v4912_v18 = vadd.f32 %v6889_v2, %v4848_v34  ;;  %v3981_v24 = vpop.f32.mrb[80].mxu1 }
 0x4c5   :  { %v4977_v33 = vmax.f32 %v4913_v13, 0.0  ;;  %v4432_v55 = vmax.f32 %v4362_v54, 0.0  ;;  %v6619_v14 = vadd.f32 %v3981_v24, %v2827_v41  ;;  %v3983_v53 = vpop.f32.mrb[81].mxu1 }
 0x4c6   :  { %v4976_v47 = vmax.f32 %v4912_v18, 0.0  ;;  %v6118_v8 = vpop.f32.mrb[8].mxu0  ;;  %v6898_v18 = vld [vmem:[%s12037_s0 + $0x88] sm:$0xff] }
 0x4c7   :  { %5041 = vst.msk [vmem:[%s12044_s7 + $0x38] sm:$0xff] %vm14478_vm12, %v4977_v33  ;;  %v4367_v4 = vadd.f32 %v6619_v14, %v11427_v28  ;;  %v4569_v22 = vadd.f32 %v6118_v8, %v11503_v29  ;;  %v4563_v17 = vpop.f32.mrb[9].mxu0  ;;  %6197 = vmatprep.mubr.f32.mxu0 %v4432_v55  ;;  %v6891_v28 = vld [vmem:[%s12037_s0 + $0x40] sm:$0xff]  ;;  %vm14494_vm12 = vmmov %vm14487_vm0 }
 0x4c8   :  { %5040 = vst.msk [vmem:[%s12044_s7 + $0x30] sm:$0xff] %vm14479_vm5, %v4976_v47  ;;  %v4564_v57 = vadd.f32 %v11503_v29, %v4563_v17  ;;  %v6899_v33 = vld [vmem:[%s12037_s0 + $0x80] sm:$0xff]  ;;  %vm14495_vm5 = vmmov %vm14487_vm0 }
 0x4c9   :  { %v4433_v36 = vmax.f32 %v4367_v4, 0.0  ;;  %v4851_v43 = vmax.f32 %v4569_v22, 0.0 }
 0x4ca   :  { %v4850_v49 = vmax.f32 %v4564_v57, 0.0 }
 0x4cb   :  { %v4915_v0 = vadd.f32 %v6890_v51, %v4851_v43  ;;  %6198 = vmatmul.mubr.f32.gmra.mrb[62].mxu0 %v4433_v36  ;;  %v6900_v36 = vld [vmem:[%s12037_s0 + $0x98] sm:$0xff] }
 0x4cc   :  { %v4914_v1 = vadd.f32 %v6891_v28, %v4850_v49  ;;  %v6901_v49 = vld [vmem:[%s12037_s0 + $0x90] sm:$0xff] }
 0x4cd   :  { %v4979_v11 = vmax.f32 %v4915_v0, 0.0 }
 0x4ce   :  { %v4978_v63 = vmax.f32 %v4914_v1, 0.0  ;;  %v6121_v32 = vpop.f32.mrb[10].mxu0 }
 0x4cf   :  { %5043 = vst.msk [vmem:[%s12044_s7 + $0x48] sm:$0xff] %vm14480_vm13, %v4979_v11  ;;  %v4579_v40 = vadd.f32 %v6121_v32, %v11503_v29  ;;  %v4573_v15 = vpop.f32.mrb[11].mxu0  ;;  %vm14496_vm13 = vmmov %vm14487_vm0 }
 0x4d0   :  { %5042 = vst.msk [vmem:[%s12044_s7 + $0x40] sm:$0xff] %vm14481_vm15, %v4978_v63  ;;  %v4574_v45 = vadd.f32 %v11503_v29, %v4573_v15  ;;  %vm14497_vm15 = vmmov %vm14487_vm0 }
 0x4d1   :  { %v4853_v9 = vmax.f32 %v4579_v40, 0.0 }
 0x4d2   :  { %v4852_v31 = vmax.f32 %v4574_v45, 0.0  ;;  %v6902_v45 = vld [vmem:[%s12037_s0 + $0xa8] sm:$0xff] }
 0x4d3   :  { %v4917_v37 = vadd.f32 %v6892_v27, %v4853_v9 }
 0x4d4   :  { %v4916_v61 = vadd.f32 %v6893_v48, %v4852_v31  ;;  %v6903_v31 = vld [vmem:[%s12037_s0 + $0xa0] sm:$0xff] }
 0x4d5   :  { %v4981_v25 = vmax.f32 %v4917_v37, 0.0 }
 0x4d6   :  { %v4980_v35 = vmax.f32 %v4916_v61, 0.0  ;;  %v6124_v39 = vpop.f32.mrb[12].mxu0 }
 0x4d7   :  { %5045 = vst.msk [vmem:[%s12044_s7 + $0x58] sm:$0xff] %vm14482_vm6, %v4981_v25  ;;  %v4589_v52 = vadd.f32 %v6124_v39, %v11503_v29  ;;  %v4583_v50 = vpop.f32.mrb[13].mxu0  ;;  %vm14498_vm6 = vmmov %vm14487_vm0 }
 0x4d8   :  { %5044 = vst.msk [vmem:[%s12044_s7 + $0x50] sm:$0xff] %vm14483_vm2, %v4980_v35  ;;  %v4584_v60 = vadd.f32 %v11503_v29, %v4583_v50  ;;  %vm14499_vm2 = vmmov %vm14487_vm0 }
 0x4d9   :  { %v4855_v6 = vmax.f32 %v4589_v52, 0.0 }
 0x4da   :  { %v4854_v20 = vmax.f32 %v4584_v60, 0.0  ;;  %v6904_v60 = vld [vmem:[%s12037_s0 + $0xb8] sm:$0xff] }
 0x4db   :  { %v4919_v7 = vadd.f32 %v6894_v44, %v4855_v6 }
 0x4dc   :  { %v4918_v12 = vadd.f32 %v6895_v26, %v4854_v20  ;;  %v6905_v20 = vld [vmem:[%s12037_s0 + $0xb0] sm:$0xff] }
 0x4dd   :  { %v4983_v16 = vmax.f32 %v4919_v7, 0.0 }
 0x4de   :  { %v4982_v42 = vmax.f32 %v4918_v12, 0.0  ;;  %v6127_v19 = vpop.f32.mrb[14].mxu0 }
 0x4df   :  { %5047 = vst.msk [vmem:[%s12044_s7 + $0x68] sm:$0xff] %vm14484_vm1, %v4983_v16  ;;  %v4599_v62 = vadd.f32 %v6127_v19, %v11503_v29  ;;  %v4593_v30 = vpop.f32.mrb[15].mxu0  ;;  %vm14500_vm1 = vmmov %vm14487_vm0 }
 0x4e0   :  { %5046 = vst.msk [vmem:[%s12044_s7 + $0x60] sm:$0xff] %vm14485_vm8, %v4982_v42  ;;  %v4594_v5 = vadd.f32 %v11503_v29, %v4593_v30  ;;  %vm14501_vm8 = vmmov %vm14487_vm0 }
 0x4e1   :  { %v4857_v10 = vmax.f32 %v4599_v62, 0.0 }
 0x4e2   :  { %v4856_v3 = vmax.f32 %v4594_v5, 0.0  ;;  %v6906_v5 = vld [vmem:[%s12037_s0 + $0xc8] sm:$0xff] }
 0x4e3   :  { %v4921_v46 = vadd.f32 %v6896_v56, %v4857_v10 }
 0x4e4   :  { %v4920_v23 = vadd.f32 %v6897_v38, %v4856_v3  ;;  %v6907_v3 = vld [vmem:[%s12037_s0 + $0xc0] sm:$0xff] }
 0x4e5   :  { %v4985_v21 = vmax.f32 %v4921_v46, 0.0 }
 0x4e6   :  { %v4984_v34 = vmax.f32 %v4920_v23, 0.0  ;;  %v6130_v59 = vpop.f32.mrb[16].mxu0 }
 0x4e7   :  { %5049 = vst.msk [vmem:[%s12044_s7 + $0x78] sm:$0xff] %vm14486_vm3, %v4985_v21  ;;  %v4609_v41 = vadd.f32 %v6130_v59, %v11503_v29  ;;  %v4603_v58 = vpop.f32.mrb[17].mxu0  ;;  %vm14502_vm3 = vmmov %vm14487_vm0 }
 0x4e8   :  { %5048 = vst.msk [vmem:[%s12044_s7 + $0x70] sm:$0xff] %vm14487_vm0, %v4984_v34  ;;  %v4604_v13 = vadd.f32 %v11503_v29, %v4603_v58 }
 0x4e9   :  { %v4859_v54 = vmax.f32 %v4609_v41, 0.0 }
 0x4ea   :  { %v4858_v2 = vmax.f32 %v4604_v13, 0.0  ;;  %v6908_v13 = vld [vmem:[%s12037_s0 + $0xd8] sm:$0xff] }
 0x4eb   :  { %v4923_v24 = vadd.f32 %v6898_v18, %v4859_v54 }
 0x4ec   :  { %v4922_v55 = vadd.f32 %v6899_v33, %v4858_v2  ;;  %v6909_v2 = vld [vmem:[%s12037_s0 + $0xd0] sm:$0xff] }
 0x4ed   :  { %v4987_v14 = vmax.f32 %v4923_v24, 0.0 }
 0x4ee   :  { %v4986_v53 = vmax.f32 %v4922_v55, 0.0  ;;  %v6133_v47 = vpop.f32.mrb[18].mxu0 }
 0x4ef   :  { %5051 = vst.msk [vmem:[%s12044_s7 + $0x88] sm:$0xff] %vm14488_vm9, %v4987_v14  ;;  %v4619_v8 = vadd.f32 %v6133_v47, %v11503_v29  ;;  %v4613_v4 = vpop.f32.mrb[19].mxu0  ;;  %vm14503_vm9 = vmmov %vm14487_vm0 }
 0x4f0   :  { %5050 = vst.msk [vmem:[%s12044_s7 + $0x80] sm:$0xff] %vm14489_vm4, %v4986_v53  ;;  %v4614_v22 = vadd.f32 %v11503_v29, %v4613_v4  ;;  %vm14504_vm4 = vmmov %vm14487_vm0 }
 0x4f1   :  { %v4861_v17 = vmax.f32 %v4619_v8, 0.0 }
 0x4f2   :  { %v4860_v57 = vmax.f32 %v4614_v22, 0.0  ;;  %v6910_v22 = vld [vmem:[%s12037_s0 + $0xe8] sm:$0xff] }
 0x4f3   :  { %v4925_v43 = vadd.f32 %v6900_v36, %v4861_v17 }
 0x4f4   :  { %v4924_v51 = vadd.f32 %v6901_v49, %v4860_v57  ;;  %v6911_v57 = vld [vmem:[%s12037_s0 + $0xe0] sm:$0xff] }
 0x4f5   :  { %v4989_v0 = vmax.f32 %v4925_v43, 0.0 }
 0x4f6   :  { %v4988_v28 = vmax.f32 %v4924_v51, 0.0  ;;  %v6136_v1 = vpop.f32.mrb[20].mxu0 }
 0x4f7   :  { %5053 = vst.msk [vmem:[%s12044_s7 + $0x98] sm:$0xff] %vm14490_vm10, %v4989_v0  ;;  %v4629_v11 = vadd.f32 %v6136_v1, %v11503_v29  ;;  %v4623_v63 = vpop.f32.mrb[21].mxu0  ;;  %vm14505_vm10 = vmmov %vm14487_vm0 }
 0x4f8   :  { %5052 = vst.msk [vmem:[%s12044_s7 + $0x90] sm:$0xff] %vm14491_vm11, %v4988_v28  ;;  %v4624_v32 = vadd.f32 %v11503_v29, %v4623_v63  ;;  %vm14506_vm11 = vmmov %vm14487_vm0 }
 0x4f9   :  { %v4863_v40 = vmax.f32 %v4629_v11, 0.0 }
 0x4fa   :  { %v4862_v15 = vmax.f32 %v4624_v32, 0.0  ;;  %v6912_v32 = vld [vmem:[%s12037_s0 + $0xf8] sm:$0xff] }
 0x4fb   :  { %v4927_v9 = vadd.f32 %v6902_v45, %v4863_v40 }
 0x4fc   :  { %v4926_v27 = vadd.f32 %v6903_v31, %v4862_v15  ;;  %v6913_v15 = vld [vmem:[%s12037_s0 + $0xf0] sm:$0xff] }
 0x4fd   :  { %v4991_v37 = vmax.f32 %v4927_v9, 0.0 }
 0x4fe   :  { %v4990_v48 = vmax.f32 %v4926_v27, 0.0  ;;  %v6139_v61 = vpop.f32.mrb[22].mxu0 }
 0x4ff   :  { %5055 = vst.msk [vmem:[%s12044_s7 + $0xa8] sm:$0xff] %vm14492_vm7, %v4991_v37  ;;  %v4639_v25 = vadd.f32 %v6139_v61, %v11503_v29  ;;  %v4633_v35 = vpop.f32.mrb[23].mxu0  ;;  %vm14507_vm7 = vmmov %vm14487_vm0 }
 0x500   :  { %5054 = vst.msk [vmem:[%s12044_s7 + $0xa0] sm:$0xff] %vm14493_vm14, %v4990_v48  ;;  %v4634_v39 = vadd.f32 %v11503_v29, %v4633_v35  ;;  %vm14508_vm14 = vmmov %vm14487_vm0 }
 0x501   :  { %v4865_v52 = vmax.f32 %v4639_v25, 0.0 }
 0x502   :  { %v4864_v50 = vmax.f32 %v4634_v39, 0.0  ;;  %v6914_v39 = vld [vmem:[%s12037_s0 + $0x108] sm:$0xff] }
 0x503   :  { %v4929_v6 = vadd.f32 %v6904_v60, %v4865_v52 }
 0x504   :  { %v4928_v44 = vadd.f32 %v6905_v20, %v4864_v50  ;;  %v6915_v50 = vld [vmem:[%s12037_s0 + $0x100] sm:$0xff] }
 0x505   :  { %v4993_v7 = vmax.f32 %v4929_v6, 0.0 }
 0x506   :  { %v4992_v26 = vmax.f32 %v4928_v44, 0.0  ;;  %v6142_v12 = vpop.f32.mrb[24].mxu0 }
 0x507   :  { %5057 = vst.msk [vmem:[%s12044_s7 + $0xb8] sm:$0xff] %vm14494_vm12, %v4993_v7  ;;  %v4649_v16 = vadd.f32 %v6142_v12, %v11503_v29  ;;  %v4643_v42 = vpop.f32.mrb[25].mxu0  ;;  %vm14509_vm12 = vmmov %vm14487_vm0 }
 0x508   :  { %5056 = vst.msk [vmem:[%s12044_s7 + $0xb0] sm:$0xff] %vm14495_vm5, %v4992_v26  ;;  %v4644_v19 = vadd.f32 %v11503_v29, %v4643_v42  ;;  %vm14510_vm5 = vmmov %vm14487_vm0 }
 0x509   :  { %v4867_v62 = vmax.f32 %v4649_v16, 0.0 }
 0x50a   :  { %v4866_v30 = vmax.f32 %v4644_v19, 0.0  ;;  %v6916_v19 = vld [vmem:[%s12037_s0 + $0x118] sm:$0xff] }
 0x50b   :  { %v4931_v10 = vadd.f32 %v6906_v5, %v4867_v62 }
 0x50c   :  { %v4930_v56 = vadd.f32 %v6907_v3, %v4866_v30  ;;  %v6917_v30 = vld [vmem:[%s12037_s0 + $0x110] sm:$0xff] }
 0x50d   :  { %v4995_v46 = vmax.f32 %v4931_v10, 0.0 }
 0x50e   :  { %v4994_v38 = vmax.f32 %v4930_v56, 0.0  ;;  %v6145_v23 = vpop.f32.mrb[26].mxu0 }
 0x50f   :  { %5059 = vst.msk [vmem:[%s12044_s7 + $0xc8] sm:$0xff] %vm14496_vm13, %v4995_v46  ;;  %v4659_v21 = vadd.f32 %v6145_v23, %v11503_v29  ;;  %v4653_v34 = vpop.f32.mrb[27].mxu0  ;;  %vm14511_vm13 = vmmov %vm14487_vm0 }
 0x510   :  { %5058 = vst.msk [vmem:[%s12044_s7 + $0xc0] sm:$0xff] %vm14497_vm15, %v4994_v38  ;;  %v4654_v59 = vadd.f32 %v11503_v29, %v4653_v34  ;;  %vm14512_vm15 = vmmov %vm14487_vm0 }
 0x511   :  { %v4869_v41 = vmax.f32 %v4659_v21, 0.0 }
 0x512   :  { %v4868_v58 = vmax.f32 %v4654_v59, 0.0  ;;  %v6918_v59 = vld [vmem:[%s12037_s0 + $0x128] sm:$0xff] }
 0x513   :  { %v4933_v54 = vadd.f32 %v6908_v13, %v4869_v41 }
 0x514   :  { %v4932_v18 = vadd.f32 %v6909_v2, %v4868_v58  ;;  %v6919_v58 = vld [vmem:[%s12037_s0 + $0x120] sm:$0xff] }
 0x515   :  { %v4997_v24 = vmax.f32 %v4933_v54, 0.0 }
 0x516   :  { %v4996_v33 = vmax.f32 %v4932_v18, 0.0  ;;  %v6148_v55 = vpop.f32.mrb[28].mxu0 }
 0x517   :  { %5061 = vst.msk [vmem:[%s12044_s7 + $0xd8] sm:$0xff] %vm14498_vm6, %v4997_v24  ;;  %v4669_v14 = vadd.f32 %v6148_v55, %v11503_v29  ;;  %v4663_v53 = vpop.f32.mrb[29].mxu0  ;;  %vm14513_vm6 = vmmov %vm14487_vm0 }
 0x518   :  { %5060 = vst.msk [vmem:[%s12044_s7 + $0xd0] sm:$0xff] %vm14499_vm2, %v4996_v33  ;;  %v4664_v47 = vadd.f32 %v11503_v29, %v4663_v53  ;;  %vm14514_vm2 = vmmov %vm14487_vm0 }
 0x519   :  { %v4871_v8 = vmax.f32 %v4669_v14, 0.0 }
 0x51a   :  { %v4870_v4 = vmax.f32 %v4664_v47, 0.0  ;;  %v6920_v47 = vld [vmem:[%s12037_s0 + $0x138] sm:$0xff] }
 0x51b   :  { %v4935_v17 = vadd.f32 %v6910_v22, %v4871_v8 }
 0x51c   :  { %v4934_v36 = vadd.f32 %v6911_v57, %v4870_v4  ;;  %v6921_v4 = vld [vmem:[%s12037_s0 + $0x130] sm:$0xff] }
 0x51d   :  { %v4999_v43 = vmax.f32 %v4935_v17, 0.0 }
 0x51e   :  { %v4998_v49 = vmax.f32 %v4934_v36, 0.0  ;;  %v6151_v51 = vpop.f32.mrb[30].mxu0 }
 0x51f   :  { %5063 = vst.msk [vmem:[%s12044_s7 + $0xe8] sm:$0xff] %vm14500_vm1, %v4999_v43  ;;  %v4679_v0 = vadd.f32 %v6151_v51, %v11503_v29  ;;  %v4673_v28 = vpop.f32.mrb[31].mxu0  ;;  %vm14515_vm1 = vmmov %vm14487_vm0 }
 0x520   :  { %5062 = vst.msk [vmem:[%s12044_s7 + $0xe0] sm:$0xff] %vm14501_vm8, %v4998_v49  ;;  %v4674_v1 = vadd.f32 %v11503_v29, %v4673_v28  ;;  %vm14516_vm8 = vmmov %vm14487_vm0 }
 0x521   :  { %v4873_v11 = vmax.f32 %v4679_v0, 0.0 }
 0x522   :  { %v4872_v63 = vmax.f32 %v4674_v1, 0.0  ;;  %v6922_v1 = vld [vmem:[%s12037_s0 + $0x148] sm:$0xff] }
 0x523   :  { %v4937_v40 = vadd.f32 %v6912_v32, %v4873_v11 }
 0x524   :  { %v4936_v45 = vadd.f32 %v6913_v15, %v4872_v63  ;;  %v6923_v63 = vld [vmem:[%s12037_s0 + $0x140] sm:$0xff] }
 0x525   :  { %v5001_v9 = vmax.f32 %v4937_v40, 0.0 }
 0x526   :  { %v5000_v31 = vmax.f32 %v4936_v45, 0.0  ;;  %v6154_v27 = vpop.f32.mrb[32].mxu0 }
 0x527   :  { %5065 = vst.msk [vmem:[%s12044_s7 + $0xf8] sm:$0xff] %vm14502_vm3, %v5001_v9  ;;  %v4689_v37 = vadd.f32 %v6154_v27, %v11503_v29  ;;  %v4683_v48 = vpop.f32.mrb[33].mxu0  ;;  %vm14517_vm3 = vmmov %vm14487_vm0 }
 0x528   :  { %5064 = vst.msk [vmem:[%s12044_s7 + $0xf0] sm:$0xff] %vm14487_vm0, %v5000_v31  ;;  %v4684_v61 = vadd.f32 %v11503_v29, %v4683_v48 }
 0x529   :  { %v4875_v25 = vmax.f32 %v4689_v37, 0.0 }
 0x52a   :  { %v4874_v35 = vmax.f32 %v4684_v61, 0.0  ;;  %v6924_v61 = vld [vmem:[%s12037_s0 + $0x158] sm:$0xff] }
 0x52b   :  { %v4939_v52 = vadd.f32 %v6914_v39, %v4875_v25 }
 0x52c   :  { %v4938_v60 = vadd.f32 %v6915_v50, %v4874_v35  ;;  %v6925_v35 = vld [vmem:[%s12037_s0 + $0x150] sm:$0xff] }
 0x52d   :  { %v5003_v6 = vmax.f32 %v4939_v52, 0.0 }
 0x52e   :  { %v5002_v20 = vmax.f32 %v4938_v60, 0.0  ;;  %v6157_v44 = vpop.f32.mrb[34].mxu0 }
 0x52f   :  { %5067 = vst.msk [vmem:[%s12044_s7 + $0x108] sm:$0xff] %vm14503_vm9, %v5003_v6  ;;  %v4699_v7 = vadd.f32 %v6157_v44, %v11503_v29  ;;  %v4693_v26 = vpop.f32.mrb[35].mxu0  ;;  %vm14518_vm9 = vmmov %vm14487_vm0 }
 0x530   :  { %5066 = vst.msk [vmem:[%s12044_s7 + $0x100] sm:$0xff] %vm14504_vm4, %v5002_v20  ;;  %v4694_v12 = vadd.f32 %v11503_v29, %v4693_v26  ;;  %vm14519_vm4 = vmmov %vm14487_vm0 }
 0x531   :  { %v4877_v16 = vmax.f32 %v4699_v7, 0.0 }
 0x532   :  { %v4876_v42 = vmax.f32 %v4694_v12, 0.0  ;;  %v6926_v12 = vld [vmem:[%s12037_s0 + $0x168] sm:$0xff] }
 0x533   :  { %v4941_v62 = vadd.f32 %v6916_v19, %v4877_v16 }
 0x534   :  { %v4940_v5 = vadd.f32 %v6917_v30, %v4876_v42  ;;  %v6927_v42 = vld [vmem:[%s12037_s0 + $0x160] sm:$0xff] }
 0x535   :  { %v5005_v10 = vmax.f32 %v4941_v62, 0.0 }
 0x536   :  { %v5004_v3 = vmax.f32 %v4940_v5, 0.0  ;;  %v6160_v56 = vpop.f32.mrb[36].mxu0 }
 0x537   :  { %5069 = vst.msk [vmem:[%s12044_s7 + $0x118] sm:$0xff] %vm14505_vm10, %v5005_v10  ;;  %v4709_v46 = vadd.f32 %v6160_v56, %v11503_v29  ;;  %v4703_v38 = vpop.f32.mrb[37].mxu0  ;;  %vm14520_vm10 = vmmov %vm14487_vm0 }
 0x538   :  { %5068 = vst.msk [vmem:[%s12044_s7 + $0x110] sm:$0xff] %vm14506_vm11, %v5004_v3  ;;  %v4704_v23 = vadd.f32 %v11503_v29, %v4703_v38  ;;  %vm14521_vm11 = vmmov %vm14487_vm0 }
 0x539   :  { %v4879_v21 = vmax.f32 %v4709_v46, 0.0 }
 0x53a   :  { %v4878_v34 = vmax.f32 %v4704_v23, 0.0  ;;  %v6928_v23 = vld [vmem:[%s12037_s0 + $0x178] sm:$0xff] }
 0x53b   :  { %v4943_v41 = vadd.f32 %v6918_v59, %v4879_v21 }
 0x53c   :  { %v4942_v13 = vadd.f32 %v6919_v58, %v4878_v34  ;;  %v6929_v34 = vld [vmem:[%s12037_s0 + $0x170] sm:$0xff] }
 0x53d   :  { %v5007_v54 = vmax.f32 %v4943_v41, 0.0 }
 0x53e   :  { %v5006_v2 = vmax.f32 %v4942_v13, 0.0  ;;  %v6163_v18 = vpop.f32.mrb[38].mxu0 }
 0x53f   :  { %5071 = vst.msk [vmem:[%s12044_s7 + $0x128] sm:$0xff] %vm14507_vm7, %v5007_v54  ;;  %v4719_v24 = vadd.f32 %v6163_v18, %v11503_v29  ;;  %v4713_v33 = vpop.f32.mrb[39].mxu0  ;;  %vm14522_vm7 = vmmov %vm14487_vm0 }
 0x540   :  { %5070 = vst.msk [vmem:[%s12044_s7 + $0x120] sm:$0xff] %vm14508_vm14, %v5006_v2  ;;  %v4714_v55 = vadd.f32 %v11503_v29, %v4713_v33  ;;  %vm14523_vm14 = vmmov %vm14487_vm0 }
 0x541   :  { %v4881_v14 = vmax.f32 %v4719_v24, 0.0 }
 0x542   :  { %v4880_v53 = vmax.f32 %v4714_v55, 0.0  ;;  %v6930_v55 = vld [vmem:[%s12037_s0 + $0x188] sm:$0xff] }
 0x543   :  { %v4945_v8 = vadd.f32 %v6920_v47, %v4881_v14 }
 0x544   :  { %v4944_v22 = vadd.f32 %v6921_v4, %v4880_v53  ;;  %v6931_v53 = vld [vmem:[%s12037_s0 + $0x180] sm:$0xff] }
 0x545   :  { %v5009_v17 = vmax.f32 %v4945_v8, 0.0 }
 0x546   :  { %v5008_v57 = vmax.f32 %v4944_v22, 0.0  ;;  %v6166_v36 = vpop.f32.mrb[40].mxu0 }
 0x547   :  { %5073 = vst.msk [vmem:[%s12044_s7 + $0x138] sm:$0xff] %vm14509_vm12, %v5009_v17  ;;  %v4729_v43 = vadd.f32 %v6166_v36, %v11503_v29  ;;  %v4723_v49 = vpop.f32.mrb[41].mxu0  ;;  %vm14524_vm12 = vmmov %vm14487_vm0 }
 0x548   :  { %5072 = vst.msk [vmem:[%s12044_s7 + $0x130] sm:$0xff] %vm14510_vm5, %v5008_v57  ;;  %v4724_v51 = vadd.f32 %v11503_v29, %v4723_v49  ;;  %vm14525_vm5 = vmmov %vm14487_vm0 }
 0x549   :  { %v4883_v0 = vmax.f32 %v4729_v43, 0.0 }
 0x54a   :  { %v4882_v28 = vmax.f32 %v4724_v51, 0.0  ;;  %v6932_v51 = vld [vmem:[%s12037_s0 + $0x198] sm:$0xff] }
 0x54b   :  { %v4947_v11 = vadd.f32 %v6922_v1, %v4883_v0 }
 0x54c   :  { %v4946_v32 = vadd.f32 %v6923_v63, %v4882_v28  ;;  %v6933_v28 = vld [vmem:[%s12037_s0 + $0x190] sm:$0xff] }
 0x54d   :  { %v5011_v40 = vmax.f32 %v4947_v11, 0.0 }
 0x54e   :  { %v5010_v15 = vmax.f32 %v4946_v32, 0.0  ;;  %v6169_v45 = vpop.f32.mrb[42].mxu0 }
 0x54f   :  { %5075 = vst.msk [vmem:[%s12044_s7 + $0x148] sm:$0xff] %vm14511_vm13, %v5011_v40  ;;  %v4739_v9 = vadd.f32 %v6169_v45, %v11503_v29  ;;  %v4733_v31 = vpop.f32.mrb[43].mxu0  ;;  %vm14526_vm13 = vmmov %vm14487_vm0 }
 0x550   :  { %5074 = vst.msk [vmem:[%s12044_s7 + $0x140] sm:$0xff] %vm14512_vm15, %v5010_v15  ;;  %v4734_v27 = vadd.f32 %v11503_v29, %v4733_v31  ;;  %vm14527_vm15 = vmmov %vm14487_vm0 }
 0x551   :  { %v4885_v37 = vmax.f32 %v4739_v9, 0.0 }
 0x552   :  { %v4884_v48 = vmax.f32 %v4734_v27, 0.0  ;;  %v6934_v27 = vld [vmem:[%s12037_s0 + $0x1a8] sm:$0xff] }
 0x553   :  { %v4949_v25 = vadd.f32 %v6924_v61, %v4885_v37 }
 0x554   :  { %v4948_v39 = vadd.f32 %v6925_v35, %v4884_v48  ;;  %v6935_v48 = vld [vmem:[%s12037_s0 + $0x1a0] sm:$0xff] }
 0x555   :  { %v5013_v52 = vmax.f32 %v4949_v25, 0.0 }
 0x556   :  { %v5012_v50 = vmax.f32 %v4948_v39, 0.0  ;;  %v6172_v60 = vpop.f32.mrb[44].mxu0 }
 0x557   :  { %5077 = vst.msk [vmem:[%s12044_s7 + $0x158] sm:$0xff] %vm14513_vm6, %v5013_v52  ;;  %v4749_v6 = vadd.f32 %v6172_v60, %v11503_v29  ;;  %v4743_v20 = vpop.f32.mrb[45].mxu0  ;;  %vm14528_vm6 = vmmov %vm14487_vm0 }
 0x558   :  { %5076 = vst.msk [vmem:[%s12044_s7 + $0x150] sm:$0xff] %vm14514_vm2, %v5012_v50  ;;  %v4744_v44 = vadd.f32 %v11503_v29, %v4743_v20  ;;  %vm14529_vm2 = vmmov %vm14487_vm0 }
 0x559   :  { %v4887_v7 = vmax.f32 %v4749_v6, 0.0 }
 0x55a   :  { %v4886_v26 = vmax.f32 %v4744_v44, 0.0  ;;  %v6936_v44 = vld [vmem:[%s12037_s0 + $0x1b8] sm:$0xff] }
 0x55b   :  { %v4951_v16 = vadd.f32 %v6926_v12, %v4887_v7 }
 0x55c   :  { %v4950_v19 = vadd.f32 %v6927_v42, %v4886_v26  ;;  %v6937_v26 = vld [vmem:[%s12037_s0 + $0x1b0] sm:$0xff] }
 0x55d   :  { %v5015_v62 = vmax.f32 %v4951_v16, 0.0 }
 0x55e   :  { %v5014_v30 = vmax.f32 %v4950_v19, 0.0  ;;  %v6175_v5 = vpop.f32.mrb[46].mxu0 }
 0x55f   :  { %5079 = vst.msk [vmem:[%s12044_s7 + $0x168] sm:$0xff] %vm14515_vm1, %v5015_v62  ;;  %v4759_v10 = vadd.f32 %v6175_v5, %v11503_v29  ;;  %v4753_v3 = vpop.f32.mrb[47].mxu0  ;;  %vm14530_vm1 = vmmov %vm14487_vm0 }
 0x560   :  { %5078 = vst.msk [vmem:[%s12044_s7 + $0x160] sm:$0xff] %vm14516_vm8, %v5014_v30  ;;  %v4754_v56 = vadd.f32 %v11503_v29, %v4753_v3  ;;  %vm14531_vm8 = vmmov %vm14487_vm0 }
 0x561   :  { %v4889_v46 = vmax.f32 %v4759_v10, 0.0 }
 0x562   :  { %v4888_v38 = vmax.f32 %v4754_v56, 0.0  ;;  %v6938_v56 = vld [vmem:[%s12037_s0 + $0x1c8] sm:$0xff] }
 0x563   :  { %v4953_v21 = vadd.f32 %v6928_v23, %v4889_v46 }
 0x564   :  { %v4952_v59 = vadd.f32 %v6929_v34, %v4888_v38  ;;  %v6939_v38 = vld [vmem:[%s12037_s0 + $0x1c0] sm:$0xff] }
 0x565   :  { %v5017_v41 = vmax.f32 %v4953_v21, 0.0 }
 0x566   :  { %v5016_v58 = vmax.f32 %v4952_v59, 0.0  ;;  %v6178_v13 = vpop.f32.mrb[48].mxu0 }
 0x567   :  { %5081 = vst.msk [vmem:[%s12044_s7 + $0x178] sm:$0xff] %vm14517_vm3, %v5017_v41  ;;  %v4769_v54 = vadd.f32 %v6178_v13, %v11503_v29  ;;  %v4763_v2 = vpop.f32.mrb[49].mxu0  ;;  %vm14532_vm3 = vmmov %vm14487_vm0 }
 0x568   :  { %5080 = vst.msk [vmem:[%s12044_s7 + $0x170] sm:$0xff] %vm14487_vm0, %v5016_v58  ;;  %v4764_v18 = vadd.f32 %v11503_v29, %v4763_v2 }
 0x569   :  { %v4891_v24 = vmax.f32 %v4769_v54, 0.0 }
 0x56a   :  { %v4890_v33 = vmax.f32 %v4764_v18, 0.0  ;;  %v6940_v18 = vld [vmem:[%s12037_s0 + $0x1d8] sm:$0xff] }
 0x56b   :  { %v4955_v14 = vadd.f32 %v6930_v55, %v4891_v24 }
 0x56c   :  { %v4954_v47 = vadd.f32 %v6931_v53, %v4890_v33  ;;  %v6941_v33 = vld [vmem:[%s12037_s0 + $0x1d0] sm:$0xff] }
 0x56d   :  { %v5019_v8 = vmax.f32 %v4955_v14, 0.0 }
 0x56e   :  { %v5018_v4 = vmax.f32 %v4954_v47, 0.0  ;;  %v6181_v22 = vpop.f32.mrb[50].mxu0 }
 0x56f   :  { %5083 = vst.msk [vmem:[%s12044_s7 + $0x188] sm:$0xff] %vm14518_vm9, %v5019_v8  ;;  %v4779_v17 = vadd.f32 %v6181_v22, %v11503_v29  ;;  %v4773_v57 = vpop.f32.mrb[51].mxu0 }
 0x570   :  { %5082 = vst.msk [vmem:[%s12044_s7 + $0x180] sm:$0xff] %vm14519_vm4, %v5018_v4  ;;  %v4774_v36 = vadd.f32 %v11503_v29, %v4773_v57 }
 0x571   :  { %v4893_v43 = vmax.f32 %v4779_v17, 0.0 }
 0x572   :  { %v4892_v49 = vmax.f32 %v4774_v36, 0.0  ;;  %v6942_v36 = vld [vmem:[%s12037_s0 + $0x1e8] sm:$0xff] }
 0x573   :  { %v4957_v0 = vadd.f32 %v6932_v51, %v4893_v43 }
 0x574   :  { %v4956_v1 = vadd.f32 %v6933_v28, %v4892_v49  ;;  %v6943_v49 = vld [vmem:[%s12037_s0 + $0x1e0] sm:$0xff] }
 0x575   :  { %v5021_v11 = vmax.f32 %v4957_v0, 0.0 }
 0x576   :  { %v5020_v63 = vmax.f32 %v4956_v1, 0.0  ;;  %v6184_v32 = vpop.f32.mrb[52].mxu0 }
 0x577   :  { %5085 = vst.msk [vmem:[%s12044_s7 + $0x198] sm:$0xff] %vm14520_vm10, %v5021_v11  ;;  %v4789_v40 = vadd.f32 %v6184_v32, %v11503_v29  ;;  %v4783_v15 = vpop.f32.mrb[53].mxu0 }
 0x578   :  { %5084 = vst.msk [vmem:[%s12044_s7 + $0x190] sm:$0xff] %vm14521_vm11, %v5020_v63  ;;  %v4784_v45 = vadd.f32 %v11503_v29, %v4783_v15 }
 0x579   :  { %v4895_v9 = vmax.f32 %v4789_v40, 0.0 }
 0x57a   :  { %v4894_v31 = vmax.f32 %v4784_v45, 0.0  ;;  %v6944_v45 = vld [vmem:[%s12037_s0 + $0x1f8] sm:$0xff] }
 0x57b   :  { %v4959_v37 = vadd.f32 %v6934_v27, %v4895_v9 }
 0x57c   :  { %v4958_v61 = vadd.f32 %v6935_v48, %v4894_v31  ;;  %v6945_v31 = vld [vmem:[%s12037_s0 + $0x1f0] sm:$0xff] }
 0x57d   :  { %v5023_v25 = vmax.f32 %v4959_v37, 0.0 }
 0x57e   :  { %v5022_v35 = vmax.f32 %v4958_v61, 0.0  ;;  %v6187_v39 = vpop.f32.mrb[54].mxu0 }
 0x57f   :  { %5087 = vst.msk [vmem:[%s12044_s7 + $0x1a8] sm:$0xff] %vm14522_vm7, %v5023_v25  ;;  %v4799_v52 = vadd.f32 %v6187_v39, %v11503_v29  ;;  %v4793_v50 = vpop.f32.mrb[55].mxu0 }
 0x580   :  { %5086 = vst.msk [vmem:[%s12044_s7 + $0x1a0] sm:$0xff] %vm14523_vm14, %v5022_v35  ;;  %v4794_v60 = vadd.f32 %v11503_v29, %v4793_v50 }
 0x581   :  { %v4897_v6 = vmax.f32 %v4799_v52, 0.0 }
 0x582   :  { %v4896_v20 = vmax.f32 %v4794_v60, 0.0 }
 0x583   :  { %v4961_v7 = vadd.f32 %v6936_v44, %v4897_v6 }
 0x584   :  { %v4960_v12 = vadd.f32 %v6937_v26, %v4896_v20 }
 0x585   :  { %v5025_v16 = vmax.f32 %v4961_v7, 0.0 }
 0x586   :  { %v5024_v42 = vmax.f32 %v4960_v12, 0.0  ;;  %v6190_v19 = vpop.f32.mrb[56].mxu0 }
 0x587   :  { %5089 = vst.msk [vmem:[%s12044_s7 + $0x1b8] sm:$0xff] %vm14524_vm12, %v5025_v16  ;;  %v4809_v62 = vadd.f32 %v6190_v19, %v11503_v29  ;;  %v4803_v30 = vpop.f32.mrb[57].mxu0 }
 0x588   :  { %5088 = vst.msk [vmem:[%s12044_s7 + $0x1b0] sm:$0xff] %vm14525_vm5, %v5024_v42  ;;  %v4804_v5 = vadd.f32 %v11503_v29, %v4803_v30 }
 0x589   :  { %v4899_v10 = vmax.f32 %v4809_v62, 0.0 }
 0x58a   :  { %v4898_v3 = vmax.f32 %v4804_v5, 0.0 }
 0x58b   :  { %v4963_v46 = vadd.f32 %v6938_v56, %v4899_v10 }
 0x58c   :  { %v4962_v23 = vadd.f32 %v6939_v38, %v4898_v3 }
 0x58d   :  { %v5027_v21 = vmax.f32 %v4963_v46, 0.0 }
 0x58e   :  { %v5026_v34 = vmax.f32 %v4962_v23, 0.0  ;;  %v6193_v59 = vpop.f32.mrb[58].mxu0 }
 0x58f   :  { %5091 = vst.msk [vmem:[%s12044_s7 + $0x1c8] sm:$0xff] %vm14526_vm13, %v5027_v21  ;;  %v4819_v41 = vadd.f32 %v6193_v59, %v11503_v29  ;;  %v4813_v58 = vpop.f32.mrb[59].mxu0 }
 0x590   :  { %5090 = vst.msk [vmem:[%s12044_s7 + $0x1c0] sm:$0xff] %vm14527_vm15, %v5026_v34  ;;  %v4814_v13 = vadd.f32 %v11503_v29, %v4813_v58 }
 0x591   :  { %v4901_v54 = vmax.f32 %v4819_v41, 0.0 }
 0x592   :  { %v4900_v2 = vmax.f32 %v4814_v13, 0.0 }
 0x593   :  { %v4965_v24 = vadd.f32 %v6940_v18, %v4901_v54 }
 0x594   :  { %v4964_v55 = vadd.f32 %v6941_v33, %v4900_v2 }
 0x595   :  { %v5029_v14 = vmax.f32 %v4965_v24, 0.0 }
 0x596   :  { %v5028_v53 = vmax.f32 %v4964_v55, 0.0  ;;  %v6196_v47 = vpop.f32.mrb[60].mxu0 }
 0x597   :  { %5093 = vst.msk [vmem:[%s12044_s7 + $0x1d8] sm:$0xff] %vm14528_vm6, %v5029_v14  ;;  %v4829_v8 = vadd.f32 %v6196_v47, %v11503_v29  ;;  %v4823_v4 = vpop.f32.mrb[61].mxu0 }
 0x598   :  { %5092 = vst.msk [vmem:[%s12044_s7 + $0x1d0] sm:$0xff] %vm14529_vm2, %v5028_v53  ;;  %v4824_v22 = vadd.f32 %v11503_v29, %v4823_v4 }
 0x599   :  { %v4903_v17 = vmax.f32 %v4829_v8, 0.0 }
 0x59a   :  { %v4902_v57 = vmax.f32 %v4824_v22, 0.0 }
 0x59b   :  { %v4967_v43 = vadd.f32 %v6942_v36, %v4903_v17 }
 0x59c   :  { %v4966_v51 = vadd.f32 %v6943_v49, %v4902_v57 }
 0x59d   :  { %v5031_v0 = vmax.f32 %v4967_v43, 0.0 }
 0x59e   :  { %v5030_v28 = vmax.f32 %v4966_v51, 0.0  ;;  %v6199_v1 = vpop.f32.mrb[62].mxu0 }
 0x59f   :  { %5095 = vst.msk [vmem:[%s12044_s7 + $0x1e8] sm:$0xff] %vm14530_vm1, %v5031_v0  ;;  %v4839_v11 = vadd.f32 %v6199_v1, %v11503_v29  ;;  %v4833_v63 = vpop.f32.mrb[63].mxu0 }
 0x5a0   :  { %5094 = vst.msk [vmem:[%s12044_s7 + $0x1e0] sm:$0xff] %vm14531_vm8, %v5030_v28  ;;  %v4834_v32 = vadd.f32 %v11503_v29, %v4833_v63 }
 0x5a1   :  { %v4905_v40 = vmax.f32 %v4839_v11, 0.0 }
 0x5a2   :  { %v4904_v15 = vmax.f32 %v4834_v32, 0.0 }
 0x5a3   :  { %v4969_v9 = vadd.f32 %v6944_v45, %v4905_v40 }
 0x5a4   :  { %v4968_v27 = vadd.f32 %v6945_v31, %v4904_v15 }
 0x5a5   :  { %v5033_v37 = vmax.f32 %v4969_v9, 0.0 }
 0x5a6   :  { %v5032_v48 = vmax.f32 %v4968_v27, 0.0 }
 0x5a7   :  { %5097 = vst.msk [vmem:[%s12044_s7 + $0x1f8] sm:$0xff] %vm14532_vm3, %v5033_v37 }
 0x5a8   :  { %5096 = vst.msk [vmem:[%s12044_s7 + $0x1f0] sm:$0xff] %vm14487_vm0, %v5032_v48 }
 0x5a9   :  { %5102 = vsyncpa [#allocation3], 1 }

</bundles_post_ra>
